<compile_context>
chip_gen: v5e
topology: v5e:2x2
jax: 0.10.0
libtpu: 0.0.40
codegen_flags: <defaults>
</compile_context>

<pallas_src>
import functools

import jax
import jax.numpy as jnp
from jax.experimental import pallas as pl
from jax.experimental.pallas import tpu as pltpu


MX_DTYPE = jnp.bfloat16   # MXU operand dtype (accumulation stays f32)


# ----------------------------- Pallas kernel ------------------------------ #
def _dnbsrn_kernel(x_ref, hband_ref, hbias_ref, bband_ref, bbias_ref,
                   cband_ref, cbias_ref, out_ref, xstg_ref, x0stg_ref, *,
                   N, H, W, C, F, KH, B):
    """Fused head + num_branches * (SRB + branch conv) for the whole batch.

    x_ref     : (N, H, W*C)            input images, channel-fastest rows
    hband_ref : (KH*W*C, W*F)          head banded weights, K-folded (bf16)
    hbias_ref : (1, W*F)               head bias tiled over W (f32)
    bband_ref : (B, KH*W*F, W*F)       body banded weights, K-folded (bf16)
    bbias_ref : (B, 1, W*F)            body biases (f32)
    cband_ref : (B, KH*W*F, W*C)       branch-conv banded weights, K-folded (bf16)
    cbias_ref : (B, 1, W*C)            branch-conv biases (f32)
    out_ref   : (N, H, W*C)            output
    xstg_ref  : (N*H, KH*W*C) scratch  staged LHS for the head conv (bf16)
    x0stg_ref : (N*H, KH*W*F) scratch  staged LHS for body/branch convs (bf16)
    """
    PAD = KH // 2
    WC = W * C
    WF = W * F
    f32 = jnp.float32

    def stage(stg_ref, val, seg):
        # val: (N*H, seg) f32.  Writes the KH shifted row-windows of each image
        # (with the zero H-halo baked in) as bf16, so every conv is ONE matmul:
        #   stg[n*H + h, kh*seg + j] = val[n*H + h + kh - PAD, j]  (0 if OOB)
        v = val.astype(MX_DTYPE)                       # single bf16 cast
        zpad = jnp.zeros((PAD, seg), MX_DTYPE)
        for n in range(N):
            r0 = n * H
            xp = jnp.concatenate([zpad, v[r0:r0 + H, :], zpad], axis=0)
            for kh in range(KH):                       # aligned (H, seg) stores
                stg_ref[r0:r0 + H, kh * seg:(kh + 1) * seg] = xp[kh:kh + H, :]

    def conv_k(stg_ref, band, bias):
        # One K-dense MXU matmul per conv: (N*H, KH*seg) @ (KH*seg, n_out).
        return jnp.dot(stg_ref[...], band, preferred_element_type=f32) + bias

    x_in = x_ref[...].astype(f32).reshape(N * H, WC)   # (N*H, W*C)

    # head: x0 = head(x)
    stage(xstg_ref, x_in, WC)
    x0 = conv_k(xstg_ref, hband_ref[...], hbias_ref[...])      # (N*H, W*F) f32

    out = x_in                                         # running residual "x"

    stage(x0stg_ref, x0, WF)                           # stage x0^(0) for body_0
    for i in range(B):
        # SRB: x0 = x0 + relu(body_i(x0))
        y = conv_k(x0stg_ref, bband_ref[i], bbias_ref[i])
        x0 = x0 + jnp.maximum(y, 0.0)
        stage(x0stg_ref, x0, WF)                       # reused by conv_i AND body_{i+1}
        # x = x + conv_i(x0)
        out = out + conv_k(x0stg_ref, cband_ref[i], cbias_ref[i])

    out_ref[...] = out.reshape(N, H, WC).astype(out_ref.dtype)


# ------------------------- Weight pre-processing --------------------------- #
def _band_weights(w, W):
    """HWIO (KH, KW, Cin, Cout) -> K-folded banded (KH*W*Cin, W*Cout).

    band[kh*W*Cin + wi*Cin+ci, wo*Cout+co] = w[kh, kw, ci, co] where
    wi = wo + kw - pad, zero otherwise (realises SAME zero-padding along W).
    """
    KH, KW, Cin, Cout = w.shape
    pad = KW // 2
    wi = jnp.arange(W)
    wo = jnp.arange(W)
    kw = jnp.arange(KW)
    sel = (wi[None, :, None] == wo[None, None, :] + kw[:, None, None] - pad)
    sel = sel.astype(w.dtype)                       # (KW, W_in, W_out)
    band = jnp.einsum('hkic,kab->haibc', w, sel)    # (KH, W_in, Cin, W_out, Cout)
    return band.reshape(KH * W * Cin, W * Cout)


def _tile_bias(b, W):
    return jnp.tile(b, W).reshape(1, W * b.shape[0])   # matches wo*Cout+co order


# ----------------------------- Model forward ------------------------------ #
def dnbsrn_forward_pallas(x_nhwc, params, num_branches):
    """Forward pass, NHWC in / NHWC out.  Whole network in one pallas_call."""
    N, H, W, C = x_nhwc.shape
    w_head, b_head = params["head"]
    KH, KW, _, F = w_head.shape

    hband = _band_weights(w_head, W).astype(MX_DTYPE)             # (KH*W*C, W*F)
    hbias = _tile_bias(b_head, W)                                 # (1, W*F)
    bband = jnp.stack([_band_weights(w, W) for w, _ in params["body"]]
                      ).astype(MX_DTYPE)                          # (B, KH*W*F, W*F)
    bbias = jnp.stack([_tile_bias(b, W) for _, b in params["body"]])
    cband = jnp.stack([_band_weights(w, W) for w, _ in params["conv"]]
                      ).astype(MX_DTYPE)                          # (B, KH*W*F, W*C)
    cbias = jnp.stack([_tile_bias(b, W) for _, b in params["conv"]])

    x_flat = x_nhwc.reshape(N, H, W * C)

    kernel = functools.partial(_dnbsrn_kernel, N=N, H=H, W=W, C=C, F=F, KH=KH,
                               B=num_branches)

    out = pl.pallas_call(
        kernel,
        out_shape=jax.ShapeDtypeStruct((N, H, W * C), jnp.float32),
        grid=(1,),                              # whole batch in one step (M = N*H)
        in_specs=[
            pl.BlockSpec((N, H, W * C), lambda i: (0, 0, 0)),
            pl.BlockSpec(hband.shape, lambda i: (0, 0)),
            pl.BlockSpec(hbias.shape, lambda i: (0, 0)),
            pl.BlockSpec(bband.shape, lambda i: (0, 0, 0)),
            pl.BlockSpec(bbias.shape, lambda i: (0, 0, 0)),
            pl.BlockSpec(cband.shape, lambda i: (0, 0, 0)),
            pl.BlockSpec(cbias.shape, lambda i: (0, 0, 0)),
        ],
        out_specs=pl.BlockSpec((N, H, W * C), lambda i: (0, 0, 0)),
        scratch_shapes=[
            pltpu.VMEM((N * H, KH * W * C), MX_DTYPE),   # staged LHS (head)
            pltpu.VMEM((N * H, KH * W * F), MX_DTYPE),   # staged LHS (body/conv)
        ],
        compiler_params=pltpu.CompilerParams(
            dimension_semantics=("arbitrary",)),
    )(x_flat, hband, hbias, bband, bbias, cband, cbias)

    return out.reshape(N, H, W, C)


# ----------------------------- Param init ---------------------------------- #
def init_params(key, num_channels, num_branches, n_feat, kernel_size):
    """Deterministic synthetic weights (HWIO layout), kaiming-ish scale."""
    def conv_init(k, cin, cout):
        kw_key, kb_key = jax.random.split(k)
        fan_in = cin * kernel_size * kernel_size
        w = jax.random.normal(kw_key, (kernel_size, kernel_size, cin, cout),
                              jnp.float32) * (1.0 / jnp.sqrt(fan_in))
        b = jax.random.normal(kb_key, (cout,), jnp.float32) * 0.01
        return w, b

    keys = jax.random.split(key, 1 + 2 * num_branches)
    params = {}
    params["head"] = conv_init(keys[0], num_channels, n_feat)
    params["body"] = [conv_init(keys[1 + i], n_feat, n_feat)
                      for i in range(num_branches)]
    params["conv"] = [conv_init(keys[1 + num_branches + i], n_feat,
                                num_channels)
                      for i in range(num_branches)]
    return params


# --------------------------- Pure-JAX reference ---------------------------- #
def _conv_ref(x, w, b):
    # Mirrors the kernel's MXU dtype policy: bf16 operands, f32 accumulation.
    y = jax.lax.conv_general_dilated(
        x.astype(MX_DTYPE), w.astype(MX_DTYPE), window_strides=(1, 1),
        padding="SAME", dimension_numbers=("NHWC", "HWIO", "NHWC"),
        preferred_element_type=jnp.float32)
    return y + b


def dnbsrn_forward_ref(x_nhwc, params, num_branches):
    x0 = _conv_ref(x_nhwc, *params["head"])
    out = x_nhwc
    for i in range(num_branches):
        x0 = x0 + jax.nn.relu(_conv_ref(x0, *params["body"][i]))
        out = out + _conv_ref(x0, *params["conv"][i])
    return out


# ---------------------------------- Main ----------------------------------- #
if __name__ == "__main__":
    # Small, module-consistent shapes (PyTorch input is NCHW: (2, 1, 16, 16)).
    N, C, H, W = 2, 1, 16, 16
    num_branches = 3
    n_feat = 16
    kernel_size = 7

    key = jax.random.PRNGKey(0)
    k_x, k_p = jax.random.split(key)

    x_nchw = jax.random.normal(k_x, (N, C, H, W), jnp.float32)
    x_nhwc = jnp.transpose(x_nchw, (0, 2, 3, 1))   # NCHW -> NHWC for the kernel

    params = init_params(k_p, C, num_branches, n_feat, kernel_size)

    fwd = jax.jit(dnbsrn_forward_pallas, static_argnums=(2,))
    y_pallas = jax.block_until_ready(fwd(x_nhwc, params, num_branches))
    y_ref = jax.block_until_ready(
        dnbsrn_forward_ref(x_nhwc, params, num_branches))

    assert y_pallas.shape == (N, H, W, C)
    # bf16 MXU operands (f32 accumulation) in both kernel and reference.
    max_err = float(jnp.max(jnp.abs(y_pallas - y_ref)))
    assert jnp.allclose(y_pallas, y_ref, atol=2e-2, rtol=2e-2), max_err

    # Back to NCHW to match the PyTorch module's output convention.
    y_nchw = jnp.transpose(y_pallas, (0, 3, 1, 2))
    assert y_nchw.shape == x_nchw.shape

    print("KERNEL_OK")
</pallas_src>

<mosaic_0001>
module attributes {stable_mosaic.version = 11 : i64} {
  func.func @_dnbsrn_kernel(%arg0: i32, %arg1: memref<2x16x16xf32, #tpu.memory_space<vmem>>, %arg2: memref<112x256xbf16, #tpu.memory_space<vmem>>, %arg3: memref<1x256xf32, #tpu.memory_space<vmem>>, %arg4: memref<3x1792x256xbf16, #tpu.memory_space<vmem>>, %arg5: memref<3x1x256xf32, #tpu.memory_space<vmem>>, %arg6: memref<3x1792x16xbf16, #tpu.memory_space<vmem>>, %arg7: memref<3x1x16xf32, #tpu.memory_space<vmem>>, %arg8: memref<2x16x16xf32, #tpu.memory_space<vmem>>, %arg9: memref<32x112xbf16, #tpu.memory_space<vmem>>, %arg10: memref<32x1792xbf16, #tpu.memory_space<vmem>>) attributes {dimension_semantics = [#tpu.dimension_semantics<arbitrary>], iteration_bounds = array<i64: 1>, scalar_prefetch = 0 : i64, scratch_operands = 2 : i64, tpu.core_type = #tpu.core_type<tc>, window_params = [{pipeline_mode = #tpu.pipeline_mode<synchronous>, transform_indices = @transform_0, window_bounds = array<i64: 2, 16, 16>}, {pipeline_mode = #tpu.pipeline_mode<synchronous>, transform_indices = @transform_1, window_bounds = array<i64: 112, 256>}, {pipeline_mode = #tpu.pipeline_mode<synchronous>, transform_indices = @transform_2, window_bounds = array<i64: 1, 256>}, {pipeline_mode = #tpu.pipeline_mode<synchronous>, transform_indices = @transform_3, window_bounds = array<i64: 3, 1792, 256>}, {pipeline_mode = #tpu.pipeline_mode<synchronous>, transform_indices = @transform_4, window_bounds = array<i64: 3, 1, 256>}, {pipeline_mode = #tpu.pipeline_mode<synchronous>, transform_indices = @transform_5, window_bounds = array<i64: 3, 1792, 16>}, {pipeline_mode = #tpu.pipeline_mode<synchronous>, transform_indices = @transform_6, window_bounds = array<i64: 3, 1, 16>}, {pipeline_mode = #tpu.pipeline_mode<synchronous>, transform_indices = @transform_7, window_bounds = array<i64: 2, 16, 16>}]} {
    %c0 = arith.constant 0 : index
    %c0_0 = arith.constant 0 : index
    %c0_1 = arith.constant 0 : index
    %0 = vector.load %arg1[%c0, %c0_0, %c0_1] : memref<2x16x16xf32, #tpu.memory_space<vmem>>, vector<2x16x16xf32>
    %1 = vector.shape_cast %0 : vector<2x16x16xf32> to vector<32x16xf32>
    %2 = arith.truncf %1 : vector<32x16xf32> to vector<32x16xbf16>
    %cst = arith.constant 0.000000e+00 : bf16
    %3 = vector.broadcast %cst : bf16 to vector<3x16xbf16>
    %4 = vector.extract_strided_slice %2 {offsets = [0, 0], sizes = [16, 16], strides = [1, 1]} : vector<32x16xbf16> to vector<16x16xbf16>
    %5 = tpu.concatenate %3, %4, %3 in 0 : vector<3x16xbf16>, vector<16x16xbf16>, vector<3x16xbf16> -> vector<22x16xbf16>
    %6 = vector.extract_strided_slice %5 {offsets = [0, 0], sizes = [16, 16], strides = [1, 1]} : vector<22x16xbf16> to vector<16x16xbf16>
    %c0_2 = arith.constant 0 : index
    %c0_3 = arith.constant 0 : index
    %7 = vector.load %arg9[%c0_2, %c0_3] : memref<32x112xbf16, #tpu.memory_space<vmem>>, vector<16x16xbf16>
    tpu.vector_store %arg9[%c0_2, %c0_3], %6 {strides = array<i32>} : memref<32x112xbf16, #tpu.memory_space<vmem>>, vector<16x16xbf16>,
    %8 = vector.extract_strided_slice %5 {offsets = [1, 0], sizes = [16, 16], strides = [1, 1]} : vector<22x16xbf16> to vector<16x16xbf16>
    %c0_4 = arith.constant 0 : index
    %c16 = arith.constant 16 : index
    %9 = vector.load %arg9[%c0_4, %c16] : memref<32x112xbf16, #tpu.memory_space<vmem>>, vector<16x16xbf16>
    tpu.vector_store %arg9[%c0_4, %c16], %8 {strides = array<i32>} : memref<32x112xbf16, #tpu.memory_space<vmem>>, vector<16x16xbf16>,
    %10 = vector.extract_strided_slice %5 {offsets = [2, 0], sizes = [16, 16], strides = [1, 1]} : vector<22x16xbf16> to vector<16x16xbf16>
    %c0_5 = arith.constant 0 : index
    %c32 = arith.constant 32 : index
    %11 = vector.load %arg9[%c0_5, %c32] : memref<32x112xbf16, #tpu.memory_space<vmem>>, vector<16x16xbf16>
    tpu.vector_store %arg9[%c0_5, %c32], %10 {strides = array<i32>} : memref<32x112xbf16, #tpu.memory_space<vmem>>, vector<16x16xbf16>,
    %12 = vector.extract_strided_slice %5 {offsets = [3, 0], sizes = [16, 16], strides = [1, 1]} : vector<22x16xbf16> to vector<16x16xbf16>
    %c0_6 = arith.constant 0 : index
    %c48 = arith.constant 48 : index
    %13 = vector.load %arg9[%c0_6, %c48] : memref<32x112xbf16, #tpu.memory_space<vmem>>, vector<16x16xbf16>
    tpu.vector_store %arg9[%c0_6, %c48], %12 {strides = array<i32>} : memref<32x112xbf16, #tpu.memory_space<vmem>>, vector<16x16xbf16>,
    %14 = vector.extract_strided_slice %5 {offsets = [4, 0], sizes = [16, 16], strides = [1, 1]} : vector<22x16xbf16> to vector<16x16xbf16>
    %c0_7 = arith.constant 0 : index
    %c64 = arith.constant 64 : index
    %15 = vector.load %arg9[%c0_7, %c64] : memref<32x112xbf16, #tpu.memory_space<vmem>>, vector<16x16xbf16>
    tpu.vector_store %arg9[%c0_7, %c64], %14 {strides = array<i32>} : memref<32x112xbf16, #tpu.memory_space<vmem>>, vector<16x16xbf16>,
    %16 = vector.extract_strided_slice %5 {offsets = [5, 0], sizes = [16, 16], strides = [1, 1]} : vector<22x16xbf16> to vector<16x16xbf16>
    %c0_8 = arith.constant 0 : index
    %c80 = arith.constant 80 : index
    %17 = vector.load %arg9[%c0_8, %c80] : memref<32x112xbf16, #tpu.memory_space<vmem>>, vector<16x16xbf16>
    tpu.vector_store %arg9[%c0_8, %c80], %16 {strides = array<i32>} : memref<32x112xbf16, #tpu.memory_space<vmem>>, vector<16x16xbf16>,
    %18 = vector.extract_strided_slice %5 {offsets = [6, 0], sizes = [16, 16], strides = [1, 1]} : vector<22x16xbf16> to vector<16x16xbf16>
    %c0_9 = arith.constant 0 : index
    %c96 = arith.constant 96 : index
    %19 = vector.load %arg9[%c0_9, %c96] : memref<32x112xbf16, #tpu.memory_space<vmem>>, vector<16x16xbf16>
    tpu.vector_store %arg9[%c0_9, %c96], %18 {strides = array<i32>} : memref<32x112xbf16, #tpu.memory_space<vmem>>, vector<16x16xbf16>,
    %20 = vector.extract_strided_slice %2 {offsets = [16, 0], sizes = [16, 16], strides = [1, 1]} : vector<32x16xbf16> to vector<16x16xbf16>
    %21 = tpu.concatenate %3, %20, %3 in 0 : vector<3x16xbf16>, vector<16x16xbf16>, vector<3x16xbf16> -> vector<22x16xbf16>
    %22 = vector.extract_strided_slice %21 {offsets = [0, 0], sizes = [16, 16], strides = [1, 1]} : vector<22x16xbf16> to vector<16x16xbf16>
    %c16_10 = arith.constant 16 : index
    %c0_11 = arith.constant 0 : index
    %23 = vector.load %arg9[%c16_10, %c0_11] : memref<32x112xbf16, #tpu.memory_space<vmem>>, vector<16x16xbf16>
    tpu.vector_store %arg9[%c16_10, %c0_11], %22 {strides = array<i32>} : memref<32x112xbf16, #tpu.memory_space<vmem>>, vector<16x16xbf16>,
    %24 = vector.extract_strided_slice %21 {offsets = [1, 0], sizes = [16, 16], strides = [1, 1]} : vector<22x16xbf16> to vector<16x16xbf16>
    %c16_12 = arith.constant 16 : index
    %c16_13 = arith.constant 16 : index
    %25 = vector.load %arg9[%c16_12, %c16_13] : memref<32x112xbf16, #tpu.memory_space<vmem>>, vector<16x16xbf16>
    tpu.vector_store %arg9[%c16_12, %c16_13], %24 {strides = array<i32>} : memref<32x112xbf16, #tpu.memory_space<vmem>>, vector<16x16xbf16>,
    %26 = vector.extract_strided_slice %21 {offsets = [2, 0], sizes = [16, 16], strides = [1, 1]} : vector<22x16xbf16> to vector<16x16xbf16>
    %c16_14 = arith.constant 16 : index
    %c32_15 = arith.constant 32 : index
    %27 = vector.load %arg9[%c16_14, %c32_15] : memref<32x112xbf16, #tpu.memory_space<vmem>>, vector<16x16xbf16>
    tpu.vector_store %arg9[%c16_14, %c32_15], %26 {strides = array<i32>} : memref<32x112xbf16, #tpu.memory_space<vmem>>, vector<16x16xbf16>,
    %28 = vector.extract_strided_slice %21 {offsets = [3, 0], sizes = [16, 16], strides = [1, 1]} : vector<22x16xbf16> to vector<16x16xbf16>
    %c16_16 = arith.constant 16 : index
    %c48_17 = arith.constant 48 : index
    %29 = vector.load %arg9[%c16_16, %c48_17] : memref<32x112xbf16, #tpu.memory_space<vmem>>, vector<16x16xbf16>
    tpu.vector_store %arg9[%c16_16, %c48_17], %28 {strides = array<i32>} : memref<32x112xbf16, #tpu.memory_space<vmem>>, vector<16x16xbf16>,
    %30 = vector.extract_strided_slice %21 {offsets = [4, 0], sizes = [16, 16], strides = [1, 1]} : vector<22x16xbf16> to vector<16x16xbf16>
    %c16_18 = arith.constant 16 : index
    %c64_19 = arith.constant 64 : index
    %31 = vector.load %arg9[%c16_18, %c64_19] : memref<32x112xbf16, #tpu.memory_space<vmem>>, vector<16x16xbf16>
    tpu.vector_store %arg9[%c16_18, %c64_19], %30 {strides = array<i32>} : memref<32x112xbf16, #tpu.memory_space<vmem>>, vector<16x16xbf16>,
    %32 = vector.extract_strided_slice %21 {offsets = [5, 0], sizes = [16, 16], strides = [1, 1]} : vector<22x16xbf16> to vector<16x16xbf16>
    %c16_20 = arith.constant 16 : index
    %c80_21 = arith.constant 80 : index
    %33 = vector.load %arg9[%c16_20, %c80_21] : memref<32x112xbf16, #tpu.memory_space<vmem>>, vector<16x16xbf16>
    tpu.vector_store %arg9[%c16_20, %c80_21], %32 {strides = array<i32>} : memref<32x112xbf16, #tpu.memory_space<vmem>>, vector<16x16xbf16>,
    %34 = vector.extract_strided_slice %21 {offsets = [6, 0], sizes = [16, 16], strides = [1, 1]} : vector<22x16xbf16> to vector<16x16xbf16>
    %c16_22 = arith.constant 16 : index
    %c96_23 = arith.constant 96 : index
    %35 = vector.load %arg9[%c16_22, %c96_23] : memref<32x112xbf16, #tpu.memory_space<vmem>>, vector<16x16xbf16>
    tpu.vector_store %arg9[%c16_22, %c96_23], %34 {strides = array<i32>} : memref<32x112xbf16, #tpu.memory_space<vmem>>, vector<16x16xbf16>,
    %c0_24 = arith.constant 0 : index
    %c0_25 = arith.constant 0 : index
    %36 = vector.load %arg2[%c0_24, %c0_25] : memref<112x256xbf16, #tpu.memory_space<vmem>>, vector<112x256xbf16>
    %c0_26 = arith.constant 0 : index
    %c0_27 = arith.constant 0 : index
    %37 = vector.load %arg3[%c0_26, %c0_27] : memref<1x256xf32, #tpu.memory_space<vmem>>, vector<1x256xf32>
    %c0_28 = arith.constant 0 : index
    %c0_29 = arith.constant 0 : index
    %38 = vector.load %arg9[%c0_28, %c0_29] : memref<32x112xbf16, #tpu.memory_space<vmem>>, vector<32x112xbf16>
    %cst_30 = arith.constant dense<0.000000e+00> : vector<32x256xf32>
    %39 = tpu.matmul %38, %36, %cst_30 {dimension_numbers = #tpu.dot_dimension_numbers<[1], [0], [0], [1], [0, 0, 1, 1], [], []>} : vector<32x112xbf16>, vector<112x256xbf16>, vector<32x256xf32> -> vector<32x256xf32>
    %40 = vector.broadcast %37 : vector<1x256xf32> to vector<32x256xf32>
    %41 = arith.addf %39, %40 : vector<32x256xf32>
    %42 = arith.truncf %41 : vector<32x256xf32> to vector<32x256xbf16>
    %cst_31 = arith.constant 0.000000e+00 : bf16
    %43 = vector.broadcast %cst_31 : bf16 to vector<3x256xbf16>
    %44 = vector.extract_strided_slice %42 {offsets = [0, 0], sizes = [16, 256], strides = [1, 1]} : vector<32x256xbf16> to vector<16x256xbf16>
    %45 = tpu.concatenate %43, %44, %43 in 0 : vector<3x256xbf16>, vector<16x256xbf16>, vector<3x256xbf16> -> vector<22x256xbf16>
    %46 = vector.extract_strided_slice %45 {offsets = [0, 0], sizes = [16, 256], strides = [1, 1]} : vector<22x256xbf16> to vector<16x256xbf16>
    %c0_32 = arith.constant 0 : index
    %c0_33 = arith.constant 0 : index
    %47 = vector.load %arg10[%c0_32, %c0_33] : memref<32x1792xbf16, #tpu.memory_space<vmem>>, vector<16x256xbf16>
    tpu.vector_store %arg10[%c0_32, %c0_33], %46 {strides = array<i32>} : memref<32x1792xbf16, #tpu.memory_space<vmem>>, vector<16x256xbf16>,
    %48 = vector.extract_strided_slice %45 {offsets = [1, 0], sizes = [16, 256], strides = [1, 1]} : vector<22x256xbf16> to vector<16x256xbf16>
    %c0_34 = arith.constant 0 : index
    %c256 = arith.constant 256 : index
    %49 = vector.load %arg10[%c0_34, %c256] : memref<32x1792xbf16, #tpu.memory_space<vmem>>, vector<16x256xbf16>
    tpu.vector_store %arg10[%c0_34, %c256], %48 {strides = array<i32>} : memref<32x1792xbf16, #tpu.memory_space<vmem>>, vector<16x256xbf16>,
    %50 = vector.extract_strided_slice %45 {offsets = [2, 0], sizes = [16, 256], strides = [1, 1]} : vector<22x256xbf16> to vector<16x256xbf16>
    %c0_35 = arith.constant 0 : index
    %c512 = arith.constant 512 : index
    %51 = vector.load %arg10[%c0_35, %c512] : memref<32x1792xbf16, #tpu.memory_space<vmem>>, vector<16x256xbf16>
    tpu.vector_store %arg10[%c0_35, %c512], %50 {strides = array<i32>} : memref<32x1792xbf16, #tpu.memory_space<vmem>>, vector<16x256xbf16>,
    %52 = vector.extract_strided_slice %45 {offsets = [3, 0], sizes = [16, 256], strides = [1, 1]} : vector<22x256xbf16> to vector<16x256xbf16>
    %c0_36 = arith.constant 0 : index
    %c768 = arith.constant 768 : index
    %53 = vector.load %arg10[%c0_36, %c768] : memref<32x1792xbf16, #tpu.memory_space<vmem>>, vector<16x256xbf16>
    tpu.vector_store %arg10[%c0_36, %c768], %52 {strides = array<i32>} : memref<32x1792xbf16, #tpu.memory_space<vmem>>, vector<16x256xbf16>,
    %54 = vector.extract_strided_slice %45 {offsets = [4, 0], sizes = [16, 256], strides = [1, 1]} : vector<22x256xbf16> to vector<16x256xbf16>
    %c0_37 = arith.constant 0 : index
    %c1024 = arith.constant 1024 : index
    %55 = vector.load %arg10[%c0_37, %c1024] : memref<32x1792xbf16, #tpu.memory_space<vmem>>, vector<16x256xbf16>
    tpu.vector_store %arg10[%c0_37, %c1024], %54 {strides = array<i32>} : memref<32x1792xbf16, #tpu.memory_space<vmem>>, vector<16x256xbf16>,
    %56 = vector.extract_strided_slice %45 {offsets = [5, 0], sizes = [16, 256], strides = [1, 1]} : vector<22x256xbf16> to vector<16x256xbf16>
    %c0_38 = arith.constant 0 : index
    %c1280 = arith.constant 1280 : index
    %57 = vector.load %arg10[%c0_38, %c1280] : memref<32x1792xbf16, #tpu.memory_space<vmem>>, vector<16x256xbf16>
    tpu.vector_store %arg10[%c0_38, %c1280], %56 {strides = array<i32>} : memref<32x1792xbf16, #tpu.memory_space<vmem>>, vector<16x256xbf16>,
    %58 = vector.extract_strided_slice %45 {offsets = [6, 0], sizes = [16, 256], strides = [1, 1]} : vector<22x256xbf16> to vector<16x256xbf16>
    %c0_39 = arith.constant 0 : index
    %c1536 = arith.constant 1536 : index
    %59 = vector.load %arg10[%c0_39, %c1536] : memref<32x1792xbf16, #tpu.memory_space<vmem>>, vector<16x256xbf16>
    tpu.vector_store %arg10[%c0_39, %c1536], %58 {strides = array<i32>} : memref<32x1792xbf16, #tpu.memory_space<vmem>>, vector<16x256xbf16>,
    %60 = vector.extract_strided_slice %42 {offsets = [16, 0], sizes = [16, 256], strides = [1, 1]} : vector<32x256xbf16> to vector<16x256xbf16>
    %61 = tpu.concatenate %43, %60, %43 in 0 : vector<3x256xbf16>, vector<16x256xbf16>, vector<3x256xbf16> -> vector<22x256xbf16>
    %62 = vector.extract_strided_slice %61 {offsets = [0, 0], sizes = [16, 256], strides = [1, 1]} : vector<22x256xbf16> to vector<16x256xbf16>
    %c16_40 = arith.constant 16 : index
    %c0_41 = arith.constant 0 : index
    %63 = vector.load %arg10[%c16_40, %c0_41] : memref<32x1792xbf16, #tpu.memory_space<vmem>>, vector<16x256xbf16>
    tpu.vector_store %arg10[%c16_40, %c0_41], %62 {strides = array<i32>} : memref<32x1792xbf16, #tpu.memory_space<vmem>>, vector<16x256xbf16>,
    %64 = vector.extract_strided_slice %61 {offsets = [1, 0], sizes = [16, 256], strides = [1, 1]} : vector<22x256xbf16> to vector<16x256xbf16>
    %c16_42 = arith.constant 16 : index
    %c256_43 = arith.constant 256 : index
    %65 = vector.load %arg10[%c16_42, %c256_43] : memref<32x1792xbf16, #tpu.memory_space<vmem>>, vector<16x256xbf16>
    tpu.vector_store %arg10[%c16_42, %c256_43], %64 {strides = array<i32>} : memref<32x1792xbf16, #tpu.memory_space<vmem>>, vector<16x256xbf16>,
    %66 = vector.extract_strided_slice %61 {offsets = [2, 0], sizes = [16, 256], strides = [1, 1]} : vector<22x256xbf16> to vector<16x256xbf16>
    %c16_44 = arith.constant 16 : index
    %c512_45 = arith.constant 512 : index
    %67 = vector.load %arg10[%c16_44, %c512_45] : memref<32x1792xbf16, #tpu.memory_space<vmem>>, vector<16x256xbf16>
    tpu.vector_store %arg10[%c16_44, %c512_45], %66 {strides = array<i32>} : memref<32x1792xbf16, #tpu.memory_space<vmem>>, vector<16x256xbf16>,
    %68 = vector.extract_strided_slice %61 {offsets = [3, 0], sizes = [16, 256], strides = [1, 1]} : vector<22x256xbf16> to vector<16x256xbf16>
    %c16_46 = arith.constant 16 : index
    %c768_47 = arith.constant 768 : index
    %69 = vector.load %arg10[%c16_46, %c768_47] : memref<32x1792xbf16, #tpu.memory_space<vmem>>, vector<16x256xbf16>
    tpu.vector_store %arg10[%c16_46, %c768_47], %68 {strides = array<i32>} : memref<32x1792xbf16, #tpu.memory_space<vmem>>, vector<16x256xbf16>,
    %70 = vector.extract_strided_slice %61 {offsets = [4, 0], sizes = [16, 256], strides = [1, 1]} : vector<22x256xbf16> to vector<16x256xbf16>
    %c16_48 = arith.constant 16 : index
    %c1024_49 = arith.constant 1024 : index
    %71 = vector.load %arg10[%c16_48, %c1024_49] : memref<32x1792xbf16, #tpu.memory_space<vmem>>, vector<16x256xbf16>
    tpu.vector_store %arg10[%c16_48, %c1024_49], %70 {strides = array<i32>} : memref<32x1792xbf16, #tpu.memory_space<vmem>>, vector<16x256xbf16>,
    %72 = vector.extract_strided_slice %61 {offsets = [5, 0], sizes = [16, 256], strides = [1, 1]} : vector<22x256xbf16> to vector<16x256xbf16>
    %c16_50 = arith.constant 16 : index
    %c1280_51 = arith.constant 1280 : index
    %73 = vector.load %arg10[%c16_50, %c1280_51] : memref<32x1792xbf16, #tpu.memory_space<vmem>>, vector<16x256xbf16>
    tpu.vector_store %arg10[%c16_50, %c1280_51], %72 {strides = array<i32>} : memref<32x1792xbf16, #tpu.memory_space<vmem>>, vector<16x256xbf16>,
    %74 = vector.extract_strided_slice %61 {offsets = [6, 0], sizes = [16, 256], strides = [1, 1]} : vector<22x256xbf16> to vector<16x256xbf16>
    %c16_52 = arith.constant 16 : index
    %c1536_53 = arith.constant 1536 : index
    %75 = vector.load %arg10[%c16_52, %c1536_53] : memref<32x1792xbf16, #tpu.memory_space<vmem>>, vector<16x256xbf16>
    tpu.vector_store %arg10[%c16_52, %c1536_53], %74 {strides = array<i32>} : memref<32x1792xbf16, #tpu.memory_space<vmem>>, vector<16x256xbf16>,
    %c0_54 = arith.constant 0 : index
    %c0_55 = arith.constant 0 : index
    %c0_56 = arith.constant 0 : index
    %76 = vector.load %arg4[%c0_54, %c0_55, %c0_56] : memref<3x1792x256xbf16, #tpu.memory_space<vmem>>, vector<1x1792x256xbf16>
    %77 = vector.shape_cast %76 : vector<1x1792x256xbf16> to vector<1792x256xbf16>
    %c0_57 = arith.constant 0 : index
    %c0_58 = arith.constant 0 : index
    %c0_59 = arith.constant 0 : index
    %78 = vector.load %arg5[%c0_57, %c0_58, %c0_59] : memref<3x1x256xf32, #tpu.memory_space<vmem>>, vector<1x1x256xf32>
    %79 = vector.shape_cast %78 : vector<1x1x256xf32> to vector<1x256xf32>
    %c0_60 = arith.constant 0 : index
    %c0_61 = arith.constant 0 : index
    %80 = vector.load %arg10[%c0_60, %c0_61] : memref<32x1792xbf16, #tpu.memory_space<vmem>>, vector<32x1792xbf16>
    %cst_62 = arith.constant dense<0.000000e+00> : vector<32x256xf32>
    %81 = tpu.matmul %80, %77, %cst_62 {dimension_numbers = #tpu.dot_dimension_numbers<[1], [0], [0], [1], [0, 0, 1, 1], [], []>} : vector<32x1792xbf16>, vector<1792x256xbf16>, vector<32x256xf32> -> vector<32x256xf32>
    %82 = vector.broadcast %79 : vector<1x256xf32> to vector<32x256xf32>
    %83 = arith.addf %81, %82 : vector<32x256xf32>
    %cst_63 = arith.constant 0.000000e+00 : f32
    %84 = vector.broadcast %cst_63 : f32 to vector<32x256xf32>
    %85 = arith.maximumf %83, %84 : vector<32x256xf32>
    %86 = arith.addf %41, %85 : vector<32x256xf32>
    %87 = arith.truncf %86 : vector<32x256xf32> to vector<32x256xbf16>
    %cst_64 = arith.constant 0.000000e+00 : bf16
    %88 = vector.broadcast %cst_64 : bf16 to vector<3x256xbf16>
    %89 = vector.extract_strided_slice %87 {offsets = [0, 0], sizes = [16, 256], strides = [1, 1]} : vector<32x256xbf16> to vector<16x256xbf16>
    %90 = tpu.concatenate %88, %89, %88 in 0 : vector<3x256xbf16>, vector<16x256xbf16>, vector<3x256xbf16> -> vector<22x256xbf16>
    %91 = vector.extract_strided_slice %90 {offsets = [0, 0], sizes = [16, 256], strides = [1, 1]} : vector<22x256xbf16> to vector<16x256xbf16>
    %c0_65 = arith.constant 0 : index
    %c0_66 = arith.constant 0 : index
    %92 = vector.load %arg10[%c0_65, %c0_66] : memref<32x1792xbf16, #tpu.memory_space<vmem>>, vector<16x256xbf16>
    tpu.vector_store %arg10[%c0_65, %c0_66], %91 {strides = array<i32>} : memref<32x1792xbf16, #tpu.memory_space<vmem>>, vector<16x256xbf16>,
    %93 = vector.extract_strided_slice %90 {offsets = [1, 0], sizes = [16, 256], strides = [1, 1]} : vector<22x256xbf16> to vector<16x256xbf16>
    %c0_67 = arith.constant 0 : index
    %c256_68 = arith.constant 256 : index
    %94 = vector.load %arg10[%c0_67, %c256_68] : memref<32x1792xbf16, #tpu.memory_space<vmem>>, vector<16x256xbf16>
    tpu.vector_store %arg10[%c0_67, %c256_68], %93 {strides = array<i32>} : memref<32x1792xbf16, #tpu.memory_space<vmem>>, vector<16x256xbf16>,
    %95 = vector.extract_strided_slice %90 {offsets = [2, 0], sizes = [16, 256], strides = [1, 1]} : vector<22x256xbf16> to vector<16x256xbf16>
    %c0_69 = arith.constant 0 : index
    %c512_70 = arith.constant 512 : index
    %96 = vector.load %arg10[%c0_69, %c512_70] : memref<32x1792xbf16, #tpu.memory_space<vmem>>, vector<16x256xbf16>
    tpu.vector_store %arg10[%c0_69, %c512_70], %95 {strides = array<i32>} : memref<32x1792xbf16, #tpu.memory_space<vmem>>, vector<16x256xbf16>,
    %97 = vector.extract_strided_slice %90 {offsets = [3, 0], sizes = [16, 256], strides = [1, 1]} : vector<22x256xbf16> to vector<16x256xbf16>
    %c0_71 = arith.constant 0 : index
    %c768_72 = arith.constant 768 : index
    %98 = vector.load %arg10[%c0_71, %c768_72] : memref<32x1792xbf16, #tpu.memory_space<vmem>>, vector<16x256xbf16>
    tpu.vector_store %arg10[%c0_71, %c768_72], %97 {strides = array<i32>} : memref<32x1792xbf16, #tpu.memory_space<vmem>>, vector<16x256xbf16>,
    %99 = vector.extract_strided_slice %90 {offsets = [4, 0], sizes = [16, 256], strides = [1, 1]} : vector<22x256xbf16> to vector<16x256xbf16>
    %c0_73 = arith.constant 0 : index
    %c1024_74 = arith.constant 1024 : index
    %100 = vector.load %arg10[%c0_73, %c1024_74] : memref<32x1792xbf16, #tpu.memory_space<vmem>>, vector<16x256xbf16>
    tpu.vector_store %arg10[%c0_73, %c1024_74], %99 {strides = array<i32>} : memref<32x1792xbf16, #tpu.memory_space<vmem>>, vector<16x256xbf16>,
    %101 = vector.extract_strided_slice %90 {offsets = [5, 0], sizes = [16, 256], strides = [1, 1]} : vector<22x256xbf16> to vector<16x256xbf16>
    %c0_75 = arith.constant 0 : index
    %c1280_76 = arith.constant 1280 : index
    %102 = vector.load %arg10[%c0_75, %c1280_76] : memref<32x1792xbf16, #tpu.memory_space<vmem>>, vector<16x256xbf16>
    tpu.vector_store %arg10[%c0_75, %c1280_76], %101 {strides = array<i32>} : memref<32x1792xbf16, #tpu.memory_space<vmem>>, vector<16x256xbf16>,
    %103 = vector.extract_strided_slice %90 {offsets = [6, 0], sizes = [16, 256], strides = [1, 1]} : vector<22x256xbf16> to vector<16x256xbf16>
    %c0_77 = arith.constant 0 : index
    %c1536_78 = arith.constant 1536 : index
    %104 = vector.load %arg10[%c0_77, %c1536_78] : memref<32x1792xbf16, #tpu.memory_space<vmem>>, vector<16x256xbf16>
    tpu.vector_store %arg10[%c0_77, %c1536_78], %103 {strides = array<i32>} : memref<32x1792xbf16, #tpu.memory_space<vmem>>, vector<16x256xbf16>,
    %105 = vector.extract_strided_slice %87 {offsets = [16, 0], sizes = [16, 256], strides = [1, 1]} : vector<32x256xbf16> to vector<16x256xbf16>
    %106 = tpu.concatenate %88, %105, %88 in 0 : vector<3x256xbf16>, vector<16x256xbf16>, vector<3x256xbf16> -> vector<22x256xbf16>
    %107 = vector.extract_strided_slice %106 {offsets = [0, 0], sizes = [16, 256], strides = [1, 1]} : vector<22x256xbf16> to vector<16x256xbf16>
    %c16_79 = arith.constant 16 : index
    %c0_80 = arith.constant 0 : index
    %108 = vector.load %arg10[%c16_79, %c0_80] : memref<32x1792xbf16, #tpu.memory_space<vmem>>, vector<16x256xbf16>
    tpu.vector_store %arg10[%c16_79, %c0_80], %107 {strides = array<i32>} : memref<32x1792xbf16, #tpu.memory_space<vmem>>, vector<16x256xbf16>,
    %109 = vector.extract_strided_slice %106 {offsets = [1, 0], sizes = [16, 256], strides = [1, 1]} : vector<22x256xbf16> to vector<16x256xbf16>
    %c16_81 = arith.constant 16 : index
    %c256_82 = arith.constant 256 : index
    %110 = vector.load %arg10[%c16_81, %c256_82] : memref<32x1792xbf16, #tpu.memory_space<vmem>>, vector<16x256xbf16>
    tpu.vector_store %arg10[%c16_81, %c256_82], %109 {strides = array<i32>} : memref<32x1792xbf16, #tpu.memory_space<vmem>>, vector<16x256xbf16>,
    %111 = vector.extract_strided_slice %106 {offsets = [2, 0], sizes = [16, 256], strides = [1, 1]} : vector<22x256xbf16> to vector<16x256xbf16>
    %c16_83 = arith.constant 16 : index
    %c512_84 = arith.constant 512 : index
    %112 = vector.load %arg10[%c16_83, %c512_84] : memref<32x1792xbf16, #tpu.memory_space<vmem>>, vector<16x256xbf16>
    tpu.vector_store %arg10[%c16_83, %c512_84], %111 {strides = array<i32>} : memref<32x1792xbf16, #tpu.memory_space<vmem>>, vector<16x256xbf16>,
    %113 = vector.extract_strided_slice %106 {offsets = [3, 0], sizes = [16, 256], strides = [1, 1]} : vector<22x256xbf16> to vector<16x256xbf16>
    %c16_85 = arith.constant 16 : index
    %c768_86 = arith.constant 768 : index
    %114 = vector.load %arg10[%c16_85, %c768_86] : memref<32x1792xbf16, #tpu.memory_space<vmem>>, vector<16x256xbf16>
    tpu.vector_store %arg10[%c16_85, %c768_86], %113 {strides = array<i32>} : memref<32x1792xbf16, #tpu.memory_space<vmem>>, vector<16x256xbf16>,
    %115 = vector.extract_strided_slice %106 {offsets = [4, 0], sizes = [16, 256], strides = [1, 1]} : vector<22x256xbf16> to vector<16x256xbf16>
    %c16_87 = arith.constant 16 : index
    %c1024_88 = arith.constant 1024 : index
    %116 = vector.load %arg10[%c16_87, %c1024_88] : memref<32x1792xbf16, #tpu.memory_space<vmem>>, vector<16x256xbf16>
    tpu.vector_store %arg10[%c16_87, %c1024_88], %115 {strides = array<i32>} : memref<32x1792xbf16, #tpu.memory_space<vmem>>, vector<16x256xbf16>,
    %117 = vector.extract_strided_slice %106 {offsets = [5, 0], sizes = [16, 256], strides = [1, 1]} : vector<22x256xbf16> to vector<16x256xbf16>
    %c16_89 = arith.constant 16 : index
    %c1280_90 = arith.constant 1280 : index
    %118 = vector.load %arg10[%c16_89, %c1280_90] : memref<32x1792xbf16, #tpu.memory_space<vmem>>, vector<16x256xbf16>
    tpu.vector_store %arg10[%c16_89, %c1280_90], %117 {strides = array<i32>} : memref<32x1792xbf16, #tpu.memory_space<vmem>>, vector<16x256xbf16>,
    %119 = vector.extract_strided_slice %106 {offsets = [6, 0], sizes = [16, 256], strides = [1, 1]} : vector<22x256xbf16> to vector<16x256xbf16>
    %c16_91 = arith.constant 16 : index
    %c1536_92 = arith.constant 1536 : index
    %120 = vector.load %arg10[%c16_91, %c1536_92] : memref<32x1792xbf16, #tpu.memory_space<vmem>>, vector<16x256xbf16>
    tpu.vector_store %arg10[%c16_91, %c1536_92], %119 {strides = array<i32>} : memref<32x1792xbf16, #tpu.memory_space<vmem>>, vector<16x256xbf16>,
    %c0_93 = arith.constant 0 : index
    %c0_94 = arith.constant 0 : index
    %c0_95 = arith.constant 0 : index
    %121 = vector.load %arg6[%c0_93, %c0_94, %c0_95] : memref<3x1792x16xbf16, #tpu.memory_space<vmem>>, vector<1x1792x16xbf16>
    %122 = vector.shape_cast %121 : vector<1x1792x16xbf16> to vector<1792x16xbf16>
    %c0_96 = arith.constant 0 : index
    %c0_97 = arith.constant 0 : index
    %c0_98 = arith.constant 0 : index
    %123 = vector.load %arg7[%c0_96, %c0_97, %c0_98] : memref<3x1x16xf32, #tpu.memory_space<vmem>>, vector<1x1x16xf32>
    %124 = vector.shape_cast %123 : vector<1x1x16xf32> to vector<1x16xf32>
    %c0_99 = arith.constant 0 : index
    %c0_100 = arith.constant 0 : index
    %125 = vector.load %arg10[%c0_99, %c0_100] : memref<32x1792xbf16, #tpu.memory_space<vmem>>, vector<32x1792xbf16>
    %cst_101 = arith.constant dense<0.000000e+00> : vector<32x16xf32>
    %126 = tpu.matmul %125, %122, %cst_101 {dimension_numbers = #tpu.dot_dimension_numbers<[1], [0], [0], [1], [0, 0, 1, 1], [], []>} : vector<32x1792xbf16>, vector<1792x16xbf16>, vector<32x16xf32> -> vector<32x16xf32>
    %127 = vector.broadcast %124 : vector<1x16xf32> to vector<32x16xf32>
    %128 = arith.addf %126, %127 : vector<32x16xf32>
    %129 = arith.addf %1, %128 : vector<32x16xf32>
    %c1 = arith.constant 1 : index
    %c0_102 = arith.constant 0 : index
    %c0_103 = arith.constant 0 : index
    %130 = vector.load %arg4[%c1, %c0_102, %c0_103] : memref<3x1792x256xbf16, #tpu.memory_space<vmem>>, vector<1x1792x256xbf16>
    %131 = vector.shape_cast %130 : vector<1x1792x256xbf16> to vector<1792x256xbf16>
    %c1_104 = arith.constant 1 : index
    %c0_105 = arith.constant 0 : index
    %c0_106 = arith.constant 0 : index
    %132 = vector.load %arg5[%c1_104, %c0_105, %c0_106] : memref<3x1x256xf32, #tpu.memory_space<vmem>>, vector<1x1x256xf32>
    %133 = vector.shape_cast %132 : vector<1x1x256xf32> to vector<1x256xf32>
    %c0_107 = arith.constant 0 : index
    %c0_108 = arith.constant 0 : index
    %134 = vector.load %arg10[%c0_107, %c0_108] : memref<32x1792xbf16, #tpu.memory_space<vmem>>, vector<32x1792xbf16>
    %cst_109 = arith.constant dense<0.000000e+00> : vector<32x256xf32>
    %135 = tpu.matmul %134, %131, %cst_109 {dimension_numbers = #tpu.dot_dimension_numbers<[1], [0], [0], [1], [0, 0, 1, 1], [], []>} : vector<32x1792xbf16>, vector<1792x256xbf16>, vector<32x256xf32> -> vector<32x256xf32>
    %136 = vector.broadcast %133 : vector<1x256xf32> to vector<32x256xf32>
    %137 = arith.addf %135, %136 : vector<32x256xf32>
    %cst_110 = arith.constant 0.000000e+00 : f32
    %138 = vector.broadcast %cst_110 : f32 to vector<32x256xf32>
    %139 = arith.maximumf %137, %138 : vector<32x256xf32>
    %140 = arith.addf %86, %139 : vector<32x256xf32>
    %141 = arith.truncf %140 : vector<32x256xf32> to vector<32x256xbf16>
    %cst_111 = arith.constant 0.000000e+00 : bf16
    %142 = vector.broadcast %cst_111 : bf16 to vector<3x256xbf16>
    %143 = vector.extract_strided_slice %141 {offsets = [0, 0], sizes = [16, 256], strides = [1, 1]} : vector<32x256xbf16> to vector<16x256xbf16>
    %144 = tpu.concatenate %142, %143, %142 in 0 : vector<3x256xbf16>, vector<16x256xbf16>, vector<3x256xbf16> -> vector<22x256xbf16>
    %145 = vector.extract_strided_slice %144 {offsets = [0, 0], sizes = [16, 256], strides = [1, 1]} : vector<22x256xbf16> to vector<16x256xbf16>
    %c0_112 = arith.constant 0 : index
    %c0_113 = arith.constant 0 : index
    %146 = vector.load %arg10[%c0_112, %c0_113] : memref<32x1792xbf16, #tpu.memory_space<vmem>>, vector<16x256xbf16>
    tpu.vector_store %arg10[%c0_112, %c0_113], %145 {strides = array<i32>} : memref<32x1792xbf16, #tpu.memory_space<vmem>>, vector<16x256xbf16>,
    %147 = vector.extract_strided_slice %144 {offsets = [1, 0], sizes = [16, 256], strides = [1, 1]} : vector<22x256xbf16> to vector<16x256xbf16>
    %c0_114 = arith.constant 0 : index
    %c256_115 = arith.constant 256 : index
    %148 = vector.load %arg10[%c0_114, %c256_115] : memref<32x1792xbf16, #tpu.memory_space<vmem>>, vector<16x256xbf16>
    tpu.vector_store %arg10[%c0_114, %c256_115], %147 {strides = array<i32>} : memref<32x1792xbf16, #tpu.memory_space<vmem>>, vector<16x256xbf16>,
    %149 = vector.extract_strided_slice %144 {offsets = [2, 0], sizes = [16, 256], strides = [1, 1]} : vector<22x256xbf16> to vector<16x256xbf16>
    %c0_116 = arith.constant 0 : index
    %c512_117 = arith.constant 512 : index
    %150 = vector.load %arg10[%c0_116, %c512_117] : memref<32x1792xbf16, #tpu.memory_space<vmem>>, vector<16x256xbf16>
    tpu.vector_store %arg10[%c0_116, %c512_117], %149 {strides = array<i32>} : memref<32x1792xbf16, #tpu.memory_space<vmem>>, vector<16x256xbf16>,
    %151 = vector.extract_strided_slice %144 {offsets = [3, 0], sizes = [16, 256], strides = [1, 1]} : vector<22x256xbf16> to vector<16x256xbf16>
    %c0_118 = arith.constant 0 : index
    %c768_119 = arith.constant 768 : index
    %152 = vector.load %arg10[%c0_118, %c768_119] : memref<32x1792xbf16, #tpu.memory_space<vmem>>, vector<16x256xbf16>
    tpu.vector_store %arg10[%c0_118, %c768_119], %151 {strides = array<i32>} : memref<32x1792xbf16, #tpu.memory_space<vmem>>, vector<16x256xbf16>,
    %153 = vector.extract_strided_slice %144 {offsets = [4, 0], sizes = [16, 256], strides = [1, 1]} : vector<22x256xbf16> to vector<16x256xbf16>
    %c0_120 = arith.constant 0 : index
    %c1024_121 = arith.constant 1024 : index
    %154 = vector.load %arg10[%c0_120, %c1024_121] : memref<32x1792xbf16, #tpu.memory_space<vmem>>, vector<16x256xbf16>
    tpu.vector_store %arg10[%c0_120, %c1024_121], %153 {strides = array<i32>} : memref<32x1792xbf16, #tpu.memory_space<vmem>>, vector<16x256xbf16>,
    %155 = vector.extract_strided_slice %144 {offsets = [5, 0], sizes = [16, 256], strides = [1, 1]} : vector<22x256xbf16> to vector<16x256xbf16>
    %c0_122 = arith.constant 0 : index
    %c1280_123 = arith.constant 1280 : index
    %156 = vector.load %arg10[%c0_122, %c1280_123] : memref<32x1792xbf16, #tpu.memory_space<vmem>>, vector<16x256xbf16>
    tpu.vector_store %arg10[%c0_122, %c1280_123], %155 {strides = array<i32>} : memref<32x1792xbf16, #tpu.memory_space<vmem>>, vector<16x256xbf16>,
    %157 = vector.extract_strided_slice %144 {offsets = [6, 0], sizes = [16, 256], strides = [1, 1]} : vector<22x256xbf16> to vector<16x256xbf16>
    %c0_124 = arith.constant 0 : index
    %c1536_125 = arith.constant 1536 : index
    %158 = vector.load %arg10[%c0_124, %c1536_125] : memref<32x1792xbf16, #tpu.memory_space<vmem>>, vector<16x256xbf16>
    tpu.vector_store %arg10[%c0_124, %c1536_125], %157 {strides = array<i32>} : memref<32x1792xbf16, #tpu.memory_space<vmem>>, vector<16x256xbf16>,
    %159 = vector.extract_strided_slice %141 {offsets = [16, 0], sizes = [16, 256], strides = [1, 1]} : vector<32x256xbf16> to vector<16x256xbf16>
    %160 = tpu.concatenate %142, %159, %142 in 0 : vector<3x256xbf16>, vector<16x256xbf16>, vector<3x256xbf16> -> vector<22x256xbf16>
    %161 = vector.extract_strided_slice %160 {offsets = [0, 0], sizes = [16, 256], strides = [1, 1]} : vector<22x256xbf16> to vector<16x256xbf16>
    %c16_126 = arith.constant 16 : index
    %c0_127 = arith.constant 0 : index
    %162 = vector.load %arg10[%c16_126, %c0_127] : memref<32x1792xbf16, #tpu.memory_space<vmem>>, vector<16x256xbf16>
    tpu.vector_store %arg10[%c16_126, %c0_127], %161 {strides = array<i32>} : memref<32x1792xbf16, #tpu.memory_space<vmem>>, vector<16x256xbf16>,
    %163 = vector.extract_strided_slice %160 {offsets = [1, 0], sizes = [16, 256], strides = [1, 1]} : vector<22x256xbf16> to vector<16x256xbf16>
    %c16_128 = arith.constant 16 : index
    %c256_129 = arith.constant 256 : index
    %164 = vector.load %arg10[%c16_128, %c256_129] : memref<32x1792xbf16, #tpu.memory_space<vmem>>, vector<16x256xbf16>
    tpu.vector_store %arg10[%c16_128, %c256_129], %163 {strides = array<i32>} : memref<32x1792xbf16, #tpu.memory_space<vmem>>, vector<16x256xbf16>,
    %165 = vector.extract_strided_slice %160 {offsets = [2, 0], sizes = [16, 256], strides = [1, 1]} : vector<22x256xbf16> to vector<16x256xbf16>
    %c16_130 = arith.constant 16 : index
    %c512_131 = arith.constant 512 : index
    %166 = vector.load %arg10[%c16_130, %c512_131] : memref<32x1792xbf16, #tpu.memory_space<vmem>>, vector<16x256xbf16>
    tpu.vector_store %arg10[%c16_130, %c512_131], %165 {strides = array<i32>} : memref<32x1792xbf16, #tpu.memory_space<vmem>>, vector<16x256xbf16>,
    %167 = vector.extract_strided_slice %160 {offsets = [3, 0], sizes = [16, 256], strides = [1, 1]} : vector<22x256xbf16> to vector<16x256xbf16>
    %c16_132 = arith.constant 16 : index
    %c768_133 = arith.constant 768 : index
    %168 = vector.load %arg10[%c16_132, %c768_133] : memref<32x1792xbf16, #tpu.memory_space<vmem>>, vector<16x256xbf16>
    tpu.vector_store %arg10[%c16_132, %c768_133], %167 {strides = array<i32>} : memref<32x1792xbf16, #tpu.memory_space<vmem>>, vector<16x256xbf16>,
    %169 = vector.extract_strided_slice %160 {offsets = [4, 0], sizes = [16, 256], strides = [1, 1]} : vector<22x256xbf16> to vector<16x256xbf16>
    %c16_134 = arith.constant 16 : index
    %c1024_135 = arith.constant 1024 : index
    %170 = vector.load %arg10[%c16_134, %c1024_135] : memref<32x1792xbf16, #tpu.memory_space<vmem>>, vector<16x256xbf16>
    tpu.vector_store %arg10[%c16_134, %c1024_135], %169 {strides = array<i32>} : memref<32x1792xbf16, #tpu.memory_space<vmem>>, vector<16x256xbf16>,
    %171 = vector.extract_strided_slice %160 {offsets = [5, 0], sizes = [16, 256], strides = [1, 1]} : vector<22x256xbf16> to vector<16x256xbf16>
    %c16_136 = arith.constant 16 : index
    %c1280_137 = arith.constant 1280 : index
    %172 = vector.load %arg10[%c16_136, %c1280_137] : memref<32x1792xbf16, #tpu.memory_space<vmem>>, vector<16x256xbf16>
    tpu.vector_store %arg10[%c16_136, %c1280_137], %171 {strides = array<i32>} : memref<32x1792xbf16, #tpu.memory_space<vmem>>, vector<16x256xbf16>,
    %173 = vector.extract_strided_slice %160 {offsets = [6, 0], sizes = [16, 256], strides = [1, 1]} : vector<22x256xbf16> to vector<16x256xbf16>
    %c16_138 = arith.constant 16 : index
    %c1536_139 = arith.constant 1536 : index
    %174 = vector.load %arg10[%c16_138, %c1536_139] : memref<32x1792xbf16, #tpu.memory_space<vmem>>, vector<16x256xbf16>
    tpu.vector_store %arg10[%c16_138, %c1536_139], %173 {strides = array<i32>} : memref<32x1792xbf16, #tpu.memory_space<vmem>>, vector<16x256xbf16>,
    %c1_140 = arith.constant 1 : index
    %c0_141 = arith.constant 0 : index
    %c0_142 = arith.constant 0 : index
    %175 = vector.load %arg6[%c1_140, %c0_141, %c0_142] : memref<3x1792x16xbf16, #tpu.memory_space<vmem>>, vector<1x1792x16xbf16>
    %176 = vector.shape_cast %175 : vector<1x1792x16xbf16> to vector<1792x16xbf16>
    %c1_143 = arith.constant 1 : index
    %c0_144 = arith.constant 0 : index
    %c0_145 = arith.constant 0 : index
    %177 = vector.load %arg7[%c1_143, %c0_144, %c0_145] : memref<3x1x16xf32, #tpu.memory_space<vmem>>, vector<1x1x16xf32>
    %178 = vector.shape_cast %177 : vector<1x1x16xf32> to vector<1x16xf32>
    %c0_146 = arith.constant 0 : index
    %c0_147 = arith.constant 0 : index
    %179 = vector.load %arg10[%c0_146, %c0_147] : memref<32x1792xbf16, #tpu.memory_space<vmem>>, vector<32x1792xbf16>
    %cst_148 = arith.constant dense<0.000000e+00> : vector<32x16xf32>
    %180 = tpu.matmul %179, %176, %cst_148 {dimension_numbers = #tpu.dot_dimension_numbers<[1], [0], [0], [1], [0, 0, 1, 1], [], []>} : vector<32x1792xbf16>, vector<1792x16xbf16>, vector<32x16xf32> -> vector<32x16xf32>
    %181 = vector.broadcast %178 : vector<1x16xf32> to vector<32x16xf32>
    %182 = arith.addf %180, %181 : vector<32x16xf32>
    %183 = arith.addf %129, %182 : vector<32x16xf32>
    %c2 = arith.constant 2 : index
    %c0_149 = arith.constant 0 : index
    %c0_150 = arith.constant 0 : index
    %184 = vector.load %arg4[%c2, %c0_149, %c0_150] : memref<3x1792x256xbf16, #tpu.memory_space<vmem>>, vector<1x1792x256xbf16>
    %185 = vector.shape_cast %184 : vector<1x1792x256xbf16> to vector<1792x256xbf16>
    %c2_151 = arith.constant 2 : index
    %c0_152 = arith.constant 0 : index
    %c0_153 = arith.constant 0 : index
    %186 = vector.load %arg5[%c2_151, %c0_152, %c0_153] : memref<3x1x256xf32, #tpu.memory_space<vmem>>, vector<1x1x256xf32>
    %187 = vector.shape_cast %186 : vector<1x1x256xf32> to vector<1x256xf32>
    %c0_154 = arith.constant 0 : index
    %c0_155 = arith.constant 0 : index
    %188 = vector.load %arg10[%c0_154, %c0_155] : memref<32x1792xbf16, #tpu.memory_space<vmem>>, vector<32x1792xbf16>
    %cst_156 = arith.constant dense<0.000000e+00> : vector<32x256xf32>
    %189 = tpu.matmul %188, %185, %cst_156 {dimension_numbers = #tpu.dot_dimension_numbers<[1], [0], [0], [1], [0, 0, 1, 1], [], []>} : vector<32x1792xbf16>, vector<1792x256xbf16>, vector<32x256xf32> -> vector<32x256xf32>
    %190 = vector.broadcast %187 : vector<1x256xf32> to vector<32x256xf32>
    %191 = arith.addf %189, %190 : vector<32x256xf32>
    %cst_157 = arith.constant 0.000000e+00 : f32
    %192 = vector.broadcast %cst_157 : f32 to vector<32x256xf32>
    %193 = arith.maximumf %191, %192 : vector<32x256xf32>
    %194 = arith.addf %140, %193 : vector<32x256xf32>
    %195 = arith.truncf %194 : vector<32x256xf32> to vector<32x256xbf16>
    %cst_158 = arith.constant 0.000000e+00 : bf16
    %196 = vector.broadcast %cst_158 : bf16 to vector<3x256xbf16>
    %197 = vector.extract_strided_slice %195 {offsets = [0, 0], sizes = [16, 256], strides = [1, 1]} : vector<32x256xbf16> to vector<16x256xbf16>
    %198 = tpu.concatenate %196, %197, %196 in 0 : vector<3x256xbf16>, vector<16x256xbf16>, vector<3x256xbf16> -> vector<22x256xbf16>
    %199 = vector.extract_strided_slice %198 {offsets = [0, 0], sizes = [16, 256], strides = [1, 1]} : vector<22x256xbf16> to vector<16x256xbf16>
    %c0_159 = arith.constant 0 : index
    %c0_160 = arith.constant 0 : index
    %200 = vector.load %arg10[%c0_159, %c0_160] : memref<32x1792xbf16, #tpu.memory_space<vmem>>, vector<16x256xbf16>
    tpu.vector_store %arg10[%c0_159, %c0_160], %199 {strides = array<i32>} : memref<32x1792xbf16, #tpu.memory_space<vmem>>, vector<16x256xbf16>,
    %201 = vector.extract_strided_slice %198 {offsets = [1, 0], sizes = [16, 256], strides = [1, 1]} : vector<22x256xbf16> to vector<16x256xbf16>
    %c0_161 = arith.constant 0 : index
    %c256_162 = arith.constant 256 : index
    %202 = vector.load %arg10[%c0_161, %c256_162] : memref<32x1792xbf16, #tpu.memory_space<vmem>>, vector<16x256xbf16>
    tpu.vector_store %arg10[%c0_161, %c256_162], %201 {strides = array<i32>} : memref<32x1792xbf16, #tpu.memory_space<vmem>>, vector<16x256xbf16>,
    %203 = vector.extract_strided_slice %198 {offsets = [2, 0], sizes = [16, 256], strides = [1, 1]} : vector<22x256xbf16> to vector<16x256xbf16>
    %c0_163 = arith.constant 0 : index
    %c512_164 = arith.constant 512 : index
    %204 = vector.load %arg10[%c0_163, %c512_164] : memref<32x1792xbf16, #tpu.memory_space<vmem>>, vector<16x256xbf16>
    tpu.vector_store %arg10[%c0_163, %c512_164], %203 {strides = array<i32>} : memref<32x1792xbf16, #tpu.memory_space<vmem>>, vector<16x256xbf16>,
    %205 = vector.extract_strided_slice %198 {offsets = [3, 0], sizes = [16, 256], strides = [1, 1]} : vector<22x256xbf16> to vector<16x256xbf16>
    %c0_165 = arith.constant 0 : index
    %c768_166 = arith.constant 768 : index
    %206 = vector.load %arg10[%c0_165, %c768_166] : memref<32x1792xbf16, #tpu.memory_space<vmem>>, vector<16x256xbf16>
    tpu.vector_store %arg10[%c0_165, %c768_166], %205 {strides = array<i32>} : memref<32x1792xbf16, #tpu.memory_space<vmem>>, vector<16x256xbf16>,
    %207 = vector.extract_strided_slice %198 {offsets = [4, 0], sizes = [16, 256], strides = [1, 1]} : vector<22x256xbf16> to vector<16x256xbf16>
    %c0_167 = arith.constant 0 : index
    %c1024_168 = arith.constant 1024 : index
    %208 = vector.load %arg10[%c0_167, %c1024_168] : memref<32x1792xbf16, #tpu.memory_space<vmem>>, vector<16x256xbf16>
    tpu.vector_store %arg10[%c0_167, %c1024_168], %207 {strides = array<i32>} : memref<32x1792xbf16, #tpu.memory_space<vmem>>, vector<16x256xbf16>,
    %209 = vector.extract_strided_slice %198 {offsets = [5, 0], sizes = [16, 256], strides = [1, 1]} : vector<22x256xbf16> to vector<16x256xbf16>
    %c0_169 = arith.constant 0 : index
    %c1280_170 = arith.constant 1280 : index
    %210 = vector.load %arg10[%c0_169, %c1280_170] : memref<32x1792xbf16, #tpu.memory_space<vmem>>, vector<16x256xbf16>
    tpu.vector_store %arg10[%c0_169, %c1280_170], %209 {strides = array<i32>} : memref<32x1792xbf16, #tpu.memory_space<vmem>>, vector<16x256xbf16>,
    %211 = vector.extract_strided_slice %198 {offsets = [6, 0], sizes = [16, 256], strides = [1, 1]} : vector<22x256xbf16> to vector<16x256xbf16>
    %c0_171 = arith.constant 0 : index
    %c1536_172 = arith.constant 1536 : index
    %212 = vector.load %arg10[%c0_171, %c1536_172] : memref<32x1792xbf16, #tpu.memory_space<vmem>>, vector<16x256xbf16>
    tpu.vector_store %arg10[%c0_171, %c1536_172], %211 {strides = array<i32>} : memref<32x1792xbf16, #tpu.memory_space<vmem>>, vector<16x256xbf16>,
    %213 = vector.extract_strided_slice %195 {offsets = [16, 0], sizes = [16, 256], strides = [1, 1]} : vector<32x256xbf16> to vector<16x256xbf16>
    %214 = tpu.concatenate %196, %213, %196 in 0 : vector<3x256xbf16>, vector<16x256xbf16>, vector<3x256xbf16> -> vector<22x256xbf16>
    %215 = vector.extract_strided_slice %214 {offsets = [0, 0], sizes = [16, 256], strides = [1, 1]} : vector<22x256xbf16> to vector<16x256xbf16>
    %c16_173 = arith.constant 16 : index
    %c0_174 = arith.constant 0 : index
    %216 = vector.load %arg10[%c16_173, %c0_174] : memref<32x1792xbf16, #tpu.memory_space<vmem>>, vector<16x256xbf16>
    tpu.vector_store %arg10[%c16_173, %c0_174], %215 {strides = array<i32>} : memref<32x1792xbf16, #tpu.memory_space<vmem>>, vector<16x256xbf16>,
    %217 = vector.extract_strided_slice %214 {offsets = [1, 0], sizes = [16, 256], strides = [1, 1]} : vector<22x256xbf16> to vector<16x256xbf16>
    %c16_175 = arith.constant 16 : index
    %c256_176 = arith.constant 256 : index
    %218 = vector.load %arg10[%c16_175, %c256_176] : memref<32x1792xbf16, #tpu.memory_space<vmem>>, vector<16x256xbf16>
    tpu.vector_store %arg10[%c16_175, %c256_176], %217 {strides = array<i32>} : memref<32x1792xbf16, #tpu.memory_space<vmem>>, vector<16x256xbf16>,
    %219 = vector.extract_strided_slice %214 {offsets = [2, 0], sizes = [16, 256], strides = [1, 1]} : vector<22x256xbf16> to vector<16x256xbf16>
    %c16_177 = arith.constant 16 : index
    %c512_178 = arith.constant 512 : index
    %220 = vector.load %arg10[%c16_177, %c512_178] : memref<32x1792xbf16, #tpu.memory_space<vmem>>, vector<16x256xbf16>
    tpu.vector_store %arg10[%c16_177, %c512_178], %219 {strides = array<i32>} : memref<32x1792xbf16, #tpu.memory_space<vmem>>, vector<16x256xbf16>,
    %221 = vector.extract_strided_slice %214 {offsets = [3, 0], sizes = [16, 256], strides = [1, 1]} : vector<22x256xbf16> to vector<16x256xbf16>
    %c16_179 = arith.constant 16 : index
    %c768_180 = arith.constant 768 : index
    %222 = vector.load %arg10[%c16_179, %c768_180] : memref<32x1792xbf16, #tpu.memory_space<vmem>>, vector<16x256xbf16>
    tpu.vector_store %arg10[%c16_179, %c768_180], %221 {strides = array<i32>} : memref<32x1792xbf16, #tpu.memory_space<vmem>>, vector<16x256xbf16>,
    %223 = vector.extract_strided_slice %214 {offsets = [4, 0], sizes = [16, 256], strides = [1, 1]} : vector<22x256xbf16> to vector<16x256xbf16>
    %c16_181 = arith.constant 16 : index
    %c1024_182 = arith.constant 1024 : index
    %224 = vector.load %arg10[%c16_181, %c1024_182] : memref<32x1792xbf16, #tpu.memory_space<vmem>>, vector<16x256xbf16>
    tpu.vector_store %arg10[%c16_181, %c1024_182], %223 {strides = array<i32>} : memref<32x1792xbf16, #tpu.memory_space<vmem>>, vector<16x256xbf16>,
    %225 = vector.extract_strided_slice %214 {offsets = [5, 0], sizes = [16, 256], strides = [1, 1]} : vector<22x256xbf16> to vector<16x256xbf16>
    %c16_183 = arith.constant 16 : index
    %c1280_184 = arith.constant 1280 : index
    %226 = vector.load %arg10[%c16_183, %c1280_184] : memref<32x1792xbf16, #tpu.memory_space<vmem>>, vector<16x256xbf16>
    tpu.vector_store %arg10[%c16_183, %c1280_184], %225 {strides = array<i32>} : memref<32x1792xbf16, #tpu.memory_space<vmem>>, vector<16x256xbf16>,
    %227 = vector.extract_strided_slice %214 {offsets = [6, 0], sizes = [16, 256], strides = [1, 1]} : vector<22x256xbf16> to vector<16x256xbf16>
    %c16_185 = arith.constant 16 : index
    %c1536_186 = arith.constant 1536 : index
    %228 = vector.load %arg10[%c16_185, %c1536_186] : memref<32x1792xbf16, #tpu.memory_space<vmem>>, vector<16x256xbf16>
    tpu.vector_store %arg10[%c16_185, %c1536_186], %227 {strides = array<i32>} : memref<32x1792xbf16, #tpu.memory_space<vmem>>, vector<16x256xbf16>,
    %c2_187 = arith.constant 2 : index
    %c0_188 = arith.constant 0 : index
    %c0_189 = arith.constant 0 : index
    %229 = vector.load %arg6[%c2_187, %c0_188, %c0_189] : memref<3x1792x16xbf16, #tpu.memory_space<vmem>>, vector<1x1792x16xbf16>
    %230 = vector.shape_cast %229 : vector<1x1792x16xbf16> to vector<1792x16xbf16>
    %c2_190 = arith.constant 2 : index
    %c0_191 = arith.constant 0 : index
    %c0_192 = arith.constant 0 : index
    %231 = vector.load %arg7[%c2_190, %c0_191, %c0_192] : memref<3x1x16xf32, #tpu.memory_space<vmem>>, vector<1x1x16xf32>
    %232 = vector.shape_cast %231 : vector<1x1x16xf32> to vector<1x16xf32>
    %c0_193 = arith.constant 0 : index
    %c0_194 = arith.constant 0 : index
    %233 = vector.load %arg10[%c0_193, %c0_194] : memref<32x1792xbf16, #tpu.memory_space<vmem>>, vector<32x1792xbf16>
    %cst_195 = arith.constant dense<0.000000e+00> : vector<32x16xf32>
    %234 = tpu.matmul %233, %230, %cst_195 {dimension_numbers = #tpu.dot_dimension_numbers<[1], [0], [0], [1], [0, 0, 1, 1], [], []>} : vector<32x1792xbf16>, vector<1792x16xbf16>, vector<32x16xf32> -> vector<32x16xf32>
    %235 = vector.broadcast %232 : vector<1x16xf32> to vector<32x16xf32>
    %236 = arith.addf %234, %235 : vector<32x16xf32>
    %237 = arith.addf %183, %236 : vector<32x16xf32>
    %238 = vector.shape_cast %237 : vector<32x16xf32> to vector<2x16x16xf32>
    %c0_196 = arith.constant 0 : index
    %c0_197 = arith.constant 0 : index
    %c0_198 = arith.constant 0 : index
    %239 = vector.load %arg8[%c0_196, %c0_197, %c0_198] : memref<2x16x16xf32, #tpu.memory_space<vmem>>, vector<2x16x16xf32>
    tpu.vector_store %arg8[%c0_196, %c0_197, %c0_198], %238 {strides = array<i32>} : memref<2x16x16xf32, #tpu.memory_space<vmem>>, vector<2x16x16xf32>,
    return
  }
  func.func @transform_0(%arg0: i32) -> (i32, i32, i32) {
    %c0_i32 = arith.constant 0 : i32
    %c0_i32_0 = arith.constant 0 : i32
    %c0_i32_1 = arith.constant 0 : i32
    %c0_i32_2 = arith.constant 0 : i32
    return %c0_i32, %c0_i32_0, %c0_i32_1 : i32, i32, i32
  }
  func.func @transform_1(%arg0: i32) -> (i32, i32) {
    %c0_i32 = arith.constant 0 : i32
    %c0_i32_0 = arith.constant 0 : i32
    %c0_i32_1 = arith.constant 0 : i32
    return %c0_i32, %c0_i32_0 : i32, i32
  }
  func.func @transform_2(%arg0: i32) -> (i32, i32) {
    %c0_i32 = arith.constant 0 : i32
    %c0_i32_0 = arith.constant 0 : i32
    %c0_i32_1 = arith.constant 0 : i32
    return %c0_i32, %c0_i32_0 : i32, i32
  }
  func.func @transform_3(%arg0: i32) -> (i32, i32, i32) {
    %c0_i32 = arith.constant 0 : i32
    %c0_i32_0 = arith.constant 0 : i32
    %c0_i32_1 = arith.constant 0 : i32
    %c0_i32_2 = arith.constant 0 : i32
    return %c0_i32, %c0_i32_0, %c0_i32_1 : i32, i32, i32
  }
  func.func @transform_4(%arg0: i32) -> (i32, i32, i32) {
    %c0_i32 = arith.constant 0 : i32
    %c0_i32_0 = arith.constant 0 : i32
    %c0_i32_1 = arith.constant 0 : i32
    %c0_i32_2 = arith.constant 0 : i32
    return %c0_i32, %c0_i32_0, %c0_i32_1 : i32, i32, i32
  }
  func.func @transform_5(%arg0: i32) -> (i32, i32, i32) {
    %c0_i32 = arith.constant 0 : i32
    %c0_i32_0 = arith.constant 0 : i32
    %c0_i32_1 = arith.constant 0 : i32
    %c0_i32_2 = arith.constant 0 : i32
    return %c0_i32, %c0_i32_0, %c0_i32_1 : i32, i32, i32
  }
  func.func @transform_6(%arg0: i32) -> (i32, i32, i32) {
    %c0_i32 = arith.constant 0 : i32
    %c0_i32_0 = arith.constant 0 : i32
    %c0_i32_1 = arith.constant 0 : i32
    %c0_i32_2 = arith.constant 0 : i32
    return %c0_i32, %c0_i32_0, %c0_i32_1 : i32, i32, i32
  }
  func.func @transform_7(%arg0: i32) -> (i32, i32, i32) {
    %c0_i32 = arith.constant 0 : i32
    %c0_i32_0 = arith.constant 0 : i32
    %c0_i32_1 = arith.constant 0 : i32
    %c0_i32_2 = arith.constant 0 : i32
    return %c0_i32, %c0_i32_0, %c0_i32_1 : i32, i32, i32
  }
}

</mosaic_0001>

<bundles_post_ra>
// kernel: tile.43
= control target key start
LH: loop header
LB: loop body
LE: loop exit
PB: predicated region body
PF: predicated region fallthrough
CT: control target
= control target key end

     0   :  { %s28_s0 = inlined_call_operand.vmem [shape: f32[16], index: 0, kind: input, shape index: {}]   ;;  %s29_s1 = inlined_call_operand.vmem [shape: f32[16,16], index: 1, kind: output, shape index: {}]  }
   0x1   :  { %v4_v0 = vld [vmem:[%s28_s0] ss:$0 sm:$0xff] }
   0x2   :  { %5 = vst [vmem:[%s29_s1] sm:$0xff] %v4_v0 }
   0x3   :  { %8 = vst [vmem:[%s29_s1 + $0x8] sm:$0xff] %v4_v0 }

// kernel: tile.52
= control target key start
LH: loop header
LB: loop body
LE: loop exit
PB: predicated region body
PF: predicated region fallthrough
CT: control target
= control target key end

     0   :  { %s7_s6 = smov 3  ;;  %s21_s9 = smov 3  ;;  %vm4_vm0 = vcmask 130048   ;;  %vm11_vm1 = vcmask 1048448   ;;  %vm18_vm2 = vcmask 917248   ;;  %vm25_vm3 = vcmask 786048   ;;  %s129_s0 = inlined_call_operand.vmem [shape: f32[16,16], index: 0, kind: input, shape index: {}]   ;;  %s130_s1 = inlined_call_operand.vmem [shape: f32[1,1,256], index: 1, kind: output, shape index: {}]  }
   0x1   :  { %v67_v0 = vld [vmem:[%s129_s0 + $0x7] ss:$8 sm:%s7_s6]   ;;  %s82_s10 = smov 112   ;;  %v69_v1 = vld [vmem:[%s129_s0 + $0x5] ss:$8 sm:%s21_s9]   ;;  %s83_s13 = smov 80  }
   0x2   :  { %9 = vrot.lane.b32.xlu0 %v67_v0, %s82_s10  ;;  %23 = vrot.lane.b32.xlu1 %v69_v1, %s83_s13  ;;  %s14_s14 = smov 3  ;;  %s28_s15 = smov 3  ;;  %vm32_vm4 = vcmask 654848   ;;  %vm39_vm5 = vcmask 523648   ;;  %vm46_vm6 = vcmask 392448   ;;  %vm53_vm7 = vcmask 261248  }
   0x3   :  { %s35_s16 = smov 3  ;;  %v68_v3 = vld [vmem:[%s129_s0 + $0x6] ss:$8 sm:%s14_s14]   ;;  %s84_s21 = smov 48   ;;  %v70_v4 = vld [vmem:[%s129_s0 + $0x4] ss:$8 sm:%s28_s15]  }
   0x4   :  { %v71_v2 = vld [vmem:[%s129_s0 + $0x3] ss:$8 sm:%s35_s16]   ;;  %s42_s24 = smov 3  ;;  %s85_s25 = smov 96  }
   0x5   :  { %37 = vrot.lane.b32.xlu2 %v71_v2, %s84_s21  ;;  %s86_s26 = smov 64   ;;  %s49_s27 = smov 3  ;;  %v72_v5 = vld [vmem:[%s129_s0 + $0x2] ss:$8 sm:%s42_s24]  }
   0x6   :  { %v73_v6 = vld [vmem:[%s129_s0 + $0x1] ss:$8 sm:%s49_s27]   ;;  %s87_s3 = smov 32   ;;  %s88_s4 = smov 16  }
   0x7   :  { %s2_s5 = smov 3 }
   0x8   :  { %v3_v7 = vld [vmem:[%s129_s0] ss:$8 sm:%s2_s5]  }
   0x9   :  { %5 = vst.msk [vmem:[#allocation0] ss:$8 sm:$0x3] %vm4_vm0, %v3_v7  }
   0xa   :  { %16 = vrot.lane.b32.xlu0 %v68_v3, %s85_s25  ;;  %30 = vrot.lane.b32.xlu1 %v70_v4, %s86_s26 }
   0xd   :  { %44 = vrot.lane.b32.xlu2 %v72_v5, %s87_s3 }
  0x12   :  { %51 = vrot.lane.b32.xlu0 %v73_v6, %s88_s4 }
  0x5f   :  { %v38_v8 = vpop.permute.xlu2 %37  }
  0x67   :  { %v45_v9 = vpop.permute.xlu2 %44  }
  0x74   :  { %v10_v10 = vpop.permute.xlu0 %9   ;;  %v24_v11 = vpop.permute.xlu1 %23  }
  0x75   :  { %12 = vst.msk [vmem:[#allocation0] ss:$8 sm:$0x3] %vm11_vm1, %v10_v10  }
  0x7c   :  { %v17_v12 = vpop.permute.xlu0 %16   ;;  %v31_v13 = vpop.permute.xlu1 %30  }
  0x7d   :  { %19 = vst.msk [vmem:[#allocation0] ss:$8 sm:$0x3] %vm18_vm2, %v17_v12  }
  0x7e   :  { %26 = vst.msk [vmem:[#allocation0] ss:$8 sm:$0x3] %vm25_vm3, %v24_v11  }
  0x7f   :  { %33 = vst.msk [vmem:[#allocation0] ss:$8 sm:$0x3] %vm32_vm4, %v31_v13  }
  0x80   :  { %40 = vst.msk [vmem:[#allocation0] ss:$8 sm:$0x3] %vm39_vm5, %v38_v8  }
  0x81   :  { %47 = vst.msk [vmem:[#allocation0] ss:$8 sm:$0x3] %vm46_vm6, %v45_v9  }
  0x84   :  { %v52_v14 = vpop.permute.xlu0 %51  }
  0x85   :  { %54 = vst.msk [vmem:[#allocation0] ss:$8 sm:$0x3] %vm53_vm7, %v52_v14  }
  0x8c   :  { %v57_v15 = vld [vmem:[#allocation0] sm:$0x1]  ;;  %v62_v16 = vld [vmem:[#allocation0 + $0x8] sm:$0x1] }
  0x8d   :  { %60 = vst [vmem:[%s130_s1] sm:$0x1] %v57_v15 }
  0x8e   :  { %74 = vst [vmem:[%s130_s1 + $0x1] sm:$0x1] %v62_v16 }

// kernel: tile.39
= control target key start
LH: loop header
LB: loop body
LE: loop exit
PB: predicated region body
PF: predicated region fallthrough
CT: control target
= control target key end

     0   :  { %s7_s6 = smov 3  ;;  %s21_s9 = smov 3  ;;  %vm4_vm0 = vcmask 130048   ;;  %vm11_vm1 = vcmask 1048448   ;;  %vm18_vm2 = vcmask 917248   ;;  %vm25_vm3 = vcmask 786048   ;;  %s129_s0 = inlined_call_operand.vmem [shape: f32[16,16], index: 0, kind: input, shape index: {}]   ;;  %s130_s1 = inlined_call_operand.vmem [shape: f32[1,256], index: 1, kind: output, shape index: {}]  }
   0x1   :  { %v67_v0 = vld [vmem:[%s129_s0 + $0x7] ss:$8 sm:%s7_s6]   ;;  %s82_s10 = smov 112   ;;  %v69_v1 = vld [vmem:[%s129_s0 + $0x5] ss:$8 sm:%s21_s9]   ;;  %s83_s13 = smov 80  }
   0x2   :  { %9 = vrot.lane.b32.xlu0 %v67_v0, %s82_s10  ;;  %23 = vrot.lane.b32.xlu1 %v69_v1, %s83_s13  ;;  %s14_s14 = smov 3  ;;  %s28_s15 = smov 3  ;;  %vm32_vm4 = vcmask 654848   ;;  %vm39_vm5 = vcmask 523648   ;;  %vm46_vm6 = vcmask 392448   ;;  %vm53_vm7 = vcmask 261248  }
   0x3   :  { %s35_s16 = smov 3  ;;  %v68_v3 = vld [vmem:[%s129_s0 + $0x6] ss:$8 sm:%s14_s14]   ;;  %s84_s21 = smov 48   ;;  %v70_v4 = vld [vmem:[%s129_s0 + $0x4] ss:$8 sm:%s28_s15]  }
   0x4   :  { %v71_v2 = vld [vmem:[%s129_s0 + $0x3] ss:$8 sm:%s35_s16]   ;;  %s42_s24 = smov 3  ;;  %s85_s25 = smov 96  }
   0x5   :  { %37 = vrot.lane.b32.xlu2 %v71_v2, %s84_s21  ;;  %s86_s26 = smov 64   ;;  %s49_s27 = smov 3  ;;  %v72_v5 = vld [vmem:[%s129_s0 + $0x2] ss:$8 sm:%s42_s24]  }
   0x6   :  { %v73_v6 = vld [vmem:[%s129_s0 + $0x1] ss:$8 sm:%s49_s27]   ;;  %s87_s3 = smov 32   ;;  %s88_s4 = smov 16  }
   0x7   :  { %s2_s5 = smov 3 }
   0x8   :  { %v3_v7 = vld [vmem:[%s129_s0] ss:$8 sm:%s2_s5]  }
   0x9   :  { %5 = vst.msk [vmem:[#allocation0] ss:$8 sm:$0x3] %vm4_vm0, %v3_v7  }
   0xa   :  { %16 = vrot.lane.b32.xlu0 %v68_v3, %s85_s25  ;;  %30 = vrot.lane.b32.xlu1 %v70_v4, %s86_s26 }
   0xd   :  { %44 = vrot.lane.b32.xlu2 %v72_v5, %s87_s3 }
  0x12   :  { %51 = vrot.lane.b32.xlu0 %v73_v6, %s88_s4 }
  0x5f   :  { %v38_v8 = vpop.permute.xlu2 %37  }
  0x67   :  { %v45_v9 = vpop.permute.xlu2 %44  }
  0x74   :  { %v10_v10 = vpop.permute.xlu0 %9   ;;  %v24_v11 = vpop.permute.xlu1 %23  }
  0x75   :  { %12 = vst.msk [vmem:[#allocation0] ss:$8 sm:$0x3] %vm11_vm1, %v10_v10  }
  0x7c   :  { %v17_v12 = vpop.permute.xlu0 %16   ;;  %v31_v13 = vpop.permute.xlu1 %30  }
  0x7d   :  { %19 = vst.msk [vmem:[#allocation0] ss:$8 sm:$0x3] %vm18_vm2, %v17_v12  }
  0x7e   :  { %26 = vst.msk [vmem:[#allocation0] ss:$8 sm:$0x3] %vm25_vm3, %v24_v11  }
  0x7f   :  { %33 = vst.msk [vmem:[#allocation0] ss:$8 sm:$0x3] %vm32_vm4, %v31_v13  }
  0x80   :  { %40 = vst.msk [vmem:[#allocation0] ss:$8 sm:$0x3] %vm39_vm5, %v38_v8  }
  0x81   :  { %47 = vst.msk [vmem:[#allocation0] ss:$8 sm:$0x3] %vm46_vm6, %v45_v9  }
  0x84   :  { %v52_v14 = vpop.permute.xlu0 %51  }
  0x85   :  { %54 = vst.msk [vmem:[#allocation0] ss:$8 sm:$0x3] %vm53_vm7, %v52_v14  }
  0x8c   :  { %v57_v15 = vld [vmem:[#allocation0] sm:$0x1]  ;;  %v62_v16 = vld [vmem:[#allocation0 + $0x8] sm:$0x1] }
  0x8d   :  { %60 = vst [vmem:[%s130_s1] sm:$0x1] %v57_v15 }
  0x8e   :  { %74 = vst [vmem:[%s130_s1 + $0x1] sm:$0x1] %v62_v16 }

// kernel: dnbsrn_forward_pallas.1
= control target key start
LH: loop header
LB: loop body
LE: loop exit
PB: predicated region body
PF: predicated region fallthrough
CT: control target
= control target key end

     0   :  { %s25437_s0 = inlined_call_operand.vmem [shape: f32[2,16,16], index: 0, kind: input, shape index: {}]   ;;  %s25438_s1 = inlined_call_operand.vmem [shape: bf16[112,256], index: 1, kind: input, shape index: {}]   ;;  %s25439_s2 = inlined_call_operand.vmem [shape: f32[1,256], index: 2, kind: input, shape index: {}]   ;;  %s25440_s3 = inlined_call_operand.vmem [shape: bf16[3,1792,256], index: 3, kind: input, shape index: {}]   ;;  %s25441_s4 = inlined_call_operand.vmem [shape: f32[3,1,256], index: 4, kind: input, shape index: {}]   ;;  %s25442_s5 = inlined_call_operand.vmem [shape: bf16[3,1792,16], index: 5, kind: input, shape index: {}]   ;;  %s25443_s6 = inlined_call_operand.vmem [shape: f32[3,1,16], index: 6, kind: input, shape index: {}]   ;;  %s25444_s7 = inlined_call_operand.hbm [shape: f32[2,16,16], index: 7, kind: output, shape index: {}]  }
   0x1   :  { %v28_v0 = vld [vmem:[%s25437_s0] sm:$0xff]  ;;  %v29_v1 = vld [vmem:[%s25437_s0 + $0x8] sm:$0xff]  ;;  %v30_v4 = vld [vmem:[%s25437_s0 + $0x10] sm:$0xff] }
   0x2   :  { %v32_v2 = vpack.c.bf16 %v28_v0, %v28_v0  ;;  %v33_v3 = vpack.c.bf16 %v29_v1, %v29_v1  ;;  %v31_v5 = vld [vmem:[%s25437_s0 + $0x18] sm:$0xff]  ;;  %v34_v6 = vpack.c.bf16 %v30_v4, %v30_v4 }
   0x3   :  { %v35_v7 = vpack.c.bf16 %v31_v5, %v31_v5 }
   0x4   :  { %v38_v8 = vunpack.c.l.b16 %v32_v2  ;;  %v39_v9 = vunpack.c.l.b16 %v33_v3  ;;  %v213_v10 = vunpack.c.l.b16 %v34_v6 }
   0x5   :  { %v214_v11 = vunpack.c.l.b16 %v35_v7 }
   0x6   :  { %v40_v12 = vpack.c.b16 %v39_v9, %v38_v8 }
   0x7   :  { %12 = vsyncpa [#allocation5], 0  ;;  %v215_v13 = vpack.c.b16 %v214_v11, %v213_v10  ;;  %vm50_vm0 = vcmask 1041408   ;;  %vm51_vm1 = vsmask.f32 1280  ;;  %v25486_v20 = vmov 0 }
   0x8   :  { %v42_v14 = vshrl.u32 %v40_v12, 16  ;;  %v45_v15 = vshll.u32 %v40_v12, 16  ;;  %vm18303_vm2 = vmand %vm50_vm0, %vm51_vm1  ;;  %vm150_vm3 = vcmask 1045508   ;;  %vm104_vm4 = vcmask 1042432   ;;  %s18240_s9 = smov 64   ;;  %s18241_s10 = smov 32  }
   0x9   :  { %v217_v18 = vshrl.u32 %v215_v13, 16  ;;  %v220_v19 = vshll.u32 %v215_v13, 16  ;;  %v25487_v20 = vsel %vm18303_vm2, 4294967295, %v25486_v20  ;;  %vm105_vm5 = vcmask 1046532   ;;  %vm18316_vm6 = vmor %vm50_vm0, %vm150_vm3  ;;  %s18242_s11 = smov 96   ;;  %s18243_s12 = smov 16  }
   0xa   :  { %v44_v16 = vrot.slane %v42_v14, 6  ;;  %v47_v17 = vrot.slane %v45_v15, 7  ;;  %25488 = vst [vmem:[#allocation7_spill] sm:$0xff] %v25487_v20  ;;  %v25489_v31 = vmov 0  ;;  %vm18320_vm7 = vmor %vm104_vm4, %vm105_vm5  ;;  %v25492_v32 = vmov 0  ;;  %s18244_s13 = smov 48  }
   0xb   :  { %v219_v24 = vrot.slane %v217_v18, 6  ;;  %v222_v25 = vrot.slane %v220_v19, 7  ;;  %v25490_v31 = vsel %vm18316_vm6, 4294967295, %v25489_v31  ;;  %v25493_v32 = vsel %vm18320_vm7, 4294967295, %v25492_v32  ;;  %s18245_s14 = smov 80   ;;  %s11572_s18 = sshll.u32 %s25444_s7, 4  ;;  %s11573_s18 = int_to_ptr.hbm [resolvable:$true] %s11572_s18 }
   0xc   :  { %v48_v21 = vor.u32 %v47_v17, %v44_v16  ;;  %25491 = vst [vmem:[#allocation8_spill] sm:$0xff] %v25490_v31  ;;  %vm68_vm8 = vsmask.f32 3328  ;;  %vm69_vm9 = vsmask.f32 7440  ;;  %vm192_vm10 = vcmask 1040384  }
   0xd   :  { %25494 = vst [vmem:[#allocation9_spill] sm:$0xff] %v25493_v32  ;;  %v18326_v34 = vor.u32 %v222_v25, %v219_v24  ;;  %vm193_vm11 = vcmask 1044484   ;;  %vm18354_vm12 = vmor %vm68_vm8, %vm69_vm9  ;;  %v25495_v51 = vmov 0  ;;  %v25498_v56 = vmov 0  ;;  %s18247_s19 = smov 128   ;;  %s18248_s20 = smov 8  }
   0xe   :  { %v53_v22 = vsel %vm18303_vm2, 0, %v48_v21  ;;  %v54_v23 = vsel %vm18303_vm2, %v48_v21, 0  ;;  %v25496_v51 = vsel %vm18354_vm12, 4294967295, %v25495_v51  ;;  %vm18361_vm13 = vmor %vm192_vm10, %vm193_vm11  ;;  %vm123_vm14 = vsmask.f32 2304 }
   0xf   :  { %v56_v26 = vunpack.c.l.b16 %v53_v22  ;;  %v57_v27 = vunpack.c.h.b16 %v53_v22  ;;  %v66_v28 = vunpack.c.l.b16 %v54_v23  ;;  %v225_v47 = vsel %vm18303_vm2, 0, %v18326_v34  ;;  %25497 = vst [vmem:[#allocation10_spill] sm:$0xff] %v25496_v51 }
  0x10   :  { %v25499_v56 = vsel %vm18361_vm13, 4294967295, %v25498_v56  ;;  %vm124_vm15 = vsmask.f32 6416  ;;  %v228_v57 = vunpack.c.l.b16 %v225_v47  ;;  %v229_v58 = vunpack.c.h.b16 %v225_v47 }
  0x11   :  { %v18311_v29 = vpack.c.b16 %v56_v26, %v56_v26  ;;  %v18313_v30 = vpack.c.b16 %v57_v27, %v57_v27  ;;  %v18324_v33 = vpack.c.b16 %v66_v28, %v66_v28  ;;  %25500 = vst [vmem:[#allocation11_spill] sm:$0xff] %v25499_v56  ;;  %v226_v62 = vsel %vm18303_vm2, %v18326_v34, 0  ;;  %vm18388_vm0 = vmor %vm123_vm14, %vm124_vm15  ;;  %v17198_v56 = vld [vmem:[%s25440_s3 + $0x3c4] sm:$0xf] }
  0x12   :  { %v18384_v13 = vpack.c.b16 %v228_v57, %v228_v57  ;;  %v25501_v16 = vmov 0  ;;  %v18392_v17 = vpack.c.b16 %v229_v58, %v229_v58  ;;  %v237_v21 = vunpack.c.l.b16 %v226_v62 }
  0x13   :  { %v11585_v35 = vrot.slane %v18311_v29, 10  ;;  %v154_v36 = vrot.slane %v18313_v30, 6  ;;  %v11584_v37 = vrot.slane %v18311_v29, 9  ;;  %v109_v38 = vrot.slane %v18313_v30, 5 }
  0x14   :  { %v18333_v39 = vshrl.u32 %v18311_v29, 16  ;;  %v18336_v40 = vshll.u32 %v18311_v29, 16  ;;  %v81_v41 = vshll.u32 %v18313_v30, 16  ;;  %v85_v44 = vshrl.u32 %v18313_v30, 16 }
  0x15   :  { %v155_v42 = vsel %vm18316_vm6, %v11585_v35, %v154_v36  ;;  %v110_v43 = vsel %vm18320_vm7, %v11584_v37, %v109_v38  ;;  %v111_v48 = vrot.slane %v109_v38, 4  ;;  %v112_v49 = vrot.slane %v18324_v33, 5 }
  0x16   :  { %159 = vrot.lane.b32.xlu0 %v155_v42, %s18240_s9  ;;  %114 = vrot.lane.b32.xlu1 %v110_v43, %s18241_s10  ;;  %v74_v45 = vrot.slane %v18333_v39, 4  ;;  %v77_v46 = vrot.slane %v18336_v40, 5  ;;  %v87_v50 = vrot.slane %v85_v44, 4  ;;  %v83_v53 = vrot.slane %v81_v41, 5 }
  0x17   :  { %v197_v54 = vrot.slane %v18313_v30, 7  ;;  %v200_v55 = vrot.slane %v18324_v33, 7  ;;  %v91_v60 = vshll.u32 %v18324_v33, 16  ;;  %v113_v63 = vsel %vm18320_vm7, %v111_v48, %v112_v49 }
  0x18   :  { %v78_v52 = vor.u32 %v77_v46, %v74_v45  ;;  %v88_v0 = vor.u32 %v87_v50, %v83_v53  ;;  %v156_v1 = vrot.slane %v154_v36, 4  ;;  %v126_v2 = vrot.slane %v18333_v39, 5 }
  0x19   :  { %v199_v61 = vrot.slane %v197_v54, 4  ;;  %v157_v4 = vrot.slane %v18324_v33, 6  ;;  %v127_v6 = vrot.slane %v18336_v40, 6  ;;  %v135_v7 = vshrl.u32 %v18324_v33, 16 }
  0x1a   :  { %v79_v59 = vrot.slane %v78_v52, 4  ;;  %v174_v8 = vrot.slane %v85_v44, 6  ;;  %v175_v9 = vrot.slane %v81_v41, 7  ;;  %v130_v10 = vrot.slane %v85_v44, 5 }
  0x1b   :  { %v201_v5 = vsel %vm18361_vm13, %v199_v61, %v200_v55  ;;  %v128_v11 = vor.u32 %v127_v6, %v126_v2  ;;  %v131_v12 = vrot.slane %v81_v41, 6  ;;  %v89_v14 = vrot.slane %v88_v0, 4 }
  0x1c   :  { %v84_v3 = vsel %vm18354_vm12, %v79_v59, %v83_v53  ;;  %204 = vrot.lane.b32.xlu2 %v201_v5, %s18242_s11  ;;  %v93_v15 = vrot.slane %v91_v60, 5  ;;  %v25502_v16 = vsel %vm18388_vm0, 4294967295, %v25501_v16  ;;  %v158_v22 = vsel %vm18316_vm6, %v156_v1, %v157_v4 }
  0x1d   :  { %25503 = vst [vmem:[#allocation12_spill] sm:$0xff] %v25502_v16  ;;  %v129_v18 = vrot.slane %v128_v11, 4  ;;  %v132_v19 = vor.u32 %v131_v12, %v130_v10  ;;  %v176_v23 = vor.u32 %v175_v9, %v174_v8  ;;  %v179_v24 = vrot.slane %v135_v7, 6 }
  0x1e   :  { %95 = vrot.lane.b32.xlu0 %v84_v3, %s18243_s12  ;;  %116 = vrot.lane.b32.xlu1 %v113_v63, %s18241_s10  ;;  %v180_v25 = vrot.slane %v91_v60, 7  ;;  %v18399_v27 = vshrl.u32 %v18384_v13, 16  ;;  %v137_v28 = vrot.slane %v135_v7, 5  ;;  %v138_v33 = vrot.slane %v91_v60, 6 }
  0x1f   :  { %v133_v26 = vsel %vm18388_vm0, %v129_v18, %v132_v19  ;;  %v94_v34 = vsel %vm18354_vm12, %v89_v14, %v93_v15  ;;  %v18404_v35 = vshll.u32 %v18384_v13, 16  ;;  %v18407_v36 = vshll.u32 %v18392_v17, 16 }
  0x20   :  { %v18410_v37 = vshrl.u32 %v18392_v17, 16  ;;  %vm168_vm3 = vsmask.f32 5392  ;;  %v178_v38 = vrot.slane %v176_v23, 4  ;;  %v181_v41 = vor.u32 %v180_v25, %v179_v24 }
  0x21   :  { %v11586_v42 = vrot.slane %v18311_v29, 11  ;;  %v18414_v43 = vpack.c.b16 %v237_v21, %v237_v21  ;;  %v242_v44 = vrot.slane %v18399_v27, 4  ;;  %v134_v45 = vrot.slane %v132_v19, 4  ;;  %vm18426_vm4 = vmor %vm51_vm1, %vm168_vm3 }
  0x22   :  { %v139_v46 = vor.u32 %v138_v33, %v137_v28  ;;  %v170_v47 = vrot.slane %v18333_v39, 6  ;;  %v245_v48 = vrot.slane %v18404_v35, 5  ;;  %v251_v49 = vrot.slane %v18407_v36, 5 }
  0x23   :  { %v255_v50 = vrot.slane %v18410_v37, 4  ;;  %v171_v52 = vrot.slane %v18336_v40, 7  ;;  %v25504_v53 = vmov 0  ;;  %v18431_v55 = vshll.u32 %v18414_v43, 16 }
  0x24   :  { %141 = vrot.lane.b32.xlu2 %v133_v26, %s18244_s13  ;;  %v25505_v53 = vsel %vm18426_vm4, 4294967295, %v25504_v53  ;;  %v140_v39 = vsel %vm18388_vm0, %v134_v45, %v139_v46  ;;  %v182_v58 = vsel %vm18426_vm4, %v178_v38, %v181_v41  ;;  %v198_v40 = vsel %vm18361_vm13, %v11586_v42, %v197_v54 }
  0x25   :  { %25506 = vst [vmem:[#allocation13_spill] sm:$0xff] %v25505_v53  ;;  %v172_v57 = vor.u32 %v171_v52, %v170_v47  ;;  %v246_v59 = vor.u32 %v245_v48, %v242_v44  ;;  %v256_v60 = vor.u32 %v255_v50, %v251_v49  ;;  %v261_v61 = vrot.slane %v18431_v55, 5 }
  0x26   :  { %97 = vrot.lane.b32.xlu0 %v94_v34, %s18243_s12  ;;  %161 = vrot.lane.b32.xlu1 %v158_v22, %s18240_s9  ;;  %v286_v1 = vrot.slane %v18399_v27, 5  ;;  %v287_v2 = vrot.slane %v18404_v35, 6  ;;  %v273_v54 = vrot.slane %v18392_v17, 5  ;;  %v290_v3 = vrot.slane %v18410_v37, 5 }
  0x27   :  { %v173_v62 = vrot.slane %v172_v57, 4  ;;  %v247_v63 = vrot.slane %v246_v59, 4  ;;  %v257_v0 = vrot.slane %v256_v60, 4  ;;  %v291_v8 = vrot.slane %v18407_v36, 6 }
  0x28   :  { %v288_v7 = vor.u32 %v287_v2, %v286_v1  ;;  %v11587_v9 = vrot.slane %v18384_v13, 9  ;;  %v275_v10 = vrot.slane %v273_v54, 4  ;;  %v276_v11 = vrot.slane %v18414_v43, 5  ;;  %v11642_v2 = vld [vmem:[%s25438_s1 + $0x58] sm:$0xf0] }
  0x29   :  { %v177_v4 = vsel %vm18426_vm4, %v173_v62, %v176_v23  ;;  %v252_v5 = vsel %vm18354_vm12, %v247_v63, %v251_v49  ;;  %v262_v6 = vsel %vm18354_vm12, %v257_v0, %v261_v61  ;;  %v292_v14 = vor.u32 %v291_v8, %v290_v3  ;;  %v11648_v61 = vld [vmem:[%s25438_s1 + $0x60] sm:$0xf]  ;;  %v17074_v62 = vld [vmem:[%s25438_s1 + $0x64] sm:$0xf]  ;;  %v17072_v0 = vld [vmem:[%s25438_s1 + $0x54] sm:$0xf] }
  0x2a   :  { %v289_v12 = vrot.slane %v288_v7, 4  ;;  %v295_v15 = vshrl.u32 %v18414_v43, 16  ;;  %v274_v18 = vsel %vm18320_vm7, %v11587_v9, %v273_v54  ;;  %v298_v21 = vrot.slane %v18431_v55, 6  ;;  %v11632_v3 = vld [vmem:[%s25438_s1 + $0x40] sm:$0xf] }
  0x2b   :  { %v277_v22 = vsel %vm18320_vm7, %v275_v10, %v276_v11  ;;  %v311_v24 = vrot.slane %v18392_v17, 6  ;;  %v11588_v25 = vrot.slane %v18384_v13, 10  ;;  %v294_v26 = vrot.slane %v292_v14, 4  ;;  %v11634_v7 = vld [vmem:[%s25438_s1 + $0x48] sm:$0xf0] }
  0x2c   :  { %143 = vrot.lane.b32.xlu2 %v140_v39, %s18244_s13  ;;  %v297_v19 = vrot.slane %v295_v15, 5  ;;  %v293_v23 = vsel %vm18388_vm0, %v289_v12, %v292_v14  ;;  %v324_v33 = vrot.slane %v18399_v27, 6  ;;  %v325_v34 = vrot.slane %v18404_v35, 7  ;;  %v11624_v10 = vld [vmem:[%s25438_s1 + $0x30] sm:$0xf] }
  0x2d   :  { %v313_v38 = vrot.slane %v311_v24, 4  ;;  %v314_v41 = vrot.slane %v18414_v43, 6  ;;  %v328_v42 = vrot.slane %v18410_v37, 6  ;;  %v329_v44 = vrot.slane %v18407_v36, 7  ;;  %v17069_v11 = vld [vmem:[%s25438_s1 + $0x34] sm:$0xf0] }
  0x2e   :  { %185 = vrot.lane.b32.xlu0 %v182_v58, %s18245_s14  ;;  %202 = vrot.lane.b32.xlu1 %v198_v40, %s18242_s11  ;;  %v299_v28 = vor.u32 %v298_v21, %v297_v19  ;;  %v312_v45 = vsel %vm18316_vm6, %v11588_v25, %v311_v24  ;;  %v326_v47 = vor.u32 %v325_v34, %v324_v33  ;;  %v333_v49 = vrot.slane %v295_v15, 6  ;;  %v17068_v12 = vld [vmem:[%s25438_s1 + $0x34] sm:$0xf]  ;;  %v11626_v15 = vld [vmem:[%s25438_s1 + $0x38] sm:$0xf0] }
  0x2f   :  { %v315_v48 = vsel %vm18316_vm6, %v313_v38, %v314_v41  ;;  %v330_v27 = vor.u32 %v329_v44, %v328_v42  ;;  %v334_v35 = vrot.slane %v18431_v55, 7  ;;  %v11589_v52 = vrot.slane %v18384_v13, 11  ;;  %v11616_v19 = vld [vmem:[%s25438_s1 + $0x20] sm:$0xf]  ;;  %v17067_v21 = vld [vmem:[%s25438_s1 + $0x24] sm:$0xf0] }
  0x30   :  { %v300_v46 = vsel %vm18388_vm0, %v294_v26, %v299_v28  ;;  %v327_v36 = vrot.slane %v326_v47, 4  ;;  %v347_v39 = vrot.slane %v18392_v17, 7  ;;  %v350_v59 = vrot.slane %v18414_v43, 7  ;;  %v17075_v43 = vld [vmem:[%s25438_s1 + $0x64] sm:$0xf0] }
  0x31   :  { %v332_v37 = vrot.slane %v330_v27, 4  ;;  %v335_v50 = vor.u32 %v334_v35, %v333_v49  ;;  %vm62_vm1 = vcmask 125952   ;;  %v11649_v63 = vor.u32 %v17075_v43, %v11648_v61  ;;  %v11618_v24 = vld [vmem:[%s25438_s1 + $0x28] sm:$0xf0]  ;;  %v11608_v28 = vld [vmem:[%s25438_s1 + $0x10] sm:$0xf] }
  0x32   :  { %v331_v57 = vsel %vm18426_vm4, %v327_v36, %v330_v27  ;;  %v348_v55 = vsel %vm18361_vm13, %v11589_v52, %v347_v39  ;;  %v349_v40 = vrot.slane %v347_v39, 4  ;;  %63 = vst.msk [vmem:[#allocation2] sm:$0xf] %vm62_vm1, %v18311_v29  ;;  %v11650_v29 = vld [vmem:[%s25438_s1 + $0x68] sm:$0xf0]  ;;  %v11645_v54 = vor.u32 %v17072_v0, %v11642_v2 }
  0x33   :  { %v336_v58 = vsel %vm18426_vm4, %v332_v37, %v335_v50  ;;  %64 = vst.msk [vmem:[#allocation2 + $0x4] sm:$0xf] %vm62_vm1, %v18313_v30  ;;  %v11653_v30 = vor.u32 %v17074_v62, %v11650_v29  ;;  %472 = vmatpush.bf16.msra.mxu0 %v11649_v63  ;;  %v11625_v14 = vor.u32 %v17069_v11, %v11624_v10  ;;  %v17065_v33 = vld [vmem:[%s25438_s1 + $0x14] sm:$0xf0]  ;;  %v17064_v34 = vld [vmem:[%s25438_s1 + $0x14] sm:$0xf] }
  0x34   :  { %183 = vrot.lane.b32.xlu2 %v177_v4, %s18245_s14  ;;  %v351_v60 = vsel %vm18361_vm13, %v349_v40, %v350_v59  ;;  %234 = vst.msk [vmem:[#allocation2 + $0x8] sm:$0xf] %vm62_vm1, %v18384_v13  ;;  %v11640_v13 = vld [vmem:[%s25438_s1 + $0x50] sm:$0xf]  ;;  %v17071_v4 = vld [vmem:[%s25438_s1 + $0x44] sm:$0xf0]  ;;  %v11609_v38 = vor.u32 %v17065_v33, %v11608_v28 }
  0x35   :  { %235 = vst.msk [vmem:[#allocation2 + $0xc] sm:$0xf] %vm62_vm1, %v18392_v17  ;;  %491 = vmatpush.bf16.msra.mxu1 %v11653_v30  ;;  %v17073_v17 = vld [vmem:[%s25438_s1 + $0x54] sm:$0xf0]  ;;  %v11610_v41 = vld [vmem:[%s25438_s1 + $0x18] sm:$0xf0] }
  0x36   :  { %263 = vrot.lane.b32.xlu0 %v252_v5, %s18243_s12  ;;  %265 = vrot.lane.b32.xlu1 %v262_v6, %s18243_s12  ;;  %v11641_v1 = vor.u32 %v17073_v17, %v11640_v13  ;;  %v17070_v5 = vld [vmem:[%s25438_s1 + $0x44] sm:$0xf]  ;;  %v11633_v6 = vor.u32 %v17071_v4, %v11632_v3  ;;  %v11613_v42 = vor.u32 %v17064_v34, %v11610_v41  ;;  %v11600_v44 = vld [vmem:[%s25438_s1] sm:$0xf]  ;;  %vm101_vm5 = vcmask 257152  }
  0x37   :  { %v11637_v9 = vor.u32 %v17070_v5, %v11634_v7  ;;  %v11602_v27 = vld [vmem:[%s25438_s1 + $0x8] sm:$0xf0]  ;;  %vm120_vm8 = vcmask 388352   ;;  %vm147_vm9 = vcmask 519552   ;;  %vm165_vm10 = vcmask 650752  }
  0x38   :  { %473 = vmatpush.bf16.msra.mxu0 %v11641_v1  ;;  %vm189_vm11 = vcmask 781952   ;;  %vm208_vm14 = vcmask 913152   ;;  %vm464_vm15 = vcmask 916480   ;;  %v17093_v3 = vld [vmem:[%s25440_s3 + $0x74] sm:$0xf0] }
  0x39   :  { %492 = vmatpush.bf16.msra.mxu1 %v11645_v54  ;;  %v11834_v54 = vld [vmem:[%s25440_s3 + $0x70] sm:$0xf]  ;;  %v11890_v10 = vld [vmem:[%s25440_s3 + $0xe0] sm:$0xf]  ;;  %v17141_v33 = vld [vmem:[%s25440_s3 + $0x1f4] sm:$0xf0] }
  0x3a   :  { %v11898_v4 = vld [vmem:[%s25440_s3 + $0xf0] sm:$0xf]  ;;  %v11835_v5 = vor.u32 %v17093_v3, %v11834_v54  ;;  %v374_v34 = vld [vmem:[%s25439_s2] sm:$0x3] }
  0x3b   :  { %v12026_v28 = vld [vmem:[%s25440_s3 + $0x1f0] sm:$0xf]  ;;  %v11810_v41 = vld [vmem:[%s25440_s3 + $0x40] sm:$0xf] }
  0x3c   :  { %278 = vrot.lane.b32.xlu2 %v274_v18, %s18241_s10  ;;  %474 = vmatpush.bf16.msra.mxu0 %v11633_v6  ;;  %v11629_v18 = vor.u32 %v17068_v12, %v11626_v15  ;;  %v17109_v6 = vld [vmem:[%s25440_s3 + $0xf4] sm:$0xf0]  ;;  %v17107_v12 = vld [vmem:[%s25440_s3 + $0xe4] sm:$0xf0]  ;;  %v11818_v15 = vld [vmem:[%s25440_s3 + $0x50] sm:$0xf] }
  0x3d   :  { %493 = vmatpush.bf16.msra.mxu1 %v11637_v9  ;;  %v11899_v7 = vor.u32 %v17109_v6, %v11898_v4  ;;  %2319 = vmatpush.bf16.msra.mxu2 %v11835_v5  ;;  %v17091_v9 = vld [vmem:[%s25440_s3 + $0x64] sm:$0xf0]  ;;  %v11938_v5 = vld [vmem:[%s25440_s3 + $0x140] sm:$0xf] }
  0x3e   :  { %280 = vrot.lane.b32.xlu0 %v277_v22, %s18241_s10  ;;  %301 = vrot.lane.b32.xlu1 %v293_v23, %s18244_s13  ;;  %v17066_v22 = vld [vmem:[%s25438_s1 + $0x24] sm:$0xf]  ;;  %v11617_v23 = vor.u32 %v17067_v21, %v11616_v19  ;;  %v11882_v19 = vld [vmem:[%s25440_s3 + $0xd0] sm:$0xf] }
  0x3f   :  { %v11621_v26 = vor.u32 %v17066_v22, %v11618_v24  ;;  %2338 = vmatpush.bf16.msra.mxu3 %v11899_v7  ;;  %v17105_v22 = vld [vmem:[%s25440_s3 + $0xd4] sm:$0xf0]  ;;  %v17099_v4 = vld [vmem:[%s25440_s3 + $0xa4] sm:$0xf0] }
  0x40   :  { %475 = vmatpush.bf16.msra.mxu0 %v11625_v14  ;;  %v11891_v14 = vor.u32 %v17107_v12, %v11890_v10  ;;  %v17125_v24 = vld [vmem:[%s25440_s3 + $0x174] sm:$0xf0]  ;;  %v17119_v6 = vld [vmem:[%s25440_s3 + $0x144] sm:$0xf0]  ;;  %v11786_v12 = vld [vmem:[%s25440_s3 + $0x10] sm:$0xf] }
  0x41   :  { %494 = vmatpush.bf16.msra.mxu1 %v11629_v18  ;;  %v17089_v18 = vld [vmem:[%s25440_s3 + $0x54] sm:$0xf0]  ;;  %v17135_v10 = vld [vmem:[%s25440_s3 + $0x1c4] sm:$0xf0] }
  0x42   :  { %v11819_v21 = vor.u32 %v17089_v18, %v11818_v15  ;;  %v11850_v15 = vld [vmem:[%s25440_s3 + $0x90] sm:$0xf] }
  0x43   :  { %2339 = vmatpush.bf16.msra.mxu3 %v11891_v14  ;;  %v17081_v14 = vld [vmem:[%s25440_s3 + $0x14] sm:$0xf0] }
  0x44   :  { %303 = vrot.lane.b32.xlu2 %v300_v46, %s18244_s13  ;;  %476 = vmatpush.bf16.msra.mxu0 %v11617_v23  ;;  %v17062_v46 = vld [vmem:[%s25438_s1 + $0x4] sm:$0xf]  ;;  %v11962_v23 = vld [vmem:[%s25440_s3 + $0x170] sm:$0xf] }
  0x45   :  { %495 = vmatpush.bf16.msra.mxu1 %v11621_v26  ;;  %v11605_v36 = vor.u32 %v17062_v46, %v11602_v27  ;;  %v11963_v26 = vor.u32 %v17125_v24, %v11962_v23  ;;  %v17103_v46 = vld [vmem:[%s25440_s3 + $0xc4] sm:$0xf0]  ;;  %v17097_v23 = vld [vmem:[%s25440_s3 + $0x94] sm:$0xf0]  ;;  %v11930_v24 = vld [vmem:[%s25440_s3 + $0x130] sm:$0xf] }
  0x46   :  { %316 = vrot.lane.b32.xlu0 %v312_v45, %s18240_s9  ;;  %318 = vrot.lane.b32.xlu1 %v315_v48, %s18240_s9  ;;  %v17063_v45 = vld [vmem:[%s25438_s1 + $0x4] sm:$0xf0] }
  0x47   :  { %v11601_v48 = vor.u32 %v17063_v45, %v11600_v44  ;;  %v11874_v44 = vld [vmem:[%s25440_s3 + $0xc0] sm:$0xf] }
  0x48   :  { %477 = vmatpush.bf16.msra.mxu0 %v11609_v38  ;;  %v12027_v38 = vor.u32 %v17141_v33, %v12026_v28  ;;  %v11875_v27 = vor.u32 %v17103_v46, %v11874_v44  ;;  %v11851_v33 = vor.u32 %v17097_v23, %v11850_v15  ;;  %v17079_v46 = vld [vmem:[%s25440_s3 + $0x4] sm:$0xf0] }
  0x49   :  { %496 = vmatpush.bf16.msra.mxu1 %v11613_v42  ;;  %v17087_v42 = vld [vmem:[%s25440_s3 + $0x44] sm:$0xf0] }
  0x4a   :  { %v11811_v45 = vor.u32 %v17087_v42, %v11810_v41  ;;  %v17133_v41 = vld [vmem:[%s25440_s3 + $0x1b4] sm:$0xf0] }
  0x4c   :  { %337 = vrot.lane.b32.xlu2 %v331_v57, %s18245_s14  ;;  %478 = vmatpush.bf16.msra.mxu0 %v11601_v48  ;;  %v17123_v48 = vld [vmem:[%s25440_s3 + $0x164] sm:$0xf0] }
  0x4d   :  { %497 = vmatpush.bf16.msra.mxu1 %v11605_v36  ;;  %v17139_v36 = vld [vmem:[%s25440_s3 + $0x1e4] sm:$0xf0] }
  0x4e   :  { %339 = vrot.lane.b32.xlu0 %v336_v58, %s18245_s14  ;;  %352 = vrot.lane.b32.xlu1 %v348_v55, %s18242_s11 }
  0x50   :  { %2357 = vmatpush.bf16.msrb.mxu0 %v11963_v26 }
  0x51   :  { %2376 = vmatpush.bf16.msrb.mxu1 %v12027_v38  ;;  %v11994_v38 = vld [vmem:[%s25440_s3 + $0x1b0] sm:$0xf] }
  0x52   :  { %v11995_v42 = vor.u32 %v17133_v41, %v11994_v38 }
  0x54   :  { %354 = vrot.lane.b32.xlu2 %v351_v60, %s18242_s11 }
  0x76   :  { %v18544_v8 = vpop.permute.xlu2 %204 }
  0x7e   :  { %v142_v25 = vpop.permute.xlu2 %141 }
  0x86   :  { %v144_v47 = vpop.permute.xlu2 %143 }
  0x88   :  { %v160_v49 = vpop.permute.xlu0 %159  ;;  %v115_v35 = vpop.permute.xlu1 %114 }
  0x8e   :  { %v184_v52 = vpop.permute.xlu2 %183 }
  0x90   :  { %v96_v37 = vpop.permute.xlu0 %95  ;;  %v117_v50 = vpop.permute.xlu1 %116 }
  0x91   :  { %102 = vst.msk [vmem:[#allocation2] sm:$0xf] %vm101_vm5, %v96_v37  ;;  %v18698_v37 = vperm.slane %v374_v34, 0 }
  0x92   :  { %121 = vst.msk [vmem:[#allocation2] sm:$0xf] %vm120_vm8, %v115_v35  ;;  %v12018_v35 = vld [vmem:[%s25440_s3 + $0x1e0] sm:$0xf] }
  0x93   :  { %148 = vst.msk [vmem:[#allocation2] sm:$0xf] %vm147_vm9, %v142_v25  ;;  %v11883_v25 = vor.u32 %v17105_v22, %v11882_v19  ;;  %v11787_v22 = vor.u32 %v17081_v14, %v11786_v12 }
  0x94   :  { %166 = vst.msk [vmem:[#allocation2] sm:$0xf] %vm165_vm10, %v160_v49 }
  0x95   :  { %190 = vst.msk [vmem:[#allocation2] sm:$0xf] %vm189_vm11, %v184_v52  ;;  %2340 = vmatpush.bf16.msra.mxu3 %v11883_v25  ;;  %v12019_v52 = vor.u32 %v17139_v36, %v12018_v35  ;;  %v17117_v25 = vld [vmem:[%s25440_s3 + $0x134] sm:$0xf0]  ;;  %v17095_v35 = vld [vmem:[%s25440_s3 + $0x84] sm:$0xf0] }
  0x96   :  { %v279_v40 = vpop.permute.xlu2 %278  ;;  %v11922_v36 = vld [vmem:[%s25440_s3 + $0x120] sm:$0xf] }
  0x97   :  { %2377 = vmatpush.bf16.msrb.mxu1 %v12019_v52  ;;  %v17115_v52 = vld [vmem:[%s25440_s3 + $0x124] sm:$0xf0] }
  0x98   :  { %v98_v39 = vpop.permute.xlu0 %97  ;;  %v162_v57 = vpop.permute.xlu1 %161 }
  0x99   :  { %103 = vst.msk [vmem:[#allocation2 + $0x4] sm:$0xf] %vm101_vm5, %v98_v39  ;;  %2341 = vmatpush.bf16.msra.mxu3 %v11875_v27  ;;  %v11802_v39 = vld [vmem:[%s25440_s3 + $0x30] sm:$0xf] }
  0x9a   :  { %122 = vst.msk [vmem:[#allocation2 + $0x4] sm:$0xf] %vm120_vm8, %v117_v50  ;;  %v18700_v50 = vperm.slane %v374_v34, 1  ;;  %v11931_v34 = vor.u32 %v17117_v25, %v11930_v24 }
  0x9b   :  { %149 = vst.msk [vmem:[#allocation2 + $0x4] sm:$0xf] %vm147_vm9, %v144_v47  ;;  %v11954_v47 = vld [vmem:[%s25440_s3 + $0x160] sm:$0xf] }
  0x9c   :  { %167 = vst.msk [vmem:[#allocation2 + $0x4] sm:$0xf] %vm165_vm10, %v162_v57  ;;  %v11955_v49 = vor.u32 %v17123_v48, %v11954_v47  ;;  %v17085_v57 = vld [vmem:[%s25440_s3 + $0x34] sm:$0xf0]  ;;  %v11842_v47 = vld [vmem:[%s25440_s3 + $0x80] sm:$0xf] }
  0x9e   :  { %v304_v43 = vpop.permute.xlu2 %303  ;;  %2358 = vmatpush.bf16.msrb.mxu0 %v11955_v49 }
  0xa0   :  { %v186_v58 = vpop.permute.xlu0 %185  ;;  %v203_v55 = vpop.permute.xlu1 %202 }
  0xa1   :  { %191 = vst.msk [vmem:[#allocation2 + $0x4] sm:$0xf] %vm189_vm11, %v186_v58  ;;  %v11866_v58 = vld [vmem:[%s25440_s3 + $0xb0] sm:$0xf] }
  0xa2   :  { %210 = vst.msk [vmem:[#allocation2 + $0x4] sm:$0xf] %vm208_vm14, %v18544_v8  ;;  %v11826_v8 = vld [vmem:[%s25440_s3 + $0x60] sm:$0xf] }
  0xa3   :  { %209 = vst.msk [vmem:[#allocation2] sm:$0xf] %vm208_vm14, %v203_v55  ;;  %v11827_v11 = vor.u32 %v17091_v9, %v11826_v8  ;;  %v11939_v8 = vor.u32 %v17119_v6, %v11938_v5  ;;  %v12002_v9 = vld [vmem:[%s25440_s3 + $0x1c0] sm:$0xf] }
  0xa5   :  { %2320 = vmatpush.bf16.msra.mxu2 %v11827_v11  ;;  %v12003_v11 = vor.u32 %v17135_v10, %v12002_v9  ;;  %v11906_v9 = vld [vmem:[%s25440_s3 + $0x100] sm:$0xf]  ;;  %v17111_v10 = vld [vmem:[%s25440_s3 + $0x104] sm:$0xf0] }
  0xa6   :  { %v338_v29 = vpop.permute.xlu2 %337  ;;  %v11907_v15 = vor.u32 %v17111_v10, %v11906_v9 }
  0xa8   :  { %v264_v59 = vpop.permute.xlu0 %263  ;;  %v266_v60 = vpop.permute.xlu1 %265 }
  0xa9   :  { %269 = vst.msk [vmem:[#allocation2 + $0x8] sm:$0xf] %vm101_vm5, %v264_v59  ;;  %2321 = vmatpush.bf16.msra.mxu2 %v11819_v21  ;;  %v11803_v59 = vor.u32 %v17085_v57, %v11802_v39 }
  0xaa   :  { %270 = vst.msk [vmem:[#allocation2 + $0xc] sm:$0xf] %vm101_vm5, %v266_v60  ;;  %v17076_v61 = vld [vmem:[#allocation2] sm:$0xff]  ;;  %v17101_v60 = vld [vmem:[%s25440_s3 + $0xb4] sm:$0xf0] }
  0xab   :  { %284 = vst.msk [vmem:[#allocation2 + $0x8] sm:$0xf] %vm120_vm8, %v279_v40  ;;  %11654 = vmatmul.msk.bf16.vlgmr.msra.gmra.mxu0 %vm464_vm15, %v17076_v61  ;;  %11656 = vmatmul.msk.bf16.vlgmr.msra.gmra.mxu1 %vm464_vm15, %v17076_v61  ;;  %v11946_v61 = vld [vmem:[%s25440_s3 + $0x150] sm:$0xf] }
  0xad   :  { %2322 = vmatpush.bf16.msra.mxu2 %v11811_v45  ;;  %v11778_v45 = vld [vmem:[%s25440_s3] sm:$0xf] }
  0xae   :  { %v355_v17 = vpop.permute.xlu2 %354  ;;  %v11779_v49 = vor.u32 %v17079_v46, %v11778_v45 }
  0xb0   :  { %v281_v62 = vpop.permute.xlu0 %280  ;;  %v302_v63 = vpop.permute.xlu1 %301 }
  0xb1   :  { %285 = vst.msk [vmem:[#allocation2 + $0xc] sm:$0xf] %vm120_vm8, %v281_v62  ;;  %v11867_v62 = vor.u32 %v17101_v60, %v11866_v58  ;;  %2323 = vmatpush.bf16.msra.mxu2 %v11803_v59  ;;  %v11843_v58 = vor.u32 %v17095_v35, %v11842_v47  ;;  %v17131_v59 = vld [vmem:[%s25440_s3 + $0x1a4] sm:$0xf0] }
  0xb2   :  { %307 = vst.msk [vmem:[#allocation2 + $0x8] sm:$0xf] %vm147_vm9, %v302_v63 }
  0xb3   :  { %308 = vst.msk [vmem:[#allocation2 + $0xc] sm:$0xf] %vm147_vm9, %v304_v43  ;;  %v17121_v43 = vld [vmem:[%s25440_s3 + $0x154] sm:$0xf0]  ;;  %2342 = vmatpush.bf16.msra.mxu3 %v11867_v62  ;;  %v11914_v62 = vld [vmem:[%s25440_s3 + $0x110] sm:$0xf] }
  0xb4   :  { %v11947_v63 = vor.u32 %v17121_v43, %v11946_v61 }
  0xb6   :  { %2359 = vmatpush.bf16.msrb.mxu0 %v11947_v63  ;;  %v17113_v63 = vld [vmem:[%s25440_s3 + $0x114] sm:$0xf0] }
  0xb8   :  { %v317_v30 = vpop.permute.xlu0 %316  ;;  %v319_v13 = vpop.permute.xlu1 %318 }
  0xb9   :  { %322 = vst.msk [vmem:[#allocation2 + $0x8] sm:$0xf] %vm165_vm10, %v317_v30  ;;  %v17137_v30 = vld [vmem:[%s25440_s3 + $0x1d4] sm:$0xf0] }
  0xba   :  { %323 = vst.msk [vmem:[#allocation2 + $0xc] sm:$0xf] %vm165_vm10, %v319_v13  ;;  %2360 = vmatpush.bf16.msrb.mxu0 %v11939_v8 }
  0xbb   :  { %343 = vst.msk [vmem:[#allocation2 + $0x8] sm:$0xf] %vm189_vm11, %v338_v29  ;;  %v12010_v29 = vld [vmem:[%s25440_s3 + $0x1d0] sm:$0xf] }
  0xbc   :  { %v12011_v13 = vor.u32 %v17137_v30, %v12010_v29  ;;  %v11978_v29 = vld [vmem:[%s25440_s3 + $0x190] sm:$0xf] }
  0xbe   :  { %2378 = vmatpush.bf16.msrb.mxu1 %v12011_v13  ;;  %2361 = vmatpush.bf16.msrb.mxu0 %v11931_v34 }
  0xc0   :  { %v340_v0 = vpop.permute.xlu0 %339  ;;  %v353_v1 = vpop.permute.xlu1 %352 }
  0xc1   :  { %344 = vst.msk [vmem:[#allocation2 + $0xc] sm:$0xf] %vm189_vm11, %v340_v0  ;;  %v17083_v0 = vld [vmem:[%s25440_s3 + $0x24] sm:$0xf0] }
  0xc2   :  { %358 = vst.msk [vmem:[#allocation2 + $0x8] sm:$0xf] %vm208_vm14, %v353_v1  ;;  %v11858_v1 = vld [vmem:[%s25440_s3 + $0xa0] sm:$0xf]  ;;  %2379 = vmatpush.bf16.msrb.mxu1 %v12003_v11 }
  0xc3   :  { %359 = vst.msk [vmem:[#allocation2 + $0xc] sm:$0xf] %vm208_vm14, %v355_v17  ;;  %v11794_v17 = vld [vmem:[%s25440_s3 + $0x20] sm:$0xf]  ;;  %v11859_v7 = vor.u32 %v17099_v4, %v11858_v1  ;;  %v17129_v1 = vld [vmem:[%s25440_s3 + $0x194] sm:$0xf0] }
  0xc4   :  { %v11795_v3 = vor.u32 %v17083_v0, %v11794_v17  ;;  %v11979_v4 = vor.u32 %v17129_v1, %v11978_v29  ;;  %v11970_v11 = vld [vmem:[%s25440_s3 + $0x180] sm:$0xf] }
  0xc5   :  { %2343 = vmatpush.bf16.msra.mxu3 %v11859_v7 }
  0xc6   :  { %2324 = vmatpush.bf16.msra.mxu2 %v11795_v3  ;;  %2380 = vmatpush.bf16.msrb.mxu1 %v11995_v42  ;;  %v11915_v3 = vor.u32 %v17113_v63, %v11914_v62 }
  0xc9   :  { %2344 = vmatpush.bf16.msra.mxu3 %v11851_v33 }
  0xca   :  { %v17077_v2 = vld [vmem:[#allocation2 + $0x8] sm:$0xff]  ;;  %2325 = vmatpush.bf16.msra.mxu2 %v11787_v22 }
  0xcb   :  { %11655 = vmatmul.msk.bf16.gmra.mxu0 %vm464_vm15, %v17077_v2  ;;  %11657 = vmatmul.msk.bf16.gmra.mxu1 %vm464_vm15, %v17077_v2 }
  0xcd   :  { %2345 = vmatpush.bf16.msra.mxu3 %v11843_v58 }
  0xce   :  { %2326 = vmatpush.bf16.msra.mxu2 %v11779_v49 }
 0x128   :  { %v480_v55 = vpop.f32.mrf.mxu0  ;;  %v499_v40 = vpop.f32.mrf.mxu1 }
 0x129   :  { %v18736_v2 = vadd.f32 %v480_v55, %v18698_v37  ;;  %v18739_v54 = vadd.f32 %v499_v40, %v18700_v50  ;;  %v11923_v55 = vor.u32 %v17115_v52, %v11922_v36  ;;  %v11986_v40 = vld [vmem:[%s25440_s3 + $0x1a0] sm:$0xf] }
 0x12a   :  { %v11987_v60 = vor.u32 %v17131_v59, %v11986_v40 }
 0x12b   :  { %v509_v18 = vpack.c.bf16 %v18739_v54, %v18736_v2  ;;  %2362 = vmatpush.bf16.msrb.mxu0 %v11923_v55 }
 0x12c   :  { %2381 = vmatpush.bf16.msrb.mxu1 %v11987_v60 }
 0x12d   :  { %v515_v48 = vunpack.c.l.b16 %v509_v18  ;;  %v516_v27 = vunpack.c.h.b16 %v509_v18  ;;  %v17127_v18 = vld [vmem:[%s25440_s3 + $0x184] sm:$0xf0] }
 0x12f   :  { %2363 = vmatpush.bf16.msrb.mxu0 %v11915_v3 }
 0x130   :  { %v482_v19 = vpop.f32.mrf.mxu0  ;;  %v501_v21 = vpop.f32.mrf.mxu1  ;;  %2382 = vmatpush.bf16.msrb.mxu1 %v11979_v4 }
 0x131   :  { %v18777_v26 = vadd.f32 %v482_v19, %v18698_v37  ;;  %v18780_v28 = vadd.f32 %v501_v21, %v18700_v50  ;;  %v11971_v19 = vor.u32 %v17127_v18, %v11970_v11 }
 0x133   :  { %v510_v44 = vpack.c.bf16 %v18780_v28, %v18777_v26  ;;  %2364 = vmatpush.bf16.msrb.mxu0 %v11907_v15 }
 0x134   :  { %2383 = vmatpush.bf16.msrb.mxu1 %v11971_v19 }
 0x135   :  { %v517_v39 = vunpack.c.l.b16 %v510_v44  ;;  %v518_v57 = vunpack.c.h.b16 %v510_v44 }
 0x137   :  { %v519_v61 = vpack.c.b16 %v517_v39, %v515_v48  ;;  %v520_v43 = vpack.c.b16 %v518_v57, %v516_v27 }
 0x139   :  { %v522_v30 = vshrl.u32 %v519_v61, 16  ;;  %v525_v13 = vshll.u32 %v519_v61, 16  ;;  %v530_v17 = vshrl.u32 %v520_v43, 16  ;;  %v533_v0 = vshll.u32 %v520_v43, 16 }
 0x13b   :  { %v524_v5 = vrot.slane %v522_v30, 6  ;;  %v527_v6 = vrot.slane %v525_v13, 7  ;;  %v532_v7 = vrot.slane %v530_v17, 6  ;;  %v535_v8 = vrot.slane %v533_v0, 7 }
 0x13d   :  { %v528_v12 = vor.u32 %v527_v6, %v524_v5  ;;  %v536_v14 = vor.u32 %v535_v8, %v532_v7 }
 0x13f   :  { %v539_v21 = vsel %vm18303_vm2, 0, %v528_v12  ;;  %v540_v22 = vsel %vm18303_vm2, 0, %v536_v14  ;;  %v541_v23 = vsel %vm18303_vm2, %v528_v12, 0  ;;  %v542_v24 = vsel %vm18303_vm2, %v536_v14, 0 }
 0x140   :  { %v545_v25 = vunpack.c.l.b16 %v539_v21  ;;  %v546_v33 = vunpack.c.l.b16 %v540_v22  ;;  %v547_v34 = vunpack.c.h.b16 %v539_v21  ;;  %v548_v38 = vunpack.c.h.b16 %v540_v22 }
 0x141   :  { %v557_v41 = vunpack.c.l.b16 %v541_v23  ;;  %v558_v42 = vunpack.c.l.b16 %v542_v24 }
 0x142   :  { %v18846_v44 = vpack.c.b16 %v546_v33, %v545_v25  ;;  %v18848_v45 = vpack.c.b16 %v548_v38, %v547_v34 }
 0x143   :  { %v18850_v46 = vpack.c.b16 %v558_v42, %v557_v41 }
 0x144   :  { %v18853_v47 = vshrl.u32 %v18846_v44, 16  ;;  %v18856_v48 = vshll.u32 %v18846_v44, 16  ;;  %v18859_v27 = vshll.u32 %v18848_v45, 16  ;;  %v574_v49 = vshrl.u32 %v18848_v45, 16  ;;  %553 = vst [vmem:[#allocation3] sm:$0xff] %v18846_v44 }
 0x145   :  { %v18864_v35 = vshll.u32 %v18850_v46, 16  ;;  %v590_v36 = vrot.slane %v18848_v45, 5  ;;  %554 = vst [vmem:[#allocation3 + $0x38] sm:$0xff] %v18848_v45  ;;  %v11658_v57 = vrot.slane %v18846_v44, 9  ;;  %v593_v55 = vrot.slane %v18850_v46, 5 }
 0x146   :  { %v563_v52 = vrot.slane %v18853_v47, 4  ;;  %v566_v39 = vrot.slane %v18856_v48, 5  ;;  %v572_v40 = vrot.slane %v18859_v27, 5  ;;  %v576_v59 = vrot.slane %v574_v49, 4 }
 0x147   :  { %v592_v58 = vrot.slane %v590_v36, 4  ;;  %v603_v60 = vrot.slane %v574_v49, 5  ;;  %v604_v61 = vrot.slane %v18859_v27, 6  ;;  %v582_v63 = vrot.slane %v18864_v35, 5 }
 0x148   :  { %v485_v43 = vpop.f32.mrf.mxu0  ;;  %v504_v62 = vpop.f32.mrf.mxu1  ;;  %v608_v30 = vshrl.u32 %v18850_v46, 16  ;;  %v611_v13 = vrot.slane %v18864_v35, 6  ;;  %v18881_v17 = vor.u32 %v566_v39, %v563_v52  ;;  %v11659_v1 = vrot.slane %v18846_v44, 10  ;;  %v12090_v52 = vld [vmem:[%s25440_s3 + $0x270] sm:$0xf] }
 0x149   :  { %v594_v29 = vsel %vm18320_vm7, %v592_v58, %v593_v55  ;;  %v18883_v0 = vor.u32 %v604_v61, %v603_v60  ;;  %v620_v3 = vrot.slane %v18848_v45, 6  ;;  %v623_v5 = vrot.slane %v18850_v46, 6 }
 0x14a   :  { %598 = vst [vmem:[#allocation3 + $0x48] sm:$0xff] %v594_v29  ;;  %v610_v4 = vrot.slane %v608_v30, 5  ;;  %v629_v6 = vrot.slane %v18853_v47, 6  ;;  %v630_v7 = vrot.slane %v18856_v48, 7  ;;  %v633_v11 = vrot.slane %v574_v49, 6 }
 0x14b   :  { %v607_v8 = vrot.slane %v18883_v0, 4  ;;  %v621_v9 = vsel %vm18316_vm6, %v11659_v1, %v620_v3  ;;  %v622_v10 = vrot.slane %v620_v3, 4  ;;  %v11666_v12 = vld [vmem:[#allocation3] sm:$0xf]  ;;  %v634_v19 = vrot.slane %v18859_v27, 7 }
 0x14c   :  { %v17309_v14 = vld [vmem:[#allocation3 + $0x34] sm:$0xf0]  ;;  %v612_v15 = vor.u32 %v611_v13, %v610_v4  ;;  %627 = vst [vmem:[#allocation3 + $0x20] sm:$0xff] %v621_v9  ;;  %v18893_v18 = vor.u32 %v630_v7, %v629_v6  ;;  %v638_v21 = vrot.slane %v608_v30, 6  ;;  %v17302_v22 = vld [vmem:[#allocation3 + $0x4] sm:$0xf]  ;;  %v577_v38 = vor.u32 %v576_v59, %v572_v40 }
 0x14d   :  { %v624_v23 = vsel %vm18316_vm6, %v622_v10, %v623_v5  ;;  %v639_v24 = vrot.slane %v18864_v35, 7  ;;  %v11660_v25 = vrot.slane %v18846_v44, 11  ;;  %v648_v33 = vrot.slane %v18848_v45, 7  ;;  %v11668_v34 = vld [vmem:[#allocation3 + $0x38] sm:$0xf0] }
 0x14e   :  { %v613_v41 = vsel %vm18388_vm0, %v607_v8, %v612_v15  ;;  %628 = vst [vmem:[#allocation3 + $0x58] sm:$0xff] %v624_v23  ;;  %v18905_v42 = vor.u32 %v634_v19, %v633_v11  ;;  %v651_v49 = vrot.slane %v18850_v46, 7  ;;  %v18914_v59 = vadd.f32 %v485_v43, %v18698_v37  ;;  %v17157_v29 = vld [vmem:[%s25440_s3 + $0x274] sm:$0xf0]  ;;  %v12154_v46 = vld [vmem:[%s25440_s3 + $0x2f0] sm:$0xf] }
 0x14f   :  { %617 = vst [vmem:[#allocation3 + $0x50] sm:$0xff] %v613_v41  ;;  %v640_v39 = vor.u32 %v639_v24, %v638_v21  ;;  %v649_v58 = vsel %vm18361_vm13, %v11660_v25, %v648_v33  ;;  %v650_v55 = vrot.slane %v648_v33, 4  ;;  %v18924_v13 = vadd.f32 %v504_v62, %v18700_v50  ;;  %v17173_v3 = vld [vmem:[%s25440_s3 + $0x2f4] sm:$0xf0]  ;;  %v12082_v4 = vld [vmem:[%s25440_s3 + $0x260] sm:$0xf] }
 0x150   :  { %25507 = vst [vmem:[#allocation14_spill] sm:$0xff] %v18914_v59  ;;  %v487_v60 = vpop.f32.mrf.mxu0  ;;  %v506_v61 = vpop.f32.mrf.mxu1  ;;  %v637_v30 = vrot.slane %v18905_v42, 4  ;;  %v18926_v1 = vor.u32 %v17309_v14, %v11666_v12  ;;  %v18928_v43 = vor.u32 %v17302_v22, %v11668_v34  ;;  %v568_v7 = vrot.slane %v18881_v17, 4  ;;  %v17155_v8 = vld [vmem:[%s25440_s3 + $0x264] sm:$0xf0] }
 0x151   :  { %655 = vst [vmem:[#allocation3 + $0x30] sm:$0xff] %v649_v58  ;;  %v652_v5 = vsel %vm18361_vm13, %v650_v55, %v651_v49  ;;  %v18939_v6 = vadd.f32 %v487_v60, %v18698_v37  ;;  %v18942_v62 = vadd.f32 %v506_v61, %v18700_v50  ;;  %v12146_v9 = vld [vmem:[%s25440_s3 + $0x2e0] sm:$0xf]  ;;  %v511_v37 = vpack.c.bf16 %v18924_v13, %v18914_v59  ;;  %v17171_v17 = vld [vmem:[%s25440_s3 + $0x2e4] sm:$0xf0] }
 0x152   :  { %25508 = vst [vmem:[#allocation15_spill] sm:$0xff] %v18924_v13  ;;  %v641_v10 = vsel %vm18426_vm4, %v637_v30, %v640_v39  ;;  %2327 = vmatmul.bf16.vlgmr.msra.gmra.mxu2 %v18926_v1  ;;  %2346 = vmatmul.bf16.vlgmr.msra.gmra.mxu3 %v18928_v43  ;;  %v578_v50 = vrot.slane %v577_v38, 4  ;;  %v12218_v11 = vld [vmem:[%s25440_s3 + $0x370] sm:$0xf]  ;;  %v573_v14 = vsel %vm18354_vm12, %v568_v7, %v572_v40  ;;  %v17189_v21 = vld [vmem:[%s25440_s3 + $0x374] sm:$0xf0] }
 0x153   :  { %25509 = vst [vmem:[#allocation16_spill] sm:$0xff] %v18939_v6  ;;  %v512_v12 = vpack.c.bf16 %v18942_v62, %v18939_v6  ;;  %v12091_v15 = vor.u32 %v17157_v29, %v12090_v52  ;;  %v12155_v19 = vor.u32 %v17173_v3, %v12154_v46  ;;  %v12282_v22 = vld [vmem:[%s25440_s3 + $0x3f0] sm:$0xf]  ;;  %v599_v23 = vrot.slane %v18853_v47, 5  ;;  %v17205_v40 = vld [vmem:[%s25440_s3 + $0x3f4] sm:$0xf0] }
 0x154   :  { %25510 = vst [vmem:[#allocation17_spill] sm:$0xff] %v18942_v62  ;;  %v659_v24 = vunpack.c.l.b16 %v511_v37  ;;  %v660_v25 = vunpack.c.h.b16 %v511_v37  ;;  %v583_v27 = vsel %vm18354_vm12, %v578_v50, %v582_v63  ;;  %v12083_v38 = vor.u32 %v17155_v8, %v12082_v4  ;;  %v12074_v49 = vld [vmem:[%s25440_s3 + $0x250] sm:$0xf]  ;;  %v17153_v35 = vld [vmem:[%s25440_s3 + $0x254] sm:$0xf0] }
 0x155   :  { %656 = vst [vmem:[#allocation3 + $0x68] sm:$0xff] %v652_v5  ;;  %v661_v33 = vunpack.c.l.b16 %v512_v12  ;;  %v662_v34 = vunpack.c.h.b16 %v512_v12  ;;  %2395 = vmatpush.bf16.msrb.mxu2 %v12091_v15  ;;  %2414 = vmatpush.bf16.msrb.mxu3 %v12155_v19  ;;  %v12147_v41 = vor.u32 %v17171_v17, %v12146_v9  ;;  %v12138_v63 = vld [vmem:[%s25440_s3 + $0x2d0] sm:$0xf]  ;;  %v12219_v52 = vor.u32 %v17189_v21, %v12218_v11  ;;  %v12210_v58 = vld [vmem:[%s25440_s3 + $0x360] sm:$0xf] }
 0x156   :  { %645 = vst [vmem:[#allocation3 + $0x60] sm:$0xff] %v641_v10  ;;  %v12283_v39 = vor.u32 %v17205_v40, %v12282_v22  ;;  %v17187_v55 = vld [vmem:[%s25440_s3 + $0x364] sm:$0xf0]  ;;  %v17169_v29 = vld [vmem:[%s25440_s3 + $0x2d4] sm:$0xf0]  ;;  %v600_v3 = vrot.slane %v18856_v48, 6  ;;  %v12075_v4 = vor.u32 %v17153_v35, %v12074_v49 }
 0x157   :  { %586 = vst [vmem:[#allocation3 + $0x8] sm:$0xff] %v573_v14  ;;  %v663_v60 = vpack.c.b16 %v661_v33, %v659_v24  ;;  %v664_v61 = vpack.c.b16 %v662_v34, %v660_v25  ;;  %v12274_v46 = vld [vmem:[%s25440_s3 + $0x3e0] sm:$0xf]  ;;  %v17203_v30 = vld [vmem:[%s25440_s3 + $0x3e4] sm:$0xf0]  ;;  %2433 = vmatpush.bf16.msra.mxu0 %v12219_v52  ;;  %v12211_v8 = vor.u32 %v17187_v55, %v12210_v58 }
 0x158   :  { %587 = vst [vmem:[#allocation3 + $0x40] sm:$0xff] %v583_v27  ;;  %2452 = vmatpush.bf16.msra.mxu1 %v12283_v39  ;;  %v12066_v5 = vld [vmem:[%s25440_s3 + $0x240] sm:$0xf]  ;;  %v17151_v7 = vld [vmem:[%s25440_s3 + $0x244] sm:$0xf0]  ;;  %v12275_v9 = vor.u32 %v17203_v30, %v12274_v46  ;;  %v12139_v14 = vor.u32 %v17169_v29, %v12138_v63  ;;  %v19047_v29 = vor.u32 %v600_v3, %v599_v23 }
 0x159   :  { %v666_v10 = vshrl.u32 %v663_v60, 16  ;;  %v669_v37 = vshll.u32 %v663_v60, 16  ;;  %v674_v50 = vshrl.u32 %v664_v61, 16  ;;  %v677_v17 = vshll.u32 %v664_v61, 16  ;;  %2396 = vmatpush.bf16.msrb.mxu2 %v12083_v38  ;;  %2415 = vmatpush.bf16.msrb.mxu3 %v12147_v41  ;;  %v12130_v48 = vld [vmem:[%s25440_s3 + $0x2c0] sm:$0xf] }
 0x15a   :  { %v17167_v11 = vld [vmem:[%s25440_s3 + $0x2c4] sm:$0xf0]  ;;  %v12202_v12 = vld [vmem:[%s25440_s3 + $0x350] sm:$0xf]  ;;  %v17185_v15 = vld [vmem:[%s25440_s3 + $0x354] sm:$0xf0]  ;;  %v12067_v41 = vor.u32 %v17151_v7, %v12066_v5 }
 0x15b   :  { %v12266_v19 = vld [vmem:[%s25440_s3 + $0x3d0] sm:$0xf]  ;;  %v17201_v21 = vld [vmem:[%s25440_s3 + $0x3d4] sm:$0xf0]  ;;  %v668_v22 = vrot.slane %v666_v10, 6  ;;  %v671_v24 = vrot.slane %v669_v37, 7  ;;  %2434 = vmatpush.bf16.msra.mxu0 %v12211_v8  ;;  %v12203_v49 = vor.u32 %v17185_v15, %v12202_v12  ;;  %v12131_v46 = vor.u32 %v17167_v11, %v12130_v48 }
 0x15c   :  { %v676_v25 = vrot.slane %v674_v50, 6  ;;  %v679_v27 = vrot.slane %v677_v17, 7  ;;  %2453 = vmatpush.bf16.msra.mxu1 %v12275_v9  ;;  %v12267_v35 = vor.u32 %v17201_v21, %v12266_v19  ;;  %v12058_v55 = vld [vmem:[%s25440_s3 + $0x230] sm:$0xf]  ;;  %v17149_v60 = vld [vmem:[%s25440_s3 + $0x234] sm:$0xf0] }
 0x15d   :  { %v672_v63 = vor.u32 %v671_v24, %v668_v22  ;;  %2397 = vmatpush.bf16.msrb.mxu2 %v12075_v4  ;;  %v12122_v61 = vld [vmem:[%s25440_s3 + $0x2b0] sm:$0xf]  ;;  %2416 = vmatpush.bf16.msrb.mxu3 %v12139_v14  ;;  %v17165_v30 = vld [vmem:[%s25440_s3 + $0x2b4] sm:$0xf0]  ;;  %v12194_v4 = vld [vmem:[%s25440_s3 + $0x340] sm:$0xf]  ;;  %v12059_v12 = vor.u32 %v17149_v60, %v12058_v55 }
 0x15e   :  { %v11674_v40 = vld [vmem:[#allocation3 + $0x8] sm:$0xf]  ;;  %v17303_v34 = vld [vmem:[#allocation3 + $0xc] sm:$0xf]  ;;  %v680_v52 = vor.u32 %v679_v27, %v676_v25  ;;  %v17183_v5 = vld [vmem:[%s25440_s3 + $0x344] sm:$0xf0]  ;;  %v12123_v25 = vor.u32 %v17165_v30, %v12122_v61 }
 0x15f   :  { %v17310_v33 = vld [vmem:[#allocation3 + $0x3c] sm:$0xf0]  ;;  %v11676_v38 = vld [vmem:[#allocation3 + $0x40] sm:$0xf0]  ;;  %v683_v7 = vsel %vm18303_vm2, 0, %v672_v63  ;;  %v685_v23 = vsel %vm18303_vm2, %v672_v63, 0  ;;  %2435 = vmatpush.bf16.msra.mxu0 %v12203_v49  ;;  %v12195_v19 = vor.u32 %v17183_v5, %v12194_v4 }
 0x160   :  { %v19032_v39 = vor.u32 %v17310_v33, %v11674_v40  ;;  %v19034_v58 = vor.u32 %v17303_v34, %v11676_v38  ;;  %v684_v47 = vsel %vm18303_vm2, 0, %v680_v52  ;;  %v686_v3 = vsel %vm18303_vm2, %v680_v52, 0  ;;  %v12258_v8 = vld [vmem:[%s25440_s3 + $0x3c0] sm:$0xf]  ;;  %2454 = vmatpush.bf16.msra.mxu1 %v12267_v35  ;;  %v17199_v17 = vld [vmem:[%s25440_s3 + $0x3c4] sm:$0xf0] }
 0x161   :  { %v689_v9 = vunpack.c.l.b16 %v683_v7  ;;  %v690_v10 = vunpack.c.l.b16 %v684_v47  ;;  %v691_v37 = vunpack.c.h.b16 %v683_v7  ;;  %v692_v50 = vunpack.c.h.b16 %v684_v47  ;;  %2398 = vmatpush.bf16.msrb.mxu2 %v12067_v41  ;;  %v12050_v14 = vld [vmem:[%s25440_s3 + $0x220] sm:$0xf]  ;;  %v17147_v15 = vld [vmem:[%s25440_s3 + $0x224] sm:$0xf0]  ;;  %v12186_v21 = vld [vmem:[%s25440_s3 + $0x330] sm:$0xf]  ;;  %2417 = vmatpush.bf16.msrb.mxu3 %v12131_v46 }
 0x162   :  { %2365 = vmatmul.bf16.vlgmr.msrb.gmra.mxu0 %v19032_v39  ;;  %2384 = vmatmul.bf16.vlgmr.msrb.gmra.mxu1 %v19034_v58  ;;  %v701_v48 = vunpack.c.l.b16 %v685_v23  ;;  %v702_v11 = vunpack.c.l.b16 %v686_v3  ;;  %v12259_v27 = vor.u32 %v17199_v17, %v12258_v8  ;;  %v17181_v40 = vld [vmem:[%s25440_s3 + $0x334] sm:$0xf0]  ;;  %v12250_v33 = vld [vmem:[%s25440_s3 + $0x3b0] sm:$0xf]  ;;  %v12114_v41 = vld [vmem:[%s25440_s3 + $0x2a0] sm:$0xf]  ;;  %v12051_v4 = vor.u32 %v17147_v15, %v12050_v14 }
 0x163   :  { %v19083_v22 = vpack.c.b16 %v690_v10, %v689_v9  ;;  %v19085_v24 = vpack.c.b16 %v692_v50, %v691_v37  ;;  %v17197_v34 = vld [vmem:[%s25440_s3 + $0x3b4] sm:$0xf0]  ;;  %v17163_v49 = vld [vmem:[%s25440_s3 + $0x2a4] sm:$0xf0]  ;;  %v12042_v35 = vld [vmem:[%s25440_s3 + $0x210] sm:$0xf]  ;;  %2436 = vmatpush.bf16.msra.mxu0 %v12195_v19  ;;  %v12187_v60 = vor.u32 %v17181_v40, %v12186_v21  ;;  %v591_v23 = vsel %vm18320_vm7, %v11658_v57, %v590_v36 }
 0x164   :  { %v19096_v38 = vpack.c.b16 %v702_v11, %v701_v48  ;;  %2455 = vmatpush.bf16.msra.mxu1 %v12259_v27  ;;  %v17145_v55 = vld [vmem:[%s25440_s3 + $0x214] sm:$0xf0]  ;;  %v12251_v61 = vor.u32 %v17197_v34, %v12250_v33  ;;  %v602_v5 = vrot.slane %v19047_v29, 4  ;;  %v632_v7 = vrot.slane %v18893_v18, 4  ;;  %v12106_v29 = vld [vmem:[%s25440_s3 + $0x290] sm:$0xf] }
 0x165   :  { %v19108_v63 = vshrl.u32 %v19083_v22, 16  ;;  %v19111_v52 = vshll.u32 %v19083_v22, 16  ;;  %697 = vst [vmem:[#allocation3 + $0x70] sm:$0xff] %v19083_v22  ;;  %v19118_v46 = vshrl.u32 %v19085_v24, 16  ;;  %v734_v30 = vrot.slane %v19085_v24, 5  ;;  %2399 = vmatpush.bf16.msrb.mxu2 %v12059_v12  ;;  %2418 = vmatpush.bf16.msrb.mxu3 %v12123_v25 }
 0x166   :  { %698 = vst [vmem:[#allocation3 + $0xa8] sm:$0xff] %v19085_v24  ;;  %v12115_v47 = vor.u32 %v17163_v49, %v12114_v41  ;;  %v737_v8 = vrot.slane %v19096_v38, 5  ;;  %v12043_v9 = vor.u32 %v17145_v55, %v12042_v35  ;;  %v17161_v10 = vld [vmem:[%s25440_s3 + $0x294] sm:$0xf0]  ;;  %v19142_v36 = vshll.u32 %v19085_v24, 16 }
 0x167   :  { %v736_v3 = vrot.slane %v734_v30, 4  ;;  %v707_v45 = vrot.slane %v19108_v63, 4  ;;  %v710_v44 = vrot.slane %v19111_v52, 5  ;;  %v19145_v57 = vshll.u32 %v19096_v38, 16  ;;  %2437 = vmatpush.bf16.msra.mxu0 %v12187_v60  ;;  %v12034_v11 = vld [vmem:[%s25440_s3 + $0x200] sm:$0xf] }
 0x168   :  { %2456 = vmatpush.bf16.msra.mxu1 %v12251_v61  ;;  %v720_v37 = vrot.slane %v19118_v46, 4  ;;  %v11661_v50 = vrot.slane %v19083_v22, 9  ;;  %v764_v48 = vrot.slane %v19085_v24, 6  ;;  %v17143_v12 = vld [vmem:[%s25440_s3 + $0x204] sm:$0xf0]  ;;  %597 = vst [vmem:[#allocation3 + $0x10] sm:$0xff] %v591_v23  ;;  %v12107_v15 = vor.u32 %v17161_v10, %v12106_v29 }
 0x169   :  { %v738_v17 = vsel %vm18320_vm7, %v736_v3, %v737_v8  ;;  %2400 = vmatpush.bf16.msrb.mxu2 %v12051_v4  ;;  %v743_v14 = vrot.slane %v19108_v63, 5  ;;  %2419 = vmatpush.bf16.msrb.mxu3 %v12115_v47  ;;  %v12098_v19 = vld [vmem:[%s25440_s3 + $0x280] sm:$0xf]  ;;  %v17159_v21 = vld [vmem:[%s25440_s3 + $0x284] sm:$0xf0]  ;;  %v606_v40 = vsel %vm18388_vm0, %v602_v5, %v18883_v0  ;;  %v767_v34 = vrot.slane %v19096_v38, 6 }
 0x16a   :  { %742 = vst [vmem:[#allocation3 + $0xb8] sm:$0xff] %v738_v17  ;;  %v12178_v25 = vld [vmem:[%s25440_s3 + $0x320] sm:$0xf]  ;;  %v17179_v27 = vld [vmem:[%s25440_s3 + $0x324] sm:$0xf0]  ;;  %v766_v33 = vrot.slane %v764_v48, 4  ;;  %v711_v4 = vor.u32 %v710_v44, %v707_v45  ;;  %v12035_v45 = vor.u32 %v17143_v12, %v12034_v11 }
 0x16b   :  { %v12242_v49 = vld [vmem:[%s25440_s3 + $0x3a0] sm:$0xf]  ;;  %v792_v35 = vrot.slane %v19085_v24, 7  ;;  %v795_v55 = vrot.slane %v19096_v38, 7  ;;  %v716_v23 = vrot.slane %v19142_v36, 5  ;;  %616 = vst [vmem:[#allocation3 + $0x18] sm:$0xff] %v606_v40  ;;  %v12179_v17 = vor.u32 %v17179_v27, %v12178_v25 }
 0x16c   :  { %v11722_v41 = vld [vmem:[#allocation3 + $0x70] sm:$0xf]  ;;  %v17316_v61 = vld [vmem:[#allocation3 + $0x74] sm:$0xf]  ;;  %v768_v0 = vsel %vm18316_vm6, %v766_v33, %v767_v34  ;;  %v17195_v3 = vld [vmem:[%s25440_s3 + $0x3a4] sm:$0xf0] }
 0x16d   :  { %v17323_v60 = vld [vmem:[#allocation3 + $0xa4] sm:$0xf0]  ;;  %v11724_v47 = vld [vmem:[#allocation3 + $0xa8] sm:$0xf0]  ;;  %2401 = vmatpush.bf16.msrb.mxu2 %v12043_v9  ;;  %772 = vst [vmem:[#allocation3 + $0xc8] sm:$0xff] %v768_v0  ;;  %v794_v8 = vrot.slane %v792_v35, 4  ;;  %2420 = vmatpush.bf16.msrb.mxu3 %v12107_v15  ;;  %v721_v44 = vor.u32 %v720_v37, %v716_v23  ;;  %v12099_v9 = vor.u32 %v17159_v21, %v12098_v19 }
 0x16e   :  { %v19184_v5 = vor.u32 %v17323_v60, %v11722_v41  ;;  %v19192_v29 = vor.u32 %v17316_v61, %v11724_v47  ;;  %v712_v10 = vrot.slane %v711_v4, 4  ;;  %v12243_v33 = vor.u32 %v17195_v3, %v12242_v49  ;;  %v12346_v34 = vld [vmem:[%s25440_s3 + $0x470] sm:$0xf]  ;;  %v17221_v40 = vld [vmem:[%s25440_s3 + $0x474] sm:$0xf0]  ;;  %2438 = vmatpush.bf16.msra.mxu0 %v12179_v17 }
 0x16f   :  { %v726_v41 = vrot.slane %v19145_v57, 5  ;;  %v796_v15 = vsel %vm18361_vm13, %v794_v8, %v795_v55  ;;  %v12347_v11 = vor.u32 %v17221_v40, %v12346_v34  ;;  %v12410_v12 = vld [vmem:[%s25440_s3 + $0x4f0] sm:$0xf]  ;;  %v722_v19 = vrot.slane %v721_v44, 4  ;;  %v17237_v21 = vld [vmem:[%s25440_s3 + $0x4f4] sm:$0xf0] }
 0x170   :  { %2332 = vmatmul.bf16.gmra.mxu2 %v19184_v5  ;;  %2351 = vmatmul.bf16.gmra.mxu3 %v19192_v29  ;;  %v717_v37 = vsel %vm18354_vm12, %v712_v10, %v716_v23  ;;  %800 = vst [vmem:[#allocation3 + $0xd8] sm:$0xff] %v796_v15  ;;  %v12170_v25 = vld [vmem:[%s25440_s3 + $0x310] sm:$0xf]  ;;  %v744_v27 = vrot.slane %v19111_v52, 6  ;;  %v12411_v49 = vor.u32 %v17237_v21, %v12410_v12  ;;  %v17177_v55 = vld [vmem:[%s25440_s3 + $0x314] sm:$0xf0] }
 0x171   :  { %2402 = vmatpush.bf16.msrb.mxu2 %v12035_v45  ;;  %730 = vst [vmem:[#allocation3 + $0x78] sm:$0xff] %v717_v37  ;;  %2421 = vmatpush.bf16.msrb.mxu3 %v12099_v9  ;;  %v12234_v60 = vld [vmem:[%s25440_s3 + $0x390] sm:$0xf]  ;;  %v727_v61 = vsel %vm18354_vm12, %v722_v19, %v726_v41  ;;  %v12171_v4 = vor.u32 %v17177_v55, %v12170_v25  ;;  %v17193_v0 = vld [vmem:[%s25440_s3 + $0x394] sm:$0xf0]  ;;  %v747_v8 = vrot.slane %v19118_v46, 5 }
 0x172   :  { %2457 = vmatpush.bf16.msra.mxu1 %v12243_v33  ;;  %v12338_v47 = vld [vmem:[%s25440_s3 + $0x460] sm:$0xf]  ;;  %v17219_v23 = vld [vmem:[%s25440_s3 + $0x464] sm:$0xf0]  ;;  %v19239_v3 = vsel %vm18426_vm4, %v632_v7, %v18905_v42  ;;  %731 = vst [vmem:[#allocation3 + $0xb0] sm:$0xff] %v727_v61  ;;  %v12235_v10 = vor.u32 %v17193_v0, %v12234_v60  ;;  %v748_v15 = vrot.slane %v19142_v36, 6 }
 0x173   :  { %v12339_v45 = vor.u32 %v17219_v23, %v12338_v47  ;;  %v12402_v44 = vld [vmem:[%s25440_s3 + $0x4e0] sm:$0xf]  ;;  %v17235_v9 = vld [vmem:[%s25440_s3 + $0x4e4] sm:$0xf0]  ;;  %2439 = vmatpush.bf16.msra.mxu0 %v12171_v4  ;;  %v12330_v40 = vld [vmem:[%s25440_s3 + $0x450] sm:$0xf] }
 0x174   :  { %v12403_v18 = vor.u32 %v17235_v9, %v12402_v44  ;;  %v12162_v42 = vld [vmem:[%s25440_s3 + $0x300] sm:$0xf]  ;;  %v17175_v7 = vld [vmem:[%s25440_s3 + $0x304] sm:$0xf0]  ;;  %v17217_v41 = vld [vmem:[%s25440_s3 + $0x454] sm:$0xf0] }
 0x175   :  { %2471 = vmatpush.bf16.msra.mxu2 %v12347_v11  ;;  %2490 = vmatpush.bf16.msra.mxu3 %v12411_v49  ;;  %v12226_v17 = vld [vmem:[%s25440_s3 + $0x380] sm:$0xf]  ;;  %v12163_v33 = vor.u32 %v17175_v7, %v12162_v42  ;;  %v17191_v34 = vld [vmem:[%s25440_s3 + $0x384] sm:$0xf0]  ;;  %v752_v37 = vshrl.u32 %v19096_v38, 16  ;;  %v12331_v12 = vor.u32 %v17217_v41, %v12330_v40  ;;  %644 = vst [vmem:[#allocation3 + $0x28] sm:$0xff] %v19239_v3 }
 0x176   :  { %2458 = vmatpush.bf16.msra.mxu1 %v12235_v10  ;;  %v12227_v11 = vor.u32 %v17191_v34, %v12226_v17  ;;  %v17311_v19 = vld [vmem:[#allocation3 + $0x44] sm:$0xf0]  ;;  %v12394_v21 = vld [vmem:[%s25440_s3 + $0x4d0] sm:$0xf]  ;;  %v11684_v60 = vld [vmem:[#allocation3 + $0x48] sm:$0xf0]  ;;  %v749_v34 = vor.u32 %v748_v15, %v747_v8 }
 0x177   :  { %v17233_v25 = vld [vmem:[%s25440_s3 + $0x4d4] sm:$0xf0]  ;;  %2440 = vmatpush.bf16.msra.mxu0 %v12163_v33  ;;  %v12474_v4 = vld [vmem:[%s25440_s3 + $0x570] sm:$0xf]  ;;  %v11682_v0 = vld [vmem:[#allocation3 + $0x10] sm:$0xf]  ;;  %v745_v33 = vor.u32 %v744_v27, %v743_v14 }
 0x178   :  { %v11730_v49 = vld [vmem:[#allocation3 + $0x78] sm:$0xf]  ;;  %v17317_v55 = vld [vmem:[#allocation3 + $0x7c] sm:$0xf]  ;;  %v12395_v61 = vor.u32 %v17233_v25, %v12394_v21  ;;  %v17253_v47 = vld [vmem:[%s25440_s3 + $0x574] sm:$0xf0] }
 0x179   :  { %2472 = vmatpush.bf16.msra.mxu2 %v12339_v45  ;;  %2491 = vmatpush.bf16.msra.mxu3 %v12403_v18  ;;  %v12538_v23 = vld [vmem:[%s25440_s3 + $0x5f0] sm:$0xf]  ;;  %v17269_v10 = vld [vmem:[%s25440_s3 + $0x5f4] sm:$0xf0]  ;;  %v735_v45 = vsel %vm18320_vm7, %v11661_v50, %v734_v30  ;;  %v17324_v44 = vld [vmem:[#allocation3 + $0xac] sm:$0xf0]  ;;  %v12475_v42 = vor.u32 %v17253_v47, %v12474_v4 }
 0x17a   :  { %2459 = vmatpush.bf16.msra.mxu1 %v12227_v11  ;;  %v11732_v9 = vld [vmem:[#allocation3 + $0xb0] sm:$0xf0]  ;;  %v12539_v7 = vor.u32 %v17269_v10, %v12538_v23  ;;  %v12322_v17 = vld [vmem:[%s25440_s3 + $0x440] sm:$0xf]  ;;  %v19297_v40 = vor.u32 %v17324_v44, %v11730_v49  ;;  %v17215_v30 = vld [vmem:[%s25440_s3 + $0x444] sm:$0xf0] }
 0x17b   :  { %v17304_v18 = vld [vmem:[#allocation3 + $0x14] sm:$0xf]  ;;  %v19299_v41 = vor.u32 %v17317_v55, %v11732_v9  ;;  %v12386_v50 = vld [vmem:[%s25440_s3 + $0x4c0] sm:$0xf]  ;;  %v17231_v11 = vld [vmem:[%s25440_s3 + $0x4c4] sm:$0xf0]  ;;  %2509 = vmatpush.bf16.msrb.mxu0 %v12475_v42  ;;  %v12323_v14 = vor.u32 %v17215_v30, %v12322_v17 }
 0x17c   :  { %v12387_v27 = vor.u32 %v17231_v11, %v12386_v50  ;;  %v12466_v8 = vld [vmem:[%s25440_s3 + $0x560] sm:$0xf]  ;;  %v17251_v15 = vld [vmem:[%s25440_s3 + $0x564] sm:$0xf0]  ;;  %v755_v25 = vrot.slane %v19145_v57, 6  ;;  %2370 = vmatmul.bf16.gmra.mxu0 %v19297_v40  ;;  %v19326_v49 = vor.u32 %v17304_v18, %v11684_v60  ;;  %741 = vst [vmem:[#allocation3 + $0x80] sm:$0xff] %v735_v45 }
 0x17d   :  { %2473 = vmatpush.bf16.msra.mxu2 %v12331_v12  ;;  %2492 = vmatpush.bf16.msra.mxu3 %v12395_v61  ;;  %v19310_v12 = vor.u32 %v17311_v19, %v11682_v0  ;;  %v12530_v21 = vld [vmem:[%s25440_s3 + $0x5e0] sm:$0xf]  ;;  %v754_v19 = vrot.slane %v752_v37, 5  ;;  %v12467_v55 = vor.u32 %v17251_v15, %v12466_v8  ;;  %v17267_v61 = vld [vmem:[%s25440_s3 + $0x5e4] sm:$0xf0]  ;;  %v746_v23 = vrot.slane %v745_v33, 4 }
 0x17e   :  { %2528 = vmatpush.bf16.msrb.mxu1 %v12539_v7  ;;  %v12531_v4 = vor.u32 %v17267_v61, %v12530_v21  ;;  %v12314_v0 = vld [vmem:[%s25440_s3 + $0x430] sm:$0xf]  ;;  %v17213_v47 = vld [vmem:[%s25440_s3 + $0x434] sm:$0xf0]  ;;  %v751_v60 = vrot.slane %v749_v34, 4 }
 0x17f   :  { %2389 = vmatmul.bf16.gmra.mxu1 %v19299_v41  ;;  %v12315_v10 = vor.u32 %v17213_v47, %v12314_v0  ;;  %v12378_v45 = vld [vmem:[%s25440_s3 + $0x4b0] sm:$0xf]  ;;  %v17229_v44 = vld [vmem:[%s25440_s3 + $0x4b4] sm:$0xf0]  ;;  %2510 = vmatpush.bf16.msrb.mxu0 %v12467_v55  ;;  %v756_v33 = vor.u32 %v755_v25, %v754_v19  ;;  %v12306_v11 = vld [vmem:[%s25440_s3 + $0x420] sm:$0xf]  ;;  %v750_v19 = vsel %vm18388_vm0, %v746_v23, %v749_v34 }
 0x180   :  { %2403 = vmatmul.bf16.vlgmr.msrb.gmra.mxu2 %v19310_v12  ;;  %2422 = vmatmul.bf16.vlgmr.msrb.gmra.mxu3 %v19326_v49  ;;  %v12458_v9 = vld [vmem:[%s25440_s3 + $0x550] sm:$0xf]  ;;  %v12379_v18 = vor.u32 %v17229_v44, %v12378_v45  ;;  %v17249_v42 = vld [vmem:[%s25440_s3 + $0x554] sm:$0xf0]  ;;  %v17227_v8 = vld [vmem:[%s25440_s3 + $0x4a4] sm:$0xf0] }
 0x181   :  { %2474 = vmatpush.bf16.msra.mxu2 %v12323_v14  ;;  %2493 = vmatpush.bf16.msra.mxu3 %v12387_v27  ;;  %v12522_v7 = vld [vmem:[%s25440_s3 + $0x5d0] sm:$0xf]  ;;  %v17265_v17 = vld [vmem:[%s25440_s3 + $0x5d4] sm:$0xf0]  ;;  %v12459_v30 = vor.u32 %v17249_v42, %v12458_v9  ;;  %v17211_v14 = vld [vmem:[%s25440_s3 + $0x424] sm:$0xf0] }
 0x182   :  { %2529 = vmatpush.bf16.msrb.mxu1 %v12531_v4  ;;  %v12523_v50 = vor.u32 %v17265_v17, %v12522_v7  ;;  %v12370_v27 = vld [vmem:[%s25440_s3 + $0x4a0] sm:$0xf]  ;;  %v17247_v21 = vld [vmem:[%s25440_s3 + $0x544] sm:$0xf0]  ;;  %v12307_v25 = vor.u32 %v17211_v14, %v12306_v11  ;;  %v757_v4 = vsel %vm18388_vm0, %v751_v60, %v756_v33  ;;  %v12298_v34 = vld [vmem:[%s25440_s3 + $0x410] sm:$0xf] }
 0x183   :  { %v12450_v15 = vld [vmem:[%s25440_s3 + $0x540] sm:$0xf]  ;;  %v17263_v61 = vld [vmem:[%s25440_s3 + $0x5c4] sm:$0xf0]  ;;  %2511 = vmatpush.bf16.msrb.mxu0 %v12459_v30  ;;  %v12371_v0 = vor.u32 %v17227_v8, %v12370_v27  ;;  %v17209_v23 = vld [vmem:[%s25440_s3 + $0x414] sm:$0xf0] }
 0x184   :  { %v12514_v55 = vld [vmem:[%s25440_s3 + $0x5c0] sm:$0xf]  ;;  %v12451_v47 = vor.u32 %v17247_v21, %v12450_v15  ;;  %760 = vst [vmem:[#allocation3 + $0x88] sm:$0xff] %v750_v19  ;;  %v12362_v45 = vld [vmem:[%s25440_s3 + $0x490] sm:$0xf]  ;;  %v12299_v30 = vor.u32 %v17209_v23, %v12298_v34 }
 0x185   :  { %2475 = vmatpush.bf16.msra.mxu2 %v12315_v10  ;;  %2494 = vmatpush.bf16.msra.mxu3 %v12379_v18  ;;  %v12515_v10 = vor.u32 %v17263_v61, %v12514_v55  ;;  %v17225_v60 = vld [vmem:[%s25440_s3 + $0x494] sm:$0xf0]  ;;  %v11690_v44 = vld [vmem:[#allocation3 + $0x18] sm:$0xf]  ;;  %v17312_v9 = vld [vmem:[#allocation3 + $0x4c] sm:$0xf0] }
 0x186   :  { %2530 = vmatpush.bf16.msrb.mxu1 %v12523_v50  ;;  %v17305_v18 = vld [vmem:[#allocation3 + $0x1c] sm:$0xf]  ;;  %v11692_v42 = vld [vmem:[#allocation3 + $0x50] sm:$0xf0]  ;;  %761 = vst [vmem:[#allocation3 + $0xc0] sm:$0xff] %v757_v4  ;;  %v12363_v14 = vor.u32 %v17225_v60, %v12362_v45 }
 0x187   :  { %v12442_v7 = vld [vmem:[%s25440_s3 + $0x530] sm:$0xf]  ;;  %v17245_v17 = vld [vmem:[%s25440_s3 + $0x534] sm:$0xf0]  ;;  %v17325_v33 = vld [vmem:[#allocation3 + $0xb4] sm:$0xf0]  ;;  %2512 = vmatpush.bf16.msrb.mxu0 %v12451_v47  ;;  %v19427_v47 = vor.u32 %v17312_v9, %v11690_v44  ;;  %v19429_v34 = vor.u32 %v17305_v18, %v11692_v42 }
 0x188   :  { %v12506_v50 = vld [vmem:[%s25440_s3 + $0x5b0] sm:$0xf]  ;;  %v17261_v11 = vld [vmem:[%s25440_s3 + $0x5b4] sm:$0xf0]  ;;  %v12443_v27 = vor.u32 %v17245_v17, %v12442_v7  ;;  %v12290_v8 = vld [vmem:[%s25440_s3 + $0x400] sm:$0xf] }
 0x189   :  { %2476 = vmatpush.bf16.msra.mxu2 %v12307_v25  ;;  %2495 = vmatpush.bf16.msra.mxu3 %v12371_v0  ;;  %v17207_v15 = vld [vmem:[%s25440_s3 + $0x404] sm:$0xf0]  ;;  %v12354_v21 = vld [vmem:[%s25440_s3 + $0x480] sm:$0xf]  ;;  %v11738_v61 = vld [vmem:[#allocation3 + $0x80] sm:$0xf]  ;;  %v12507_v0 = vor.u32 %v17261_v11, %v12506_v50 }
 0x18a   :  { %2531 = vmatpush.bf16.msrb.mxu1 %v12515_v10  ;;  %v17223_v19 = vld [vmem:[%s25440_s3 + $0x484] sm:$0xf0]  ;;  %v12434_v25 = vld [vmem:[%s25440_s3 + $0x520] sm:$0xf]  ;;  %v11740_v4 = vld [vmem:[#allocation3 + $0xb8] sm:$0xf0]  ;;  %v12291_v23 = vor.u32 %v17207_v15, %v12290_v8  ;;  %v19440_v7 = vor.u32 %v17325_v33, %v11738_v61 }
 0x18b   :  { %v17243_v55 = vld [vmem:[%s25440_s3 + $0x524] sm:$0xf0]  ;;  %v12498_v10 = vld [vmem:[%s25440_s3 + $0x5a0] sm:$0xf]  ;;  %v12602_v60 = vld [vmem:[%s25440_s3 + $0x670] sm:$0xf]  ;;  %2513 = vmatpush.bf16.msrb.mxu0 %v12443_v27  ;;  %v12355_v9 = vor.u32 %v17223_v19, %v12354_v21 }
 0x18c   :  { %v17259_v45 = vld [vmem:[%s25440_s3 + $0x5a4] sm:$0xf0]  ;;  %v17318_v44 = vld [vmem:[#allocation3 + $0x84] sm:$0xf]  ;;  %v12435_v18 = vor.u32 %v17243_v55, %v12434_v25  ;;  %v17285_v42 = vld [vmem:[%s25440_s3 + $0x674] sm:$0xf0]  ;;  %2441 = vmatmul.bf16.vlgmr.msra.gmra.mxu0 %v19427_v47 }
 0x18d   :  { %2477 = vmatpush.bf16.msra.mxu2 %v12299_v30  ;;  %2496 = vmatpush.bf16.msra.mxu3 %v12363_v14  ;;  %v11662_v17 = vrot.slane %v19083_v22, 10  ;;  %v19448_v30 = vor.u32 %v17318_v44, %v11740_v4  ;;  %v12603_v50 = vor.u32 %v17285_v42, %v12602_v60  ;;  %v12666_v33 = vld [vmem:[%s25440_s3 + $0x6f0] sm:$0xf]  ;;  %v12499_v11 = vor.u32 %v17259_v45, %v12498_v10  ;;  %v17301_v14 = vld [vmem:[%s25440_s3 + $0x6f4] sm:$0xf0] }
 0x18e   :  { %2532 = vmatpush.bf16.msrb.mxu1 %v12507_v0  ;;  %v12426_v27 = vld [vmem:[%s25440_s3 + $0x510] sm:$0xf]  ;;  %v17241_v8 = vld [vmem:[%s25440_s3 + $0x514] sm:$0xf0]  ;;  %v12667_v15 = vor.u32 %v17301_v14, %v12666_v33  ;;  %v12594_v25 = vld [vmem:[%s25440_s3 + $0x660] sm:$0xf] }
 0x18f   :  { %2460 = vmatmul.bf16.vlgmr.msra.gmra.mxu1 %v19429_v34  ;;  %v12490_v21 = vld [vmem:[%s25440_s3 + $0x590] sm:$0xf]  ;;  %v17257_v19 = vld [vmem:[%s25440_s3 + $0x594] sm:$0xf0]  ;;  %2514 = vmatpush.bf16.msrb.mxu0 %v12435_v18  ;;  %v12427_v55 = vor.u32 %v17241_v8, %v12426_v27  ;;  %v17283_v61 = vld [vmem:[%s25440_s3 + $0x664] sm:$0xf0] }
 0x190   :  { %2408 = vmatmul.bf16.gmra.mxu2 %v19440_v7  ;;  %2427 = vmatmul.bf16.gmra.mxu3 %v19448_v30  ;;  %v12658_v4 = vld [vmem:[%s25440_s3 + $0x6e0] sm:$0xf]  ;;  %v17299_v0 = vld [vmem:[%s25440_s3 + $0x6e4] sm:$0xf0]  ;;  %v774_v10 = vrot.slane %v19111_v52, 7  ;;  %v12595_v45 = vor.u32 %v17283_v61, %v12594_v25  ;;  %v777_v18 = vrot.slane %v19118_v46, 6 }
 0x191   :  { %2478 = vmatpush.bf16.msra.mxu2 %v12291_v23  ;;  %2497 = vmatpush.bf16.msra.mxu3 %v12355_v9  ;;  %v773_v23 = vrot.slane %v19108_v63, 6  ;;  %v12659_v60 = vor.u32 %v17299_v0, %v12658_v4  ;;  %v12418_v44 = vld [vmem:[%s25440_s3 + $0x500] sm:$0xf]  ;;  %v17239_v9 = vld [vmem:[%s25440_s3 + $0x504] sm:$0xf0]  ;;  %v778_v42 = vrot.slane %v19142_v36, 7  ;;  %v12491_v63 = vor.u32 %v17257_v19, %v12490_v21 }
 0x192   :  { %2533 = vmatpush.bf16.msrb.mxu1 %v12499_v11  ;;  %v12586_v52 = vld [vmem:[%s25440_s3 + $0x650] sm:$0xf]  ;;  %v782_v33 = vrot.slane %v752_v37, 6  ;;  %v12482_v14 = vld [vmem:[%s25440_s3 + $0x580] sm:$0xf]  ;;  %v12419_v36 = vor.u32 %v17239_v9, %v12418_v44  ;;  %v765_v19 = vsel %vm18316_vm6, %v11662_v17, %v764_v48 }
 0x193   :  { %v17255_v46 = vld [vmem:[%s25440_s3 + $0x584] sm:$0xf0]  ;;  %2515 = vmatpush.bf16.msrb.mxu0 %v12427_v55  ;;  %v12650_v11 = vld [vmem:[%s25440_s3 + $0x6d0] sm:$0xf]  ;;  %v17297_v38 = vld [vmem:[%s25440_s3 + $0x6d4] sm:$0xf0]  ;;  %v779_v17 = vor.u32 %v778_v42, %v777_v18 }
 0x194   :  { %v17092_v37 = vld [vmem:[%s25440_s3 + $0x74] sm:$0xf]  ;;  %v12651_v8 = vor.u32 %v17297_v38, %v12650_v11  ;;  %v11836_v3 = vld [vmem:[%s25440_s3 + $0x78] sm:$0xf0]  ;;  %v11746_v25 = vld [vmem:[#allocation3 + $0x88] sm:$0xf]  ;;  %v12483_v0 = vor.u32 %v17255_v46, %v12482_v14 }
 0x195   :  { %2547 = vmatpush.bf16.msrb.mxu2 %v12603_v50  ;;  %2566 = vmatpush.bf16.msrb.mxu3 %v12667_v15  ;;  %v17281_v50 = vld [vmem:[%s25440_s3 + $0x654] sm:$0xf0]  ;;  %v17108_v15 = vld [vmem:[%s25440_s3 + $0xf4] sm:$0xf]  ;;  %v11900_v21 = vld [vmem:[%s25440_s3 + $0xf8] sm:$0xf0] }
 0x196   :  { %v12587_v27 = vor.u32 %v17281_v50, %v12586_v52  ;;  %v17326_v55 = vld [vmem:[#allocation3 + $0xbc] sm:$0xf0]  ;;  %v17319_v61 = vld [vmem:[#allocation3 + $0x8c] sm:$0xf]  ;;  %v11748_v4 = vld [vmem:[#allocation3 + $0xc0] sm:$0xf0]  ;;  %2534 = vmatpush.bf16.msrb.mxu1 %v12491_v63  ;;  %v11903_v9 = vor.u32 %v17108_v15, %v11900_v21 }
 0x197   :  { %v17313_v44 = vld [vmem:[#allocation3 + $0x54] sm:$0xf0]  ;;  %v12578_v52 = vld [vmem:[%s25440_s3 + $0x640] sm:$0xf]  ;;  %v783_v63 = vrot.slane %v19145_v57, 7  ;;  %2516 = vmatpush.bf16.msrb.mxu0 %v12419_v36  ;;  %771 = vst [vmem:[#allocation3 + $0x90] sm:$0xff] %v765_v19 }
 0x198   :  { %v12642_v50 = vld [vmem:[%s25440_s3 + $0x6c0] sm:$0xf]  ;;  %v17295_v48 = vld [vmem:[%s25440_s3 + $0x6c4] sm:$0xf0]  ;;  %v11698_v14 = vld [vmem:[#allocation3 + $0x20] sm:$0xf] }
 0x199   :  { %2548 = vmatpush.bf16.msrb.mxu2 %v12595_v45  ;;  %2567 = vmatpush.bf16.msrb.mxu3 %v12659_v60  ;;  %v11839_v45 = vor.u32 %v17092_v37, %v11836_v3  ;;  %v775_v60 = vor.u32 %v774_v10, %v773_v23  ;;  %v17279_v23 = vld [vmem:[%s25440_s3 + $0x644] sm:$0xf0]  ;;  %v17090_v10 = vld [vmem:[%s25440_s3 + $0x64] sm:$0xf]  ;;  %v11828_v46 = vld [vmem:[%s25440_s3 + $0x68] sm:$0xf0]  ;;  %v12643_v38 = vor.u32 %v17295_v48, %v12642_v50 }
 0x19a   :  { %v17106_v57 = vld [vmem:[%s25440_s3 + $0xe4] sm:$0xf]  ;;  %v11892_v18 = vld [vmem:[%s25440_s3 + $0xe8] sm:$0xf0]  ;;  %v11663_v42 = vrot.slane %v19083_v22, 11  ;;  %2535 = vmatpush.bf16.msrb.mxu1 %v12483_v0  ;;  %v12579_v3 = vor.u32 %v17279_v23, %v12578_v52  ;;  %v781_v21 = vrot.slane %v779_v17, 4  ;;  %v19565_v19 = vor.u32 %v17313_v44, %v11698_v14 }
 0x19b   :  { %v17306_v36 = vld [vmem:[#allocation3 + $0x24] sm:$0xf]  ;;  %v11700_v11 = vld [vmem:[#allocation3 + $0x58] sm:$0xf0]  ;;  %2585 = vmatpush.bf16.msra.mxu0 %v11839_v45  ;;  %v776_v37 = vrot.slane %v775_v60, 4  ;;  %v11831_v0 = vor.u32 %v17090_v10, %v11828_v46  ;;  %v11895_v45 = vor.u32 %v17106_v57, %v11892_v18 }
 0x19c   :  { %v12634_v15 = vld [vmem:[%s25440_s3 + $0x6b0] sm:$0xf]  ;;  %v17293_v22 = vld [vmem:[%s25440_s3 + $0x6b4] sm:$0xf0]  ;;  %v19578_v60 = vor.u32 %v17306_v36, %v11700_v11  ;;  %v11820_v44 = vld [vmem:[%s25440_s3 + $0x58] sm:$0xf0] }
 0x19d   :  { %2549 = vmatpush.bf16.msrb.mxu2 %v12587_v27  ;;  %2568 = vmatpush.bf16.msrb.mxu3 %v12651_v8  ;;  %v19555_v27 = vor.u32 %v17326_v55, %v11746_v25  ;;  %v19557_v8 = vor.u32 %v17319_v61, %v11748_v4  ;;  %v12570_v25 = vld [vmem:[%s25440_s3 + $0x630] sm:$0xf]  ;;  %v17277_v55 = vld [vmem:[%s25440_s3 + $0x634] sm:$0xf0]  ;;  %v17088_v61 = vld [vmem:[%s25440_s3 + $0x54] sm:$0xf]  ;;  %v784_v4 = vor.u32 %v783_v63, %v782_v33 }
 0x19e   :  { %2604 = vmatpush.bf16.msra.mxu1 %v11903_v9  ;;  %v17104_v9 = vld [vmem:[%s25440_s3 + $0xd4] sm:$0xf]  ;;  %v11884_v52 = vld [vmem:[%s25440_s3 + $0xd8] sm:$0xf0]  ;;  %v12635_v33 = vor.u32 %v17293_v22, %v12634_v15  ;;  %v780_v50 = vsel %vm18426_vm4, %v776_v37, %v779_v17  ;;  %v12571_v48 = vor.u32 %v17277_v55, %v12570_v25  ;;  %v12562_v63 = vld [vmem:[%s25440_s3 + $0x620] sm:$0xf]  ;;  %v19608_v17 = vsel %vm18361_vm13, %v11663_v42, %v792_v35 }
 0x19f   :  { %2446 = vmatmul.bf16.gmra.mxu0 %v19555_v27  ;;  %2465 = vmatmul.bf16.gmra.mxu1 %v19557_v8  ;;  %v12626_v23 = vld [vmem:[%s25440_s3 + $0x6a0] sm:$0xf]  ;;  %v17291_v10 = vld [vmem:[%s25440_s3 + $0x6a4] sm:$0xf0]  ;;  %v785_v14 = vsel %vm18426_vm4, %v781_v21, %v784_v4  ;;  %v11823_v46 = vor.u32 %v17088_v61, %v11820_v44  ;;  %v11887_v57 = vor.u32 %v17104_v9, %v11884_v52  ;;  %v17086_v36 = vld [vmem:[%s25440_s3 + $0x44] sm:$0xf] }
 0x1a0   :  { %2479 = vmatmul.bf16.vlgmr.msra.gmra.mxu2 %v19565_v19  ;;  %2498 = vmatmul.bf16.vlgmr.msra.gmra.mxu3 %v19578_v60  ;;  %v17275_v18 = vld [vmem:[%s25440_s3 + $0x624] sm:$0xf0]  ;;  %v11812_v24 = vld [vmem:[%s25440_s3 + $0x48] sm:$0xf0]  ;;  %v17102_v35 = vld [vmem:[%s25440_s3 + $0xc4] sm:$0xf]  ;;  %v12627_v11 = vor.u32 %v17291_v10, %v12626_v23 }
 0x1a1   :  { %2569 = vmatpush.bf16.msrb.mxu3 %v12643_v38  ;;  %2550 = vmatpush.bf16.msrb.mxu2 %v12579_v3  ;;  %v11876_v42 = vld [vmem:[%s25440_s3 + $0xc8] sm:$0xf0]  ;;  %788 = vst [vmem:[#allocation3 + $0x98] sm:$0xff] %v780_v50  ;;  %v12563_v38 = vor.u32 %v17275_v18, %v12562_v63  ;;  %v12618_v37 = vld [vmem:[%s25440_s3 + $0x690] sm:$0xf]  ;;  %v11815_v15 = vor.u32 %v17086_v36, %v11812_v24 }
 0x1a2   :  { %2586 = vmatpush.bf16.msra.mxu0 %v11831_v0  ;;  %2605 = vmatpush.bf16.msra.mxu1 %v11895_v45  ;;  %789 = vst [vmem:[#allocation3 + $0xd0] sm:$0xff] %v785_v14  ;;  %v17289_v3 = vld [vmem:[%s25440_s3 + $0x694] sm:$0xf0]  ;;  %v11879_v22 = vor.u32 %v17102_v35, %v11876_v42  ;;  %v12554_v21 = vld [vmem:[%s25440_s3 + $0x610] sm:$0xf] }
 0x1a3   :  { %v17273_v0 = vld [vmem:[%s25440_s3 + $0x614] sm:$0xf0]  ;;  %v17084_v45 = vld [vmem:[%s25440_s3 + $0x34] sm:$0xf]  ;;  %v11804_v25 = vld [vmem:[%s25440_s3 + $0x38] sm:$0xf0] }
 0x1a4   :  { %v17100_v55 = vld [vmem:[%s25440_s3 + $0xb4] sm:$0xf]  ;;  %v11868_v61 = vld [vmem:[%s25440_s3 + $0xb8] sm:$0xf0]  ;;  %v11706_v4 = vld [vmem:[#allocation3 + $0x28] sm:$0xf] }
 0x1a5   :  { %2570 = vmatpush.bf16.msrb.mxu3 %v12635_v33  ;;  %2551 = vmatpush.bf16.msrb.mxu2 %v12571_v48  ;;  %v17314_v44 = vld [vmem:[#allocation3 + $0x5c] sm:$0xf0]  ;;  %v17307_v9 = vld [vmem:[#allocation3 + $0x2c] sm:$0xf]  ;;  %v11708_v52 = vld [vmem:[#allocation3 + $0x60] sm:$0xf0]  ;;  %v12619_v33 = vor.u32 %v17289_v3, %v12618_v37  ;;  %v12555_v48 = vor.u32 %v17273_v0, %v12554_v21 }
 0x1a6   :  { %2587 = vmatpush.bf16.msra.mxu0 %v11823_v46  ;;  %2606 = vmatpush.bf16.msra.mxu1 %v11887_v57  ;;  %v17327_v50 = vld [vmem:[#allocation3 + $0xc4] sm:$0xf0]  ;;  %v12546_v63 = vld [vmem:[%s25440_s3 + $0x600] sm:$0xf]  ;;  %v17287_v10 = vld [vmem:[%s25440_s3 + $0x684] sm:$0xf0]  ;;  %v11807_v46 = vor.u32 %v17084_v45, %v11804_v25  ;;  %v11871_v57 = vor.u32 %v17100_v55, %v11868_v61  ;;  %v19687_v21 = vor.u32 %v17307_v9, %v11708_v52 }
 0x1a7   :  { %v12610_v23 = vld [vmem:[%s25440_s3 + $0x680] sm:$0xf]  ;;  %v11756_v14 = vld [vmem:[#allocation3 + $0xc8] sm:$0xf0]  ;;  %v17271_v18 = vld [vmem:[%s25440_s3 + $0x604] sm:$0xf0] }
 0x1a8   :  { %v17082_v36 = vld [vmem:[%s25440_s3 + $0x24] sm:$0xf]  ;;  %v11796_v24 = vld [vmem:[%s25440_s3 + $0x28] sm:$0xf0]  ;;  %v11964_v37 = vld [vmem:[%s25440_s3 + $0x178] sm:$0xf0]  ;;  %v12547_v45 = vor.u32 %v17271_v18, %v12546_v63 }
 0x1a9   :  { %2571 = vmatpush.bf16.msrb.mxu3 %v12627_v11  ;;  %2552 = vmatpush.bf16.msrb.mxu2 %v12563_v38  ;;  %v17098_v35 = vld [vmem:[%s25440_s3 + $0xa4] sm:$0xf]  ;;  %v11860_v42 = vld [vmem:[%s25440_s3 + $0xa8] sm:$0xf0]  ;;  %v17124_v11 = vld [vmem:[%s25440_s3 + $0x174] sm:$0xf]  ;;  %v12611_v38 = vor.u32 %v17287_v10, %v12610_v23  ;;  %v11799_v61 = vor.u32 %v17082_v36, %v11796_v24 }
 0x1aa   :  { %2588 = vmatpush.bf16.msra.mxu0 %v11815_v15  ;;  %2607 = vmatpush.bf16.msra.mxu1 %v11879_v22  ;;  %v17140_v3 = vld [vmem:[%s25440_s3 + $0x1f4] sm:$0xf]  ;;  %v12028_v15 = vld [vmem:[%s25440_s3 + $0x1f8] sm:$0xf0]  ;;  %v19685_v22 = vor.u32 %v17314_v44, %v11706_v4  ;;  %v11754_v0 = vld [vmem:[#allocation3 + $0x90] sm:$0xf]  ;;  %v11967_v9 = vor.u32 %v17124_v11, %v11964_v37 }
 0x1ab   :  { %v19689_v25 = vor.u32 %v17327_v50, %v11754_v0  ;;  %v17320_v55 = vld [vmem:[#allocation3 + $0x94] sm:$0xf]  ;;  %v17080_v23 = vld [vmem:[%s25440_s3 + $0x14] sm:$0xf]  ;;  %v11788_v4 = vld [vmem:[%s25440_s3 + $0x18] sm:$0xf0]  ;;  %v12031_v52 = vor.u32 %v17140_v3, %v12028_v15 }
 0x1ac   :  { %v19699_v44 = vor.u32 %v17320_v55, %v11756_v14  ;;  %v17096_v50 = vld [vmem:[%s25440_s3 + $0x94] sm:$0xf]  ;;  %v17122_v63 = vld [vmem:[%s25440_s3 + $0x164] sm:$0xf]  ;;  %v11956_v10 = vld [vmem:[%s25440_s3 + $0x168] sm:$0xf0]  ;;  %v11791_v18 = vor.u32 %v17080_v23, %v11788_v4 }
 0x1ad   :  { %2572 = vmatpush.bf16.msrb.mxu3 %v12619_v33  ;;  %2553 = vmatpush.bf16.msrb.mxu2 %v12555_v48  ;;  %v11863_v33 = vor.u32 %v17098_v35, %v11860_v42  ;;  %v11852_v48 = vld [vmem:[%s25440_s3 + $0x98] sm:$0xf0]  ;;  %v17138_v14 = vld [vmem:[%s25440_s3 + $0x1e4] sm:$0xf]  ;;  %v11780_v24 = vld [vmem:[%s25440_s3 + $0x8] sm:$0xf0]  ;;  %v11959_v11 = vor.u32 %v17122_v63, %v11956_v10 }
 0x1ae   :  { %2589 = vmatpush.bf16.msra.mxu0 %v11807_v46  ;;  %2608 = vmatpush.bf16.msra.mxu1 %v11871_v57  ;;  %v12020_v46 = vld [vmem:[%s25440_s3 + $0x1e8] sm:$0xf0]  ;;  %v17078_v57 = vld [vmem:[%s25440_s3 + $0x4] sm:$0xf]  ;;  %v11855_v36 = vor.u32 %v17096_v50, %v11852_v48  ;;  %v17120_v37 = vld [vmem:[%s25440_s3 + $0x154] sm:$0xf] }
 0x1af   :  { %2517 = vmatmul.bf16.vlgmr.msrb.gmra.mxu0 %v19685_v22  ;;  %2536 = vmatmul.bf16.vlgmr.msrb.gmra.mxu1 %v19687_v21  ;;  %v17094_v35 = vld [vmem:[%s25440_s3 + $0x84] sm:$0xf]  ;;  %v11844_v42 = vld [vmem:[%s25440_s3 + $0x88] sm:$0xf0]  ;;  %v11948_v3 = vld [vmem:[%s25440_s3 + $0x158] sm:$0xf0]  ;;  %v11783_v23 = vor.u32 %v17078_v57, %v11780_v24 }
 0x1b0   :  { %2484 = vmatmul.bf16.gmra.mxu2 %v19689_v25  ;;  %2503 = vmatmul.bf16.gmra.mxu3 %v19699_v44  ;;  %v17136_v15 = vld [vmem:[%s25440_s3 + $0x1d4] sm:$0xf]  ;;  %v12012_v0 = vld [vmem:[%s25440_s3 + $0x1d8] sm:$0xf0]  ;;  %799 = vst [vmem:[#allocation3 + $0xa0] sm:$0xff] %v19608_v17  ;;  %v11847_v4 = vor.u32 %v17094_v35, %v11844_v42 }
 0x1b1   :  { %2573 = vmatpush.bf16.msrb.mxu3 %v12611_v38  ;;  %2554 = vmatpush.bf16.msrb.mxu2 %v12547_v45  ;;  %v12023_v38 = vor.u32 %v17138_v14, %v12020_v46  ;;  %v17156_v45 = vld [vmem:[%s25440_s3 + $0x274] sm:$0xf]  ;;  %v12092_v55 = vld [vmem:[%s25440_s3 + $0x278] sm:$0xf0]  ;;  %v11762_v50 = vld [vmem:[#allocation3 + $0x98] sm:$0xf] }
 0x1b2   :  { %2590 = vmatpush.bf16.msra.mxu0 %v11799_v61  ;;  %2609 = vmatpush.bf16.msra.mxu1 %v11863_v33  ;;  %v17172_v61 = vld [vmem:[%s25440_s3 + $0x2f4] sm:$0xf]  ;;  %v12156_v33 = vld [vmem:[%s25440_s3 + $0x2f8] sm:$0xf0]  ;;  %v17328_v48 = vld [vmem:[#allocation3 + $0xcc] sm:$0xf0]  ;;  %v12095_v10 = vor.u32 %v17156_v45, %v12092_v55 }
 0x1b3   :  { %v17321_v63 = vld [vmem:[#allocation3 + $0x9c] sm:$0xf]  ;;  %v12159_v14 = vor.u32 %v17172_v61, %v12156_v33  ;;  %v11764_v46 = vld [vmem:[#allocation3 + $0xd0] sm:$0xf0]  ;;  %v17315_v62 = vld [vmem:[#allocation3 + $0x64] sm:$0xf0] }
 0x1b4   :  { %v17134_v6 = vld [vmem:[%s25440_s3 + $0x1c4] sm:$0xf]  ;;  %v12004_v17 = vld [vmem:[%s25440_s3 + $0x1c8] sm:$0xf0]  ;;  %v17132_v55 = vld [vmem:[%s25440_s3 + $0x1b4] sm:$0xf] }
 0x1b5   :  { %2623 = vmatpush.bf16.msra.mxu2 %v11967_v9  ;;  %2642 = vmatpush.bf16.msra.mxu3 %v12031_v52  ;;  %v11951_v9 = vor.u32 %v17120_v37, %v11948_v3  ;;  %v12015_v52 = vor.u32 %v17136_v15, %v12012_v0  ;;  %v17118_v57 = vld [vmem:[%s25440_s3 + $0x144] sm:$0xf]  ;;  %v12084_v24 = vld [vmem:[%s25440_s3 + $0x268] sm:$0xf0]  ;;  %v12007_v37 = vor.u32 %v17134_v6, %v12004_v17  ;;  %v11996_v61 = vld [vmem:[%s25440_s3 + $0x1b8] sm:$0xf0] }
 0x1b6   :  { %2591 = vmatpush.bf16.msra.mxu0 %v11791_v18  ;;  %2610 = vmatpush.bf16.msra.mxu1 %v11855_v36  ;;  %v11940_v18 = vld [vmem:[%s25440_s3 + $0x148] sm:$0xf0]  ;;  %v17154_v36 = vld [vmem:[%s25440_s3 + $0x264] sm:$0xf]  ;;  %v19782_v3 = vor.u32 %v17328_v48, %v11762_v50  ;;  %v19784_v15 = vor.u32 %v17321_v63, %v11764_v46  ;;  %v17116_v6 = vld [vmem:[%s25440_s3 + $0x134] sm:$0xf] }
 0x1b7   :  { %v17170_v35 = vld [vmem:[%s25440_s3 + $0x2e4] sm:$0xf]  ;;  %v12148_v42 = vld [vmem:[%s25440_s3 + $0x2e8] sm:$0xf0]  ;;  %v11943_v45 = vor.u32 %v17118_v57, %v11940_v18  ;;  %v12076_v50 = vld [vmem:[%s25440_s3 + $0x258] sm:$0xf0] }
 0x1b8   :  { %v17308_v0 = vld [vmem:[#allocation3 + $0x34] sm:$0xf]  ;;  %v17168_v48 = vld [vmem:[%s25440_s3 + $0x2d4] sm:$0xf]  ;;  %v12140_v63 = vld [vmem:[%s25440_s3 + $0x2d8] sm:$0xf0] }
 0x1b9   :  { %2624 = vmatpush.bf16.msra.mxu2 %v11959_v11  ;;  %2643 = vmatpush.bf16.msra.mxu3 %v12023_v38  ;;  %v11714_v11 = vld [vmem:[#allocation3 + $0x30] sm:$0xf]  ;;  %v11716_v38 = vld [vmem:[#allocation3 + $0x68] sm:$0xf0]  ;;  %v17130_v46 = vld [vmem:[%s25440_s3 + $0x1a4] sm:$0xf]  ;;  %v12143_v18 = vor.u32 %v17168_v48, %v12140_v63 }
 0x1ba   :  { %2592 = vmatpush.bf16.msra.mxu0 %v11783_v23  ;;  %2611 = vmatpush.bf16.msra.mxu1 %v11847_v4  ;;  %v19792_v33 = vor.u32 %v17315_v62, %v11714_v11  ;;  %v12087_v23 = vor.u32 %v17154_v36, %v12084_v24  ;;  %v12151_v4 = vor.u32 %v17170_v35, %v12148_v42  ;;  %v11988_v17 = vld [vmem:[%s25440_s3 + $0x1a8] sm:$0xf0]  ;;  %v17114_v36 = vld [vmem:[%s25440_s3 + $0x124] sm:$0xf]  ;;  %v12124_v48 = vld [vmem:[%s25440_s3 + $0x2b8] sm:$0xf0] }
 0x1bb   :  { %v19805_v62 = vor.u32 %v17308_v0, %v11716_v38  ;;  %v11924_v24 = vld [vmem:[%s25440_s3 + $0x128] sm:$0xf0]  ;;  %v17150_v35 = vld [vmem:[%s25440_s3 + $0x244] sm:$0xf] }
 0x1bc   :  { %v12068_v42 = vld [vmem:[%s25440_s3 + $0x248] sm:$0xf0]  ;;  %v17166_v11 = vld [vmem:[%s25440_s3 + $0x2c4] sm:$0xf]  ;;  %v11927_v0 = vor.u32 %v17114_v36, %v11924_v24 }
 0x1bd   :  { %2625 = vmatpush.bf16.msra.mxu2 %v11951_v9  ;;  %2644 = vmatpush.bf16.msra.mxu3 %v12015_v52  ;;  %v11932_v9 = vld [vmem:[%s25440_s3 + $0x138] sm:$0xf0]  ;;  %v17152_v52 = vld [vmem:[%s25440_s3 + $0x254] sm:$0xf]  ;;  %v12132_v38 = vld [vmem:[%s25440_s3 + $0x2c8] sm:$0xf0] }
 0x1be   :  { %2661 = vmatpush.bf16.msrb.mxu0 %v12095_v10  ;;  %2680 = vmatpush.bf16.msrb.mxu1 %v12159_v14  ;;  %v11999_v10 = vor.u32 %v17132_v55, %v11996_v61  ;;  %v11935_v14 = vor.u32 %v17116_v6, %v11932_v9  ;;  %v12079_v57 = vor.u32 %v17152_v52, %v12076_v50  ;;  %v11980_v55 = vld [vmem:[%s25440_s3 + $0x198] sm:$0xf0]  ;;  %v17148_v9 = vld [vmem:[%s25440_s3 + $0x234] sm:$0xf] }
 0x1bf   :  { %2522 = vmatmul.bf16.gmra.mxu0 %v19782_v3  ;;  %2541 = vmatmul.bf16.gmra.mxu1 %v19784_v15  ;;  %v12071_v61 = vor.u32 %v17150_v35, %v12068_v42  ;;  %v11916_v6 = vld [vmem:[%s25440_s3 + $0x118] sm:$0xf0]  ;;  %v17164_v50 = vld [vmem:[%s25440_s3 + $0x2b4] sm:$0xf]  ;;  %v11908_v35 = vld [vmem:[%s25440_s3 + $0x108] sm:$0xf0] }
 0x1c0   :  { %2555 = vmatmul.bf16.vlgmr.msrb.gmra.mxu2 %v19792_v33  ;;  %2574 = vmatmul.bf16.vlgmr.msrb.gmra.mxu3 %v19805_v62  ;;  %v12060_v52 = vld [vmem:[%s25440_s3 + $0x238] sm:$0xf0]  ;;  %v12127_v24 = vor.u32 %v17164_v50, %v12124_v48  ;;  %v17146_v42 = vld [vmem:[%s25440_s3 + $0x224] sm:$0xf]  ;;  %v17322_v50 = vld [vmem:[#allocation3 + $0xa4] sm:$0xf] }
 0x1c1   :  { %2645 = vmatpush.bf16.msra.mxu3 %v12007_v37  ;;  %2626 = vmatpush.bf16.msra.mxu2 %v11943_v45  ;;  %v11991_v37 = vor.u32 %v17130_v46, %v11988_v17  ;;  %v17128_v45 = vld [vmem:[%s25440_s3 + $0x194] sm:$0xf]  ;;  %v17110_v46 = vld [vmem:[%s25440_s3 + $0x104] sm:$0xf]  ;;  %v12063_v36 = vor.u32 %v17148_v9, %v12060_v52 }
 0x1c2   :  { %2662 = vmatpush.bf16.msrb.mxu0 %v12087_v23  ;;  %2681 = vmatpush.bf16.msrb.mxu1 %v12151_v4  ;;  %v12135_v23 = vor.u32 %v17166_v11, %v12132_v38  ;;  %v17112_v4 = vld [vmem:[%s25440_s3 + $0x114] sm:$0xf]  ;;  %v11983_v63 = vor.u32 %v17128_v45, %v11980_v55  ;;  %v17126_v17 = vld [vmem:[%s25440_s3 + $0x184] sm:$0xf]  ;;  %v12052_v11 = vld [vmem:[%s25440_s3 + $0x228] sm:$0xf0]  ;;  %v11911_v9 = vor.u32 %v17110_v46, %v11908_v35 }
 0x1c3   :  { %v17162_v38 = vld [vmem:[%s25440_s3 + $0x2a4] sm:$0xf]  ;;  %v12220_v55 = vld [vmem:[%s25440_s3 + $0x378] sm:$0xf0]  ;;  %v12055_v48 = vor.u32 %v17146_v42, %v12052_v11 }
 0x1c4   :  { %v17186_v35 = vld [vmem:[%s25440_s3 + $0x364] sm:$0xf] }
 0x1c5   :  { %2646 = vmatpush.bf16.msra.mxu3 %v11999_v10  ;;  %2627 = vmatpush.bf16.msra.mxu2 %v11935_v14  ;;  %v17329_v10 = vld [vmem:[#allocation3 + $0xd4] sm:$0xf0]  ;;  %v11919_v14 = vor.u32 %v17112_v4, %v11916_v6  ;;  %v11770_v4 = vld [vmem:[#allocation3 + $0xa0] sm:$0xf]  ;;  %v19905_v6 = vld [vmem:[%s25441_s4] sm:$0x3] }
 0x1c6   :  { %2663 = vmatpush.bf16.msrb.mxu0 %v12079_v57  ;;  %2682 = vmatpush.bf16.msrb.mxu1 %v12143_v18  ;;  %v11972_v57 = vld [vmem:[%s25440_s3 + $0x188] sm:$0xf0]  ;;  %v19907_v52 = vor.u32 %v17329_v10, %v11770_v4  ;;  %v19940_v42 = vperm.slane %v19905_v6, 0  ;;  %v17184_v4 = vld [vmem:[%s25440_s3 + $0x354] sm:$0xf] }
 0x1c7   :  { %v11772_v18 = vld [vmem:[#allocation3 + $0xd8] sm:$0xf0]  ;;  %v11975_v45 = vor.u32 %v17126_v17, %v11972_v57  ;;  %v17144_v17 = vld [vmem:[%s25440_s3 + $0x214] sm:$0xf]  ;;  %v12044_v57 = vld [vmem:[%s25440_s3 + $0x218] sm:$0xf0] }
 0x1c8   :  { %v12047_v11 = vor.u32 %v17144_v17, %v12044_v57  ;;  %v12348_v17 = vld [vmem:[%s25440_s3 + $0x478] sm:$0xf0]  ;;  %v17236_v57 = vld [vmem:[%s25440_s3 + $0x4f4] sm:$0xf] }
 0x1c9   :  { %2647 = vmatpush.bf16.msra.mxu3 %v11991_v37  ;;  %2628 = vmatpush.bf16.msra.mxu2 %v11927_v0  ;;  %v12116_v37 = vld [vmem:[%s25440_s3 + $0x2a8] sm:$0xf0]  ;;  %v17188_v0 = vld [vmem:[%s25440_s3 + $0x374] sm:$0xf] }
 0x1ca   :  { %2664 = vmatpush.bf16.msrb.mxu0 %v12071_v61  ;;  %2683 = vmatpush.bf16.msrb.mxu1 %v12135_v23  ;;  %v17204_v61 = vld [vmem:[%s25440_s3 + $0x3f4] sm:$0xf]  ;;  %v12284_v23 = vld [vmem:[%s25440_s3 + $0x3f8] sm:$0xf0]  ;;  %v12223_v10 = vor.u32 %v17188_v0, %v12220_v55  ;;  %v12036_v0 = vld [vmem:[%s25440_s3 + $0x208] sm:$0xf0] }
 0x1cb   :  { %v12287_v46 = vor.u32 %v17204_v61, %v12284_v23  ;;  %v12100_v23 = vld [vmem:[%s25440_s3 + $0x288] sm:$0xf0] }
 0x1cd   :  { %2648 = vmatpush.bf16.msra.mxu3 %v11983_v63  ;;  %2629 = vmatpush.bf16.msra.mxu2 %v11919_v14  ;;  %v12119_v63 = vor.u32 %v17162_v38, %v12116_v37  ;;  %v19917_v14 = vor.u32 %v17322_v50, %v11772_v18  ;;  %v12276_v18 = vld [vmem:[%s25440_s3 + $0x3e8] sm:$0xf0]  ;;  %v17142_v37 = vld [vmem:[%s25440_s3 + $0x204] sm:$0xf]  ;;  %v17200_v50 = vld [vmem:[%s25440_s3 + $0x3d4] sm:$0xf] }
 0x1ce   :  { %2665 = vmatpush.bf16.msrb.mxu0 %v12063_v36  ;;  %2684 = vmatpush.bf16.msrb.mxu1 %v12127_v24  ;;  %v17160_v36 = vld [vmem:[%s25440_s3 + $0x294] sm:$0xf]  ;;  %v12108_v24 = vld [vmem:[%s25440_s3 + $0x298] sm:$0xf0] }
 0x1cf   :  { %2593 = vmatmul.bf16.vlgmr.msra.gmra.mxu0 %v18926_v1  ;;  %2612 = vmatmul.bf16.vlgmr.msra.gmra.mxu1 %v18928_v43  ;;  %v12212_v1 = vld [vmem:[%s25440_s3 + $0x368] sm:$0xf0]  ;;  %v17202_v43 = vld [vmem:[%s25440_s3 + $0x3e4] sm:$0xf]  ;;  %v12111_v38 = vor.u32 %v17160_v36, %v12108_v24  ;;  %v12039_v36 = vor.u32 %v17142_v37, %v12036_v0 }
 0x1d0   :  { %2560 = vmatmul.bf16.gmra.mxu2 %v19907_v52  ;;  %2579 = vmatmul.bf16.gmra.mxu3 %v19917_v14  ;;  %v12215_v55 = vor.u32 %v17186_v35, %v12212_v1  ;;  %v12279_v61 = vor.u32 %v17202_v43, %v12276_v18  ;;  %v12196_v37 = vld [vmem:[%s25440_s3 + $0x348] sm:$0xf0]  ;;  %v17218_v0 = vld [vmem:[%s25440_s3 + $0x464] sm:$0xf] }
 0x1d1   :  { %2649 = vmatpush.bf16.msra.mxu3 %v11975_v45  ;;  %2630 = vmatpush.bf16.msra.mxu2 %v11911_v9  ;;  %v17158_v45 = vld [vmem:[%s25440_s3 + $0x284] sm:$0xf]  ;;  %v12204_v9 = vld [vmem:[%s25440_s3 + $0x358] sm:$0xf0] }
 0x1d2   :  { %2666 = vmatpush.bf16.msrb.mxu0 %v12055_v48  ;;  %2685 = vmatpush.bf16.msrb.mxu1 %v12119_v63  ;;  %v12268_v48 = vld [vmem:[%s25440_s3 + $0x3d8] sm:$0xf0]  ;;  %v17220_v63 = vld [vmem:[%s25440_s3 + $0x474] sm:$0xf]  ;;  %v12103_v24 = vor.u32 %v17158_v45, %v12100_v23  ;;  %v12207_v1 = vor.u32 %v17184_v4, %v12204_v9  ;;  %v12340_v45 = vld [vmem:[%s25440_s3 + $0x468] sm:$0xf0] }
 0x1d3   :  { %v12271_v43 = vor.u32 %v17200_v50, %v12268_v48  ;;  %v12351_v59 = vor.u32 %v17220_v63, %v12348_v17  ;;  %v17196_v50 = vld [vmem:[%s25440_s3 + $0x3b4] sm:$0xf]  ;;  %v12252_v48 = vld [vmem:[%s25440_s3 + $0x3b8] sm:$0xf0]  ;;  %v12343_v17 = vor.u32 %v17218_v0, %v12340_v45  ;;  %v12388_v0 = vld [vmem:[%s25440_s3 + $0x4c8] sm:$0xf0] }
 0x1d5   :  { %2699 = vmatpush.bf16.msrb.mxu2 %v12223_v10  ;;  %2718 = vmatpush.bf16.msrb.mxu3 %v12287_v46  ;;  %v12412_v10 = vld [vmem:[%s25440_s3 + $0x4f8] sm:$0xf0]  ;;  %v2328_v46 = vpop.f32.mrf.mxu2  ;;  %v2347_v18 = vpop.f32.mrf.mxu3 }
 0x1d6   :  { %2667 = vmatpush.bf16.msrb.mxu0 %v12047_v11  ;;  %2686 = vmatpush.bf16.msrb.mxu1 %v12111_v38  ;;  %v2329_v35 = vadd.f32 %v2328_v46, %v19940_v42  ;;  %v12415_v53 = vor.u32 %v17236_v57, %v12412_v10  ;;  %v12260_v11 = vld [vmem:[%s25440_s3 + $0x3c8] sm:$0xf0]  ;;  %v17182_v38 = vld [vmem:[%s25440_s3 + $0x344] sm:$0xf]  ;;  %v17180_v10 = vld [vmem:[%s25440_s3 + $0x334] sm:$0xf] }
 0x1d7   :  { %v12263_v23 = vor.u32 %v17198_v56, %v12260_v11  ;;  %v12199_v9 = vor.u32 %v17182_v38, %v12196_v37  ;;  %v12188_v56 = vld [vmem:[%s25440_s3 + $0x338] sm:$0xf0]  ;;  %v17232_v46 = vld [vmem:[%s25440_s3 + $0x4d4] sm:$0xf]  ;;  %v17214_v11 = vld [vmem:[%s25440_s3 + $0x444] sm:$0xf] }
 0x1d8   :  { %v2348_v13 = vadd.f32 %v2347_v18, %v2329_v35  ;;  %v17194_v35 = vld [vmem:[%s25440_s3 + $0x3a4] sm:$0xf]  ;;  %v12324_v38 = vld [vmem:[%s25440_s3 + $0x448] sm:$0xf0] }
 0x1d9   :  { %2700 = vmatpush.bf16.msrb.mxu2 %v12215_v55  ;;  %2719 = vmatpush.bf16.msrb.mxu3 %v12279_v61  ;;  %v17234_v55 = vld [vmem:[%s25440_s3 + $0x4e4] sm:$0xf]  ;;  %v12404_v61 = vld [vmem:[%s25440_s3 + $0x4e8] sm:$0xf0] }
 0x1da   :  { %2668 = vmatpush.bf16.msrb.mxu0 %v12039_v36  ;;  %2687 = vmatpush.bf16.msrb.mxu1 %v12103_v24  ;;  %v12407_v57 = vor.u32 %v17234_v55, %v12404_v61  ;;  %v12396_v36 = vld [vmem:[%s25440_s3 + $0x4d8] sm:$0xf0]  ;;  %v17230_v37 = vld [vmem:[%s25440_s3 + $0x4c4] sm:$0xf]  ;;  %v17192_v61 = vld [vmem:[%s25440_s3 + $0x394] sm:$0xf] }
 0x1db   :  { %v12399_v18 = vor.u32 %v17232_v46, %v12396_v36  ;;  %v12228_v46 = vld [vmem:[%s25440_s3 + $0x388] sm:$0xf0] }
 0x1dd   :  { %2701 = vmatpush.bf16.msrb.mxu2 %v12207_v1  ;;  %2720 = vmatpush.bf16.msrb.mxu3 %v12271_v43  ;;  %v12244_v1 = vld [vmem:[%s25440_s3 + $0x3a8] sm:$0xf0] }
 0x1de   :  { %2737 = vmatpush.bf16.msra.mxu0 %v12351_v59  ;;  %2756 = vmatpush.bf16.msra.mxu1 %v12415_v53  ;;  %v17216_v53 = vld [vmem:[%s25440_s3 + $0x454] sm:$0xf]  ;;  %v12247_v45 = vor.u32 %v17194_v35, %v12244_v1  ;;  %v17210_v35 = vld [vmem:[%s25440_s3 + $0x424] sm:$0xf]  ;;  %v12308_v1 = vld [vmem:[%s25440_s3 + $0x428] sm:$0xf0] }
 0x1df   :  { %v2366_v4 = vpop.f32.mrf.mxu0  ;;  %v2385_v59 = vpop.f32.mrf.mxu1  ;;  %2598 = vmatmul.bf16.gmra.mxu0 %v19184_v5  ;;  %2617 = vmatmul.bf16.gmra.mxu1 %v19192_v29  ;;  %v12255_v5 = vor.u32 %v17196_v50, %v12252_v48  ;;  %v12191_v29 = vor.u32 %v17180_v10, %v12188_v56  ;;  %v17176_v50 = vld [vmem:[%s25440_s3 + $0x314] sm:$0xf]  ;;  %v12172_v48 = vld [vmem:[%s25440_s3 + $0x318] sm:$0xf0] }
 0x1e0   :  { %v2367_v63 = vadd.f32 %v2366_v4, %v2348_v13  ;;  %v12332_v13 = vld [vmem:[%s25440_s3 + $0x458] sm:$0xf0]  ;;  %2631 = vmatmul.bf16.vlgmr.msra.gmra.mxu2 %v19032_v39  ;;  %2650 = vmatmul.bf16.vlgmr.msra.gmra.mxu3 %v19034_v58  ;;  %v17178_v39 = vld [vmem:[%s25440_s3 + $0x324] sm:$0xf]  ;;  %v12180_v58 = vld [vmem:[%s25440_s3 + $0x328] sm:$0xf0]  ;;  %v12327_v4 = vor.u32 %v17214_v11, %v12324_v38  ;;  %v20110_v11 = vpop.f32.mrf.mxu3 }
 0x1e1   :  { %2721 = vmatpush.bf16.msrb.mxu3 %v12263_v23  ;;  %2702 = vmatpush.bf16.msrb.mxu2 %v12199_v9  ;;  %v12335_v43 = vor.u32 %v17216_v53, %v12332_v13  ;;  %v12183_v55 = vor.u32 %v17178_v39, %v12180_v58  ;;  %v12236_v23 = vld [vmem:[%s25440_s3 + $0x398] sm:$0xf0]  ;;  %v12391_v9 = vor.u32 %v17230_v37, %v12388_v0  ;;  %v17190_v13 = vld [vmem:[%s25440_s3 + $0x384] sm:$0xf]  ;;  %v12372_v39 = vld [vmem:[%s25440_s3 + $0x4a8] sm:$0xf0] }
 0x1e2   :  { %v20029_v24 = vadd.f32 %v2385_v59, %v2367_v63  ;;  %2738 = vmatpush.bf16.msra.mxu0 %v12343_v17  ;;  %2757 = vmatpush.bf16.msra.mxu1 %v12407_v57  ;;  %v17212_v63 = vld [vmem:[%s25440_s3 + $0x434] sm:$0xf]  ;;  %v12316_v17 = vld [vmem:[%s25440_s3 + $0x438] sm:$0xf0]  ;;  %v12239_v56 = vor.u32 %v17192_v61, %v12236_v23  ;;  %v12175_v53 = vor.u32 %v17176_v50, %v12172_v48  ;;  %v17174_v59 = vld [vmem:[%s25440_s3 + $0x304] sm:$0xf] }
 0x1e3   :  { %v17228_v57 = vld [vmem:[%s25440_s3 + $0x4b4] sm:$0xf]  ;;  %v12380_v10 = vld [vmem:[%s25440_s3 + $0x4b8] sm:$0xf0]  ;;  %v12319_v36 = vor.u32 %v17212_v63, %v12316_v17  ;;  %v12231_v38 = vor.u32 %v17190_v13, %v12228_v46  ;;  %v12311_v61 = vor.u32 %v17210_v35, %v12308_v1  ;;  %v17222_v13 = vld [vmem:[%s25440_s3 + $0x484] sm:$0xf] }
 0x1e4   :  { %v17252_v58 = vld [vmem:[%s25440_s3 + $0x574] sm:$0xf]  ;;  %v12476_v37 = vld [vmem:[%s25440_s3 + $0x578] sm:$0xf0] }
 0x1e5   :  { %2722 = vmatpush.bf16.msrb.mxu3 %v12255_v5  ;;  %2703 = vmatpush.bf16.msrb.mxu2 %v12191_v29  ;;  %v12383_v5 = vor.u32 %v17228_v57, %v12380_v10  ;;  %v12164_v29 = vld [vmem:[%s25440_s3 + $0x308] sm:$0xf0]  ;;  %v17268_v0 = vld [vmem:[%s25440_s3 + $0x5f4] sm:$0xf]  ;;  %v12479_v50 = vor.u32 %v17252_v58, %v12476_v37  ;;  %v12364_v17 = vld [vmem:[%s25440_s3 + $0x498] sm:$0xf0] }
 0x1e6   :  { %2739 = vmatpush.bf16.msra.mxu0 %v12335_v43  ;;  %2758 = vmatpush.bf16.msra.mxu1 %v12399_v18  ;;  %v20099_v43 = vpop.f32.mrf.mxu2  ;;  %v17226_v18 = vld [vmem:[%s25440_s3 + $0x4a4] sm:$0xf]  ;;  %v17224_v63 = vld [vmem:[%s25440_s3 + $0x494] sm:$0xf]  ;;  %v12532_v10 = vld [vmem:[%s25440_s3 + $0x5e8] sm:$0xf0] }
 0x1e7   :  { %v12375_v23 = vor.u32 %v17226_v18, %v12372_v39  ;;  %v17250_v57 = vld [vmem:[%s25440_s3 + $0x564] sm:$0xf]  ;;  %v20158_v46 = vpop.f32.mrf.mxu0  ;;  %v17248_v35 = vld [vmem:[%s25440_s3 + $0x554] sm:$0xf]  ;;  %v12460_v1 = vld [vmem:[%s25440_s3 + $0x558] sm:$0xf0]  ;;  %v20169_v18 = vpop.f32.mrf.mxu1  ;;  %v2331_v16 = vadd.f32 %v20099_v43, %v19940_v42 }
 0x1e8   :  { %v12524_v37 = vld [vmem:[%s25440_s3 + $0x5d8] sm:$0xf0] }
 0x1e9   :  { %2723 = vmatpush.bf16.msrb.mxu3 %v12247_v45  ;;  %2704 = vmatpush.bf16.msrb.mxu2 %v12183_v55  ;;  %v12540_v45 = vld [vmem:[%s25440_s3 + $0x5f8] sm:$0xf0]  ;;  %v12167_v55 = vor.u32 %v17174_v59, %v12164_v29  ;;  %v12292_v59 = vld [vmem:[%s25440_s3 + $0x408] sm:$0xf0] }
 0x1ea   :  { %2740 = vmatpush.bf16.msra.mxu0 %v12327_v4  ;;  %2759 = vmatpush.bf16.msra.mxu1 %v12391_v9  ;;  %v17208_v4 = vld [vmem:[%s25440_s3 + $0x414] sm:$0xf]  ;;  %v12300_v9 = vld [vmem:[%s25440_s3 + $0x418] sm:$0xf0]  ;;  %v12543_v48 = vor.u32 %v17268_v0, %v12540_v45  ;;  %v12356_v29 = vld [vmem:[%s25440_s3 + $0x488] sm:$0xf0] }
 0x1eb   :  { %v17284_v0 = vld [vmem:[%s25440_s3 + $0x674] sm:$0xf]  ;;  %v12604_v45 = vld [vmem:[%s25440_s3 + $0x678] sm:$0xf0] }
 0x1ed   :  { %2724 = vmatpush.bf16.msrb.mxu3 %v12239_v56  ;;  %2705 = vmatpush.bf16.msrb.mxu2 %v12175_v53  ;;  %v12303_v56 = vor.u32 %v17208_v4, %v12300_v9  ;;  %v17206_v53 = vld [vmem:[%s25440_s3 + $0x404] sm:$0xf]  ;;  %v12359_v9 = vor.u32 %v17222_v13, %v12356_v29  ;;  %v12660_v13 = vld [vmem:[%s25440_s3 + $0x6e8] sm:$0xf0] }
 0x1ee   :  { %2741 = vmatpush.bf16.msra.mxu0 %v12319_v36  ;;  %2760 = vmatpush.bf16.msra.mxu1 %v12383_v5  ;;  %v12295_v4 = vor.u32 %v17206_v53, %v12292_v59  ;;  %v12596_v53 = vld [vmem:[%s25440_s3 + $0x668] sm:$0xf0]  ;;  %v17298_v59 = vld [vmem:[%s25440_s3 + $0x6e4] sm:$0xf] }
 0x1ef   :  { %2669 = vmatmul.bf16.vlgmr.msrb.gmra.mxu0 %v19310_v12  ;;  %2688 = vmatmul.bf16.vlgmr.msrb.gmra.mxu1 %v19326_v49  ;;  %v12468_v12 = vld [vmem:[%s25440_s3 + $0x568] sm:$0xf0]  ;;  %v17266_v49 = vld [vmem:[%s25440_s3 + $0x5e4] sm:$0xf] }
 0x1f0   :  { %2636 = vmatmul.bf16.gmra.mxu2 %v19297_v40  ;;  %2655 = vmatmul.bf16.gmra.mxu3 %v19299_v41  ;;  %v12367_v40 = vor.u32 %v17224_v63, %v12364_v17  ;;  %v12471_v36 = vor.u32 %v17250_v57, %v12468_v12  ;;  %v12535_v5 = vor.u32 %v17266_v49, %v12532_v10  ;;  %v17262_v57 = vld [vmem:[%s25440_s3 + $0x5c4] sm:$0xf]  ;;  %v12516_v12 = vld [vmem:[%s25440_s3 + $0x5c8] sm:$0xf0] }
 0x1f1   :  { %2725 = vmatpush.bf16.msrb.mxu3 %v12231_v38  ;;  %2706 = vmatpush.bf16.msrb.mxu2 %v12167_v55  ;;  %v17264_v38 = vld [vmem:[%s25440_s3 + $0x5d4] sm:$0xf]  ;;  %v12607_v63 = vor.u32 %v17284_v0, %v12604_v45  ;;  %v17246_v49 = vld [vmem:[%s25440_s3 + $0x544] sm:$0xf]  ;;  %v12452_v10 = vld [vmem:[%s25440_s3 + $0x548] sm:$0xf0]  ;;  %v12519_v29 = vor.u32 %v17262_v57, %v12516_v12  ;;  %v12663_v45 = vor.u32 %v17298_v59, %v12660_v13 }
 0x1f2   :  { %2742 = vmatpush.bf16.msra.mxu0 %v12311_v61  ;;  %2761 = vmatpush.bf16.msra.mxu1 %v12375_v23  ;;  %v17300_v55 = vld [vmem:[%s25440_s3 + $0x6f4] sm:$0xf]  ;;  %v12668_v61 = vld [vmem:[%s25440_s3 + $0x6f8] sm:$0xf0] }
 0x1f3   :  { %v2333_v41 = vpop.f32.mrf.mxu2  ;;  %v2352_v58 = vpop.f32.mrf.mxu3  ;;  %v12671_v17 = vor.u32 %v17300_v55, %v12668_v61  ;;  %v17244_v55 = vld [vmem:[%s25440_s3 + $0x534] sm:$0xf]  ;;  %v12444_v61 = vld [vmem:[%s25440_s3 + $0x538] sm:$0xf0] }
 0x1f4   :  { %v2334_v39 = vadd.f32 %v2333_v41, %v19940_v42 }
 0x1f5   :  { %2775 = vmatpush.bf16.msra.mxu2 %v12479_v50  ;;  %2794 = vmatpush.bf16.msra.mxu3 %v12543_v48  ;;  %v12463_v50 = vor.u32 %v17248_v35, %v12460_v1  ;;  %v12527_v48 = vor.u32 %v17264_v38, %v12524_v37  ;;  %v12508_v38 = vld [vmem:[%s25440_s3 + $0x5b8] sm:$0xf0] }
 0x1f6   :  { %v2353_v23 = vadd.f32 %v2352_v58, %v2334_v39  ;;  %2743 = vmatpush.bf16.msra.mxu0 %v12303_v56  ;;  %2762 = vmatpush.bf16.msra.mxu1 %v12367_v40  ;;  %v17282_v56 = vld [vmem:[%s25440_s3 + $0x664] sm:$0xf]  ;;  %v12455_v39 = vor.u32 %v17246_v49, %v12452_v10  ;;  %v17260_v58 = vld [vmem:[%s25440_s3 + $0x5b4] sm:$0xf] }
 0x1f7   :  { %v12599_v0 = vor.u32 %v17282_v56, %v12596_v53  ;;  %v17278_v49 = vld [vmem:[%s25440_s3 + $0x644] sm:$0xf]  ;;  %v12580_v56 = vld [vmem:[%s25440_s3 + $0x648] sm:$0xf0] }
 0x1f8   :  { %v12644_v53 = vld [vmem:[%s25440_s3 + $0x6c8] sm:$0xf0] }
 0x1f9   :  { %2776 = vmatpush.bf16.msra.mxu2 %v12471_v36  ;;  %2795 = vmatpush.bf16.msra.mxu3 %v12535_v5  ;;  %v2371_v41 = vpop.f32.mrf.mxu0 }
 0x1fa   :  { %2744 = vmatpush.bf16.msra.mxu0 %v12295_v4  ;;  %2763 = vmatpush.bf16.msra.mxu1 %v12359_v9  ;;  %v2372_v35 = vadd.f32 %v2371_v41, %v2353_v23  ;;  %v17280_v23 = vld [vmem:[%s25440_s3 + $0x654] sm:$0xf]  ;;  %v12588_v9 = vld [vmem:[%s25440_s3 + $0x658] sm:$0xf0] }
 0x1fb   :  { %v2335_v40 = vpop.f32.mrf.mxu2  ;;  %v2354_v1 = vpop.f32.mrf.mxu3  ;;  %v12591_v57 = vor.u32 %v17280_v23, %v12588_v9  ;;  %v17292_v23 = vld [vmem:[%s25440_s3 + $0x6b4] sm:$0xf]  ;;  %v12636_v9 = vld [vmem:[%s25440_s3 + $0x6b8] sm:$0xf0] }
 0x1fc   :  { %v2390_v36 = vpop.f32.mrf.mxu1  ;;  %v2336_v5 = vadd.f32 %v2335_v40, %v19940_v42  ;;  %v17294_v40 = vld [vmem:[%s25440_s3 + $0x6c4] sm:$0xf] }
 0x1fd   :  { %2777 = vmatpush.bf16.msra.mxu2 %v12463_v50  ;;  %2796 = vmatpush.bf16.msra.mxu3 %v12527_v48  ;;  %v20230_v4 = vadd.f32 %v2390_v36, %v2372_v35  ;;  %v17296_v50 = vld [vmem:[%s25440_s3 + $0x6d4] sm:$0xf]  ;;  %v12652_v48 = vld [vmem:[%s25440_s3 + $0x6d8] sm:$0xf0] }
 0x1fe   :  { %2813 = vmatpush.bf16.msrb.mxu0 %v12607_v63  ;;  %2832 = vmatpush.bf16.msrb.mxu1 %v12671_v17  ;;  %v2355_v37 = vadd.f32 %v2354_v1, %v2336_v5  ;;  %v12511_v63 = vor.u32 %v17260_v58, %v12508_v38  ;;  %v12500_v17 = vld [vmem:[%s25440_s3 + $0x5a8] sm:$0xf0]  ;;  %v12655_v12 = vor.u32 %v17296_v50, %v12652_v48  ;;  %v17256_v1 = vld [vmem:[%s25440_s3 + $0x594] sm:$0xf] }
 0x1ff   :  { %2674 = vmatmul.bf16.gmra.mxu0 %v19440_v7  ;;  %2693 = vmatmul.bf16.gmra.mxu1 %v19448_v30  ;;  %v12447_v7 = vor.u32 %v17244_v55, %v12444_v61  ;;  %v17258_v30 = vld [vmem:[%s25440_s3 + $0x5a4] sm:$0xf]  ;;  %v12583_v38 = vor.u32 %v17278_v49, %v12580_v56  ;;  %v12572_v61 = vld [vmem:[%s25440_s3 + $0x638] sm:$0xf0]  ;;  %v12564_v49 = vld [vmem:[%s25440_s3 + $0x628] sm:$0xf0] }
 0x200   :  { %2707 = vmatmul.bf16.vlgmr.msrb.gmra.mxu2 %v19427_v47  ;;  %2726 = vmatmul.bf16.vlgmr.msrb.gmra.mxu3 %v19429_v34  ;;  %v17242_v47 = vld [vmem:[%s25440_s3 + $0x524] sm:$0xf]  ;;  %v12436_v34 = vld [vmem:[%s25440_s3 + $0x528] sm:$0xf0]  ;;  %v12503_v36 = vor.u32 %v17258_v30, %v12500_v17  ;;  %v12639_v17 = vor.u32 %v17292_v23, %v12636_v9 }
 0x201   :  { %2797 = vmatpush.bf16.msra.mxu3 %v12519_v29  ;;  %2778 = vmatpush.bf16.msra.mxu2 %v12455_v39  ;;  %v2373_v59 = vpop.f32.mrf.mxu0  ;;  %v12439_v35 = vor.u32 %v17242_v47, %v12436_v34  ;;  %v12492_v39 = vld [vmem:[%s25440_s3 + $0x598] sm:$0xf0]  ;;  %v17274_v47 = vld [vmem:[%s25440_s3 + $0x624] sm:$0xf]  ;;  %v12628_v56 = vld [vmem:[%s25440_s3 + $0x6a8] sm:$0xf0] }
 0x202   :  { %2814 = vmatpush.bf16.msrb.mxu0 %v12599_v0  ;;  %2833 = vmatpush.bf16.msrb.mxu1 %v12663_v45  ;;  %v2374_v5 = vadd.f32 %v2373_v59, %v2355_v37  ;;  %v12647_v0 = vor.u32 %v17294_v40, %v12644_v53  ;;  %v12428_v37 = vld [vmem:[%s25440_s3 + $0x518] sm:$0xf0]  ;;  %v17276_v45 = vld [vmem:[%s25440_s3 + $0x634] sm:$0xf]  ;;  %v12495_v50 = vor.u32 %v17256_v1, %v12492_v39 }
 0x203   :  { %v2404_v10 = vpop.f32.mrf.mxu2  ;;  %v2423_v29 = vpop.f32.mrf.mxu3  ;;  %v12575_v30 = vor.u32 %v17276_v45, %v12572_v61  ;;  %v12556_v39 = vld [vmem:[%s25440_s3 + $0x618] sm:$0xf0] }
 0x204   :  { %v2392_v13 = vpop.f32.mrf.mxu1  ;;  %v2405_v41 = vadd.f32 %v2404_v10, %v20029_v24  ;;  %v17240_v24 = vld [vmem:[%s25440_s3 + $0x514] sm:$0xf]  ;;  %v17290_v10 = vld [vmem:[%s25440_s3 + $0x6a4] sm:$0xf] }
 0x205   :  { %2798 = vmatpush.bf16.msra.mxu3 %v12511_v63  ;;  %2779 = vmatpush.bf16.msra.mxu2 %v12447_v7  ;;  %v20285_v55 = vadd.f32 %v2392_v13, %v2374_v5  ;;  %v12431_v48 = vor.u32 %v17240_v24, %v12428_v37  ;;  %v17254_v63 = vld [vmem:[%s25440_s3 + $0x584] sm:$0xf]  ;;  %v12484_v7 = vld [vmem:[%s25440_s3 + $0x588] sm:$0xf0]  ;;  %v12567_v5 = vor.u32 %v17274_v47, %v12564_v49 }
 0x206   :  { %v2424_v58 = vadd.f32 %v2423_v29, %v2405_v41  ;;  %2815 = vmatpush.bf16.msrb.mxu0 %v12591_v57  ;;  %2834 = vmatpush.bf16.msrb.mxu1 %v12655_v12  ;;  %v17238_v57 = vld [vmem:[%s25440_s3 + $0x504] sm:$0xf]  ;;  %v12420_v12 = vld [vmem:[%s25440_s3 + $0x508] sm:$0xf0]  ;;  %v12487_v59 = vor.u32 %v17254_v63, %v12484_v7  ;;  %v12631_v29 = vor.u32 %v17290_v10, %v12628_v56 }
 0x207   :  { %v12548_v37 = vld [vmem:[%s25440_s3 + $0x608] sm:$0xf0] }
 0x209   :  { %2799 = vmatpush.bf16.msra.mxu3 %v12503_v36  ;;  %2780 = vmatpush.bf16.msra.mxu2 %v12439_v35  ;;  %v2442_v40 = vpop.f32.mrf.mxu0  ;;  %v12423_v36 = vor.u32 %v17238_v57, %v12420_v12  ;;  %v17272_v35 = vld [vmem:[%s25440_s3 + $0x614] sm:$0xf] }
 0x20a   :  { %2816 = vmatpush.bf16.msrb.mxu0 %v12583_v38  ;;  %2835 = vmatpush.bf16.msrb.mxu1 %v12647_v0  ;;  %v2443_v13 = vadd.f32 %v2442_v40, %v2424_v58  ;;  %v17288_v58 = vld [vmem:[%s25440_s3 + $0x694] sm:$0xf]  ;;  %v12620_v38 = vld [vmem:[%s25440_s3 + $0x698] sm:$0xf0]  ;;  %v17270_v0 = vld [vmem:[%s25440_s3 + $0x604] sm:$0xf] }
 0x20b   :  { %v20311_v34 = vpop.f32.mrf.mxu2  ;;  %v20322_v41 = vpop.f32.mrf.mxu3 }
 0x20c   :  { %v2461_v53 = vpop.f32.mrf.mxu1 }
 0x20d   :  { %2800 = vmatpush.bf16.msra.mxu3 %v12495_v50  ;;  %2781 = vmatpush.bf16.msra.mxu2 %v12431_v48  ;;  %v2462_v1 = vadd.f32 %v2461_v53, %v2443_v13  ;;  %v12551_v48 = vor.u32 %v17270_v0, %v12548_v37 }
 0x20e   :  { %2817 = vmatpush.bf16.msrb.mxu0 %v12575_v30  ;;  %2836 = vmatpush.bf16.msrb.mxu1 %v12639_v17 }
 0x20f   :  { %2745 = vmatmul.bf16.vlgmr.msra.gmra.mxu0 %v19565_v19  ;;  %2764 = vmatmul.bf16.vlgmr.msra.gmra.mxu1 %v19578_v60  ;;  %v12559_v19 = vor.u32 %v17272_v35, %v12556_v39  ;;  %v12623_v60 = vor.u32 %v17288_v58, %v12620_v38 }
 0x210   :  { %2712 = vmatmul.bf16.gmra.mxu2 %v19555_v27  ;;  %2731 = vmatmul.bf16.gmra.mxu3 %v19557_v8  ;;  %v17286_v27 = vld [vmem:[%s25440_s3 + $0x684] sm:$0xf]  ;;  %v12612_v8 = vld [vmem:[%s25440_s3 + $0x688] sm:$0xf0] }
 0x211   :  { %2801 = vmatpush.bf16.msra.mxu3 %v12487_v59  ;;  %2782 = vmatpush.bf16.msra.mxu2 %v12423_v36  ;;  %v20352_v45 = vpop.f32.mrf.mxu0  ;;  %v12615_v63 = vor.u32 %v17286_v27, %v12612_v8  ;;  %v20394_v8 = vperm.slane %v19905_v6, 1 }
 0x212   :  { %2818 = vmatpush.bf16.msrb.mxu0 %v12567_v5  ;;  %2837 = vmatpush.bf16.msrb.mxu1 %v12631_v29 }
 0x213   :  { %v2409_v24 = vpop.f32.mrf.mxu2  ;;  %v2428_v9 = vpop.f32.mrf.mxu3 }
 0x214   :  { %v20354_v61 = vpop.f32.mrf.mxu1  ;;  %v2410_v23 = vadd.f32 %v2409_v24, %v20230_v4 }
 0x216   :  { %v2429_v50 = vadd.f32 %v2428_v9, %v2410_v23  ;;  %2819 = vmatpush.bf16.msrb.mxu0 %v12559_v19  ;;  %2838 = vmatpush.bf16.msrb.mxu1 %v12623_v60 }
 0x21a   :  { %2820 = vmatpush.bf16.msrb.mxu0 %v12551_v48  ;;  %2839 = vmatpush.bf16.msrb.mxu1 %v12615_v63 }
 0x21b   :  { %v20357_v7 = vpop.f32.mrf.mxu2  ;;  %v20359_v12 = vpop.f32.mrf.mxu3 }
 0x21c   :  { %v2447_v30 = vpop.f32.mrf.mxu0  ;;  %v2466_v17 = vpop.f32.mrf.mxu1 }
 0x21d   :  { %v2448_v57 = vadd.f32 %v2447_v30, %v2429_v50 }
 0x21f   :  { %v2467_v47 = vadd.f32 %v2466_v17, %v2448_v57  ;;  %2750 = vmatmul.bf16.gmra.mxu0 %v19689_v25  ;;  %2769 = vmatmul.bf16.gmra.mxu1 %v19699_v44 }
 0x220   :  { %2783 = vmatmul.bf16.vlgmr.msra.gmra.mxu2 %v19685_v22  ;;  %2802 = vmatmul.bf16.vlgmr.msra.gmra.mxu3 %v19687_v21 }
 0x223   :  { %v2480_v4 = vpop.f32.mrf.mxu2  ;;  %v2499_v40 = vpop.f32.mrf.mxu3 }
 0x224   :  { %v20365_v49 = vpop.f32.mrf.mxu0  ;;  %v20367_v10 = vpop.f32.mrf.mxu1  ;;  %v2481_v56 = vadd.f32 %v2480_v4, %v2462_v1 }
 0x226   :  { %v2500_v53 = vadd.f32 %v2499_v40, %v2481_v56 }
 0x22b   :  { %v20369_v59 = vpop.f32.mrf.mxu2  ;;  %v20371_v25 = vpop.f32.mrf.mxu3 }
 0x22c   :  { %v2518_v13 = vpop.f32.mrf.mxu0  ;;  %v2537_v36 = vpop.f32.mrf.mxu1 }
 0x22d   :  { %v2519_v5 = vadd.f32 %v2518_v13, %v2500_v53 }
 0x22f   :  { %v2538_v44 = vadd.f32 %v2537_v36, %v2519_v5  ;;  %2821 = vmatmul.bf16.vlgmr.msrb.gmra.mxu0 %v19792_v33  ;;  %2840 = vmatmul.bf16.vlgmr.msrb.gmra.mxu1 %v19805_v62 }
 0x230   :  { %2788 = vmatmul.bf16.gmra.mxu2 %v19782_v3  ;;  %2807 = vmatmul.bf16.gmra.mxu3 %v19784_v15 }
 0x233   :  { %v2485_v22 = vpop.f32.mrf.mxu2  ;;  %v2504_v1 = vpop.f32.mrf.mxu3 }
 0x234   :  { %v20377_v21 = vpop.f32.mrf.mxu0  ;;  %v20379_v29 = vpop.f32.mrf.mxu1  ;;  %v2486_v35 = vadd.f32 %v2485_v22, %v2467_v47 }
 0x236   :  { %v2505_v39 = vadd.f32 %v2504_v1, %v2486_v35 }
 0x23b   :  { %v20381_v58 = vpop.f32.mrf.mxu2  ;;  %v20383_v33 = vpop.f32.mrf.mxu3 }
 0x23c   :  { %v2523_v38 = vpop.f32.mrf.mxu0  ;;  %v2542_v19 = vpop.f32.mrf.mxu1  ;;  %25511 = vst [vmem:[#allocation18_spill] sm:$0xff] %v20383_v33 }
 0x23d   :  { %v2524_v60 = vadd.f32 %v2523_v38, %v2505_v39 }
 0x23f   :  { %v2543_v62 = vadd.f32 %v2542_v19, %v2524_v60  ;;  %2826 = vmatmul.bf16.gmra.mxu0 %v19907_v52  ;;  %2845 = vmatmul.bf16.gmra.mxu1 %v19917_v14 }
 0x243   :  { %v2556_v3 = vpop.f32.mrf.mxu2  ;;  %v2575_v37 = vpop.f32.mrf.mxu3 }
 0x244   :  { %v20387_v15 = vpop.f32.mrf.mxu0  ;;  %v20389_v0 = vpop.f32.mrf.mxu1  ;;  %v2557_v24 = vadd.f32 %v2556_v3, %v2538_v44 }
 0x245   :  { %25512 = vst [vmem:[#allocation19_spill] sm:$0xff] %v20387_v15 }
 0x246   :  { %25513 = vst [vmem:[#allocation20_spill] sm:$0xff] %v20389_v0  ;;  %v20391_v27 = vadd.f32 %v2575_v37, %v2557_v24 }
 0x24b   :  { %v20396_v23 = vpop.f32.mrf.mxu2  ;;  %v20399_v48 = vpop.f32.mrf.mxu3 }
 0x24c   :  { %v2594_v9 = vpop.f32.mrf.mxu0  ;;  %v2613_v50 = vpop.f32.mrf.mxu1 }
 0x24d   :  { %v2595_v52 = vadd.f32 %v2594_v9, %v20394_v8 }
 0x24f   :  { %v2614_v14 = vadd.f32 %v2613_v50, %v2595_v52 }
 0x253   :  { %v2561_v63 = vpop.f32.mrf.mxu2  ;;  %v2580_v47 = vpop.f32.mrf.mxu3 }
 0x254   :  { %v2596_v30 = vpop.f32.mrf.mxu0  ;;  %v2615_v17 = vpop.f32.mrf.mxu1  ;;  %v2562_v57 = vadd.f32 %v2561_v63, %v2543_v62 }
 0x256   :  { %v20401_v4 = vadd.f32 %v2580_v47, %v2562_v57 }
 0x258   :  { %25514 = vst [vmem:[#allocation21_spill] sm:$0xff] %v20401_v4 }
 0x25b   :  { %v20403_v56 = vpop.f32.mrf.mxu2  ;;  %v20406_v13 = vpop.f32.mrf.mxu3 }
 0x25c   :  { %25515 = vst [vmem:[#allocation22_spill] sm:$0xff] %v20403_v56  ;;  %v2599_v6 = vpop.f32.mrf.mxu0  ;;  %v2618_v40 = vpop.f32.mrf.mxu1 }
 0x25d   :  { %v2600_v53 = vadd.f32 %v2599_v6, %v20394_v8  ;;  %25516 = vst [vmem:[#allocation23_spill] sm:$0xff] %v20406_v13 }
 0x25f   :  { %v2619_v36 = vadd.f32 %v2618_v40, %v2600_v53 }
 0x263   :  { %v2632_v5 = vpop.f32.mrf.mxu2  ;;  %v2651_v35 = vpop.f32.mrf.mxu3 }
 0x264   :  { %v20408_v44 = vpop.f32.mrf.mxu0  ;;  %v20410_v22 = vpop.f32.mrf.mxu1 }
 0x26b   :  { %v2634_v1 = vpop.f32.mrf.mxu2  ;;  %v2653_v19 = vpop.f32.mrf.mxu3 }
 0x26c   :  { %v2670_v39 = vpop.f32.mrf.mxu0  ;;  %v2689_v38 = vpop.f32.mrf.mxu1 }
 0x273   :  { %v2637_v60 = vpop.f32.mrf.mxu2  ;;  %v2656_v37 = vpop.f32.mrf.mxu3 }
 0x274   :  { %v2672_v62 = vpop.f32.mrf.mxu0  ;;  %v2691_v3 = vpop.f32.mrf.mxu1  ;;  %v2638_v24 = vadd.f32 %v2637_v60, %v2619_v36  ;;  %v2350_v60 = vadd.f32 %v20110_v11, %v2331_v16 }
 0x276   :  { %v2657_v9 = vadd.f32 %v2656_v37, %v2638_v24  ;;  %v2633_v24 = vadd.f32 %v2632_v5, %v2614_v14  ;;  %v2597_v37 = vadd.f32 %v2596_v30, %v20394_v8 }
 0x278   :  { %v2616_v32 = vadd.f32 %v2615_v17, %v2597_v37 }
 0x27a   :  { %v2635_v56 = vadd.f32 %v2634_v1, %v2616_v32 }
 0x27b   :  { %v20412_v50 = vpop.f32.mrf.mxu2  ;;  %v20414_v47 = vpop.f32.mrf.mxu3 }
 0x27c   :  { %v2675_v52 = vpop.f32.mrf.mxu0  ;;  %v2694_v63 = vpop.f32.mrf.mxu1  ;;  %v2654_v14 = vadd.f32 %v2653_v19, %v2635_v56 }
 0x27d   :  { %v2676_v57 = vadd.f32 %v2675_v52, %v2657_v9 }
 0x27e   :  { %v2673_v33 = vadd.f32 %v2672_v62, %v2654_v14  ;;  %v2851_v14 = vmax.f32 %v20391_v27, 0.0 }
 0x27f   :  { %v20416_v6 = vadd.f32 %v2694_v63, %v2676_v57  ;;  %v2369_v63 = vadd.f32 %v20158_v46, %v2350_v60  ;;  %v2652_v57 = vadd.f32 %v2651_v35, %v2633_v24 }
 0x280   :  { %v2692_v32 = vadd.f32 %v2691_v3, %v2673_v33  ;;  %v2602_v3 = vadd.f32 %v20408_v44, %v20394_v8 }
 0x281   :  { %v2388_v13 = vadd.f32 %v20169_v18, %v2369_v63  ;;  %v2671_v20 = vadd.f32 %v2670_v39, %v2652_v57 }
 0x282   :  { %v2621_v24 = vadd.f32 %v20410_v22, %v2602_v3 }
 0x283   :  { %v2708_v40 = vpop.f32.mrf.mxu2  ;;  %v2727_v36 = vpop.f32.mrf.mxu3  ;;  %v2407_v42 = vadd.f32 %v20311_v34, %v2388_v13  ;;  %v2690_v11 = vadd.f32 %v2689_v38, %v2671_v20 }
 0x284   :  { %v20418_v53 = vpop.f32.mrf.mxu0  ;;  %v20420_v4 = vpop.f32.mrf.mxu1 }
 0x285   :  { %v2426_v5 = vadd.f32 %v20322_v41, %v2407_v42  ;;  %v2709_v15 = vadd.f32 %v2708_v40, %v2690_v11 }
 0x287   :  { %v2445_v46 = vadd.f32 %v20352_v45, %v2426_v5  ;;  %v2728_v35 = vadd.f32 %v2727_v36, %v2709_v15 }
 0x289   :  { %v2464_v34 = vadd.f32 %v20354_v61, %v2445_v46 }
 0x28b   :  { %v2710_v31 = vpop.f32.mrf.mxu2  ;;  %v2729_v51 = vpop.f32.mrf.mxu3  ;;  %v2483_v56 = vadd.f32 %v20369_v59, %v2464_v34 }
 0x28c   :  { %v2746_v9 = vpop.f32.mrf.mxu0  ;;  %v2765_v52 = vpop.f32.mrf.mxu1  ;;  %v2711_v20 = vadd.f32 %v2710_v31, %v2692_v32  ;;  %v20463_v32 = vadd.f32 %v2851_v14, %v18736_v2 }
 0x28d   :  { %v2747_v13 = vadd.f32 %v2746_v9, %v2728_v35  ;;  %v2502_v15 = vadd.f32 %v20371_v25, %v2483_v56 }
 0x28e   :  { %v2730_v41 = vadd.f32 %v2729_v51, %v2711_v20  ;;  %v2412_v51 = vadd.f32 %v20357_v7, %v20285_v55 }
 0x28f   :  { %v2766_v39 = vadd.f32 %v2765_v52, %v2747_v13  ;;  %v2521_v61 = vadd.f32 %v20377_v21, %v2502_v15 }
 0x290   :  { %v2431_v21 = vadd.f32 %v20359_v12, %v2412_v51  ;;  %v17353_v51 = vld [vmem:[%s25442_s5 + $0xb8] sm:$0xff] }
 0x291   :  { %v2540_v25 = vadd.f32 %v20379_v29, %v2521_v61  ;;  %4265 = vmatpush.bf16.msra.mxu0 %v17353_v51 }
 0x292   :  { %v2450_v22 = vadd.f32 %v20365_v49, %v2431_v21 }
 0x293   :  { %v2713_v43 = vpop.f32.mrf.mxu2  ;;  %v2732_v30 = vpop.f32.mrf.mxu3  ;;  %v2559_v8 = vadd.f32 %v20396_v23, %v2540_v25 }
 0x294   :  { %v2748_v0 = vpop.f32.mrf.mxu0  ;;  %v2767_v16 = vpop.f32.mrf.mxu1  ;;  %v2714_v29 = vadd.f32 %v2713_v43, %v20416_v6 }
 0x295   :  { %v2749_v33 = vadd.f32 %v2748_v0, %v2730_v41  ;;  %v2640_v0 = vadd.f32 %v20412_v50, %v2621_v24  ;;  %v2578_v55 = vadd.f32 %v20399_v48, %v2559_v8  ;;  %v17361_v24 = vld [vmem:[%s25442_s5 + $0xf8] sm:$0xff] }
 0x296   :  { %v2733_v48 = vadd.f32 %v2732_v30, %v2714_v29  ;;  %v25517_v30 = vld [vmem:[#allocation18_spill] sm:$0xff]  ;;  %4284 = vmatpush.bf16.msra.mxu1 %v17361_v24  ;;  %v25519_v8 = vld [vmem:[#allocation20_spill] sm:$0xff] }
 0x297   :  { %v2768_v36 = vadd.f32 %v2767_v16, %v2749_v33  ;;  %v2659_v16 = vadd.f32 %v20414_v47, %v2640_v0  ;;  %v2853_v46 = vmax.f32 %v2578_v55, 0.0  ;;  %v2469_v47 = vadd.f32 %v20367_v10, %v2450_v22  ;;  %v17335_v55 = vld [vmem:[%s25442_s5 + $0x28] sm:$0xff] }
 0x299   :  { %v2678_v23 = vadd.f32 %v20418_v53, %v2659_v16  ;;  %v2488_v6 = vadd.f32 %v20381_v58, %v2469_v47  ;;  %v20468_v43 = vadd.f32 %v2853_v46, %v18777_v26 }
 0x29b   :  { %v2715_v17 = vpop.f32.mrf.mxu2  ;;  %v20433_v1 = vpop.f32.mrf.mxu3  ;;  %v2697_v27 = vadd.f32 %v20420_v4, %v2678_v23  ;;  %v2507_v13 = vadd.f32 %v25517_v30, %v2488_v6  ;;  %v25522_v30 = vld [vmem:[#allocation23_spill] sm:$0xff] }
 0x29c   :  { %v2751_v60 = vpop.f32.mrf.mxu0  ;;  %v20431_v18 = vpop.f32.mrf.mxu1 }
 0x29d   :  { %v2752_v34 = vadd.f32 %v2751_v60, %v2733_v48  ;;  %v2716_v10 = vadd.f32 %v2715_v17, %v2697_v27  ;;  %v17345_v17 = vld [vmem:[%s25442_s5 + $0x78] sm:$0xff]  ;;  %v25518_v60 = vld [vmem:[#allocation19_spill] sm:$0xff] }
 0x29e   :  { %4246 = vmatpush.bf16.msrb.mxu3 %v17345_v17 }
 0x29f   :  { %v2771_v26 = vadd.f32 %v20431_v18, %v2752_v34  ;;  %v17336_v18 = vld [vmem:[%s25442_s5 + $0x30] sm:$0xff] }
 0x2a3   :  { %v2784_v38 = vpop.f32.mrf.mxu2  ;;  %v2803_v40 = vpop.f32.mrf.mxu3 }
 0x2a4   :  { %v20437_v19 = vpop.f32.mrf.mxu0  ;;  %v20439_v45 = vpop.f32.mrf.mxu1  ;;  %v2785_v62 = vadd.f32 %v2784_v38, %v2766_v39  ;;  %v2735_v39 = vadd.f32 %v20433_v1, %v2716_v10  ;;  %v17344_v1 = vld [vmem:[%s25442_s5 + $0x70] sm:$0xff] }
 0x2a5   :  { %4247 = vmatpush.bf16.msrb.mxu3 %v17344_v1 }
 0x2a6   :  { %v2804_v31 = vadd.f32 %v2803_v40, %v2785_v62  ;;  %v2526_v62 = vadd.f32 %v25518_v60, %v2507_v13 }
 0x2ab   :  { %v2786_v59 = vpop.f32.mrf.mxu2  ;;  %v2805_v57 = vpop.f32.mrf.mxu3 }
 0x2ac   :  { %v2822_v37 = vpop.f32.mrf.mxu0  ;;  %v2841_v9 = vpop.f32.mrf.mxu1  ;;  %v2787_v63 = vadd.f32 %v2786_v59, %v2768_v36 }
 0x2ad   :  { %v2823_v52 = vadd.f32 %v2822_v37, %v2804_v31  ;;  %v2754_v37 = vadd.f32 %v20437_v19, %v2735_v39  ;;  %v17343_v19 = vld [vmem:[%s25442_s5 + $0x68] sm:$0xff] }
 0x2ae   :  { %v2806_v42 = vadd.f32 %v2805_v57, %v2787_v63  ;;  %4248 = vmatpush.bf16.msrb.mxu3 %v17343_v19 }
 0x2af   :  { %v2842_v44 = vadd.f32 %v2841_v9, %v2823_v52  ;;  %v2773_v29 = vadd.f32 %v20439_v45, %v2754_v37 }
 0x2b1   :  { %v2852_v7 = vmax.f32 %v2842_v44, 0.0  ;;  %v2545_v44 = vadd.f32 %v25519_v8, %v2526_v62 }
 0x2b3   :  { %v20459_v12 = vadd.f32 %v2852_v7, %v18739_v54  ;;  %v2789_v15 = vpop.f32.mrf.mxu2  ;;  %v2808_v33 = vpop.f32.mrf.mxu3  ;;  %v25520_v7 = vld [vmem:[#allocation22_spill] sm:$0xff] }
 0x2b4   :  { %v2824_v11 = vpop.f32.mrf.mxu0  ;;  %v2843_v5 = vpop.f32.mrf.mxu1  ;;  %v2790_v40 = vadd.f32 %v2789_v15, %v2771_v26  ;;  %v2564_v22 = vadd.f32 %v25520_v7, %v2545_v44 }
 0x2b5   :  { %v2825_v50 = vadd.f32 %v2824_v11, %v2806_v42  ;;  %v2867_v53 = vpack.c.bf16 %v20459_v12, %v20463_v32 }
 0x2b6   :  { %v2809_v9 = vadd.f32 %v2808_v33, %v2790_v40  ;;  %v20524_v13 = vadd.f32 %v25522_v30, %v2564_v22 }
 0x2b7   :  { %v2844_v35 = vadd.f32 %v2843_v5, %v2825_v50  ;;  %v2873_v20 = vunpack.c.l.b16 %v2867_v53  ;;  %v2874_v58 = vunpack.c.h.b16 %v2867_v53 }
 0x2b9   :  { %v2854_v49 = vmax.f32 %v2844_v35, 0.0 }
 0x2bb   :  { %v20473_v54 = vadd.f32 %v2854_v49, %v18780_v28  ;;  %v17337_v28 = vld [vmem:[%s25442_s5 + $0x38] sm:$0xff]  ;;  %v2791_v35 = vpop.f32.mrf.mxu2 }
 0x2bc   :  { %4227 = vmatpush.bf16.msrb.mxu2 %v17337_v28  ;;  %v2827_v59 = vpop.f32.mrf.mxu0  ;;  %v2846_v16 = vpop.f32.mrf.mxu1  ;;  %v2792_v53 = vadd.f32 %v2791_v35, %v2773_v29 }
 0x2bd   :  { %v2868_v2 = vpack.c.bf16 %v20473_v54, %v20468_v43  ;;  %v2828_v21 = vadd.f32 %v2827_v59, %v2809_v9 }
 0x2bf   :  { %v2875_v56 = vunpack.c.l.b16 %v2868_v2  ;;  %v2876_v4 = vunpack.c.h.b16 %v2868_v2  ;;  %v20509_v11 = vadd.f32 %v2846_v16, %v2828_v21  ;;  %v2810_v2 = vpop.f32.mrf.mxu3 }
 0x2c0   :  { %4228 = vmatpush.bf16.msrb.mxu2 %v17336_v18 }
 0x2c1   :  { %v2877_v41 = vpack.c.b16 %v2875_v56, %v2873_v20  ;;  %v2878_v38 = vpack.c.b16 %v2876_v4, %v2874_v58  ;;  %v2856_v58 = vmax.f32 %v20509_v11, 0.0  ;;  %v20529_v56 = vadd.f32 %v2810_v2, %v2792_v53 }
 0x2c3   :  { %v2880_v3 = vshrl.u32 %v2877_v41, 16  ;;  %v2883_v61 = vshll.u32 %v2877_v41, 16  ;;  %v2888_v31 = vshrl.u32 %v2878_v38, 16  ;;  %v2891_v36 = vshll.u32 %v2878_v38, 16 }
 0x2c4   :  { %4229 = vmatpush.bf16.msrb.mxu2 %v17335_v55 }
 0x2c5   :  { %v2882_v25 = vrot.slane %v2880_v3, 6  ;;  %v2885_v52 = vrot.slane %v2883_v61, 7  ;;  %v2890_v63 = vrot.slane %v2888_v31, 6  ;;  %v2893_v0 = vrot.slane %v2891_v36, 7 }
 0x2c7   :  { %v2886_v57 = vor.u32 %v2885_v52, %v2882_v25  ;;  %v2894_v42 = vor.u32 %v2893_v0, %v2890_v63 }
 0x2c9   :  { %v2897_v50 = vsel %vm18303_vm2, 0, %v2886_v57  ;;  %v2898_v23 = vsel %vm18303_vm2, 0, %v2894_v42  ;;  %v2899_v5 = vsel %vm18303_vm2, %v2886_v57, 0  ;;  %v2900_v46 = vsel %vm18303_vm2, %v2894_v42, 0 }
 0x2ca   :  { %v2903_v47 = vunpack.c.l.b16 %v2897_v50  ;;  %v2904_v48 = vunpack.c.l.b16 %v2898_v23  ;;  %v2905_v49 = vunpack.c.h.b16 %v2897_v50  ;;  %v2906_v6 = vunpack.c.h.b16 %v2898_v23 }
 0x2cb   :  { %v2915_v45 = vunpack.c.l.b16 %v2899_v5  ;;  %v2916_v27 = vunpack.c.l.b16 %v2900_v46 }
 0x2cc   :  { %v20519_v34 = vpack.c.b16 %v2904_v48, %v2903_v47  ;;  %v20521_v10 = vpack.c.b16 %v2906_v6, %v2905_v49  ;;  %v13985_v47 = vld [vmem:[%s25440_s3 + $0xb10] sm:$0xf] }
 0x2cd   :  { %v20526_v20 = vpack.c.b16 %v2916_v27, %v2915_v45  ;;  %v2829_v27 = vpop.f32.mrf.mxu0 }
 0x2ce   :  { %2911 = vst [vmem:[#allocation3] sm:$0xff] %v20519_v34  ;;  %v2919_v4 = vshrl.u32 %v20519_v34, 16  ;;  %v2922_v26 = vshll.u32 %v20519_v34, 16  ;;  %v2928_v39 = vshll.u32 %v20521_v10, 16  ;;  %v2932_v41 = vshrl.u32 %v20521_v10, 16 }
 0x2cf   :  { %2912 = vst [vmem:[#allocation3 + $0x38] sm:$0xff] %v20521_v10  ;;  %v2938_v38 = vshll.u32 %v20526_v20, 16  ;;  %v12672_v15 = vrot.slane %v20519_v34, 9  ;;  %v2948_v28 = vrot.slane %v20521_v10, 5  ;;  %v2951_v17 = vrot.slane %v20526_v20, 5 }
 0x2d0   :  { %v2921_v60 = vrot.slane %v2919_v4, 4  ;;  %v2924_v62 = vrot.slane %v2922_v26, 5  ;;  %v2930_v40 = vrot.slane %v2928_v39, 5  ;;  %v2934_v33 = vrot.slane %v2932_v41, 4 }
 0x2d1   :  { %v2940_v18 = vrot.slane %v2938_v38, 5  ;;  %v2949_v3 = vsel %vm18320_vm7, %v12672_v15, %v2948_v28  ;;  %v2950_v61 = vrot.slane %v2948_v28, 4  ;;  %v2957_v31 = vrot.slane %v2919_v4, 5 }
 0x2d2   :  { %v2925_v36 = vor.u32 %v2924_v62, %v2921_v60  ;;  %v2935_v59 = vor.u32 %v2934_v33, %v2930_v40  ;;  %v2958_v51 = vrot.slane %v2922_v26, 6  ;;  %v2961_v24 = vrot.slane %v2932_v41, 5  ;;  %2955 = vst [vmem:[#allocation3 + $0x10] sm:$0xff] %v2949_v3 }
 0x2d3   :  { %v2952_v37 = vsel %vm18320_vm7, %v2950_v61, %v2951_v17  ;;  %v2962_v9 = vrot.slane %v2928_v39, 6  ;;  %v2966_v25 = vshrl.u32 %v20526_v20, 16  ;;  %v2969_v52 = vrot.slane %v2938_v38, 6 }
 0x2d4   :  { %v2926_v63 = vrot.slane %v2925_v36, 4  ;;  %v2936_v0 = vrot.slane %v2935_v59, 4  ;;  %2956 = vst [vmem:[#allocation3 + $0x48] sm:$0xff] %v2952_v37  ;;  %v2959_v8 = vor.u32 %v2958_v51, %v2957_v31  ;;  %v12673_v44 = vrot.slane %v20519_v34, 10  ;;  %v2848_v31 = vpop.f32.mrf.mxu1  ;;  %v25532_v37 = vld [vmem:[#allocation14_spill] sm:$0xff] }
 0x2d5   :  { %v2963_v21 = vor.u32 %v2962_v9, %v2961_v24  ;;  %v2968_v57 = vrot.slane %v2966_v25, 5  ;;  %v2978_v42 = vrot.slane %v20521_v10, 6  ;;  %v2981_v16 = vrot.slane %v20526_v20, 6 }
 0x2d6   :  { %v2931_v19 = vsel %vm18354_vm12, %v2926_v63, %v2930_v40  ;;  %v2941_v7 = vsel %vm18354_vm12, %v2936_v0, %v2940_v18  ;;  %v2960_v22 = vrot.slane %v2959_v8, 4  ;;  %v2987_v29 = vrot.slane %v2919_v4, 6 }
 0x2d7   :  { %2945 = vst [vmem:[#allocation3 + $0x40] sm:$0xff] %v2941_v7  ;;  %v2965_v50 = vrot.slane %v2963_v21, 4  ;;  %v2970_v23 = vor.u32 %v2969_v52, %v2968_v57  ;;  %v2979_v46 = vsel %vm18316_vm6, %v12673_v44, %v2978_v42  ;;  %v2980_v35 = vrot.slane %v2978_v42, 4  ;;  %v25536_v52 = vld [vmem:[#allocation17_spill] sm:$0xff]  ;;  %v17360_v7 = vld [vmem:[%s25442_s5 + $0xf0] sm:$0xff] }
 0x2d8   :  { %v2964_v48 = vsel %vm18388_vm0, %v2960_v22, %v2963_v21  ;;  %v2988_v49 = vrot.slane %v2922_v26, 7  ;;  %v2991_v6 = vrot.slane %v2932_v41, 6  ;;  %v2992_v45 = vrot.slane %v2928_v39, 7  ;;  %2944 = vst [vmem:[#allocation3 + $0x8] sm:$0xff] %v2931_v19  ;;  %v25527_v41 = vld [vmem:[#allocation21_spill] sm:$0xff]  ;;  %v17352_v19 = vld [vmem:[%s25442_s5 + $0xb0] sm:$0xff]  ;;  %4285 = vmatpush.bf16.msra.mxu1 %v17360_v7 }
 0x2d9   :  { %v2971_v53 = vsel %vm18388_vm0, %v2965_v50, %v2970_v23  ;;  %v2982_v2 = vsel %vm18316_vm6, %v2980_v35, %v2981_v16  ;;  %v2996_v30 = vrot.slane %v2966_v25, 6  ;;  %v2997_v4 = vrot.slane %v2938_v38, 7  ;;  %2974 = vst [vmem:[#allocation3 + $0x18] sm:$0xff] %v2964_v48  ;;  %v25534_v25 = vld [vmem:[#allocation16_spill] sm:$0xff]  ;;  %v17334_v42 = vld [vmem:[%s25442_s5 + $0x20] sm:$0xff]  ;;  %4266 = vmatpush.bf16.msra.mxu0 %v17352_v19  ;;  %v17359_v35 = vld [vmem:[%s25442_s5 + $0xe8] sm:$0xff] }
 0x2da   :  { %2975 = vst [vmem:[#allocation3 + $0x50] sm:$0xff] %v2971_v53  ;;  %v2989_v15 = vor.u32 %v2988_v49, %v2987_v29  ;;  %v2993_v28 = vor.u32 %v2992_v45, %v2991_v6  ;;  %v12674_v17 = vrot.slane %v20519_v34, 11  ;;  %v3006_v26 = vrot.slane %v20521_v10, 7  ;;  %v25529_v10 = vld [vmem:[#allocation15_spill] sm:$0xff]  ;;  %v17342_v16 = vld [vmem:[%s25442_s5 + $0x60] sm:$0xff]  ;;  %4230 = vmatpush.bf16.msrb.mxu2 %v17334_v42  ;;  %v17333_v50 = vld [vmem:[%s25442_s5 + $0x18] sm:$0xff] }
 0x2db   :  { %v2855_v39 = vmax.f32 %v25527_v41, 0.0  ;;  %2986 = vst [vmem:[#allocation3 + $0x58] sm:$0xff] %v2982_v2  ;;  %v2998_v60 = vor.u32 %v2997_v4, %v2996_v30  ;;  %v3009_v62 = vrot.slane %v20526_v20, 7  ;;  %v2830_v40 = vadd.f32 %v2829_v27, %v20529_v56  ;;  %4249 = vmatpush.bf16.msrb.mxu3 %v17342_v16  ;;  %v17341_v23 = vld [vmem:[%s25442_s5 + $0x58] sm:$0xff]  ;;  %v17332_v4 = vld [vmem:[%s25442_s5 + $0x10] sm:$0xff] }
 0x2dc   :  { %v2990_v33 = vrot.slane %v2989_v15, 4  ;;  %v2995_v18 = vrot.slane %v2993_v28, 4  ;;  %v3007_v38 = vsel %vm18361_vm13, %v12674_v17, %v3006_v26  ;;  %v3008_v61 = vrot.slane %v3006_v26, 4  ;;  %2985 = vst [vmem:[#allocation3 + $0x20] sm:$0xff] %v2979_v46  ;;  %v17351_v46 = vld [vmem:[%s25442_s5 + $0xa8] sm:$0xff]  ;;  %v17340_v15 = vld [vmem:[%s25442_s5 + $0x50] sm:$0xff]  ;;  %4286 = vmatpush.bf16.msra.mxu1 %v17359_v35 }
 0x2dd   :  { %v2857_v34 = vmax.f32 %v20524_v13, 0.0  ;;  %3013 = vst [vmem:[#allocation3 + $0x30] sm:$0xff] %v3007_v38  ;;  %v20572_v36 = vadd.f32 %v2856_v58, %v25529_v10  ;;  %v2849_v59 = vadd.f32 %v2848_v31, %v2830_v40  ;;  %v20581_v9 = vadd.f32 %v2855_v39, %v25532_v37  ;;  %4267 = vmatpush.bf16.msra.mxu0 %v17351_v46  ;;  %v17358_v17 = vld [vmem:[%s25442_s5 + $0xe0] sm:$0xff]  ;;  %v17349_v10 = vld [vmem:[%s25442_s5 + $0x98] sm:$0xff]  ;;  %v17356_v7 = vld [vmem:[%s25442_s5 + $0xd0] sm:$0xff] }
 0x2de   :  { %v2994_v56 = vsel %vm18426_vm4, %v2990_v33, %v2993_v28  ;;  %v2999_v51 = vsel %vm18426_vm4, %v2995_v18, %v2998_v60  ;;  %v3010_v24 = vsel %vm18361_vm13, %v3008_v61, %v3009_v62  ;;  %4231 = vmatpush.bf16.msrb.mxu2 %v17333_v50  ;;  %v17350_v28 = vld [vmem:[%s25442_s5 + $0xa0] sm:$0xff]  ;;  %v17331_v33 = vld [vmem:[%s25442_s5 + $0x8] sm:$0xff]  ;;  %v17369_v46 = vld [vmem:[%s25442_s5 + $0x138] sm:$0xff] }
 0x2df   :  { %25530 = vst [vmem:[#allocation18_spill] sm:$0xff] %v20572_v36  ;;  %v2858_v13 = vmax.f32 %v2849_v59, 0.0  ;;  %v20584_v11 = vadd.f32 %v2857_v34, %v25534_v25  ;;  %v2869_v58 = vpack.c.bf16 %v20572_v36, %v20581_v9  ;;  %4250 = vmatpush.bf16.msrb.mxu3 %v17341_v23  ;;  %v17339_v18 = vld [vmem:[%s25442_s5 + $0x48] sm:$0xff]  ;;  %v17357_v59 = vld [vmem:[%s25442_s5 + $0xd8] sm:$0xff] }
 0x2e0   :  { %25533 = vst [vmem:[#allocation19_spill] sm:$0xff] %v20581_v9  ;;  %4287 = vmatpush.bf16.msra.mxu1 %v17358_v17  ;;  %v17449_v25 = vld [vmem:[#allocation3 + $0x34] sm:$0xf0]  ;;  %v17377_v35 = vld [vmem:[%s25442_s5 + $0x178] sm:$0xff] }
 0x2e1   :  { %3003 = vst [vmem:[#allocation3 + $0x60] sm:$0xff] %v2999_v51  ;;  %v20589_v63 = vadd.f32 %v2858_v13, %v25536_v52  ;;  %v3017_v8 = vunpack.c.l.b16 %v2869_v58  ;;  %v3018_v44 = vunpack.c.h.b16 %v2869_v58  ;;  %4268 = vmatpush.bf16.msra.mxu0 %v17350_v28  ;;  %v17442_v58 = vld [vmem:[#allocation3 + $0x4] sm:$0xf]  ;;  %v12682_v52 = vld [vmem:[#allocation3 + $0x38] sm:$0xf0] }
 0x2e2   :  { %3014 = vst [vmem:[#allocation3 + $0x68] sm:$0xff] %v3010_v24  ;;  %4232 = vmatpush.bf16.msrb.mxu2 %v17332_v4  ;;  %v12680_v24 = vld [vmem:[#allocation3] sm:$0xf]  ;;  %v20687_v23 = vor.u32 %v17442_v58, %v12682_v52  ;;  %v17347_v28 = vld [vmem:[%s25442_s5 + $0x88] sm:$0xff]  ;;  %v17346_v58 = vld [vmem:[%s25442_s5 + $0x80] sm:$0xff] }
 0x2e3   :  { %25535 = vst [vmem:[#allocation20_spill] sm:$0xff] %v20584_v11  ;;  %v2870_v0 = vpack.c.bf16 %v20589_v63, %v20584_v11  ;;  %4251 = vmatpush.bf16.msrb.mxu3 %v17340_v15  ;;  %v20685_v50 = vor.u32 %v17449_v25, %v12680_v24  ;;  %v17355_v17 = vld [vmem:[%s25442_s5 + $0xc8] sm:$0xff]  ;;  %v17354_v52 = vld [vmem:[%s25442_s5 + $0xc0] sm:$0xff]  ;;  %v17537_v20 = vld [vmem:[%s25440_s3 + $0x914] sm:$0xf0] }
 0x2e4   :  { %3002 = vst [vmem:[#allocation3 + $0x28] sm:$0xff] %v2994_v56  ;;  %4288 = vmatpush.bf16.msra.mxu1 %v17357_v59  ;;  %v12690_v59 = vld [vmem:[#allocation3 + $0x40] sm:$0xf0]  ;;  %v17601_v36 = vld [vmem:[%s25440_s3 + $0xb14] sm:$0xf0] }
 0x2e5   :  { %25537 = vst [vmem:[#allocation22_spill] sm:$0xff] %v20589_v63  ;;  %v3019_v21 = vunpack.c.l.b16 %v2870_v0  ;;  %v3020_v57 = vunpack.c.h.b16 %v2870_v0  ;;  %4269 = vmatpush.bf16.msra.mxu0 %v17349_v10  ;;  %v17443_v10 = vld [vmem:[#allocation3 + $0xc] sm:$0xf]  ;;  %v13793_v63 = vld [vmem:[%s25440_s3 + $0x990] sm:$0xf] }
 0x2e6   :  { %4233 = vmatpush.bf16.msrb.mxu2 %v17331_v33 }
 0x2e7   :  { %v3021_v22 = vpack.c.b16 %v3019_v21, %v3017_v8  ;;  %v3022_v29 = vpack.c.b16 %v3020_v57, %v3018_v44  ;;  %4252 = vmatpush.bf16.msrb.mxu3 %v17339_v18  ;;  %v17330_v8 = vld [vmem:[%s25442_s5] sm:$0xff]  ;;  %v17348_v21 = vld [vmem:[%s25442_s5 + $0x90] sm:$0xff] }
 0x2e8   :  { %v17338_v44 = vld [vmem:[%s25442_s5 + $0x40] sm:$0xff]  ;;  %4289 = vmatpush.bf16.msra.mxu1 %v17356_v7 }
 0x2e9   :  { %v3024_v48 = vshrl.u32 %v3021_v22, 16  ;;  %v3027_v49 = vshll.u32 %v3021_v22, 16  ;;  %v3032_v6 = vshrl.u32 %v3022_v29, 16  ;;  %v3035_v45 = vshll.u32 %v3022_v29, 16  ;;  %4270 = vmatpush.bf16.msra.mxu0 %v17348_v21 }
 0x2ea   :  { %4234 = vmatpush.bf16.msrb.mxu2 %v17330_v8 }
 0x2eb   :  { %v3026_v27 = vrot.slane %v3024_v48, 6  ;;  %v3029_v53 = vrot.slane %v3027_v49, 7  ;;  %v3034_v2 = vrot.slane %v3032_v6, 6  ;;  %v3037_v30 = vrot.slane %v3035_v45, 7  ;;  %4253 = vmatpush.bf16.msrb.mxu3 %v17338_v44 }
 0x2ec   :  { %4290 = vmatpush.bf16.msra.mxu1 %v17355_v17  ;;  %v17366_v17 = vld [vmem:[%s25442_s5 + $0x120] sm:$0xff] }
 0x2ed   :  { %v3030_v26 = vor.u32 %v3029_v53, %v3026_v27  ;;  %v3038_v41 = vor.u32 %v3037_v30, %v3034_v2  ;;  %4235 = vmatmul.bf16.vlgmr.msrb.gmra.mxu2 %v20685_v50  ;;  %4271 = vmatpush.bf16.msra.mxu0 %v17347_v28 }
 0x2ee   :  { %4303 = vmatpush.bf16.msra.mxu2 %v17369_v46  ;;  %4254 = vmatmul.bf16.vlgmr.msrb.gmra.mxu3 %v20687_v23  ;;  %v17367_v46 = vld [vmem:[%s25442_s5 + $0x128] sm:$0xff] }
 0x2ef   :  { %v3041_v39 = vsel %vm18303_vm2, 0, %v3030_v26  ;;  %v3042_v60 = vsel %vm18303_vm2, 0, %v3038_v41  ;;  %v3043_v62 = vsel %vm18303_vm2, %v3030_v26, 0  ;;  %v3044_v40 = vsel %vm18303_vm2, %v3038_v41, 0  ;;  %4322 = vmatpush.bf16.msra.mxu3 %v17377_v35  ;;  %v17375_v35 = vld [vmem:[%s25442_s5 + $0x168] sm:$0xff] }
 0x2f0   :  { %v3047_v38 = vunpack.c.l.b16 %v3041_v39  ;;  %v3048_v61 = vunpack.c.l.b16 %v3042_v60  ;;  %v3049_v31 = vunpack.c.h.b16 %v3041_v39  ;;  %v3050_v34 = vunpack.c.h.b16 %v3042_v60  ;;  %v17368_v60 = vld [vmem:[%s25442_s5 + $0x130] sm:$0xff]  ;;  %4291 = vmatpush.bf16.msra.mxu1 %v17354_v52 }
 0x2f1   :  { %v3059_v56 = vunpack.c.l.b16 %v3043_v62  ;;  %v3060_v51 = vunpack.c.l.b16 %v3044_v40  ;;  %v17376_v62 = vld [vmem:[%s25442_s5 + $0x170] sm:$0xff]  ;;  %v12688_v40 = vld [vmem:[#allocation3 + $0x8] sm:$0xf]  ;;  %4272 = vmatpush.bf16.msra.mxu0 %v17346_v58 }
 0x2f2   :  { %v20649_v37 = vpack.c.b16 %v3048_v61, %v3047_v38  ;;  %v20651_v13 = vpack.c.b16 %v3050_v34, %v3049_v31  ;;  %v17450_v61 = vld [vmem:[#allocation3 + $0x3c] sm:$0xf0]  ;;  %4304 = vmatpush.bf16.msra.mxu2 %v17368_v60  ;;  %v17374_v60 = vld [vmem:[%s25442_s5 + $0x160] sm:$0xff] }
 0x2f3   :  { %v20653_v0 = vpack.c.b16 %v3060_v51, %v3059_v56  ;;  %4323 = vmatpush.bf16.msra.mxu3 %v17376_v62  ;;  %v17384_v62 = vld [vmem:[%s25442_s5 + $0x1b0] sm:$0xff] }
 0x2f4   :  { %v20665_v57 = vshrl.u32 %v20649_v37, 16  ;;  %v20668_v42 = vshll.u32 %v20649_v37, 16  ;;  %v20671_v16 = vshll.u32 %v20651_v13, 16  ;;  %v20674_v19 = vshrl.u32 %v20651_v13, 16  ;;  %3055 = vst [vmem:[#allocation3 + $0x70] sm:$0xff] %v20649_v37 }
 0x2f5   :  { %v20681_v22 = vshll.u32 %v20653_v0, 16  ;;  %v3092_v29 = vrot.slane %v20651_v13, 5  ;;  %3056 = vst [vmem:[#allocation3 + $0xa8] sm:$0xff] %v20651_v13  ;;  %v3095_v53 = vrot.slane %v20653_v0, 5  ;;  %v3110_v41 = vshrl.u32 %v20653_v0, 16 }
 0x2f6   :  { %v3065_v48 = vrot.slane %v20665_v57, 4  ;;  %v3068_v49 = vrot.slane %v20668_v42, 5  ;;  %v3074_v6 = vrot.slane %v20671_v16, 5  ;;  %v3078_v45 = vrot.slane %v20674_v19, 4  ;;  %4305 = vmatpush.bf16.msra.mxu2 %v17367_v46  ;;  %v17382_v46 = vld [vmem:[%s25442_s5 + $0x1a0] sm:$0xff] }
 0x2f7   :  { %v3094_v27 = vrot.slane %v3092_v29, 4  ;;  %v3105_v4 = vrot.slane %v20674_v19, 5  ;;  %v3106_v15 = vrot.slane %v20671_v16, 6  ;;  %v3113_v39 = vrot.slane %v20681_v22, 6  ;;  %4324 = vmatpush.bf16.msra.mxu3 %v17375_v35  ;;  %v17390_v35 = vld [vmem:[%s25442_s5 + $0x1e0] sm:$0xff] }
 0x2f8   :  { %v20702_v2 = vor.u32 %v3068_v49, %v3065_v48  ;;  %v3079_v30 = vor.u32 %v3078_v45, %v3074_v6  ;;  %v3084_v18 = vrot.slane %v20681_v22, 5  ;;  %v3112_v31 = vrot.slane %v3110_v41, 5 }
 0x2f9   :  { %v3096_v26 = vsel %vm18320_vm7, %v3094_v27, %v3095_v53  ;;  %v20725_v38 = vor.u32 %v3106_v15, %v3105_v4  ;;  %v3122_v34 = vrot.slane %v20651_v13, 6  ;;  %v3125_v25 = vrot.slane %v20653_v0, 6  ;;  %v17393_v53 = vld [vmem:[%s25442_s5 + $0x1f8] sm:$0xff] }
 0x2fa   :  { %v3080_v33 = vrot.slane %v3079_v30, 4  ;;  %3100 = vst [vmem:[#allocation3 + $0xb8] sm:$0xff] %v3096_v26  ;;  %v3070_v56 = vrot.slane %v20702_v2, 4  ;;  %v3114_v8 = vor.u32 %v3113_v39, %v3112_v31  ;;  %v3135_v21 = vrot.slane %v20674_v19, 6  ;;  %v17385_v19 = vld [vmem:[%s25442_s5 + $0x1b8] sm:$0xff]  ;;  %4360 = vmatpush.bf16.msrb.mxu1 %v17393_v53  ;;  %4306 = vmatpush.bf16.msra.mxu2 %v17366_v17 }
 0x2fb   :  { %v3109_v24 = vrot.slane %v20725_v38, 4  ;;  %v3124_v44 = vrot.slane %v3122_v34, 4  ;;  %v3136_v7 = vrot.slane %v20671_v16, 7  ;;  %v3140_v48 = vrot.slane %v3110_v41, 6  ;;  %4341 = vmatpush.bf16.msrb.mxu0 %v17385_v19  ;;  %4325 = vmatpush.bf16.msra.mxu3 %v17374_v60  ;;  %v17381_v60 = vld [vmem:[%s25442_s5 + $0x198] sm:$0xff] }
 0x2fc   :  { %v3085_v51 = vsel %vm18354_vm12, %v3080_v33, %v3084_v18  ;;  %v3141_v49 = vrot.slane %v20681_v22, 7  ;;  %v20752_v45 = vor.u32 %v17450_v61, %v12688_v40  ;;  %v20754_v27 = vor.u32 %v17443_v10, %v12690_v59  ;;  %v17392_v18 = vld [vmem:[%s25442_s5 + $0x1f0] sm:$0xff]  ;;  %v12736_v61 = vld [vmem:[#allocation3 + $0x70] sm:$0xf]  ;;  %v17456_v10 = vld [vmem:[#allocation3 + $0x74] sm:$0xf] }
 0x2fd   :  { %3089 = vst [vmem:[#allocation3 + $0xb0] sm:$0xff] %v3085_v51  ;;  %v3115_v2 = vsel %vm18388_vm0, %v3109_v24, %v3114_v8  ;;  %v3126_v30 = vsel %vm18316_vm6, %v3124_v44, %v3125_v25  ;;  %v20766_v4 = vor.u32 %v3136_v7, %v3135_v21  ;;  %v3150_v22 = vrot.slane %v20651_v13, 7  ;;  %v12738_v59 = vld [vmem:[#allocation3 + $0xa8] sm:$0xf0]  ;;  %v17383_v8 = vld [vmem:[%s25442_s5 + $0x1a8] sm:$0xff]  ;;  %v17372_v21 = vld [vmem:[%s25442_s5 + $0x150] sm:$0xff] }
 0x2fe   :  { %v12675_v15 = vrot.slane %v20649_v37, 9  ;;  %v3142_v28 = vor.u32 %v3141_v49, %v3140_v48  ;;  %3119 = vst [vmem:[#allocation3 + $0xc0] sm:$0xff] %v3115_v2  ;;  %v3153_v39 = vrot.slane %v20653_v0, 7  ;;  %v3075_v40 = vsel %vm18354_vm12, %v3070_v56, %v3074_v6  ;;  %4273 = vmatmul.bf16.vlgmr.msra.gmra.mxu0 %v20752_v45  ;;  %4292 = vmatmul.bf16.vlgmr.msra.gmra.mxu1 %v20754_v27  ;;  %v17463_v6 = vld [vmem:[#allocation3 + $0xa4] sm:$0xf0]  ;;  %v17391_v44 = vld [vmem:[%s25442_s5 + $0x1e8] sm:$0xff] }
 0x2ff   :  { %v3139_v26 = vrot.slane %v20766_v4, 4  ;;  %v3152_v41 = vrot.slane %v3150_v22, 4  ;;  %3130 = vst [vmem:[#allocation3 + $0xc8] sm:$0xff] %v3126_v30  ;;  %v3101_v33 = vrot.slane %v20665_v57, 5  ;;  %v3102_v0 = vrot.slane %v20668_v42, 6  ;;  %v17365_v56 = vld [vmem:[%s25442_s5 + $0x118] sm:$0xff]  ;;  %4342 = vmatpush.bf16.msrb.mxu0 %v17384_v62  ;;  %4361 = vmatpush.bf16.msrb.mxu1 %v17392_v18 }
 0x300   :  { %3088 = vst [vmem:[#allocation3 + $0x78] sm:$0xff] %v3075_v40  ;;  %v17373_v51 = vld [vmem:[%s25442_s5 + $0x158] sm:$0xff]  ;;  %v3093_v24 = vsel %vm18320_vm7, %v12675_v15, %v3092_v29  ;;  %v20808_v25 = vor.u32 %v17463_v6, %v12736_v61  ;;  %v20810_v58 = vor.u32 %v17456_v10, %v12738_v59  ;;  %4307 = vmatpush.bf16.msra.mxu2 %v17365_v56  ;;  %v17364_v29 = vld [vmem:[%s25442_s5 + $0x110] sm:$0xff]  ;;  %v17363_v2 = vld [vmem:[%s25442_s5 + $0x108] sm:$0xff]  ;;  %v3131_v15 = vrot.slane %v20665_v57, 6 }
 0x301   :  { %v3143_v31 = vsel %vm18426_vm4, %v3139_v26, %v3142_v28  ;;  %v3154_v16 = vsel %vm18361_vm13, %v3152_v41, %v3153_v39  ;;  %3099 = vst [vmem:[#allocation3 + $0x80] sm:$0xff] %v3093_v24  ;;  %v3103_v52 = vor.u32 %v3102_v0, %v3101_v33  ;;  %4326 = vmatpush.bf16.msra.mxu3 %v17373_v51  ;;  %v17371_v30 = vld [vmem:[%s25442_s5 + $0x148] sm:$0xff]  ;;  %v3132_v28 = vrot.slane %v20668_v42, 7  ;;  %v17389_v57 = vld [vmem:[%s25442_s5 + $0x1d8] sm:$0xff]  ;;  %v17362_v62 = vld [vmem:[%s25442_s5 + $0x100] sm:$0xff] }
 0x302   :  { %3147 = vst [vmem:[#allocation3 + $0xd0] sm:$0xff] %v3143_v31  ;;  %4240 = vmatmul.bf16.gmra.mxu2 %v20808_v25  ;;  %4259 = vmatmul.bf16.gmra.mxu3 %v20810_v58  ;;  %v12676_v41 = vrot.slane %v20649_v37, 10  ;;  %v12677_v39 = vrot.slane %v20649_v37, 11  ;;  %v17370_v37 = vld [vmem:[%s25442_s5 + $0x140] sm:$0xff]  ;;  %v17401_v33 = vld [vmem:[%s25442_s5 + $0x238] sm:$0xff]  ;;  %v17380_v0 = vld [vmem:[%s25442_s5 + $0x190] sm:$0xff] }
 0x303   :  { %3158 = vst [vmem:[#allocation3 + $0xd8] sm:$0xff] %v3154_v16  ;;  %v3104_v7 = vrot.slane %v3103_v52, 4  ;;  %4343 = vmatpush.bf16.msrb.mxu0 %v17383_v8  ;;  %4362 = vmatpush.bf16.msrb.mxu1 %v17391_v44  ;;  %v3133_v40 = vor.u32 %v3132_v28, %v3131_v15  ;;  %v17388_v18 = vld [vmem:[%s25442_s5 + $0x1d0] sm:$0xff]  ;;  %v17451_v16 = vld [vmem:[#allocation3 + $0x44] sm:$0xf0]  ;;  %v17379_v24 = vld [vmem:[%s25442_s5 + $0x188] sm:$0xff] }
 0x304   :  { %v17464_v48 = vld [vmem:[#allocation3 + $0xac] sm:$0xf0]  ;;  %v12746_v53 = vld [vmem:[#allocation3 + $0xb0] sm:$0xf0]  ;;  %4308 = vmatpush.bf16.msra.mxu2 %v17364_v29  ;;  %v3123_v61 = vsel %vm18316_vm6, %v12676_v41, %v3122_v34  ;;  %v3151_v31 = vsel %vm18361_vm13, %v12677_v39, %v3150_v22  ;;  %v12698_v6 = vld [vmem:[#allocation3 + $0x48] sm:$0xf0] }
 0x305   :  { %4327 = vmatpush.bf16.msra.mxu3 %v17372_v21  ;;  %v3108_v42 = vsel %vm18388_vm0, %v3104_v7, %v20725_v38  ;;  %v17409_v38 = vld [vmem:[%s25442_s5 + $0x278] sm:$0xff]  ;;  %3129 = vst [vmem:[#allocation3 + $0x90] sm:$0xff] %v3123_v61  ;;  %v3134_v10 = vrot.slane %v3133_v40, 4  ;;  %v12696_v59 = vld [vmem:[#allocation3 + $0x10] sm:$0xf]  ;;  %v17400_v34 = vld [vmem:[%s25442_s5 + $0x230] sm:$0xff] }
 0x306   :  { %3118 = vst [vmem:[#allocation3 + $0x88] sm:$0xff] %v3108_v42  ;;  %v17444_v56 = vld [vmem:[#allocation3 + $0x14] sm:$0xf]  ;;  %v17408_v13 = vld [vmem:[%s25442_s5 + $0x270] sm:$0xff]  ;;  %v20889_v22 = vor.u32 %v17451_v16, %v12696_v59  ;;  %v17387_v52 = vld [vmem:[%s25442_s5 + $0x1c8] sm:$0xff] }
 0x307   :  { %v12744_v49 = vld [vmem:[#allocation3 + $0x78] sm:$0xf]  ;;  %v17457_v19 = vld [vmem:[#allocation3 + $0x7c] sm:$0xf]  ;;  %4344 = vmatpush.bf16.msrb.mxu0 %v17382_v46  ;;  %4363 = vmatpush.bf16.msrb.mxu1 %v17390_v35  ;;  %3157 = vst [vmem:[#allocation3 + $0xa0] sm:$0xff] %v3151_v31  ;;  %v20891_v51 = vor.u32 %v17444_v56, %v12698_v6  ;;  %v3138_v8 = vsel %vm18426_vm4, %v3134_v10, %v20766_v4  ;;  %v17378_v21 = vld [vmem:[%s25442_s5 + $0x180] sm:$0xff] }
 0x308   :  { %v20840_v17 = vor.u32 %v17464_v48, %v12744_v49  ;;  %v20842_v26 = vor.u32 %v17457_v19, %v12746_v53  ;;  %4309 = vmatpush.bf16.msra.mxu2 %v17363_v2  ;;  %v17399_v44 = vld [vmem:[%s25442_s5 + $0x228] sm:$0xff]  ;;  %3146 = vst [vmem:[#allocation3 + $0x98] sm:$0xff] %v3138_v8  ;;  %v17386_v4 = vld [vmem:[%s25442_s5 + $0x1c0] sm:$0xff]  ;;  %v17417_v46 = vld [vmem:[%s25442_s5 + $0x2b8] sm:$0xff] }
 0x309   :  { %4328 = vmatpush.bf16.msra.mxu3 %v17371_v30  ;;  %v17407_v29 = vld [vmem:[%s25442_s5 + $0x268] sm:$0xff]  ;;  %v17425_v35 = vld [vmem:[%s25442_s5 + $0x2f8] sm:$0xff]  ;;  %v17452_v48 = vld [vmem:[#allocation3 + $0x4c] sm:$0xf0] }
 0x30a   :  { %v12704_v7 = vld [vmem:[#allocation3 + $0x18] sm:$0xf]  ;;  %v17445_v49 = vld [vmem:[#allocation3 + $0x1c] sm:$0xf]  ;;  %v12706_v19 = vld [vmem:[#allocation3 + $0x50] sm:$0xf0] }
 0x30b   :  { %4345 = vmatpush.bf16.msrb.mxu0 %v17381_v60  ;;  %4364 = vmatpush.bf16.msrb.mxu1 %v17389_v57  ;;  %v17398_v53 = vld [vmem:[%s25442_s5 + $0x220] sm:$0xff]  ;;  %v20928_v30 = vor.u32 %v17452_v48, %v12704_v7  ;;  %v20930_v15 = vor.u32 %v17445_v49, %v12706_v19  ;;  %v17416_v28 = vld [vmem:[%s25442_s5 + $0x2b0] sm:$0xff]  ;;  %v17465_v39 = vld [vmem:[#allocation3 + $0xb4] sm:$0xf0] }
 0x30c   :  { %4310 = vmatpush.bf16.msra.mxu2 %v17362_v62  ;;  %v17406_v2 = vld [vmem:[%s25442_s5 + $0x260] sm:$0xff]  ;;  %v17424_v41 = vld [vmem:[%s25442_s5 + $0x2f0] sm:$0xff]  ;;  %v17397_v60 = vld [vmem:[%s25442_s5 + $0x218] sm:$0xff] }
 0x30d   :  { %4329 = vmatpush.bf16.msra.mxu3 %v17370_v37  ;;  %v17405_v57 = vld [vmem:[%s25442_s5 + $0x258] sm:$0xff]  ;;  %v12754_v42 = vld [vmem:[#allocation3 + $0xb8] sm:$0xf0]  ;;  %v12752_v40 = vld [vmem:[#allocation3 + $0x80] sm:$0xf] }
 0x30e   :  { %4278 = vmatmul.bf16.gmra.mxu0 %v20840_v17  ;;  %4297 = vmatmul.bf16.gmra.mxu1 %v20842_v26  ;;  %v17415_v62 = vld [vmem:[%s25442_s5 + $0x2a8] sm:$0xff]  ;;  %v17404_v61 = vld [vmem:[%s25442_s5 + $0x250] sm:$0xff]  ;;  %v17414_v31 = vld [vmem:[%s25442_s5 + $0x2a0] sm:$0xff] }
 0x30f   :  { %4346 = vmatpush.bf16.msrb.mxu0 %v17380_v0  ;;  %4365 = vmatpush.bf16.msrb.mxu1 %v17388_v18  ;;  %v17423_v37 = vld [vmem:[%s25442_s5 + $0x2e8] sm:$0xff]  ;;  %v17396_v18 = vld [vmem:[%s25442_s5 + $0x210] sm:$0xff]  ;;  %v17422_v16 = vld [vmem:[%s25442_s5 + $0x2e0] sm:$0xff] }
 0x310   :  { %4379 = vmatpush.bf16.msrb.mxu2 %v17401_v33  ;;  %v17458_v33 = vld [vmem:[#allocation3 + $0x84] sm:$0xf]  ;;  %v17395_v6 = vld [vmem:[%s25442_s5 + $0x208] sm:$0xff]  ;;  %v17466_v59 = vld [vmem:[#allocation3 + $0xbc] sm:$0xf0] }
 0x311   :  { %4398 = vmatpush.bf16.msrb.mxu3 %v17409_v38  ;;  %v20952_v38 = vor.u32 %v17465_v39, %v12752_v40  ;;  %v20954_v0 = vor.u32 %v17458_v33, %v12754_v42  ;;  %v17403_v10 = vld [vmem:[%s25442_s5 + $0x248] sm:$0xff]  ;;  %v17413_v56 = vld [vmem:[%s25442_s5 + $0x298] sm:$0xff]  ;;  %v17394_v8 = vld [vmem:[%s25442_s5 + $0x200] sm:$0xff] }
 0x312   :  { %4311 = vmatmul.bf16.vlgmr.msra.gmra.mxu2 %v20889_v22  ;;  %4330 = vmatmul.bf16.vlgmr.msra.gmra.mxu3 %v20891_v51  ;;  %v17420_v7 = vld [vmem:[%s25442_s5 + $0x2d0] sm:$0xff]  ;;  %v17453_v48 = vld [vmem:[#allocation3 + $0x54] sm:$0xf0]  ;;  %v17410_v33 = vld [vmem:[%s25442_s5 + $0x280] sm:$0xff] }
 0x313   :  { %4347 = vmatpush.bf16.msrb.mxu0 %v17379_v24  ;;  %4366 = vmatpush.bf16.msrb.mxu1 %v17387_v52  ;;  %v17459_v24 = vld [vmem:[#allocation3 + $0x8c] sm:$0xf]  ;;  %v12762_v52 = vld [vmem:[#allocation3 + $0xc0] sm:$0xf0]  ;;  %v12712_v49 = vld [vmem:[#allocation3 + $0x20] sm:$0xf] }
 0x314   :  { %4380 = vmatpush.bf16.msrb.mxu2 %v17400_v34  ;;  %v17421_v34 = vld [vmem:[%s25442_s5 + $0x2d8] sm:$0xff]  ;;  %v17446_v19 = vld [vmem:[#allocation3 + $0x24] sm:$0xf]  ;;  %v13585_v42 = vld [vmem:[%s25440_s3 + $0x7f0] sm:$0xf] }
 0x315   :  { %4399 = vmatpush.bf16.msrb.mxu3 %v17408_v13  ;;  %v12760_v13 = vld [vmem:[#allocation3 + $0x88] sm:$0xf]  ;;  %v17440_v39 = vld [vmem:[%s25442_s5 + $0x370] sm:$0xff] }
 0x317   :  { %4348 = vmatpush.bf16.msrb.mxu0 %v17378_v21  ;;  %4367 = vmatpush.bf16.msrb.mxu1 %v17386_v4  ;;  %v20990_v21 = vor.u32 %v17459_v24, %v12762_v52  ;;  %v17412_v4 = vld [vmem:[%s25442_s5 + $0x290] sm:$0xff]  ;;  %v17447_v52 = vld [vmem:[#allocation3 + $0x2c] sm:$0xf] }
 0x318   :  { %4381 = vmatpush.bf16.msrb.mxu2 %v17399_v44  ;;  %v17402_v44 = vld [vmem:[%s25442_s5 + $0x240] sm:$0xff]  ;;  %v17454_v24 = vld [vmem:[#allocation3 + $0x5c] sm:$0xf0] }
 0x319   :  { %4400 = vmatpush.bf16.msrb.mxu3 %v17407_v29  ;;  %v20988_v29 = vor.u32 %v17466_v59, %v12760_v13  ;;  %v17483_v59 = vld [vmem:[%s25440_s3 + $0x764] sm:$0xf0]  ;;  %v12720_v13 = vld [vmem:[#allocation3 + $0x28] sm:$0xf] }
 0x31b   :  { %4417 = vmatpush.bf16.msra.mxu0 %v17417_v46  ;;  %4436 = vmatpush.bf16.msra.mxu1 %v17425_v35  ;;  %v17433_v46 = vld [vmem:[%s25442_s5 + $0x338] sm:$0xff] }
 0x31c   :  { %4382 = vmatpush.bf16.msrb.mxu2 %v17398_v53  ;;  %v17441_v35 = vld [vmem:[%s25442_s5 + $0x378] sm:$0xff]  ;;  %v12714_v53 = vld [vmem:[#allocation3 + $0x58] sm:$0xf0] }
 0x31d   :  { %4401 = vmatpush.bf16.msrb.mxu3 %v17406_v2  ;;  %v17411_v2 = vld [vmem:[%s25442_s5 + $0x288] sm:$0xff]  ;;  %v21032_v40 = vor.u32 %v17446_v19, %v12714_v53  ;;  %v17438_v19 = vld [vmem:[%s25442_s5 + $0x360] sm:$0xff]  ;;  %v21078_v53 = vor.u32 %v17454_v24, %v12720_v13 }
 0x31e   :  { %4349 = vmatmul.bf16.vlgmr.msrb.gmra.mxu0 %v20928_v30  ;;  %4368 = vmatmul.bf16.vlgmr.msrb.gmra.mxu1 %v20930_v15 }
 0x31f   :  { %4418 = vmatpush.bf16.msra.mxu0 %v17416_v28  ;;  %4437 = vmatpush.bf16.msra.mxu1 %v17424_v41  ;;  %v17419_v28 = vld [vmem:[%s25442_s5 + $0x2c8] sm:$0xff]  ;;  %v17432_v41 = vld [vmem:[%s25442_s5 + $0x330] sm:$0xff] }
 0x320   :  { %4383 = vmatpush.bf16.msrb.mxu2 %v17397_v60  ;;  %v13521_v60 = vld [vmem:[%s25440_s3 + $0x770] sm:$0xf] }
 0x321   :  { %4402 = vmatpush.bf16.msrb.mxu3 %v17405_v57  ;;  %v17485_v57 = vld [vmem:[%s25440_s3 + $0x774] sm:$0xf0] }
 0x322   :  { %4316 = vmatmul.bf16.gmra.mxu2 %v20952_v38  ;;  %4335 = vmatmul.bf16.gmra.mxu3 %v20954_v0 }
 0x323   :  { %4419 = vmatpush.bf16.msra.mxu0 %v17415_v62  ;;  %4438 = vmatpush.bf16.msra.mxu1 %v17423_v37  ;;  %v17501_v62 = vld [vmem:[%s25440_s3 + $0x7f4] sm:$0xf0]  ;;  %v21030_v37 = vor.u32 %v17453_v48, %v12712_v49  ;;  %v17430_v49 = vld [vmem:[%s25442_s5 + $0x320] sm:$0xff] }
 0x324   :  { %4384 = vmatpush.bf16.msrb.mxu2 %v17396_v18  ;;  %v17418_v18 = vld [vmem:[%s25442_s5 + $0x2c0] sm:$0xff]  ;;  %v17497_v48 = vld [vmem:[%s25440_s3 + $0x7d4] sm:$0xf0] }
 0x325   :  { %4403 = vmatpush.bf16.msrb.mxu3 %v17404_v61  ;;  %v17431_v61 = vld [vmem:[%s25442_s5 + $0x328] sm:$0xff] }
 0x327   :  { %4420 = vmatpush.bf16.msra.mxu0 %v17414_v31  ;;  %4439 = vmatpush.bf16.msra.mxu1 %v17422_v16  ;;  %v17439_v31 = vld [vmem:[%s25442_s5 + $0x368] sm:$0xff]  ;;  %v13522_v16 = vor.u32 %v17485_v57, %v13521_v60  ;;  %v17437_v60 = vld [vmem:[%s25442_s5 + $0x358] sm:$0xff]  ;;  %v13497_v57 = vld [vmem:[%s25440_s3 + $0x740] sm:$0xf] }
 0x328   :  { %4385 = vmatpush.bf16.msrb.mxu2 %v17395_v6  ;;  %v13586_v6 = vor.u32 %v17501_v62, %v13585_v42  ;;  %v17479_v42 = vld [vmem:[%s25440_s3 + $0x744] sm:$0xf0]  ;;  %v13561_v62 = vld [vmem:[%s25440_s3 + $0x7c0] sm:$0xf] }
 0x329   :  { %4404 = vmatpush.bf16.msrb.mxu3 %v17403_v10  ;;  %v13513_v10 = vld [vmem:[%s25440_s3 + $0x760] sm:$0xf] }
 0x32b   :  { %4421 = vmatpush.bf16.msra.mxu0 %v17413_v56  ;;  %4440 = vmatpush.bf16.msra.mxu1 %v17421_v34  ;;  %v13577_v56 = vld [vmem:[%s25440_s3 + $0x7e0] sm:$0xf]  ;;  %v17499_v34 = vld [vmem:[%s25440_s3 + $0x7e4] sm:$0xf0] }
 0x32c   :  { %4386 = vmatpush.bf16.msrb.mxu2 %v17394_v8  ;;  %v12722_v8 = vld [vmem:[#allocation3 + $0x60] sm:$0xf0] }
 0x32d   :  { %4405 = vmatpush.bf16.msrb.mxu3 %v17402_v44  ;;  %v13514_v44 = vor.u32 %v17483_v59, %v13513_v10  ;;  %v17436_v10 = vld [vmem:[%s25442_s5 + $0x350] sm:$0xff]  ;;  %v13498_v59 = vor.u32 %v17479_v42, %v13497_v57  ;;  %v17491_v57 = vld [vmem:[%s25440_s3 + $0x7a4] sm:$0xf0] }
 0x32e   :  { %4354 = vmatmul.bf16.gmra.mxu0 %v20988_v29  ;;  %4373 = vmatmul.bf16.gmra.mxu1 %v20990_v21  ;;  %v13649_v42 = vld [vmem:[%s25440_s3 + $0x870] sm:$0xf] }
 0x32f   :  { %4422 = vmatpush.bf16.msra.mxu0 %v17412_v4  ;;  %4441 = vmatpush.bf16.msra.mxu1 %v17420_v7  ;;  %v13578_v4 = vor.u32 %v17499_v34, %v13577_v56  ;;  %v13505_v7 = vld [vmem:[%s25440_s3 + $0x750] sm:$0xf] }
 0x330   :  { %4455 = vmatpush.bf16.msra.mxu2 %v17433_v46  ;;  %v17481_v46 = vld [vmem:[%s25440_s3 + $0x754] sm:$0xf0]  ;;  %v13489_v34 = vld [vmem:[%s25440_s3 + $0x730] sm:$0xf] }
 0x331   :  { %4474 = vmatpush.bf16.msra.mxu3 %v17441_v35  ;;  %v13569_v35 = vld [vmem:[%s25440_s3 + $0x7d0] sm:$0xf] }
 0x332   :  { %4387 = vmatmul.bf16.vlgmr.msrb.gmra.mxu2 %v21030_v37  ;;  %4406 = vmatmul.bf16.vlgmr.msrb.gmra.mxu3 %v21032_v40 }
 0x333   :  { %4423 = vmatpush.bf16.msra.mxu0 %v17411_v2  ;;  %4442 = vmatpush.bf16.msra.mxu1 %v17419_v28  ;;  %v21080_v2 = vor.u32 %v17447_v52, %v12722_v8  ;;  %v13506_v28 = vor.u32 %v17481_v46, %v13505_v7  ;;  %v17477_v52 = vld [vmem:[%s25440_s3 + $0x734] sm:$0xf0]  ;;  %v13553_v8 = vld [vmem:[%s25440_s3 + $0x7b0] sm:$0xf]  ;;  %v17427_v46 = vld [vmem:[%s25442_s5 + $0x308] sm:$0xff] }
 0x334   :  { %4456 = vmatpush.bf16.msra.mxu2 %v17432_v41  ;;  %v13570_v41 = vor.u32 %v17497_v48, %v13569_v35  ;;  %v12776_v35 = vld [vmem:[#allocation3 + $0x98] sm:$0xf]  ;;  %v17468_v48 = vld [vmem:[#allocation3 + $0xcc] sm:$0xf0] }
 0x335   :  { %4475 = vmatpush.bf16.msra.mxu3 %v17440_v39  ;;  %v17429_v39 = vld [vmem:[%s25442_s5 + $0x318] sm:$0xff] }
 0x337   :  { %4424 = vmatpush.bf16.msra.mxu0 %v17410_v33  ;;  %4443 = vmatpush.bf16.msra.mxu1 %v17418_v18  ;;  %v17495_v33 = vld [vmem:[%s25440_s3 + $0x7c4] sm:$0xf0]  ;;  %v17467_v18 = vld [vmem:[#allocation3 + $0xc4] sm:$0xf0] }
 0x338   :  { %4457 = vmatpush.bf16.msra.mxu2 %v17431_v61  ;;  %v12770_v61 = vld [vmem:[#allocation3 + $0xc8] sm:$0xf0]  ;;  %v13562_v56 = vor.u32 %v17495_v33, %v13561_v62  ;;  %v17517_v62 = vld [vmem:[%s25440_s3 + $0x874] sm:$0xf0]  ;;  %v13713_v33 = vld [vmem:[%s25440_s3 + $0x8f0] sm:$0xf] }
 0x339   :  { %4476 = vmatpush.bf16.msra.mxu3 %v17439_v31  ;;  %v12768_v31 = vld [vmem:[#allocation3 + $0x90] sm:$0xf] }
 0x33a   :  { %v21111_v13 = vor.u32 %v17467_v18, %v12768_v31  ;;  %v17533_v18 = vld [vmem:[%s25440_s3 + $0x8f4] sm:$0xf0]  ;;  %v17434_v31 = vld [vmem:[%s25442_s5 + $0x340] sm:$0xff] }
 0x33b   :  { %5849 = vmatpush.bf16.msrb.mxu0 %v13522_v16  ;;  %5868 = vmatpush.bf16.msrb.mxu1 %v13586_v6  ;;  %v17460_v16 = vld [vmem:[#allocation3 + $0x94] sm:$0xf]  ;;  %v17428_v6 = vld [vmem:[%s25442_s5 + $0x310] sm:$0xff] }
 0x33c   :  { %4458 = vmatpush.bf16.msra.mxu2 %v17430_v49  ;;  %v21113_v24 = vor.u32 %v17460_v16, %v12770_v61  ;;  %v17461_v49 = vld [vmem:[#allocation3 + $0x9c] sm:$0xf]  ;;  %v17426_v61 = vld [vmem:[%s25442_s5 + $0x300] sm:$0xff]  ;;  %v21162_v16 = vor.u32 %v17468_v48, %v12776_v35  ;;  %v17515_v48 = vld [vmem:[%s25440_s3 + $0x864] sm:$0xf0] }
 0x33d   :  { %4477 = vmatpush.bf16.msra.mxu3 %v17438_v19  ;;  %v17435_v19 = vld [vmem:[%s25442_s5 + $0x348] sm:$0xff]  ;;  %v13641_v35 = vld [vmem:[%s25440_s3 + $0x860] sm:$0xf] }
 0x33e   :  { %4425 = vmatmul.bf16.vlgmr.msra.gmra.mxu0 %v21078_v53  ;;  %4444 = vmatmul.bf16.vlgmr.msra.gmra.mxu1 %v21080_v2 }
 0x33f   :  { %5850 = vmatpush.bf16.msrb.mxu0 %v13514_v44  ;;  %5869 = vmatpush.bf16.msrb.mxu1 %v13578_v4  ;;  %v17493_v44 = vld [vmem:[%s25440_s3 + $0x7b4] sm:$0xf0]  ;;  %v13490_v4 = vor.u32 %v17477_v52, %v13489_v34  ;;  %v13650_v34 = vor.u32 %v17517_v62, %v13649_v42  ;;  %v13714_v52 = vor.u32 %v17533_v18, %v13713_v33  ;;  %v17471_v42 = vld [vmem:[%s25440_s3 + $0x704] sm:$0xf0]  ;;  %v13529_v62 = vld [vmem:[%s25440_s3 + $0x780] sm:$0xf] }
 0x340   :  { %4459 = vmatpush.bf16.msra.mxu2 %v17429_v39  ;;  %v13554_v7 = vor.u32 %v17493_v44, %v13553_v8  ;;  %v17475_v39 = vld [vmem:[%s25440_s3 + $0x724] sm:$0xf0]  ;;  %v17473_v8 = vld [vmem:[%s25440_s3 + $0x714] sm:$0xf0]  ;;  %v13537_v44 = vld [vmem:[%s25440_s3 + $0x790] sm:$0xf] }
 0x341   :  { %4478 = vmatpush.bf16.msra.mxu3 %v17437_v60  ;;  %v13545_v60 = vld [vmem:[%s25440_s3 + $0x7a0] sm:$0xf]  ;;  %v17487_v33 = vld [vmem:[%s25440_s3 + $0x784] sm:$0xf0]  ;;  %v13633_v18 = vld [vmem:[%s25440_s3 + $0x850] sm:$0xf] }
 0x342   :  { %4392 = vmatmul.bf16.gmra.mxu2 %v21111_v13  ;;  %4411 = vmatmul.bf16.gmra.mxu3 %v21113_v24 }
 0x343   :  { %5851 = vmatpush.bf16.msrb.mxu0 %v13506_v28  ;;  %5870 = vmatpush.bf16.msrb.mxu1 %v13570_v41  ;;  %v12778_v28 = vld [vmem:[#allocation3 + $0xd0] sm:$0xf0]  ;;  %v13481_v41 = vld [vmem:[%s25440_s3 + $0x720] sm:$0xf] }
 0x344   :  { %4460 = vmatpush.bf16.msra.mxu2 %v17428_v6  ;;  %v21164_v6 = vor.u32 %v17461_v49, %v12778_v28  ;;  %v13705_v49 = vld [vmem:[%s25440_s3 + $0x8e0] sm:$0xf] }
 0x345   :  { %4479 = vmatpush.bf16.msra.mxu3 %v17436_v10  ;;  %v13482_v10 = vor.u32 %v17475_v39, %v13481_v41  ;;  %v12728_v28 = vld [vmem:[#allocation3 + $0x30] sm:$0xf]  ;;  %v17448_v41 = vld [vmem:[#allocation3 + $0x34] sm:$0xf] }
 0x347   :  { %5852 = vmatpush.bf16.msrb.mxu0 %v13498_v59  ;;  %5871 = vmatpush.bf16.msrb.mxu1 %v13562_v56  ;;  %v13546_v59 = vor.u32 %v17491_v57, %v13545_v60  ;;  %v13473_v56 = vld [vmem:[%s25440_s3 + $0x710] sm:$0xf]  ;;  %v13465_v57 = vld [vmem:[%s25440_s3 + $0x700] sm:$0xf] }
 0x348   :  { %4461 = vmatpush.bf16.msra.mxu2 %v17427_v46  ;;  %v12730_v46 = vld [vmem:[#allocation3 + $0x68] sm:$0xf0]  ;;  %v13474_v39 = vor.u32 %v17473_v8, %v13473_v56  ;;  %v13841_v56 = vld [vmem:[%s25440_s3 + $0x9f0] sm:$0xf] }
 0x349   :  { %4480 = vmatpush.bf16.msra.mxu3 %v17435_v19  ;;  %v17531_v19 = vld [vmem:[%s25440_s3 + $0x8e4] sm:$0xf0]  ;;  %v21221_v8 = vor.u32 %v17448_v41, %v12730_v46 }
 0x34b   :  { %5853 = vmatpush.bf16.msrb.mxu0 %v13490_v4  ;;  %5872 = vmatpush.bf16.msrb.mxu1 %v13554_v7  ;;  %v17489_v4 = vld [vmem:[%s25440_s3 + $0x794] sm:$0xf0] }
 0x34c   :  { %v17455_v7 = vld [vmem:[#allocation3 + $0x64] sm:$0xf0]  ;;  %4462 = vmatpush.bf16.msra.mxu2 %v17426_v61  ;;  %v13538_v60 = vor.u32 %v17489_v4, %v13537_v44  ;;  %v13777_v61 = vld [vmem:[%s25440_s3 + $0x970] sm:$0xf] }
 0x34d   :  { %4481 = vmatpush.bf16.msra.mxu3 %v17434_v31  ;;  %v13642_v31 = vor.u32 %v17515_v48, %v13641_v35  ;;  %v17513_v44 = vld [vmem:[%s25440_s3 + $0x854] sm:$0xf0]  ;;  %v13697_v4 = vld [vmem:[%s25440_s3 + $0x8d0] sm:$0xf]  ;;  %v13466_v48 = vor.u32 %v17471_v42, %v13465_v57  ;;  %v17563_v57 = vld [vmem:[%s25440_s3 + $0x9e4] sm:$0xf0] }
 0x34e   :  { %4430 = vmatmul.bf16.gmra.mxu0 %v21162_v16  ;;  %4449 = vmatmul.bf16.gmra.mxu1 %v21164_v6  ;;  %v17529_v35 = vld [vmem:[%s25440_s3 + $0x8d4] sm:$0xf0]  ;;  %v13625_v42 = vld [vmem:[%s25440_s3 + $0x840] sm:$0xf] }
 0x34f   :  { %5854 = vmatpush.bf16.msrb.mxu0 %v13482_v10  ;;  %5873 = vmatpush.bf16.msrb.mxu1 %v13546_v59  ;;  %v13706_v10 = vor.u32 %v17531_v19, %v13705_v49  ;;  %v17549_v59 = vld [vmem:[%s25440_s3 + $0x974] sm:$0xf0]  ;;  %v13530_v49 = vor.u32 %v17487_v33, %v13529_v62  ;;  %v13769_v19 = vld [vmem:[%s25440_s3 + $0x960] sm:$0xf]  ;;  %v13698_v41 = vor.u32 %v17529_v35, %v13697_v4  ;;  %v17511_v62 = vld [vmem:[%s25440_s3 + $0x844] sm:$0xf0] }
 0x350   :  { %5887 = vmatpush.bf16.msrb.mxu2 %v13650_v34  ;;  %v17565_v34 = vld [vmem:[%s25440_s3 + $0x9f4] sm:$0xf0]  ;;  %v13689_v33 = vld [vmem:[%s25440_s3 + $0x8c0] sm:$0xf]  ;;  %v13617_v35 = vld [vmem:[%s25440_s3 + $0x830] sm:$0xf] }
 0x351   :  { %5906 = vmatpush.bf16.msrb.mxu3 %v13714_v52  ;;  %v21219_v52 = vor.u32 %v17455_v7, %v12728_v28  ;;  %v13778_v7 = vor.u32 %v17549_v59, %v13777_v61  ;;  %v13842_v46 = vor.u32 %v17565_v34, %v13841_v56  ;;  %v13634_v28 = vor.u32 %v17513_v44, %v13633_v18  ;;  %v17527_v18 = vld [vmem:[%s25440_s3 + $0x8c4] sm:$0xf0]  ;;  %v17545_v59 = vld [vmem:[%s25440_s3 + $0x954] sm:$0xf0]  ;;  %v13825_v56 = vld [vmem:[%s25440_s3 + $0x9d0] sm:$0xf] }
 0x352   :  { %4482 = vmatmul.bf16.vlgmr.msra.gmra.mxu3 %v21221_v8  ;;  %v17561_v34 = vld [vmem:[%s25440_s3 + $0x9d4] sm:$0xf0]  ;;  %v13626_v44 = vor.u32 %v17511_v62, %v13625_v42  ;;  %v13690_v4 = vor.u32 %v17527_v18, %v13689_v33  ;;  %v17543_v62 = vld [vmem:[%s25440_s3 + $0x944] sm:$0xf0]  ;;  %v13817_v33 = vld [vmem:[%s25440_s3 + $0x9c0] sm:$0xf] }
 0x353   :  { %5855 = vmatpush.bf16.msrb.mxu0 %v13474_v39  ;;  %5874 = vmatpush.bf16.msrb.mxu1 %v13538_v60  ;;  %v17547_v39 = vld [vmem:[%s25440_s3 + $0x964] sm:$0xf0]  ;;  %v13833_v60 = vld [vmem:[%s25440_s3 + $0x9e0] sm:$0xf] }
 0x354   :  { %4463 = vmatmul.bf16.vlgmr.msra.gmra.mxu2 %v21219_v52  ;;  %v13770_v61 = vor.u32 %v17547_v39, %v13769_v19  ;;  %v13609_v39 = vld [vmem:[%s25440_s3 + $0x820] sm:$0xf]  ;;  %v17559_v18 = vld [vmem:[%s25440_s3 + $0x9c4] sm:$0xf0] }
 0x355   :  { %5888 = vmatpush.bf16.msrb.mxu2 %v13642_v31  ;;  %5907 = vmatpush.bf16.msrb.mxu3 %v13706_v10  ;;  %v13834_v31 = vor.u32 %v17563_v57, %v13833_v60  ;;  %v13761_v10 = vld [vmem:[%s25440_s3 + $0x950] sm:$0xf]  ;;  %v13753_v60 = vld [vmem:[%s25440_s3 + $0x940] sm:$0xf] }
 0x356   :  { %v13762_v19 = vor.u32 %v17545_v59, %v13761_v10  ;;  %v17523_v10 = vld [vmem:[%s25440_s3 + $0x8a4] sm:$0xf0]  ;;  %v12784_v59 = vld [vmem:[#allocation3 + $0xa0] sm:$0xf] }
 0x357   :  { %5856 = vmatpush.bf16.msrb.mxu0 %v13466_v48  ;;  %5875 = vmatpush.bf16.msrb.mxu1 %v13530_v49  ;;  %v17509_v48 = vld [vmem:[%s25440_s3 + $0x834] sm:$0xf0]  ;;  %v13681_v49 = vld [vmem:[%s25440_s3 + $0x8b0] sm:$0xf] }
 0x358   :  { %v13618_v57 = vor.u32 %v17509_v48, %v13617_v35  ;;  %v13601_v35 = vld [vmem:[%s25440_s3 + $0x810] sm:$0xf] }
 0x359   :  { %5889 = vmatpush.bf16.msrb.mxu2 %v13634_v28  ;;  %5908 = vmatpush.bf16.msrb.mxu3 %v13698_v41  ;;  %v13826_v28 = vor.u32 %v17561_v34, %v13825_v56  ;;  %v12786_v41 = vld [vmem:[#allocation3 + $0xd8] sm:$0xf0]  ;;  %v17462_v34 = vld [vmem:[#allocation3 + $0xa4] sm:$0xf]  ;;  %v13745_v48 = vld [vmem:[%s25440_s3 + $0x930] sm:$0xf] }
 0x35b   :  { %5925 = vmatpush.bf16.msra.mxu0 %v13778_v7  ;;  %5944 = vmatpush.bf16.msra.mxu1 %v13842_v46  ;;  %v17525_v7 = vld [vmem:[%s25440_s3 + $0x8b4] sm:$0xf0]  ;;  %v17469_v46 = vld [vmem:[#allocation3 + $0xd4] sm:$0xf0] }
 0x35c   :  { %v13682_v42 = vor.u32 %v17525_v7, %v13681_v49  ;;  %v21308_v56 = vor.u32 %v17469_v46, %v12784_v59  ;;  %v21316_v49 = vor.u32 %v17462_v34, %v12786_v41  ;;  %v17541_v46 = vld [vmem:[%s25440_s3 + $0x934] sm:$0xf0]  ;;  %v17519_v59 = vld [vmem:[%s25440_s3 + $0x884] sm:$0xf0]  ;;  %v13737_v34 = vld [vmem:[%s25440_s3 + $0x920] sm:$0xf] }
 0x35d   :  { %5890 = vmatpush.bf16.msrb.mxu2 %v13626_v44  ;;  %5909 = vmatpush.bf16.msrb.mxu3 %v13690_v4  ;;  %v13754_v44 = vor.u32 %v17543_v62, %v13753_v60  ;;  %v13818_v4 = vor.u32 %v17559_v18, %v13817_v33  ;;  %v17557_v60 = vld [vmem:[%s25440_s3 + $0x9b4] sm:$0xf0] }
 0x35e   :  { %5857 = vmatmul.bf16.vlgmr.msrb.gmra.mxu0 %v20685_v50  ;;  %5876 = vmatmul.bf16.vlgmr.msrb.gmra.mxu1 %v20687_v23  ;;  %v17505_v41 = vld [vmem:[%s25440_s3 + $0x814] sm:$0xf0] }
 0x35f   :  { %5926 = vmatpush.bf16.msra.mxu0 %v13770_v61  ;;  %5945 = vmatpush.bf16.msra.mxu1 %v13834_v31  ;;  %v17507_v61 = vld [vmem:[%s25440_s3 + $0x824] sm:$0xf0]  ;;  %v13673_v31 = vld [vmem:[%s25440_s3 + $0x8a0] sm:$0xf]  ;;  %v13602_v33 = vor.u32 %v17505_v41, %v13601_v35 }
 0x360   :  { %v13610_v7 = vor.u32 %v17507_v61, %v13609_v39  ;;  %v13665_v39 = vld [vmem:[%s25440_s3 + $0x890] sm:$0xf]  ;;  %v13593_v61 = vld [vmem:[%s25440_s3 + $0x800] sm:$0xf]  ;;  %v17555_v35 = vld [vmem:[%s25440_s3 + $0x9a4] sm:$0xf0] }
 0x361   :  { %5891 = vmatpush.bf16.msrb.mxu2 %v13618_v57  ;;  %5910 = vmatpush.bf16.msrb.mxu3 %v13682_v42  ;;  %v17521_v57 = vld [vmem:[%s25440_s3 + $0x894] sm:$0xf0]  ;;  %v13746_v42 = vor.u32 %v17541_v46, %v13745_v48  ;;  %v13905_v48 = vld [vmem:[%s25440_s3 + $0xa70] sm:$0xf] }
 0x362   :  { %4487 = vmatmul.bf16.gmra.mxu3 %v21316_v49  ;;  %v13666_v18 = vor.u32 %v17521_v57, %v13665_v39  ;;  %v17597_v46 = vld [vmem:[%s25440_s3 + $0xaf4] sm:$0xf0]  ;;  %v13729_v57 = vld [vmem:[%s25440_s3 + $0x910] sm:$0xf] }
 0x363   :  { %5927 = vmatpush.bf16.msra.mxu0 %v13762_v19  ;;  %5946 = vmatpush.bf16.msra.mxu1 %v13826_v28  ;;  %v13674_v19 = vor.u32 %v17523_v10, %v13673_v31  ;;  %v13809_v28 = vld [vmem:[%s25440_s3 + $0x9b0] sm:$0xf]  ;;  %v17503_v31 = vld [vmem:[%s25440_s3 + $0x804] sm:$0xf0]  ;;  %v13657_v10 = vld [vmem:[%s25440_s3 + $0x880] sm:$0xf] }
 0x364   :  { %4468 = vmatmul.bf16.gmra.mxu2 %v21308_v56  ;;  %v13810_v62 = vor.u32 %v17557_v60, %v13809_v28  ;;  %v13594_v28 = vor.u32 %v17503_v31, %v13593_v61  ;;  %v13658_v60 = vor.u32 %v17519_v59, %v13657_v10  ;;  %v17579_v61 = vld [vmem:[%s25440_s3 + $0xa64] sm:$0xf0]  ;;  %v13961_v31 = vld [vmem:[%s25440_s3 + $0xae0] sm:$0xf]  ;;  %v13730_v59 = vor.u32 %v17537_v20, %v13729_v57  ;;  %v13889_v20 = vld [vmem:[%s25440_s3 + $0xa50] sm:$0xf] }
 0x365   :  { %5892 = vmatpush.bf16.msrb.mxu2 %v13610_v7  ;;  %5911 = vmatpush.bf16.msrb.mxu3 %v13674_v19  ;;  %v17581_v7 = vld [vmem:[%s25440_s3 + $0xa74] sm:$0xf0]  ;;  %v13969_v19 = vld [vmem:[%s25440_s3 + $0xaf0] sm:$0xf]  ;;  %v17595_v10 = vld [vmem:[%s25440_s3 + $0xae4] sm:$0xf0] }
 0x366   :  { %v17593_v57 = vld [vmem:[%s25440_s3 + $0xad4] sm:$0xf0] }
 0x367   :  { %5928 = vmatpush.bf16.msra.mxu0 %v13754_v44  ;;  %5947 = vmatpush.bf16.msra.mxu1 %v13818_v4  ;;  %v17539_v44 = vld [vmem:[%s25440_s3 + $0x924] sm:$0xf0]  ;;  %v13801_v4 = vld [vmem:[%s25440_s3 + $0x9a0] sm:$0xf] }
 0x368   :  { %v13738_v41 = vor.u32 %v17539_v44, %v13737_v34  ;;  %v13802_v39 = vor.u32 %v17555_v35, %v13801_v4  ;;  %v13721_v44 = vld [vmem:[%s25440_s3 + $0x900] sm:$0xf]  ;;  %v17535_v4 = vld [vmem:[%s25440_s3 + $0x904] sm:$0xf0] }
 0x369   :  { %5893 = vmatpush.bf16.msrb.mxu2 %v13602_v33  ;;  %5912 = vmatpush.bf16.msrb.mxu3 %v13666_v18  ;;  %v17553_v33 = vld [vmem:[%s25440_s3 + $0x994] sm:$0xf0]  ;;  %v13897_v18 = vld [vmem:[%s25440_s3 + $0xa60] sm:$0xf] }
 0x36a   :  { %v13794_v34 = vor.u32 %v17553_v33, %v13793_v63  ;;  %v13785_v35 = vld [vmem:[%s25440_s3 + $0x980] sm:$0xf]  ;;  %v14033_v63 = vld [vmem:[%s25440_s3 + $0xb70] sm:$0xf] }
 0x36b   :  { %5929 = vmatpush.bf16.msra.mxu0 %v13746_v42  ;;  %5948 = vmatpush.bf16.msra.mxu1 %v13810_v62  ;;  %v13906_v42 = vor.u32 %v17581_v7, %v13905_v48  ;;  %v13970_v62 = vor.u32 %v17597_v46, %v13969_v19  ;;  %v17551_v48 = vld [vmem:[%s25440_s3 + $0x984] sm:$0xf0]  ;;  %v13898_v7 = vor.u32 %v17579_v61, %v13897_v18  ;;  %v17613_v46 = vld [vmem:[%s25440_s3 + $0xb74] sm:$0xf0]  ;;  %v21441_v33 = vld [vmem:[%s25443_s6] ss:$0 sm:$0xff] }
 0x36c   :  { %v13962_v19 = vor.u32 %v17595_v10, %v13961_v31  ;;  %v14034_v18 = vor.u32 %v17613_v46, %v14033_v63  ;;  %v14025_v31 = vld [vmem:[%s25440_s3 + $0xb60] sm:$0xf] }
 0x36d   :  { %5894 = vmatpush.bf16.msrb.mxu2 %v13594_v28  ;;  %5913 = vmatpush.bf16.msrb.mxu3 %v13658_v60  ;;  %v14097_v28 = vld [vmem:[%s25440_s3 + $0xbf0] sm:$0xf]  ;;  %v17629_v60 = vld [vmem:[%s25440_s3 + $0xbf4] sm:$0xf0] }
 0x36e   :  { %5862 = vmatmul.bf16.gmra.mxu0 %v20808_v25  ;;  %5881 = vmatmul.bf16.gmra.mxu1 %v20810_v58  ;;  %v14098_v61 = vor.u32 %v17629_v60, %v14097_v28 }
 0x36f   :  { %5930 = vmatpush.bf16.msra.mxu0 %v13738_v41  ;;  %5949 = vmatpush.bf16.msra.mxu1 %v13802_v39  ;;  %v17577_v41 = vld [vmem:[%s25440_s3 + $0xa54] sm:$0xf0]  ;;  %v13953_v39 = vld [vmem:[%s25440_s3 + $0xad0] sm:$0xf] }
 0x370   :  { %v13890_v10 = vor.u32 %v17577_v41, %v13889_v20  ;;  %v17575_v20 = vld [vmem:[%s25440_s3 + $0xa44] sm:$0xf0]  ;;  %v14017_v41 = vld [vmem:[%s25440_s3 + $0xb50] sm:$0xf] }
 0x371   :  { %5963 = vmatpush.bf16.msra.mxu2 %v13906_v42  ;;  %5982 = vmatpush.bf16.msra.mxu3 %v13970_v62  ;;  %v13722_v42 = vor.u32 %v17535_v4, %v13721_v44  ;;  %v13786_v62 = vor.u32 %v17551_v48, %v13785_v35  ;;  %v14089_v44 = vld [vmem:[%s25440_s3 + $0xbe0] sm:$0xf]  ;;  %v17627_v4 = vld [vmem:[%s25440_s3 + $0xbe4] sm:$0xf0]  ;;  %v4236_v48 = vpop.f32.mrf.mxu2  ;;  %v4255_v63 = vpop.f32.mrf.mxu3 }
 0x372   :  { %5914 = vmatmul.bf16.vlgmr.msrb.gmra.mxu3 %v20754_v27  ;;  %v13881_v35 = vld [vmem:[%s25440_s3 + $0xa40] sm:$0xf]  ;;  %v4237_v46 = vadd.f32 %v21441_v33, %v4236_v48  ;;  %v14090_v60 = vor.u32 %v17627_v4, %v14089_v44  ;;  %v13937_v44 = vld [vmem:[%s25440_s3 + $0xab0] sm:$0xf]  ;;  %v17589_v4 = vld [vmem:[%s25440_s3 + $0xab4] sm:$0xf0] }
 0x373   :  { %5931 = vmatpush.bf16.msra.mxu0 %v13730_v59  ;;  %5950 = vmatpush.bf16.msra.mxu1 %v13794_v34  ;;  %v13954_v59 = vor.u32 %v17593_v57, %v13953_v39  ;;  %v17611_v34 = vld [vmem:[%s25440_s3 + $0xb64] sm:$0xf0]  ;;  %v17609_v39 = vld [vmem:[%s25440_s3 + $0xb54] sm:$0xf0]  ;;  %v14081_v57 = vld [vmem:[%s25440_s3 + $0xbd0] sm:$0xf] }
 0x374   :  { %5895 = vmatmul.bf16.vlgmr.msrb.gmra.mxu2 %v20752_v45  ;;  %v14026_v28 = vor.u32 %v17611_v34, %v14025_v31  ;;  %v13882_v31 = vor.u32 %v17575_v20, %v13881_v35  ;;  %v14018_v35 = vor.u32 %v17609_v39, %v14017_v41  ;;  %v13865_v20 = vld [vmem:[%s25440_s3 + $0xa20] sm:$0xf]  ;;  %v17623_v39 = vld [vmem:[%s25440_s3 + $0xbc4] sm:$0xf0] }
 0x375   :  { %5964 = vmatpush.bf16.msra.mxu2 %v13898_v7  ;;  %5983 = vmatpush.bf16.msra.mxu3 %v13962_v19  ;;  %v13945_v7 = vld [vmem:[%s25440_s3 + $0xac0] sm:$0xf]  ;;  %v17591_v19 = vld [vmem:[%s25440_s3 + $0xac4] sm:$0xf0] }
 0x376   :  { %v13946_v34 = vor.u32 %v17591_v19, %v13945_v7  ;;  %v14009_v7 = vld [vmem:[%s25440_s3 + $0xb40] sm:$0xf] }
 0x377   :  { %5932 = vmatpush.bf16.msra.mxu0 %v13722_v42  ;;  %5951 = vmatpush.bf16.msra.mxu1 %v13786_v62  ;;  %v17625_v42 = vld [vmem:[%s25440_s3 + $0xbd4] sm:$0xf0]  ;;  %v4256_v62 = vadd.f32 %v4255_v63, %v4237_v46  ;;  %v14073_v41 = vld [vmem:[%s25440_s3 + $0xbc0] sm:$0xf] }
 0x378   :  { %v14082_v63 = vor.u32 %v17625_v42, %v14081_v57 }
 0x379   :  { %5965 = vmatpush.bf16.msra.mxu2 %v13890_v10  ;;  %5984 = vmatpush.bf16.msra.mxu3 %v13954_v59  ;;  %v13873_v10 = vld [vmem:[%s25440_s3 + $0xa30] sm:$0xf]  ;;  %v17573_v59 = vld [vmem:[%s25440_s3 + $0xa34] sm:$0xf0]  ;;  %v4238_v57 = vpop.f32.mrf.mxu2  ;;  %v4257_v42 = vpop.f32.mrf.mxu3 }
 0x37a   :  { %v13874_v46 = vor.u32 %v17573_v59, %v13873_v10  ;;  %v14074_v10 = vor.u32 %v17623_v39, %v14073_v41  ;;  %v13857_v59 = vld [vmem:[%s25440_s3 + $0xa10] sm:$0xf] }
 0x37b   :  { %6001 = vmatpush.bf16.msrb.mxu0 %v14034_v18  ;;  %6020 = vmatpush.bf16.msrb.mxu1 %v14098_v61  ;;  %v4274_v18 = vpop.f32.mrf.mxu0  ;;  %v4293_v61 = vpop.f32.mrf.mxu1 }
 0x37c   :  { %v4275_v48 = vadd.f32 %v4274_v18, %v4256_v62  ;;  %v17571_v62 = vld [vmem:[%s25440_s3 + $0xa24] sm:$0xf0]  ;;  %v13929_v18 = vld [vmem:[%s25440_s3 + $0xaa0] sm:$0xf] }
 0x37d   :  { %5966 = vmatpush.bf16.msra.mxu2 %v13882_v31  ;;  %5985 = vmatpush.bf16.msra.mxu3 %v13946_v34  ;;  %v4239_v31 = vadd.f32 %v21441_v33, %v4238_v57  ;;  %v13866_v3 = vor.u32 %v17571_v62, %v13865_v20  ;;  %v13921_v20 = vld [vmem:[%s25440_s3 + $0xa90] sm:$0xf] }
 0x37e   :  { %5933 = vmatmul.bf16.vlgmr.msra.gmra.mxu0 %v20889_v22  ;;  %5952 = vmatmul.bf16.vlgmr.msra.gmra.mxu1 %v20891_v51  ;;  %v21500_v19 = vadd.f32 %v4293_v61, %v4275_v48  ;;  %v17587_v61 = vld [vmem:[%s25440_s3 + $0xaa4] sm:$0xf0] }
 0x37f   :  { %6002 = vmatpush.bf16.msrb.mxu0 %v14026_v28  ;;  %6021 = vmatpush.bf16.msrb.mxu1 %v14090_v60  ;;  %v13938_v28 = vor.u32 %v17589_v4, %v13937_v44  ;;  %v17607_v60 = vld [vmem:[%s25440_s3 + $0xb44] sm:$0xf0]  ;;  %v14001_v44 = vld [vmem:[%s25440_s3 + $0xb30] sm:$0xf]  ;;  %v4258_v4 = vadd.f32 %v4257_v42, %v4239_v31  ;;  %v13930_v9 = vor.u32 %v17587_v61, %v13929_v18  ;;  %v13849_v18 = vld [vmem:[%s25440_s3 + $0xa00] sm:$0xf] }
 0x380   :  { %v14010_v34 = vor.u32 %v17607_v60, %v14009_v7  ;;  %v17621_v7 = vld [vmem:[%s25440_s3 + $0xbb4] sm:$0xf0]  ;;  %v17567_v61 = vld [vmem:[%s25440_s3 + $0xa04] sm:$0xf0]  ;;  %v13913_v31 = vld [vmem:[%s25440_s3 + $0xa80] sm:$0xf] }
 0x381   :  { %5967 = vmatpush.bf16.msra.mxu2 %v13874_v46  ;;  %5986 = vmatpush.bf16.msra.mxu3 %v13938_v28  ;;  %v17569_v60 = vld [vmem:[%s25440_s3 + $0xa14] sm:$0xf0] }
 0x382   :  { %v17585_v46 = vld [vmem:[%s25440_s3 + $0xa94] sm:$0xf0]  ;;  %5919 = vmatmul.bf16.gmra.mxu3 %v20842_v26  ;;  %v13858_v42 = vor.u32 %v17569_v60, %v13857_v59 }
 0x383   :  { %6003 = vmatpush.bf16.msrb.mxu0 %v14018_v35  ;;  %6022 = vmatpush.bf16.msrb.mxu1 %v14082_v63  ;;  %v4276_v48 = vpop.f32.mrf.mxu0  ;;  %v4295_v11 = vpop.f32.mrf.mxu1  ;;  %v17605_v35 = vld [vmem:[%s25440_s3 + $0xb34] sm:$0xf0]  ;;  %v14065_v63 = vld [vmem:[%s25440_s3 + $0xbb0] sm:$0xf]  ;;  %v13922_v62 = vor.u32 %v17585_v46, %v13921_v20 }
 0x384   :  { %v4277_v28 = vadd.f32 %v4276_v48, %v4258_v4  ;;  %5900 = vmatmul.bf16.gmra.mxu2 %v20840_v17  ;;  %v14002_v41 = vor.u32 %v17605_v35, %v14001_v44  ;;  %v14066_v39 = vor.u32 %v17621_v7, %v14065_v63  ;;  %v14057_v44 = vld [vmem:[%s25440_s3 + $0xba0] sm:$0xf]  ;;  %v17619_v4 = vld [vmem:[%s25440_s3 + $0xba4] sm:$0xf0]  ;;  %v14161_v48 = vld [vmem:[%s25440_s3 + $0xc70] sm:$0xf] }
 0x385   :  { %5968 = vmatpush.bf16.msra.mxu2 %v13866_v3  ;;  %5987 = vmatpush.bf16.msra.mxu3 %v13930_v9  ;;  %v17583_v3 = vld [vmem:[%s25440_s3 + $0xa84] sm:$0xf0]  ;;  %v13993_v9 = vld [vmem:[%s25440_s3 + $0xb20] sm:$0xf]  ;;  %v17645_v35 = vld [vmem:[%s25440_s3 + $0xc74] sm:$0xf0] }
 0x386   :  { %v21547_v57 = vadd.f32 %v4295_v11, %v4277_v28  ;;  %v17603_v11 = vld [vmem:[%s25440_s3 + $0xb24] sm:$0xf0]  ;;  %v14225_v63 = vld [vmem:[%s25440_s3 + $0xcf0] sm:$0xf]  ;;  %v17661_v7 = vld [vmem:[%s25440_s3 + $0xcf4] sm:$0xf0]  ;;  %v13850_v28 = vor.u32 %v17567_v61, %v13849_v18  ;;  %v14162_v55 = vor.u32 %v17645_v35, %v14161_v48 }
 0x387   :  { %6004 = vmatpush.bf16.msrb.mxu0 %v14010_v34  ;;  %6023 = vmatpush.bf16.msrb.mxu1 %v14074_v10  ;;  %v4241_v34 = vpop.f32.mrf.mxu2  ;;  %v4260_v10 = vpop.f32.mrf.mxu3  ;;  %v14226_v1 = vor.u32 %v17661_v7, %v14225_v63  ;;  %v14153_v18 = vld [vmem:[%s25440_s3 + $0xc60] sm:$0xf]  ;;  %v14289_v63 = vld [vmem:[%s25440_s3 + $0xd70] sm:$0xf] }
 0x388   :  { %v4242_v59 = vadd.f32 %v21441_v33, %v4241_v34  ;;  %v14058_v34 = vor.u32 %v17619_v4, %v14057_v44  ;;  %v13977_v44 = vld [vmem:[%s25440_s3 + $0xb00] sm:$0xf]  ;;  %v17599_v4 = vld [vmem:[%s25440_s3 + $0xb04] sm:$0xf0] }
 0x389   :  { %5969 = vmatpush.bf16.msra.mxu2 %v13858_v42  ;;  %5988 = vmatpush.bf16.msra.mxu3 %v13922_v62  ;;  %v14049_v42 = vld [vmem:[%s25440_s3 + $0xb90] sm:$0xf]  ;;  %v17617_v62 = vld [vmem:[%s25440_s3 + $0xb94] sm:$0xf0]  ;;  %v14041_v48 = vld [vmem:[%s25440_s3 + $0xb80] sm:$0xf] }
 0x38a   :  { %v4261_v60 = vadd.f32 %v4260_v10, %v4242_v59  ;;  %v14217_v10 = vld [vmem:[%s25440_s3 + $0xce0] sm:$0xf]  ;;  %v14050_v59 = vor.u32 %v17617_v62, %v14049_v42  ;;  %v13978_v42 = vor.u32 %v17599_v4, %v13977_v44  ;;  %v17691_v44 = vld [vmem:[%s25440_s3 + $0xde4] sm:$0xf0] }
 0x38b   :  { %6005 = vmatpush.bf16.msrb.mxu0 %v14002_v41  ;;  %6024 = vmatpush.bf16.msrb.mxu1 %v14066_v39  ;;  %v4279_v20 = vpop.f32.mrf.mxu0  ;;  %v4298_v46 = vpop.f32.mrf.mxu1  ;;  %v13914_v41 = vor.u32 %v17583_v3, %v13913_v31  ;;  %v13994_v39 = vor.u32 %v17603_v11, %v13993_v9  ;;  %v17643_v31 = vld [vmem:[%s25440_s3 + $0xc64] sm:$0xf0] }
 0x38c   :  { %v4280_v5 = vadd.f32 %v4279_v20, %v4261_v60  ;;  %v17659_v3 = vld [vmem:[%s25440_s3 + $0xce4] sm:$0xf0]  ;;  %v14154_v7 = vor.u32 %v17643_v31, %v14153_v18 }
 0x38d   :  { %5970 = vmatpush.bf16.msra.mxu2 %v13850_v28  ;;  %5989 = vmatpush.bf16.msra.mxu3 %v13914_v41  ;;  %v14218_v60 = vor.u32 %v17659_v3, %v14217_v10  ;;  %v17641_v41 = vld [vmem:[%s25440_s3 + $0xc54] sm:$0xf0]  ;;  %v14281_v3 = vld [vmem:[%s25440_s3 + $0xd60] sm:$0xf] }
 0x38e   :  { %5938 = vmatmul.bf16.gmra.mxu0 %v20952_v38  ;;  %5957 = vmatmul.bf16.gmra.mxu1 %v20954_v0  ;;  %v21603_v61 = vadd.f32 %v4298_v46, %v4280_v5  ;;  %v13986_v5 = vor.u32 %v17601_v36, %v13985_v47  ;;  %v17615_v47 = vld [vmem:[%s25440_s3 + $0xb84] sm:$0xf0]  ;;  %v14145_v36 = vld [vmem:[%s25440_s3 + $0xc50] sm:$0xf] }
 0x38f   :  { %v4243_v9 = vpop.f32.mrf.mxu2  ;;  %v4262_v11 = vpop.f32.mrf.mxu3  ;;  %6006 = vmatpush.bf16.msrb.mxu0 %v13994_v39  ;;  %6025 = vmatpush.bf16.msrb.mxu1 %v14058_v34  ;;  %v14209_v39 = vld [vmem:[%s25440_s3 + $0xcd0] sm:$0xf]  ;;  %v17657_v34 = vld [vmem:[%s25440_s3 + $0xcd4] sm:$0xf0]  ;;  %v14042_v62 = vor.u32 %v17615_v47, %v14041_v48  ;;  %v14137_v48 = vld [vmem:[%s25440_s3 + $0xc40] sm:$0xf] }
 0x390   :  { %v4244_v35 = vadd.f32 %v21441_v33, %v4243_v9  ;;  %v17677_v33 = vld [vmem:[%s25440_s3 + $0xd74] sm:$0xf0]  ;;  %v14146_v9 = vor.u32 %v17641_v41, %v14145_v36  ;;  %v17639_v36 = vld [vmem:[%s25440_s3 + $0xc44] sm:$0xf0] }
 0x391   :  { %6039 = vmatpush.bf16.msrb.mxu2 %v14162_v55  ;;  %6058 = vmatpush.bf16.msrb.mxu3 %v14226_v1  ;;  %v14353_v1 = vld [vmem:[%s25440_s3 + $0xdf0] sm:$0xf]  ;;  %v17693_v55 = vld [vmem:[%s25440_s3 + $0xdf4] sm:$0xf0]  ;;  %v14290_v31 = vor.u32 %v17677_v33, %v14289_v63  ;;  %v14201_v63 = vld [vmem:[%s25440_s3 + $0xcc0] sm:$0xf] }
 0x392   :  { %v4263_v20 = vadd.f32 %v4262_v11, %v4244_v35  ;;  %5990 = vmatmul.bf16.vlgmr.msra.gmra.mxu3 %v20930_v15  ;;  %v14354_v10 = vor.u32 %v17693_v55, %v14353_v1  ;;  %v14210_v11 = vor.u32 %v17657_v34, %v14209_v39  ;;  %v14273_v55 = vld [vmem:[%s25440_s3 + $0xd50] sm:$0xf]  ;;  %v14138_v34 = vor.u32 %v17639_v36, %v14137_v48  ;;  %v14329_v36 = vld [vmem:[%s25440_s3 + $0xdc0] sm:$0xf] }
 0x393   :  { %v4281_v46 = vpop.f32.mrf.mxu0  ;;  %v4300_v28 = vpop.f32.mrf.mxu1  ;;  %6007 = vmatpush.bf16.msrb.mxu0 %v13986_v5  ;;  %6026 = vmatpush.bf16.msrb.mxu1 %v14050_v59  ;;  %v17675_v5 = vld [vmem:[%s25440_s3 + $0xd64] sm:$0xf0]  ;;  %v14345_v59 = vld [vmem:[%s25440_s3 + $0xde0] sm:$0xf] }
 0x394   :  { %v4282_v18 = vadd.f32 %v4281_v46, %v4263_v20  ;;  %5971 = vmatmul.bf16.vlgmr.msra.gmra.mxu2 %v20928_v30  ;;  %v14282_v33 = vor.u32 %v17675_v5, %v14281_v3  ;;  %v14346_v1 = vor.u32 %v17691_v44, %v14345_v59  ;;  %v17673_v20 = vld [vmem:[%s25440_s3 + $0xd54] sm:$0xf0]  ;;  %v14337_v46 = vld [vmem:[%s25440_s3 + $0xdd0] sm:$0xf]  ;;  %v14121_v5 = vld [vmem:[%s25440_s3 + $0xc20] sm:$0xf] }
 0x395   :  { %6040 = vmatpush.bf16.msrb.mxu2 %v14154_v7  ;;  %6059 = vmatpush.bf16.msrb.mxu3 %v14218_v60  ;;  %v17655_v7 = vld [vmem:[%s25440_s3 + $0xcc4] sm:$0xf0]  ;;  %v14265_v59 = vld [vmem:[%s25440_s3 + $0xd40] sm:$0xf] }
 0x396   :  { %v21665_v4 = vadd.f32 %v4300_v28, %v4282_v18  ;;  %v17637_v18 = vld [vmem:[%s25440_s3 + $0xc34] sm:$0xf0] }
 0x397   :  { %v4312_v35 = vpop.f32.mrf.mxu2  ;;  %v4331_v47 = vpop.f32.mrf.mxu3  ;;  %6008 = vmatpush.bf16.msrb.mxu0 %v13978_v42  ;;  %6027 = vmatpush.bf16.msrb.mxu1 %v14042_v62  ;;  %v14202_v42 = vor.u32 %v17655_v7, %v14201_v63  ;;  %v14129_v62 = vld [vmem:[%s25440_s3 + $0xc30] sm:$0xf]  ;;  %v17687_v63 = vld [vmem:[%s25440_s3 + $0xdc4] sm:$0xf0] }
 0x398   :  { %v4313_v60 = vadd.f32 %v4312_v35, %v21500_v19  ;;  %v17689_v19 = vld [vmem:[%s25440_s3 + $0xdd4] sm:$0xf0]  ;;  %v14130_v48 = vor.u32 %v17637_v18, %v14129_v62 }
 0x399   :  { %6041 = vmatpush.bf16.msrb.mxu2 %v14146_v9  ;;  %6060 = vmatpush.bf16.msrb.mxu3 %v14210_v11  ;;  %v14274_v9 = vor.u32 %v17673_v20, %v14273_v55  ;;  %v14338_v11 = vor.u32 %v17689_v19, %v14337_v46  ;;  %v17651_v55 = vld [vmem:[%s25440_s3 + $0xca4] sm:$0xf0]  ;;  %v14330_v19 = vor.u32 %v17687_v63, %v14329_v36  ;;  %v14105_v63 = vld [vmem:[%s25440_s3 + $0xc00] sm:$0xf] }
 0x39a   :  { %v4332_v28 = vadd.f32 %v4331_v47, %v4313_v60  ;;  %v17671_v47 = vld [vmem:[%s25440_s3 + $0xd44] sm:$0xf0] }
 0x39b   :  { %6077 = vmatpush.bf16.msra.mxu0 %v14290_v31  ;;  %6096 = vmatpush.bf16.msra.mxu1 %v14354_v10  ;;  %v4350_v41 = vpop.f32.mrf.mxu0  ;;  %v4369_v39 = vpop.f32.mrf.mxu1  ;;  %v14193_v31 = vld [vmem:[%s25440_s3 + $0xcb0] sm:$0xf]  ;;  %v17653_v10 = vld [vmem:[%s25440_s3 + $0xcb4] sm:$0xf0]  ;;  %v14266_v46 = vor.u32 %v17671_v47, %v14265_v59 }
 0x39c   :  { %v4351_v3 = vadd.f32 %v4350_v41, %v4332_v28  ;;  %v14194_v35 = vor.u32 %v17653_v10, %v14193_v31  ;;  %v14113_v28 = vld [vmem:[%s25440_s3 + $0xc10] sm:$0xf]  ;;  %v17685_v10 = vld [vmem:[%s25440_s3 + $0xdb4] sm:$0xf0] }
 0x39d   :  { %6042 = vmatpush.bf16.msrb.mxu2 %v14138_v34  ;;  %6061 = vmatpush.bf16.msrb.mxu3 %v14202_v42  ;;  %v14257_v41 = vld [vmem:[%s25440_s3 + $0xd30] sm:$0xf] }
 0x39e   :  { %6009 = vmatmul.bf16.vlgmr.msrb.gmra.mxu0 %v21030_v37  ;;  %6028 = vmatmul.bf16.vlgmr.msrb.gmra.mxu1 %v21032_v40  ;;  %v21712_v44 = vadd.f32 %v4369_v39, %v4351_v3  ;;  %v14321_v31 = vld [vmem:[%s25440_s3 + $0xdb0] sm:$0xf]  ;;  %v17633_v3 = vld [vmem:[%s25440_s3 + $0xc14] sm:$0xf0] }
 0x39f   :  { %6078 = vmatpush.bf16.msra.mxu0 %v14282_v33  ;;  %6097 = vmatpush.bf16.msra.mxu1 %v14346_v1  ;;  %v4314_v7 = vpop.f32.mrf.mxu2  ;;  %v4333_v60 = vpop.f32.mrf.mxu3  ;;  %v17635_v33 = vld [vmem:[%s25440_s3 + $0xc24] sm:$0xf0]  ;;  %v14185_v1 = vld [vmem:[%s25440_s3 + $0xca0] sm:$0xf]  ;;  %v14114_v47 = vor.u32 %v17633_v3, %v14113_v28 }
 0x3a0   :  { %v4315_v20 = vadd.f32 %v4314_v7, %v21547_v57  ;;  %v14122_v62 = vor.u32 %v17635_v33, %v14121_v5  ;;  %v14186_v18 = vor.u32 %v17651_v55, %v14185_v1  ;;  %v17669_v57 = vld [vmem:[%s25440_s3 + $0xd34] sm:$0xf0]  ;;  %v17631_v7 = vld [vmem:[%s25440_s3 + $0xc04] sm:$0xf0]  ;;  %v14313_v28 = vld [vmem:[%s25440_s3 + $0xda0] sm:$0xf] }
 0x3a1   :  { %6043 = vmatpush.bf16.msrb.mxu2 %v14130_v48  ;;  %6062 = vmatpush.bf16.msrb.mxu3 %v14194_v35  ;;  %v14258_v59 = vor.u32 %v17669_v57, %v14257_v41  ;;  %v14322_v48 = vor.u32 %v17685_v10, %v14321_v31  ;;  %v17647_v55 = vld [vmem:[%s25440_s3 + $0xc84] sm:$0xf0]  ;;  %v14106_v31 = vor.u32 %v17631_v7, %v14105_v63  ;;  %v17482_v63 = vld [vmem:[%s25440_s3 + $0x764] sm:$0xf] }
 0x3a2   :  { %v4334_v39 = vadd.f32 %v4333_v60, %v4315_v20  ;;  %5995 = vmatmul.bf16.gmra.mxu3 %v20990_v21  ;;  %v14169_v60 = vld [vmem:[%s25440_s3 + $0xc80] sm:$0xf]  ;;  %v17683_v41 = vld [vmem:[%s25440_s3 + $0xda4] sm:$0xf0] }
 0x3a3   :  { %6079 = vmatpush.bf16.msra.mxu0 %v14274_v9  ;;  %6098 = vmatpush.bf16.msra.mxu1 %v14338_v11  ;;  %v4352_v34 = vpop.f32.mrf.mxu0  ;;  %v4371_v42 = vpop.f32.mrf.mxu1  ;;  %v14177_v9 = vld [vmem:[%s25440_s3 + $0xc90] sm:$0xf]  ;;  %v17649_v11 = vld [vmem:[%s25440_s3 + $0xc94] sm:$0xf0]  ;;  %v14249_v20 = vld [vmem:[%s25440_s3 + $0xd20] sm:$0xf]  ;;  %v14170_v10 = vor.u32 %v17647_v55, %v14169_v60 }
 0x3a4   :  { %v4353_v5 = vadd.f32 %v4352_v34, %v4334_v39  ;;  %5976 = vmatmul.bf16.gmra.mxu2 %v20988_v29  ;;  %v14178_v36 = vor.u32 %v17649_v11, %v14177_v9  ;;  %v17484_v39 = vld [vmem:[%s25440_s3 + $0x774] sm:$0xf]  ;;  %v13523_v34 = vld [vmem:[%s25440_s3 + $0x778] sm:$0xf0]  ;;  %v14314_v9 = vor.u32 %v17683_v41, %v14313_v28  ;;  %v14241_v11 = vld [vmem:[%s25440_s3 + $0xd10] sm:$0xf] }
 0x3a5   :  { %6044 = vmatpush.bf16.msrb.mxu2 %v14122_v62  ;;  %6063 = vmatpush.bf16.msrb.mxu3 %v14186_v18  ;;  %v13515_v60 = vld [vmem:[%s25440_s3 + $0x768] sm:$0xf0]  ;;  %v14233_v41 = vld [vmem:[%s25440_s3 + $0xd00] sm:$0xf] }
 0x3a6   :  { %v21759_v35 = vadd.f32 %v4371_v42, %v4353_v5  ;;  %v13587_v42 = vld [vmem:[%s25440_s3 + $0x7f8] sm:$0xf0]  ;;  %v13579_v55 = vld [vmem:[%s25440_s3 + $0x7e8] sm:$0xf0] }
 0x3a7   :  { %6080 = vmatpush.bf16.msra.mxu0 %v14266_v46  ;;  %6099 = vmatpush.bf16.msra.mxu1 %v14330_v19  ;;  %v4317_v33 = vpop.f32.mrf.mxu2  ;;  %v4336_v1 = vpop.f32.mrf.mxu3  ;;  %v17667_v46 = vld [vmem:[%s25440_s3 + $0xd24] sm:$0xf0] }
 0x3a8   :  { %v4318_v19 = vadd.f32 %v4317_v33, %v21603_v61  ;;  %v17500_v61 = vld [vmem:[%s25440_s3 + $0x7f4] sm:$0xf]  ;;  %v14250_v3 = vor.u32 %v17667_v46, %v14249_v20  ;;  %v17665_v33 = vld [vmem:[%s25440_s3 + $0xd14] sm:$0xf0] }
 0x3a9   :  { %6045 = vmatpush.bf16.msrb.mxu2 %v14114_v47  ;;  %6064 = vmatpush.bf16.msrb.mxu3 %v14178_v36  ;;  %v14305_v47 = vld [vmem:[%s25440_s3 + $0xd90] sm:$0xf]  ;;  %v17681_v36 = vld [vmem:[%s25440_s3 + $0xd94] sm:$0xf0] }
 0x3aa   :  { %v4337_v62 = vadd.f32 %v4336_v1, %v4318_v19  ;;  %v17498_v1 = vld [vmem:[%s25440_s3 + $0x7e4] sm:$0xf]  ;;  %v14242_v19 = vor.u32 %v17665_v33, %v14241_v11  ;;  %v14306_v28 = vor.u32 %v17681_v36, %v14305_v47  ;;  %v13571_v33 = vld [vmem:[%s25440_s3 + $0x7d8] sm:$0xf0] }
 0x3ab   :  { %6081 = vmatpush.bf16.msra.mxu0 %v14258_v59  ;;  %6100 = vmatpush.bf16.msra.mxu1 %v14322_v48  ;;  %v4355_v18 = vpop.f32.mrf.mxu0  ;;  %v4374_v57 = vpop.f32.mrf.mxu1  ;;  %v13526_v59 = vor.u32 %v17484_v39, %v13523_v34  ;;  %v13590_v48 = vor.u32 %v17500_v61, %v13587_v42  ;;  %v17663_v39 = vld [vmem:[%s25440_s3 + $0xd04] sm:$0xf0]  ;;  %v14297_v34 = vld [vmem:[%s25440_s3 + $0xd80] sm:$0xf] }
 0x3ac   :  { %v4356_v5 = vadd.f32 %v4355_v18, %v4337_v62  ;;  %v17679_v42 = vld [vmem:[%s25440_s3 + $0xd84] sm:$0xf0]  ;;  %v17480_v62 = vld [vmem:[%s25440_s3 + $0x754] sm:$0xf]  ;;  %v14234_v47 = vor.u32 %v17663_v39, %v14233_v41  ;;  %v13707_v41 = vld [vmem:[%s25440_s3 + $0x8e8] sm:$0xf0] }
 0x3ad   :  { %6046 = vmatpush.bf16.msrb.mxu2 %v14106_v31  ;;  %6065 = vmatpush.bf16.msrb.mxu3 %v14170_v10  ;;  %v17516_v18 = vld [vmem:[%s25440_s3 + $0x874] sm:$0xf]  ;;  %v13582_v31 = vor.u32 %v17498_v1, %v13579_v55  ;;  %v14298_v36 = vor.u32 %v17679_v42, %v14297_v34  ;;  %v17514_v55 = vld [vmem:[%s25440_s3 + $0x864] sm:$0xf] }
 0x3ae   :  { %6014 = vmatmul.bf16.gmra.mxu0 %v21111_v13  ;;  %6033 = vmatmul.bf16.gmra.mxu1 %v21113_v24  ;;  %v21815_v7 = vadd.f32 %v4374_v57, %v4356_v5  ;;  %v13518_v57 = vor.u32 %v17482_v63, %v13515_v60  ;;  %v17532_v10 = vld [vmem:[%s25440_s3 + $0x8f4] sm:$0xf]  ;;  %v17478_v34 = vld [vmem:[%s25440_s3 + $0x744] sm:$0xf] }
 0x3af   :  { %v4319_v20 = vpop.f32.mrf.mxu2  ;;  %v4338_v46 = vpop.f32.mrf.mxu3  ;;  %6082 = vmatpush.bf16.msra.mxu0 %v14250_v3  ;;  %6101 = vmatpush.bf16.msra.mxu1 %v14314_v9  ;;  %v13715_v3 = vld [vmem:[%s25440_s3 + $0x8f8] sm:$0xf0] }
 0x3b0   :  { %v4320_v61 = vadd.f32 %v4319_v20, %v21665_v4  ;;  %v13651_v4 = vld [vmem:[%s25440_s3 + $0x878] sm:$0xf0]  ;;  %v13718_v1 = vor.u32 %v17532_v10, %v13715_v3  ;;  %v17512_v3 = vld [vmem:[%s25440_s3 + $0x854] sm:$0xf] }
 0x3b1   :  { %6115 = vmatpush.bf16.msra.mxu2 %v13526_v59  ;;  %6134 = vmatpush.bf16.msra.mxu3 %v13590_v48  ;;  %v13507_v59 = vld [vmem:[%s25440_s3 + $0x758] sm:$0xf0]  ;;  %v17496_v48 = vld [vmem:[%s25440_s3 + $0x7d4] sm:$0xf]  ;;  %v13654_v60 = vor.u32 %v17516_v18, %v13651_v4  ;;  %v17494_v18 = vld [vmem:[%s25440_s3 + $0x7c4] sm:$0xf] }
 0x3b2   :  { %v4339_v9 = vadd.f32 %v4338_v46, %v4320_v61  ;;  %6066 = vmatmul.bf16.vlgmr.msrb.gmra.mxu3 %v21080_v2  ;;  %v13510_v20 = vor.u32 %v17480_v62, %v13507_v59  ;;  %v13574_v46 = vor.u32 %v17496_v48, %v13571_v33  ;;  %v13499_v62 = vld [vmem:[%s25440_s3 + $0x748] sm:$0xf0] }
 0x3b3   :  { %v4357_v11 = vpop.f32.mrf.mxu0  ;;  %v4376_v5 = vpop.f32.mrf.mxu1  ;;  %6083 = vmatpush.bf16.msra.mxu0 %v14242_v19  ;;  %6102 = vmatpush.bf16.msra.mxu1 %v14306_v28  ;;  %v13643_v19 = vld [vmem:[%s25440_s3 + $0x868] sm:$0xf0]  ;;  %v17530_v28 = vld [vmem:[%s25440_s3 + $0x8e4] sm:$0xf]  ;;  %v13502_v33 = vor.u32 %v17478_v34, %v13499_v62 }
 0x3b4   :  { %v4358_v63 = vadd.f32 %v4357_v11, %v4339_v9  ;;  %6047 = vmatmul.bf16.vlgmr.msrb.gmra.mxu2 %v21078_v53  ;;  %v13646_v4 = vor.u32 %v17514_v55, %v13643_v19  ;;  %v13710_v10 = vor.u32 %v17530_v28, %v13707_v41  ;;  %v13635_v9 = vld [vmem:[%s25440_s3 + $0x858] sm:$0xf0]  ;;  %v17528_v11 = vld [vmem:[%s25440_s3 + $0x8d4] sm:$0xf]  ;;  %v17474_v19 = vld [vmem:[%s25440_s3 + $0x724] sm:$0xf] }
 0x3b5   :  { %6116 = vmatpush.bf16.msra.mxu2 %v13518_v57  ;;  %6135 = vmatpush.bf16.msra.mxu3 %v13582_v31  ;;  %v13563_v57 = vld [vmem:[%s25440_s3 + $0x7c8] sm:$0xf0]  ;;  %v17510_v28 = vld [vmem:[%s25440_s3 + $0x844] sm:$0xf] }
 0x3b6   :  { %v21877_v39 = vadd.f32 %v4376_v5, %v4358_v63  ;;  %v13491_v63 = vld [vmem:[%s25440_s3 + $0x738] sm:$0xf0]  ;;  %v17526_v62 = vld [vmem:[%s25440_s3 + $0x8c4] sm:$0xf] }
 0x3b7   :  { %v4388_v61 = vpop.f32.mrf.mxu2  ;;  %v4407_v42 = vpop.f32.mrf.mxu3  ;;  %6084 = vmatpush.bf16.msra.mxu0 %v14234_v47  ;;  %6103 = vmatpush.bf16.msra.mxu1 %v14298_v36  ;;  %v13566_v47 = vor.u32 %v17494_v18, %v13563_v57  ;;  %v17476_v36 = vld [vmem:[%s25440_s3 + $0x734] sm:$0xf]  ;;  %v13691_v18 = vld [vmem:[%s25440_s3 + $0x8c8] sm:$0xf0] }
 0x3b8   :  { %v4389_v31 = vadd.f32 %v4388_v61, %v21712_v44  ;;  %v13699_v44 = vld [vmem:[%s25440_s3 + $0x8d8] sm:$0xf0]  ;;  %v13494_v34 = vor.u32 %v17476_v36, %v13491_v63 }
 0x3b9   :  { %6117 = vmatpush.bf16.msra.mxu2 %v13510_v20  ;;  %6136 = vmatpush.bf16.msra.mxu3 %v13574_v46  ;;  %v13638_v20 = vor.u32 %v17512_v3, %v13635_v9  ;;  %v13702_v46 = vor.u32 %v17528_v11, %v13699_v44  ;;  %v13547_v3 = vld [vmem:[%s25440_s3 + $0x7a8] sm:$0xf0]  ;;  %v13694_v44 = vor.u32 %v17526_v62, %v13691_v18  ;;  %v17470_v18 = vld [vmem:[%s25440_s3 + $0x704] sm:$0xf] }
 0x3ba   :  { %v4408_v5 = vadd.f32 %v4407_v42, %v4389_v31  ;;  %v13627_v42 = vld [vmem:[%s25440_s3 + $0x848] sm:$0xf0] }
 0x3bb   :  { %6153 = vmatpush.bf16.msrb.mxu0 %v13654_v60  ;;  %6172 = vmatpush.bf16.msrb.mxu1 %v13718_v1  ;;  %v4426_v59 = vpop.f32.mrf.mxu0  ;;  %v4445_v48 = vpop.f32.mrf.mxu1  ;;  %v17492_v60 = vld [vmem:[%s25440_s3 + $0x7b4] sm:$0xf]  ;;  %v13555_v1 = vld [vmem:[%s25440_s3 + $0x7b8] sm:$0xf0]  ;;  %v13630_v11 = vor.u32 %v17510_v28, %v13627_v42 }
 0x3bc   :  { %v4427_v55 = vadd.f32 %v4426_v59, %v4408_v5  ;;  %v13558_v61 = vor.u32 %v17492_v60, %v13555_v1  ;;  %v17472_v5 = vld [vmem:[%s25440_s3 + $0x714] sm:$0xf]  ;;  %v13683_v1 = vld [vmem:[%s25440_s3 + $0x8b8] sm:$0xf0] }
 0x3bd   :  { %6118 = vmatpush.bf16.msra.mxu2 %v13502_v33  ;;  %6137 = vmatpush.bf16.msra.mxu3 %v13566_v47  ;;  %v17508_v59 = vld [vmem:[%s25440_s3 + $0x834] sm:$0xf] }
 0x3be   :  { %6085 = vmatmul.bf16.vlgmr.msra.gmra.mxu0 %v21219_v52  ;;  %6104 = vmatmul.bf16.vlgmr.msra.gmra.mxu1 %v21221_v8  ;;  %v21924_v41 = vadd.f32 %v4445_v48, %v4427_v55  ;;  %v17524_v60 = vld [vmem:[%s25440_s3 + $0x8b4] sm:$0xf]  ;;  %v13475_v55 = vld [vmem:[%s25440_s3 + $0x718] sm:$0xf0] }
 0x3bf   :  { %6154 = vmatpush.bf16.msrb.mxu0 %v13646_v4  ;;  %6173 = vmatpush.bf16.msrb.mxu1 %v13710_v10  ;;  %v4390_v57 = vpop.f32.mrf.mxu2  ;;  %v4409_v31 = vpop.f32.mrf.mxu3  ;;  %v13483_v4 = vld [vmem:[%s25440_s3 + $0x728] sm:$0xf0]  ;;  %v17490_v10 = vld [vmem:[%s25440_s3 + $0x7a4] sm:$0xf]  ;;  %v13478_v42 = vor.u32 %v17472_v5, %v13475_v55 }
 0x3c0   :  { %v4391_v9 = vadd.f32 %v4390_v57, %v21759_v35  ;;  %v13486_v36 = vor.u32 %v17474_v19, %v13483_v4  ;;  %v13550_v63 = vor.u32 %v17490_v10, %v13547_v3  ;;  %v13619_v35 = vld [vmem:[%s25440_s3 + $0x838] sm:$0xf0]  ;;  %v13467_v57 = vld [vmem:[%s25440_s3 + $0x708] sm:$0xf0]  ;;  %v17522_v5 = vld [vmem:[%s25440_s3 + $0x8a4] sm:$0xf] }
 0x3c1   :  { %6119 = vmatpush.bf16.msra.mxu2 %v13494_v34  ;;  %6138 = vmatpush.bf16.msra.mxu3 %v13558_v61  ;;  %v13622_v28 = vor.u32 %v17508_v59, %v13619_v35  ;;  %v13686_v34 = vor.u32 %v17524_v60, %v13683_v1  ;;  %v13531_v3 = vld [vmem:[%s25440_s3 + $0x788] sm:$0xf0]  ;;  %v13470_v60 = vor.u32 %v17470_v18, %v13467_v57  ;;  %v17546_v18 = vld [vmem:[%s25440_s3 + $0x964] sm:$0xf] }
 0x3c2   :  { %v4410_v48 = vadd.f32 %v4409_v31, %v4391_v9  ;;  %6071 = vmatmul.bf16.gmra.mxu3 %v21164_v6  ;;  %v17486_v31 = vld [vmem:[%s25440_s3 + $0x784] sm:$0xf]  ;;  %v13675_v59 = vld [vmem:[%s25440_s3 + $0x8a8] sm:$0xf0] }
 0x3c3   :  { %6155 = vmatpush.bf16.msrb.mxu0 %v13638_v20  ;;  %6174 = vmatpush.bf16.msrb.mxu1 %v13702_v46  ;;  %v4428_v33 = vpop.f32.mrf.mxu0  ;;  %v4447_v47 = vpop.f32.mrf.mxu1  ;;  %v17488_v20 = vld [vmem:[%s25440_s3 + $0x794] sm:$0xf]  ;;  %v13539_v46 = vld [vmem:[%s25440_s3 + $0x798] sm:$0xf0]  ;;  %v17506_v9 = vld [vmem:[%s25440_s3 + $0x824] sm:$0xf]  ;;  %v13534_v1 = vor.u32 %v17486_v31, %v13531_v3 }
 0x3c4   :  { %v4429_v19 = vadd.f32 %v4428_v33, %v4410_v48  ;;  %6052 = vmatmul.bf16.gmra.mxu2 %v21162_v16  ;;  %v13542_v62 = vor.u32 %v17488_v20, %v13539_v46  ;;  %v17548_v48 = vld [vmem:[%s25440_s3 + $0x974] sm:$0xf]  ;;  %v13779_v33 = vld [vmem:[%s25440_s3 + $0x978] sm:$0xf0]  ;;  %v13678_v20 = vor.u32 %v17522_v5, %v13675_v59  ;;  %v13771_v31 = vld [vmem:[%s25440_s3 + $0x968] sm:$0xf0] }
 0x3c5   :  { %6120 = vmatpush.bf16.msra.mxu2 %v13486_v36  ;;  %6139 = vmatpush.bf16.msra.mxu3 %v13550_v63  ;;  %v17504_v46 = vld [vmem:[%s25440_s3 + $0x814] sm:$0xf]  ;;  %v13835_v3 = vld [vmem:[%s25440_s3 + $0x9e8] sm:$0xf0]  ;;  %v17502_v59 = vld [vmem:[%s25440_s3 + $0x804] sm:$0xf] }
 0x3c6   :  { %v21971_v61 = vadd.f32 %v4447_v47, %v4429_v19  ;;  %v13843_v47 = vld [vmem:[%s25440_s3 + $0x9f8] sm:$0xf0] }
 0x3c7   :  { %6156 = vmatpush.bf16.msrb.mxu0 %v13630_v11  ;;  %6175 = vmatpush.bf16.msrb.mxu1 %v13694_v44  ;;  %v4393_v4 = vpop.f32.mrf.mxu2  ;;  %v4412_v10 = vpop.f32.mrf.mxu3  ;;  %v13611_v11 = vld [vmem:[%s25440_s3 + $0x828] sm:$0xf0] }
 0x3c8   :  { %v4394_v44 = vadd.f32 %v4393_v4, %v21815_v7  ;;  %v17564_v7 = vld [vmem:[%s25440_s3 + $0x9f4] sm:$0xf]  ;;  %v13614_v55 = vor.u32 %v17506_v9, %v13611_v11  ;;  %v13603_v4 = vld [vmem:[%s25440_s3 + $0x818] sm:$0xf0] }
 0x3c9   :  { %6121 = vmatpush.bf16.msra.mxu2 %v13478_v42  ;;  %6140 = vmatpush.bf16.msra.mxu3 %v13542_v62  ;;  %v17520_v42 = vld [vmem:[%s25440_s3 + $0x894] sm:$0xf]  ;;  %v13667_v62 = vld [vmem:[%s25440_s3 + $0x898] sm:$0xf0] }
 0x3ca   :  { %v4413_v36 = vadd.f32 %v4412_v10, %v4394_v44  ;;  %v17562_v10 = vld [vmem:[%s25440_s3 + $0x9e4] sm:$0xf]  ;;  %v13606_v44 = vor.u32 %v17504_v46, %v13603_v4  ;;  %v13670_v5 = vor.u32 %v17520_v42, %v13667_v62  ;;  %v13827_v4 = vld [vmem:[%s25440_s3 + $0x9d8] sm:$0xf0]  ;;  %v22078_v42 = vld [vmem:[%s25441_s4 + $0x2] sm:$0x3] }
 0x3cb   :  { %6157 = vmatpush.bf16.msrb.mxu0 %v13622_v28  ;;  %6176 = vmatpush.bf16.msrb.mxu1 %v13686_v34  ;;  %v4431_v63 = vpop.f32.mrf.mxu0  ;;  %v4450_v35 = vpop.f32.mrf.mxu1  ;;  %v13782_v28 = vor.u32 %v17548_v48, %v13779_v33  ;;  %v13846_v34 = vor.u32 %v17564_v7, %v13843_v47  ;;  %v13595_v48 = vld [vmem:[%s25440_s3 + $0x808] sm:$0xf0]  ;;  %v17518_v33 = vld [vmem:[%s25440_s3 + $0x884] sm:$0xf] }
 0x3cc   :  { %v4432_v19 = vadd.f32 %v4431_v63, %v4413_v36  ;;  %v13659_v47 = vld [vmem:[%s25440_s3 + $0x888] sm:$0xf0]  ;;  %v17544_v36 = vld [vmem:[%s25440_s3 + $0x954] sm:$0xf]  ;;  %v13598_v62 = vor.u32 %v17502_v59, %v13595_v48  ;;  %v22097_v48 = vperm.slane %v22078_v42, 0 }
 0x3cd   :  { %6122 = vmatpush.bf16.msra.mxu2 %v13470_v60  ;;  %6141 = vmatpush.bf16.msra.mxu3 %v13534_v1  ;;  %v17580_v63 = vld [vmem:[%s25440_s3 + $0xa74] sm:$0xf]  ;;  %v13838_v60 = vor.u32 %v17562_v10, %v13835_v3 }
 0x3ce   :  { %6090 = vmatmul.bf16.gmra.mxu0 %v21308_v56  ;;  %6109 = vmatmul.bf16.gmra.mxu1 %v21316_v49  ;;  %v22027_v57 = vadd.f32 %v4450_v35, %v4432_v19  ;;  %v13774_v35 = vor.u32 %v17546_v18, %v13771_v31  ;;  %v17596_v1 = vld [vmem:[%s25440_s3 + $0xaf4] sm:$0xf]  ;;  %v13662_v18 = vor.u32 %v17518_v33, %v13659_v47  ;;  %v17542_v33 = vld [vmem:[%s25440_s3 + $0x944] sm:$0xf] }
 0x3cf   :  { %v4395_v9 = vpop.f32.mrf.mxu2  ;;  %v4414_v11 = vpop.f32.mrf.mxu3  ;;  %6158 = vmatpush.bf16.msrb.mxu0 %v13614_v55  ;;  %6177 = vmatpush.bf16.msrb.mxu1 %v13678_v20  ;;  %v13971_v55 = vld [vmem:[%s25440_s3 + $0xaf8] sm:$0xf0] }
 0x3d0   :  { %v4396_v7 = vadd.f32 %v4395_v9, %v21877_v39  ;;  %v13907_v39 = vld [vmem:[%s25440_s3 + $0xa78] sm:$0xf0]  ;;  %v13974_v3 = vor.u32 %v17596_v1, %v13971_v55  ;;  %v17578_v9 = vld [vmem:[%s25440_s3 + $0xa64] sm:$0xf]  ;;  %v17576_v55 = vld [vmem:[%s25440_s3 + $0xa54] sm:$0xf] }
 0x3d1   :  { %6191 = vmatpush.bf16.msrb.mxu2 %v13782_v28  ;;  %6210 = vmatpush.bf16.msrb.mxu3 %v13846_v34  ;;  %v13763_v28 = vld [vmem:[%s25440_s3 + $0x958] sm:$0xf0]  ;;  %v17560_v34 = vld [vmem:[%s25440_s3 + $0x9d4] sm:$0xf]  ;;  %v13910_v10 = vor.u32 %v17580_v63, %v13907_v39  ;;  %v17558_v63 = vld [vmem:[%s25440_s3 + $0x9c4] sm:$0xf] }
 0x3d2   :  { %v4415_v20 = vadd.f32 %v4414_v11, %v4396_v7  ;;  %6142 = vmatmul.bf16.vlgmr.msra.gmra.mxu3 %v20687_v23  ;;  %v13766_v11 = vor.u32 %v17544_v36, %v13763_v28  ;;  %v13963_v23 = vld [vmem:[%s25440_s3 + $0xae8] sm:$0xf0] }
 0x3d3   :  { %v4433_v46 = vpop.f32.mrf.mxu0  ;;  %v4452_v19 = vpop.f32.mrf.mxu1  ;;  %6159 = vmatpush.bf16.msrb.mxu0 %v13606_v44  ;;  %6178 = vmatpush.bf16.msrb.mxu1 %v13670_v5  ;;  %v13830_v44 = vor.u32 %v17560_v34, %v13827_v4  ;;  %v13899_v5 = vld [vmem:[%s25440_s3 + $0xa68] sm:$0xf0] }
 0x3d4   :  { %v4434_v31 = vadd.f32 %v4433_v46, %v4415_v20  ;;  %6123 = vmatmul.bf16.vlgmr.msra.gmra.mxu2 %v20685_v50  ;;  %v17594_v50 = vld [vmem:[%s25440_s3 + $0xae4] sm:$0xf]  ;;  %v13755_v36 = vld [vmem:[%s25440_s3 + $0x948] sm:$0xf0]  ;;  %v13902_v39 = vor.u32 %v17578_v9, %v13899_v5  ;;  %v13891_v20 = vld [vmem:[%s25440_s3 + $0xa58] sm:$0xf0] }
 0x3d5   :  { %6192 = vmatpush.bf16.msrb.mxu2 %v13774_v35  ;;  %6211 = vmatpush.bf16.msrb.mxu3 %v13838_v60  ;;  %v13819_v35 = vld [vmem:[%s25440_s3 + $0x9c8] sm:$0xf0]  ;;  %v13966_v1 = vor.u32 %v17594_v50, %v13963_v23  ;;  %v17592_v46 = vld [vmem:[%s25440_s3 + $0xad4] sm:$0xf]  ;;  %v13758_v4 = vor.u32 %v17542_v33, %v13755_v36  ;;  %v13811_v9 = vld [vmem:[%s25440_s3 + $0x9b8] sm:$0xf0] }
 0x3d6   :  { %v22094_v59 = vadd.f32 %v4452_v19, %v4434_v31  ;;  %v17538_v50 = vld [vmem:[%s25440_s3 + $0x924] sm:$0xf] }
 0x3d7   :  { %v4464_v7 = vpop.f32.mrf.mxu2  ;;  %v4483_v47 = vpop.f32.mrf.mxu3  ;;  %6160 = vmatpush.bf16.msrb.mxu0 %v13598_v62  ;;  %6179 = vmatpush.bf16.msrb.mxu1 %v13662_v18  ;;  %v13822_v62 = vor.u32 %v17558_v63, %v13819_v35  ;;  %v17540_v18 = vld [vmem:[%s25440_s3 + $0x934] sm:$0xf]  ;;  %v17574_v23 = vld [vmem:[%s25440_s3 + $0xa44] sm:$0xf]  ;;  %v13739_v35 = vld [vmem:[%s25440_s3 + $0x928] sm:$0xf0] }
 0x3d8   :  { %v4465_v60 = vadd.f32 %v4464_v7, %v21924_v41  ;;  %v13955_v41 = vld [vmem:[%s25440_s3 + $0xad8] sm:$0xf0] }
 0x3d9   :  { %6193 = vmatpush.bf16.msrb.mxu2 %v13766_v11  ;;  %6212 = vmatpush.bf16.msrb.mxu3 %v13830_v44  ;;  %v13894_v11 = vor.u32 %v17576_v55, %v13891_v20  ;;  %v13958_v44 = vor.u32 %v17592_v46, %v13955_v41  ;;  %v17536_v46 = vld [vmem:[%s25440_s3 + $0x914] sm:$0xf] }
 0x3da   :  { %v22124_v19 = vadd.f32 %v4483_v47, %v4465_v60  ;;  %v13883_v47 = vld [vmem:[%s25440_s3 + $0xa48] sm:$0xf0]  ;;  %v17554_v60 = vld [vmem:[%s25440_s3 + $0x9a4] sm:$0xf]  ;;  %v17572_v41 = vld [vmem:[%s25440_s3 + $0xa34] sm:$0xf] }
 0x3db   :  { %6229 = vmatpush.bf16.msra.mxu0 %v13910_v10  ;;  %6248 = vmatpush.bf16.msra.mxu1 %v13974_v3  ;;  %v5858_v28 = vpop.f32.mrf.mxu0  ;;  %v5877_v34 = vpop.f32.mrf.mxu1  ;;  %v13747_v10 = vld [vmem:[%s25440_s3 + $0x938] sm:$0xf0]  ;;  %v17556_v3 = vld [vmem:[%s25440_s3 + $0x9b4] sm:$0xf]  ;;  %v13886_v55 = vor.u32 %v17574_v23, %v13883_v47 }
 0x3dc   :  { %25538 = vst [vmem:[#allocation23_spill] sm:$0xff] %v22124_v19  ;;  %v5859_v31 = vadd.f32 %v5858_v28, %v22097_v48  ;;  %v13750_v33 = vor.u32 %v17540_v18, %v13747_v10  ;;  %v13814_v7 = vor.u32 %v17556_v3, %v13811_v9  ;;  %v13875_v18 = vld [vmem:[%s25440_s3 + $0xa38] sm:$0xf0] }
 0x3dd   :  { %6194 = vmatpush.bf16.msrb.mxu2 %v13758_v4  ;;  %6213 = vmatpush.bf16.msrb.mxu3 %v13822_v62  ;;  %v13742_v62 = vor.u32 %v17538_v50, %v13739_v35  ;;  %v13939_v10 = vld [vmem:[%s25440_s3 + $0xab8] sm:$0xf0]  ;;  %v13878_v23 = vor.u32 %v17572_v41, %v13875_v18  ;;  %v17570_v35 = vld [vmem:[%s25440_s3 + $0xa24] sm:$0xf] }
 0x3de   :  { %v22139_v5 = vadd.f32 %v5877_v34, %v5859_v31  ;;  %6161 = vmatmul.bf16.vlgmr.msrb.gmra.mxu0 %v20752_v45  ;;  %6180 = vmatmul.bf16.vlgmr.msrb.gmra.mxu1 %v20754_v27  ;;  %v17590_v45 = vld [vmem:[%s25440_s3 + $0xac4] sm:$0xf]  ;;  %v13947_v27 = vld [vmem:[%s25440_s3 + $0xac8] sm:$0xf0]  ;;  %v17588_v31 = vld [vmem:[%s25440_s3 + $0xab4] sm:$0xf] }
 0x3df   :  { %6230 = vmatpush.bf16.msra.mxu0 %v13902_v39  ;;  %6249 = vmatpush.bf16.msra.mxu1 %v13966_v1  ;;  %v4466_v36 = vpop.f32.mrf.mxu2  ;;  %v4485_v63 = vpop.f32.mrf.mxu3  ;;  %v13803_v39 = vld [vmem:[%s25440_s3 + $0x9a8] sm:$0xf0]  ;;  %v13950_v20 = vor.u32 %v17590_v45, %v13947_v27  ;;  %v13731_v9 = vld [vmem:[%s25440_s3 + $0x918] sm:$0xf0]  ;;  %v17534_v45 = vld [vmem:[%s25440_s3 + $0x904] sm:$0xf] }
 0x3e0   :  { %v4467_v1 = vadd.f32 %v4466_v36, %v21971_v61  ;;  %v13806_v61 = vor.u32 %v17554_v60, %v13803_v39  ;;  %v13867_v60 = vld [vmem:[%s25440_s3 + $0xa28] sm:$0xf0]  ;;  %v14099_v41 = vld [vmem:[%s25440_s3 + $0xbf8] sm:$0xf0] }
 0x3e1   :  { %6195 = vmatpush.bf16.msrb.mxu2 %v13750_v33  ;;  %6214 = vmatpush.bf16.msrb.mxu3 %v13814_v7  ;;  %v13942_v33 = vor.u32 %v17588_v31, %v13939_v10  ;;  %v13734_v7 = vor.u32 %v17536_v46, %v13731_v9  ;;  %v14035_v46 = vld [vmem:[%s25440_s3 + $0xb78] sm:$0xf0]  ;;  %v13870_v10 = vor.u32 %v17570_v35, %v13867_v60  ;;  %v17568_v9 = vld [vmem:[%s25440_s3 + $0xa14] sm:$0xf]  ;;  %v17566_v35 = vld [vmem:[%s25440_s3 + $0xa04] sm:$0xf] }
 0x3e2   :  { %v22174_v28 = vadd.f32 %v4485_v63, %v4467_v1  ;;  %6147 = vmatmul.bf16.gmra.mxu3 %v20810_v58  ;;  %v17550_v58 = vld [vmem:[%s25440_s3 + $0x984] sm:$0xf]  ;;  %v13787_v63 = vld [vmem:[%s25440_s3 + $0x988] sm:$0xf0] }
 0x3e3   :  { %6231 = vmatpush.bf16.msra.mxu0 %v13894_v11  ;;  %6250 = vmatpush.bf16.msra.mxu1 %v13958_v44  ;;  %v5860_v34 = vpop.f32.mrf.mxu0  ;;  %v5879_v4 = vpop.f32.mrf.mxu1  ;;  %v17552_v11 = vld [vmem:[%s25440_s3 + $0x994] sm:$0xf]  ;;  %v13795_v44 = vld [vmem:[%s25440_s3 + $0x998] sm:$0xf0]  ;;  %v17586_v1 = vld [vmem:[%s25440_s3 + $0xaa4] sm:$0xf]  ;;  %v13790_v18 = vor.u32 %v17550_v58, %v13787_v63 }
 0x3e4   :  { %25539 = vst [vmem:[#allocation21_spill] sm:$0xff] %v22174_v28  ;;  %v5861_v3 = vadd.f32 %v5860_v34, %v22097_v48  ;;  %6128 = vmatmul.bf16.gmra.mxu2 %v20808_v25  ;;  %v13798_v47 = vor.u32 %v17552_v11, %v13795_v44  ;;  %v13723_v25 = vld [vmem:[%s25440_s3 + $0x908] sm:$0xf0]  ;;  %v17626_v58 = vld [vmem:[%s25440_s3 + $0xbe4] sm:$0xf] }
 0x3e5   :  { %6196 = vmatpush.bf16.msrb.mxu2 %v13742_v62  ;;  %6215 = vmatpush.bf16.msrb.mxu3 %v13806_v61  ;;  %v13726_v61 = vor.u32 %v17534_v45, %v13723_v25  ;;  %v17610_v45 = vld [vmem:[%s25440_s3 + $0xb64] sm:$0xf]  ;;  %v14027_v25 = vld [vmem:[%s25440_s3 + $0xb68] sm:$0xf0] }
 0x3e6   :  { %v22197_v50 = vadd.f32 %v5879_v4, %v5861_v3  ;;  %v13851_v60 = vld [vmem:[%s25440_s3 + $0xa08] sm:$0xf0] }
 0x3e7   :  { %6232 = vmatpush.bf16.msra.mxu0 %v13886_v55  ;;  %6251 = vmatpush.bf16.msra.mxu1 %v13950_v20  ;;  %v4469_v27 = vpop.f32.mrf.mxu2  ;;  %v4488_v36 = vpop.f32.mrf.mxu3  ;;  %v13931_v55 = vld [vmem:[%s25440_s3 + $0xaa8] sm:$0xf0]  ;;  %v17612_v20 = vld [vmem:[%s25440_s3 + $0xb74] sm:$0xf] }
 0x3e8   :  { %v4470_v39 = vadd.f32 %v4469_v27, %v22027_v57  ;;  %v17628_v57 = vld [vmem:[%s25440_s3 + $0xbf4] sm:$0xf]  ;;  %v13934_v3 = vor.u32 %v17586_v1, %v13931_v55  ;;  %v14038_v11 = vor.u32 %v17612_v20, %v14035_v46  ;;  %v13915_v55 = vld [vmem:[%s25440_s3 + $0xa88] sm:$0xf0] }
 0x3e9   :  { %6197 = vmatpush.bf16.msrb.mxu2 %v13734_v7  ;;  %6216 = vmatpush.bf16.msrb.mxu3 %v13798_v47  ;;  %v14102_v44 = vor.u32 %v17628_v57, %v14099_v41  ;;  %v13923_v7 = vld [vmem:[%s25440_s3 + $0xa98] sm:$0xf0]  ;;  %v17608_v20 = vld [vmem:[%s25440_s3 + $0xb54] sm:$0xf]  ;;  %v14030_v57 = vor.u32 %v17610_v45, %v14027_v25  ;;  %v17642_v45 = vld [vmem:[%s25440_s3 + $0xc64] sm:$0xf] }
 0x3ea   :  { %v22236_v34 = vadd.f32 %v4488_v36, %v4470_v39  ;;  %v17582_v39 = vld [vmem:[%s25440_s3 + $0xa84] sm:$0xf]  ;;  %v17644_v46 = vld [vmem:[%s25440_s3 + $0xc74] sm:$0xf] }
 0x3eb   :  { %6233 = vmatpush.bf16.msra.mxu0 %v13878_v23  ;;  %6252 = vmatpush.bf16.msra.mxu1 %v13942_v33  ;;  %v5863_v4 = vpop.f32.mrf.mxu0  ;;  %v5882_v62 = vpop.f32.mrf.mxu1  ;;  %v13859_v23 = vld [vmem:[%s25440_s3 + $0xa18] sm:$0xf0]  ;;  %v17584_v33 = vld [vmem:[%s25440_s3 + $0xa94] sm:$0xf] }
 0x3ec   :  { %25540 = vst [vmem:[#allocation15_spill] sm:$0xff] %v22236_v34  ;;  %v5864_v31 = vadd.f32 %v5863_v4, %v22097_v48  ;;  %v13862_v36 = vor.u32 %v17568_v9, %v13859_v23  ;;  %v13926_v63 = vor.u32 %v17584_v33, %v13923_v7  ;;  %v17660_v4 = vld [vmem:[%s25440_s3 + $0xcf4] sm:$0xf]  ;;  %v14083_v9 = vld [vmem:[%s25440_s3 + $0xbd8] sm:$0xf0]  ;;  %v13918_v23 = vor.u32 %v17582_v39, %v13915_v55 }
 0x3ed   :  { %6198 = vmatpush.bf16.msrb.mxu2 %v13726_v61  ;;  %6217 = vmatpush.bf16.msrb.mxu3 %v13790_v18 }
 0x3ee   :  { %v22251_v47 = vadd.f32 %v5882_v62, %v5864_v31  ;;  %6166 = vmatmul.bf16.gmra.mxu0 %v20840_v17  ;;  %6185 = vmatmul.bf16.gmra.mxu1 %v20842_v26  ;;  %v14091_v17 = vld [vmem:[%s25440_s3 + $0xbe8] sm:$0xf0]  ;;  %v14227_v62 = vld [vmem:[%s25440_s3 + $0xcf8] sm:$0xf0] }
 0x3ef   :  { %v4471_v27 = vpop.f32.mrf.mxu2  ;;  %v4490_v26 = vpop.f32.mrf.mxu3  ;;  %6234 = vmatpush.bf16.msra.mxu0 %v13870_v10  ;;  %6253 = vmatpush.bf16.msra.mxu1 %v13934_v3  ;;  %v14094_v41 = vor.u32 %v17626_v58, %v14091_v17  ;;  %v14019_v10 = vld [vmem:[%s25440_s3 + $0xb58] sm:$0xf0]  ;;  %v17624_v3 = vld [vmem:[%s25440_s3 + $0xbd4] sm:$0xf]  ;;  %v14230_v7 = vor.u32 %v17660_v4, %v14227_v62  ;;  %v14155_v17 = vld [vmem:[%s25440_s3 + $0xc68] sm:$0xf0] }
 0x3f0   :  { %v4472_v1 = vadd.f32 %v4471_v27, %v22094_v59  ;;  %v14163_v59 = vld [vmem:[%s25440_s3 + $0xc78] sm:$0xf0]  ;;  %v14022_v58 = vor.u32 %v17608_v20, %v14019_v10  ;;  %v17606_v27 = vld [vmem:[%s25440_s3 + $0xb44] sm:$0xf]  ;;  %v17640_v20 = vld [vmem:[%s25440_s3 + $0xc54] sm:$0xf] }
 0x3f1   :  { %6267 = vmatpush.bf16.msra.mxu2 %v14038_v11  ;;  %6286 = vmatpush.bf16.msra.mxu3 %v14102_v44  ;;  %v13854_v44 = vor.u32 %v17566_v35, %v13851_v60  ;;  %v14166_v33 = vor.u32 %v17644_v46, %v14163_v59  ;;  %v17622_v35 = vld [vmem:[%s25440_s3 + $0xbc4] sm:$0xf]  ;;  %v14075_v60 = vld [vmem:[%s25440_s3 + $0xbc8] sm:$0xf0]  ;;  %v14147_v46 = vld [vmem:[%s25440_s3 + $0xc58] sm:$0xf0] }
 0x3f2   :  { %v22295_v61 = vadd.f32 %v4490_v26, %v4472_v1  ;;  %6218 = vmatmul.bf16.vlgmr.msrb.gmra.mxu3 %v20891_v51  ;;  %v14219_v51 = vld [vmem:[%s25440_s3 + $0xce8] sm:$0xf0]  ;;  %v14158_v1 = vor.u32 %v17642_v45, %v14155_v17  ;;  %v14003_v10 = vld [vmem:[%s25440_s3 + $0xb38] sm:$0xf0] }
 0x3f3   :  { %v5865_v18 = vpop.f32.mrf.mxu0  ;;  %v5884_v31 = vpop.f32.mrf.mxu1  ;;  %6235 = vmatpush.bf16.msra.mxu0 %v13862_v36  ;;  %6254 = vmatpush.bf16.msra.mxu1 %v13926_v63  ;;  %v14011_v63 = vld [vmem:[%s25440_s3 + $0xb48] sm:$0xf0] }
 0x3f4   :  { %25541 = vst [vmem:[#allocation14_spill] sm:$0xff] %v22295_v61  ;;  %v5866_v11 = vadd.f32 %v5865_v18, %v22097_v48  ;;  %6199 = vmatmul.bf16.vlgmr.msrb.gmra.mxu2 %v20889_v22  ;;  %v14086_v48 = vor.u32 %v17624_v3, %v14083_v9  ;;  %v17658_v22 = vld [vmem:[%s25440_s3 + $0xce4] sm:$0xf]  ;;  %v14014_v62 = vor.u32 %v17606_v27, %v14011_v63  ;;  %v17620_v3 = vld [vmem:[%s25440_s3 + $0xbb4] sm:$0xf] }
 0x3f5   :  { %6268 = vmatpush.bf16.msra.mxu2 %v14030_v57  ;;  %6287 = vmatpush.bf16.msra.mxu3 %v14094_v41  ;;  %v14222_v55 = vor.u32 %v17658_v22, %v14219_v51  ;;  %v17656_v57 = vld [vmem:[%s25440_s3 + $0xcd4] sm:$0xf]  ;;  %v14078_v18 = vor.u32 %v17622_v35, %v14075_v60  ;;  %v14067_v9 = vld [vmem:[%s25440_s3 + $0xbb8] sm:$0xf0]  ;;  %v14203_v17 = vld [vmem:[%s25440_s3 + $0xcc8] sm:$0xf0] }
 0x3f6   :  { %v22312_v25 = vadd.f32 %v5884_v31, %v5866_v11  ;;  %v17604_v31 = vld [vmem:[%s25440_s3 + $0xb34] sm:$0xf]  ;;  %v13995_v27 = vld [vmem:[%s25440_s3 + $0xb28] sm:$0xf0] }
 0x3f7   :  { %v5896_v26 = vpop.f32.mrf.mxu2  ;;  %v5915_v36 = vpop.f32.mrf.mxu3  ;;  %6236 = vmatpush.bf16.msra.mxu0 %v13854_v44  ;;  %6255 = vmatpush.bf16.msra.mxu1 %v13918_v23  ;;  %v14150_v44 = vor.u32 %v17640_v20, %v14147_v46 }
 0x3f8   :  { %v5897_v39 = vadd.f32 %v5896_v26, %v22139_v5  ;;  %v14211_v5 = vld [vmem:[%s25440_s3 + $0xcd8] sm:$0xf0]  ;;  %v17618_v26 = vld [vmem:[%s25440_s3 + $0xba4] sm:$0xf] }
 0x3f9   :  { %6269 = vmatpush.bf16.msra.mxu2 %v14022_v58  ;;  %6288 = vmatpush.bf16.msra.mxu3 %v14086_v48  ;;  %v14214_v23 = vor.u32 %v17656_v57, %v14211_v5  ;;  %v14006_v58 = vor.u32 %v17604_v31, %v14003_v10  ;;  %v14070_v48 = vor.u32 %v17620_v3, %v14067_v9  ;;  %v14131_v5 = vld [vmem:[%s25440_s3 + $0xc38] sm:$0xf0] }
 0x3fa   :  { %v5916_v41 = vadd.f32 %v5915_v36, %v5897_v39  ;;  %v14059_v36 = vld [vmem:[%s25440_s3 + $0xba8] sm:$0xf0]  ;;  %v17600_v39 = vld [vmem:[%s25440_s3 + $0xb14] sm:$0xf] }
 0x3fb   :  { %6305 = vmatpush.bf16.msrb.mxu0 %v14166_v33  ;;  %6324 = vmatpush.bf16.msrb.mxu1 %v14230_v7  ;;  %v5934_v59 = vpop.f32.mrf.mxu0  ;;  %v5953_v4 = vpop.f32.mrf.mxu1  ;;  %v17602_v33 = vld [vmem:[%s25440_s3 + $0xb24] sm:$0xf]  ;;  %v14062_v57 = vor.u32 %v17618_v26, %v14059_v36 }
 0x3fc   :  { %v5935_v11 = vadd.f32 %v5934_v59, %v5916_v41  ;;  %v17638_v7 = vld [vmem:[%s25440_s3 + $0xc44] sm:$0xf]  ;;  %v17652_v41 = vld [vmem:[%s25440_s3 + $0xcb4] sm:$0xf]  ;;  %v14195_v59 = vld [vmem:[%s25440_s3 + $0xcb8] sm:$0xf0] }
 0x3fd   :  { %6270 = vmatpush.bf16.msra.mxu2 %v14014_v62  ;;  %6289 = vmatpush.bf16.msra.mxu3 %v14078_v18  ;;  %v17616_v62 = vld [vmem:[%s25440_s3 + $0xb94] sm:$0xf]  ;;  %v14051_v18 = vld [vmem:[%s25440_s3 + $0xb98] sm:$0xf0]  ;;  %v14198_v10 = vor.u32 %v17652_v41, %v14195_v59 }
 0x3fe   :  { %6237 = vmatmul.bf16.vlgmr.msra.gmra.mxu0 %v20928_v30  ;;  %6256 = vmatmul.bf16.vlgmr.msra.gmra.mxu1 %v20930_v15  ;;  %v22368_v45 = vadd.f32 %v5953_v4, %v5935_v11  ;;  %v14139_v30 = vld [vmem:[%s25440_s3 + $0xc48] sm:$0xf0]  ;;  %v17654_v15 = vld [vmem:[%s25440_s3 + $0xcc4] sm:$0xf]  ;;  %v13987_v4 = vld [vmem:[%s25440_s3 + $0xb18] sm:$0xf0]  ;;  %v14054_v9 = vor.u32 %v17616_v62, %v14051_v18 }
 0x3ff   :  { %6306 = vmatpush.bf16.msrb.mxu0 %v14158_v1  ;;  %6325 = vmatpush.bf16.msrb.mxu1 %v14222_v55  ;;  %v5898_v22 = vpop.f32.mrf.mxu2  ;;  %v5917_v51 = vpop.f32.mrf.mxu3  ;;  %v14142_v35 = vor.u32 %v17638_v7, %v14139_v30  ;;  %v14206_v60 = vor.u32 %v17654_v15, %v14203_v17  ;;  %v17636_v1 = vld [vmem:[%s25440_s3 + $0xc34] sm:$0xf]  ;;  %v13990_v3 = vor.u32 %v17600_v39, %v13987_v4  ;;  %v17598_v11 = vld [vmem:[%s25440_s3 + $0xb04] sm:$0xf]  ;;  %v14187_v15 = vld [vmem:[%s25440_s3 + $0xca8] sm:$0xf0] }
 0x400   :  { %v5899_v63 = vadd.f32 %v5898_v22, %v22197_v50  ;;  %v13998_v50 = vor.u32 %v17602_v33, %v13995_v27  ;;  %v14134_v31 = vor.u32 %v17636_v1, %v14131_v5  ;;  %v14043_v33 = vld [vmem:[%s25440_s3 + $0xb88] sm:$0xf0]  ;;  %v17634_v7 = vld [vmem:[%s25440_s3 + $0xc24] sm:$0xf]  ;;  %v17676_v17 = vld [vmem:[%s25440_s3 + $0xd74] sm:$0xf] }
 0x401   :  { %6271 = vmatpush.bf16.msra.mxu2 %v14006_v58  ;;  %6290 = vmatpush.bf16.msra.mxu3 %v14070_v48  ;;  %v14123_v58 = vld [vmem:[%s25440_s3 + $0xc28] sm:$0xf0]  ;;  %v17650_v30 = vld [vmem:[%s25440_s3 + $0xca4] sm:$0xf]  ;;  %v14291_v22 = vld [vmem:[%s25440_s3 + $0xd78] sm:$0xf0] }
 0x402   :  { %v22395_v55 = vadd.f32 %v5917_v51, %v5899_v63  ;;  %6223 = vmatmul.bf16.gmra.mxu3 %v20954_v0  ;;  %v14355_v51 = vld [vmem:[%s25440_s3 + $0xdf8] sm:$0xf0]  ;;  %v14190_v39 = vor.u32 %v17650_v30, %v14187_v15  ;;  %v17632_v1 = vld [vmem:[%s25440_s3 + $0xc14] sm:$0xf]  ;;  %v17674_v62 = vld [vmem:[%s25440_s3 + $0xd64] sm:$0xf] }
 0x403   :  { %6307 = vmatpush.bf16.msrb.mxu0 %v14150_v44  ;;  %6326 = vmatpush.bf16.msrb.mxu1 %v14214_v23  ;;  %v22397_v20 = vpop.f32.mrf.mxu0  ;;  %v22399_v46 = vpop.f32.mrf.mxu1  ;;  %v13979_v44 = vld [vmem:[%s25440_s3 + $0xb08] sm:$0xf0]  ;;  %v14115_v41 = vld [vmem:[%s25440_s3 + $0xc18] sm:$0xf0]  ;;  %v17648_v59 = vld [vmem:[%s25440_s3 + $0xc94] sm:$0xf] }
 0x404   :  { %6204 = vmatmul.bf16.gmra.mxu2 %v20952_v38  ;;  %v17614_v38 = vld [vmem:[%s25440_s3 + $0xb84] sm:$0xf]  ;;  %v13982_v63 = vor.u32 %v17598_v11, %v13979_v44  ;;  %v14179_v4 = vld [vmem:[%s25440_s3 + $0xc98] sm:$0xf0] }
 0x405   :  { %6272 = vmatpush.bf16.msra.mxu2 %v13998_v50  ;;  %6291 = vmatpush.bf16.msra.mxu3 %v14062_v57  ;;  %v14294_v57 = vor.u32 %v17676_v17, %v14291_v22  ;;  %v14182_v11 = vor.u32 %v17648_v59, %v14179_v4  ;;  %v17630_v44 = vld [vmem:[%s25440_s3 + $0xc04] sm:$0xf]  ;;  %v14275_v17 = vld [vmem:[%s25440_s3 + $0xd58] sm:$0xf0]  ;;  %v17688_v22 = vld [vmem:[%s25440_s3 + $0xdd4] sm:$0xf] }
 0x406   :  { %v17668_v4 = vld [vmem:[%s25440_s3 + $0xd34] sm:$0xf] }
 0x407   :  { %6308 = vmatpush.bf16.msrb.mxu0 %v14142_v35  ;;  %6327 = vmatpush.bf16.msrb.mxu1 %v14206_v60  ;;  %v5901_v0 = vpop.f32.mrf.mxu2  ;;  %v5920_v23 = vpop.f32.mrf.mxu3  ;;  %v14046_v35 = vor.u32 %v17614_v38, %v14043_v33  ;;  %v14126_v60 = vor.u32 %v17634_v7, %v14123_v58  ;;  %v14171_v33 = vld [vmem:[%s25440_s3 + $0xc88] sm:$0xf0] }
 0x408   :  { %v5902_v48 = vadd.f32 %v5901_v0, %v22251_v47  ;;  %v17692_v47 = vld [vmem:[%s25440_s3 + $0xdf4] sm:$0xf]  ;;  %v14107_v0 = vld [vmem:[%s25440_s3 + $0xc08] sm:$0xf0] }
 0x409   :  { %6273 = vmatpush.bf16.msra.mxu2 %v13990_v3  ;;  %6292 = vmatpush.bf16.msra.mxu3 %v14054_v9  ;;  %v14358_v5 = vor.u32 %v17692_v47, %v14355_v51  ;;  %v14118_v9 = vor.u32 %v17632_v1, %v14115_v41  ;;  %v14339_v47 = vld [vmem:[%s25440_s3 + $0xdd8] sm:$0xf0]  ;;  %v14110_v51 = vor.u32 %v17630_v44, %v14107_v0 }
 0x40a   :  { %v5921_v27 = vadd.f32 %v5920_v23, %v5902_v48  ;;  %v17646_v23 = vld [vmem:[%s25440_s3 + $0xc84] sm:$0xf] }
 0x40b   :  { %6309 = vmatpush.bf16.msrb.mxu0 %v14134_v31  ;;  %6328 = vmatpush.bf16.msrb.mxu1 %v14198_v10  ;;  %v5939_v26 = vpop.f32.mrf.mxu0  ;;  %v5958_v36 = vpop.f32.mrf.mxu1  ;;  %v14283_v31 = vld [vmem:[%s25440_s3 + $0xd68] sm:$0xf0]  ;;  %v17690_v10 = vld [vmem:[%s25440_s3 + $0xde4] sm:$0xf] }
 0x40c   :  { %v5940_v50 = vadd.f32 %v5939_v26, %v5921_v27  ;;  %v14286_v7 = vor.u32 %v17674_v62, %v14283_v31  ;;  %v14174_v27 = vor.u32 %v17646_v23, %v14171_v33  ;;  %v14259_v62 = vld [vmem:[%s25440_s3 + $0xd38] sm:$0xf0]  ;;  %v17684_v31 = vld [vmem:[%s25440_s3 + $0xdb4] sm:$0xf] }
 0x40d   :  { %6274 = vmatpush.bf16.msra.mxu2 %v13982_v63  ;;  %6293 = vmatpush.bf16.msra.mxu3 %v14046_v35  ;;  %v17670_v63 = vld [vmem:[%s25440_s3 + $0xd44] sm:$0xf] }
 0x40e   :  { %6242 = vmatmul.bf16.gmra.mxu0 %v20988_v29  ;;  %6261 = vmatmul.bf16.gmra.mxu1 %v20990_v21  ;;  %v22475_v18 = vadd.f32 %v5958_v36, %v5940_v50  ;;  %v14347_v29 = vld [vmem:[%s25440_s3 + $0xde8] sm:$0xf0]  ;;  %v14342_v36 = vor.u32 %v17688_v22, %v14339_v47  ;;  %v14307_v22 = vld [vmem:[%s25440_s3 + $0xd98] sm:$0xf0] }
 0x40f   :  { %v5903_v21 = vpop.f32.mrf.mxu2  ;;  %v5922_v3 = vpop.f32.mrf.mxu3  ;;  %6310 = vmatpush.bf16.msrb.mxu0 %v14126_v60  ;;  %6329 = vmatpush.bf16.msrb.mxu1 %v14190_v39  ;;  %v14350_v58 = vor.u32 %v17690_v10, %v14347_v29  ;;  %v14267_v39 = vld [vmem:[%s25440_s3 + $0xd48] sm:$0xf0] }
 0x410   :  { %v5904_v38 = vadd.f32 %v5903_v21, %v22312_v25  ;;  %v17672_v25 = vld [vmem:[%s25440_s3 + $0xd54] sm:$0xf]  ;;  %v14270_v41 = vor.u32 %v17670_v63, %v14267_v39  ;;  %v14262_v21 = vor.u32 %v17668_v4, %v14259_v62  ;;  %v14235_v63 = vld [vmem:[%s25440_s3 + $0xd08] sm:$0xf0] }
 0x411   :  { %6343 = vmatpush.bf16.msrb.mxu2 %v14294_v57  ;;  %6362 = vmatpush.bf16.msrb.mxu3 %v14358_v5  ;;  %v14278_v26 = vor.u32 %v17672_v25, %v14275_v17  ;;  %v14243_v25 = vld [vmem:[%s25440_s3 + $0xd18] sm:$0xf0]  ;;  %v17680_v17 = vld [vmem:[%s25440_s3 + $0xd94] sm:$0xf] }
 0x412   :  { %v22502_v48 = vadd.f32 %v5922_v3, %v5904_v38  ;;  %6294 = vmatmul.bf16.vlgmr.msra.gmra.mxu3 %v21032_v40  ;;  %v14331_v40 = vld [vmem:[%s25440_s3 + $0xdc8] sm:$0xf0] }
 0x413   :  { %v22504_v30 = vpop.f32.mrf.mxu0  ;;  %v22506_v15 = vpop.f32.mrf.mxu1  ;;  %6311 = vmatpush.bf16.msrb.mxu0 %v14118_v9  ;;  %6330 = vmatpush.bf16.msrb.mxu1 %v14182_v11  ;;  %v17666_v9 = vld [vmem:[%s25440_s3 + $0xd24] sm:$0xf]  ;;  %v14251_v38 = vld [vmem:[%s25440_s3 + $0xd28] sm:$0xf0] }
 0x414   :  { %6275 = vmatmul.bf16.vlgmr.msra.gmra.mxu2 %v21030_v37  ;;  %v17686_v37 = vld [vmem:[%s25440_s3 + $0xdc4] sm:$0xf]  ;;  %v14254_v33 = vor.u32 %v17666_v9, %v14251_v38 }
 0x415   :  { %6344 = vmatpush.bf16.msrb.mxu2 %v14286_v7  ;;  %6363 = vmatpush.bf16.msrb.mxu3 %v14350_v58  ;;  %v14334_v59 = vor.u32 %v17686_v37, %v14331_v40  ;;  %v17664_v58 = vld [vmem:[%s25440_s3 + $0xd14] sm:$0xf] }
 0x416   :  { %v14246_v47 = vor.u32 %v17664_v58, %v14243_v25 }
 0x417   :  { %v5972_v35 = vpop.f32.mrf.mxu2  ;;  %v5991_v60 = vpop.f32.mrf.mxu3  ;;  %6312 = vmatpush.bf16.msrb.mxu0 %v14110_v51  ;;  %6331 = vmatpush.bf16.msrb.mxu1 %v14174_v27  ;;  %v14310_v51 = vor.u32 %v17680_v17, %v14307_v22  ;;  %v17662_v27 = vld [vmem:[%s25440_s3 + $0xd04] sm:$0xf] }
 0x418   :  { %v5973_v1 = vadd.f32 %v5972_v35, %v22368_v45  ;;  %v14323_v45 = vld [vmem:[%s25440_s3 + $0xdb8] sm:$0xf0]  ;;  %v14238_v40 = vor.u32 %v17662_v27, %v14235_v63 }
 0x419   :  { %6345 = vmatpush.bf16.msrb.mxu2 %v14278_v26  ;;  %6364 = vmatpush.bf16.msrb.mxu3 %v14342_v36  ;;  %v14326_v3 = vor.u32 %v17684_v31, %v14323_v45 }
 0x41a   :  { %v5992_v50 = vadd.f32 %v5991_v60, %v5973_v1 }
 0x41b   :  { %v6010_v57 = vpop.f32.mrf.mxu0  ;;  %v6029_v5 = vpop.f32.mrf.mxu1 }
 0x41c   :  { %v6011_v10 = vadd.f32 %v6010_v57, %v5992_v50 }
 0x41d   :  { %6346 = vmatpush.bf16.msrb.mxu2 %v14270_v41  ;;  %6365 = vmatpush.bf16.msrb.mxu3 %v14334_v59 }
 0x41e   :  { %6313 = vmatmul.bf16.vlgmr.msrb.gmra.mxu0 %v21078_v53  ;;  %6332 = vmatmul.bf16.vlgmr.msrb.gmra.mxu1 %v21080_v2  ;;  %v6030_v29 = vadd.f32 %v6029_v5, %v6011_v10  ;;  %v17682_v53 = vld [vmem:[%s25440_s3 + $0xda4] sm:$0xf]  ;;  %v14315_v2 = vld [vmem:[%s25440_s3 + $0xda8] sm:$0xf0] }
 0x41f   :  { %v22549_v11 = vpop.f32.mrf.mxu2  ;;  %v22551_v44 = vpop.f32.mrf.mxu3  ;;  %v14318_v7 = vor.u32 %v17682_v53, %v14315_v2 }
 0x421   :  { %6347 = vmatpush.bf16.msrb.mxu2 %v14262_v21  ;;  %6366 = vmatpush.bf16.msrb.mxu3 %v14326_v3 }
 0x422   :  { %6299 = vmatmul.bf16.gmra.mxu3 %v21113_v24  ;;  %v14299_v24 = vld [vmem:[%s25440_s3 + $0xd88] sm:$0xf0] }
 0x423   :  { %v22562_v0 = vpop.f32.mrf.mxu0  ;;  %v22564_v23 = vpop.f32.mrf.mxu1 }
 0x424   :  { %6280 = vmatmul.bf16.gmra.mxu2 %v21111_v13  ;;  %v17678_v13 = vld [vmem:[%s25440_s3 + $0xd84] sm:$0xf] }
 0x425   :  { %6348 = vmatpush.bf16.msrb.mxu2 %v14254_v33  ;;  %6367 = vmatpush.bf16.msrb.mxu3 %v14318_v7  ;;  %v14302_v1 = vor.u32 %v17678_v13, %v14299_v24 }
 0x427   :  { %v5977_v26 = vpop.f32.mrf.mxu2  ;;  %v5996_v36 = vpop.f32.mrf.mxu3 }
 0x428   :  { %v5978_v35 = vadd.f32 %v5977_v26, %v22475_v18 }
 0x429   :  { %6349 = vmatpush.bf16.msrb.mxu2 %v14246_v47  ;;  %6368 = vmatpush.bf16.msrb.mxu3 %v14310_v51 }
 0x42a   :  { %v5997_v60 = vadd.f32 %v5996_v36, %v5978_v35 }
 0x42b   :  { %v6015_v39 = vpop.f32.mrf.mxu0  ;;  %v6034_v37 = vpop.f32.mrf.mxu1 }
 0x42c   :  { %v6016_v50 = vadd.f32 %v6015_v39, %v5997_v60 }
 0x42d   :  { %6350 = vmatpush.bf16.msrb.mxu2 %v14238_v40  ;;  %6369 = vmatpush.bf16.msrb.mxu3 %v14302_v1 }
 0x42e   :  { %6318 = vmatmul.bf16.gmra.mxu0 %v21162_v16  ;;  %6337 = vmatmul.bf16.gmra.mxu1 %v21164_v6  ;;  %v6035_v57 = vadd.f32 %v6034_v37, %v6016_v50 }
 0x42f   :  { %v22595_v5 = vpop.f32.mrf.mxu2  ;;  %v22597_v41 = vpop.f32.mrf.mxu3 }
 0x432   :  { %6370 = vmatmul.bf16.vlgmr.msrb.gmra.mxu3 %v21221_v8 }
 0x433   :  { %v22599_v18 = vpop.f32.mrf.mxu0  ;;  %v22601_v59 = vpop.f32.mrf.mxu1 }
 0x434   :  { %6351 = vmatmul.bf16.vlgmr.msrb.gmra.mxu2 %v21219_v52 }
 0x437   :  { %v6048_v4 = vpop.f32.mrf.mxu2  ;;  %v6067_v62 = vpop.f32.mrf.mxu3 }
 0x438   :  { %v6049_v16 = vadd.f32 %v6048_v4, %v6030_v29 }
 0x43a   :  { %v6068_v31 = vadd.f32 %v6067_v62, %v6049_v16 }
 0x43b   :  { %v6086_v6 = vpop.f32.mrf.mxu0  ;;  %v6105_v45 = vpop.f32.mrf.mxu1 }
 0x43c   :  { %v6087_v10 = vadd.f32 %v6086_v6, %v6068_v31 }
 0x43e   :  { %v22605_v21 = vadd.f32 %v6105_v45, %v6087_v10 }
 0x43f   :  { %v22607_v3 = vpop.f32.mrf.mxu2  ;;  %v22609_v9 = vpop.f32.mrf.mxu3 }
 0x442   :  { %6375 = vmatmul.bf16.gmra.mxu3 %v21316_v49 }
 0x443   :  { %v22611_v38 = vpop.f32.mrf.mxu0  ;;  %v22613_v53 = vpop.f32.mrf.mxu1 }
 0x444   :  { %6356 = vmatmul.bf16.gmra.mxu2 %v21308_v56  ;;  %v22628_v56 = vperm.slane %v22078_v42, 1 }
 0x447   :  { %v6053_v52 = vpop.f32.mrf.mxu2  ;;  %v6072_v8 = vpop.f32.mrf.mxu3 }
 0x448   :  { %v6054_v29 = vadd.f32 %v6053_v52, %v6035_v57 }
 0x44a   :  { %v6073_v2 = vadd.f32 %v6072_v8, %v6054_v29 }
 0x44b   :  { %v6091_v33 = vpop.f32.mrf.mxu0  ;;  %v6110_v7 = vpop.f32.mrf.mxu1 }
 0x44c   :  { %v6092_v58 = vadd.f32 %v6091_v33, %v6073_v2 }
 0x44e   :  { %v22617_v25 = vadd.f32 %v6110_v7, %v6092_v58 }
 0x44f   :  { %v22619_v17 = vpop.f32.mrf.mxu2  ;;  %v22621_v22 = vpop.f32.mrf.mxu3 }
 0x450   :  { %25542 = vst [vmem:[#allocation16_spill] sm:$0xff] %v22617_v25  ;;  %v5937_v25 = vadd.f32 %v22397_v20, %v22395_v55 }
 0x451   :  { %25543 = vst [vmem:[#allocation17_spill] sm:$0xff] %v22619_v17 }
 0x452   :  { %25544 = vst [vmem:[#allocation24_spill] sm:$0xff] %v22621_v22 }
 0x453   :  { %v22623_v47 = vpop.f32.mrf.mxu0  ;;  %v22625_v51 = vpop.f32.mrf.mxu1 }
 0x454   :  { %25545 = vst [vmem:[#allocation25_spill] sm:$0xff] %v22623_v47 }
 0x455   :  { %25546 = vst [vmem:[#allocation26_spill] sm:$0xff] %v22625_v51  ;;  %v5956_v51 = vadd.f32 %v22399_v46, %v5937_v25 }
 0x457   :  { %v6124_v49 = vpop.f32.mrf.mxu2  ;;  %v6143_v27 = vpop.f32.mrf.mxu3 }
 0x458   :  { %v6125_v26 = vadd.f32 %v6124_v49, %v22628_v56 }
 0x45a   :  { %v6144_v36 = vadd.f32 %v6143_v27, %v6125_v26 }
 0x45b   :  { %v6162_v63 = vpop.f32.mrf.mxu0  ;;  %v6181_v13 = vpop.f32.mrf.mxu1 }
 0x45f   :  { %v6126_v24 = vpop.f32.mrf.mxu2  ;;  %v6145_v35 = vpop.f32.mrf.mxu3 }
 0x463   :  { %v6164_v60 = vpop.f32.mrf.mxu0  ;;  %v6183_v39 = vpop.f32.mrf.mxu1 }
 0x467   :  { %v6129_v37 = vpop.f32.mrf.mxu2  ;;  %v6148_v40 = vpop.f32.mrf.mxu3 }
 0x468   :  { %v6130_v1 = vadd.f32 %v6129_v37, %v22628_v56 }
 0x46a   :  { %v6149_v50 = vadd.f32 %v6148_v40, %v6130_v1 }
 0x46b   :  { %v6167_v57 = vpop.f32.mrf.mxu0  ;;  %v6186_v42 = vpop.f32.mrf.mxu1 }
 0x46c   :  { %v6168_v4 = vadd.f32 %v6167_v57, %v6149_v50  ;;  %v6163_v50 = vadd.f32 %v6162_v63, %v6144_v36  ;;  %v6127_v57 = vadd.f32 %v6126_v24, %v22628_v56  ;;  %v5975_v63 = vadd.f32 %v22549_v11, %v5956_v51 }
 0x46e   :  { %v6187_v62 = vadd.f32 %v6186_v42, %v6168_v4  ;;  %v6182_v34 = vadd.f32 %v6181_v13, %v6163_v50  ;;  %v6146_v28 = vadd.f32 %v6145_v35, %v6127_v57 }
 0x46f   :  { %v6131_v16 = vpop.f32.mrf.mxu2  ;;  %v6150_v31 = vpop.f32.mrf.mxu3 }
 0x470   :  { %v6165_v14 = vadd.f32 %v6164_v60, %v6146_v28  ;;  %v6132_v20 = vadd.f32 %v6131_v16, %v22628_v56 }
 0x472   :  { %v6184_v47 = vadd.f32 %v6183_v39, %v6165_v14  ;;  %v6151_v25 = vadd.f32 %v6150_v31, %v6132_v20 }
 0x473   :  { %v6169_v10 = vpop.f32.mrf.mxu0  ;;  %v6188_v29 = vpop.f32.mrf.mxu1 }
 0x477   :  { %v6200_v6 = vpop.f32.mrf.mxu2  ;;  %v6219_v45 = vpop.f32.mrf.mxu3 }
 0x478   :  { %v6201_v19 = vadd.f32 %v6200_v6, %v6182_v34  ;;  %v5994_v34 = vadd.f32 %v22551_v44, %v5975_v63 }
 0x47b   :  { %v6238_v2 = vpop.f32.mrf.mxu0  ;;  %v6257_v49 = vpop.f32.mrf.mxu1 }
 0x47f   :  { %v6202_v52 = vpop.f32.mrf.mxu2  ;;  %v6221_v8 = vpop.f32.mrf.mxu3 }
 0x480   :  { %v6203_v22 = vadd.f32 %v6202_v52, %v6184_v47 }
 0x482   :  { %v6222_v6 = vadd.f32 %v6221_v8, %v6203_v22  ;;  %v5942_v22 = vadd.f32 %v22504_v30, %v22502_v48  ;;  %v6170_v8 = vadd.f32 %v6169_v10, %v6151_v25 }
 0x483   :  { %v6240_v26 = vpop.f32.mrf.mxu0  ;;  %v6259_v1 = vpop.f32.mrf.mxu1 }
 0x484   :  { %v6241_v60 = vadd.f32 %v6240_v26, %v6222_v6  ;;  %v5961_v31 = vadd.f32 %v22506_v15, %v5942_v22  ;;  %v6189_v26 = vadd.f32 %v6188_v29, %v6170_v8 }
 0x486   :  { %v6260_v51 = vadd.f32 %v6259_v1, %v6241_v60 }
 0x487   :  { %v6205_v33 = vpop.f32.mrf.mxu2  ;;  %v6224_v7 = vpop.f32.mrf.mxu3 }
 0x488   :  { %v6206_v58 = vadd.f32 %v6205_v33, %v6187_v62 }
 0x48a   :  { %v6225_v27 = vadd.f32 %v6224_v7, %v6206_v58  ;;  %v6220_v58 = vadd.f32 %v6219_v45, %v6201_v19  ;;  %v6013_v19 = vadd.f32 %v22562_v0, %v5994_v34  ;;  %v6381_v34 = vmax.f32 %v22605_v21, 0.0 }
 0x48b   :  { %v6243_v61 = vpop.f32.mrf.mxu0  ;;  %v6262_v62 = vpop.f32.mrf.mxu1 }
 0x48c   :  { %v6239_v24 = vadd.f32 %v6238_v2, %v6220_v58  ;;  %v6032_v47 = vadd.f32 %v22564_v23, %v6013_v19  ;;  %v6244_v57 = vadd.f32 %v6243_v61, %v6225_v27 }
 0x48e   :  { %v6258_v35 = vadd.f32 %v6257_v49, %v6239_v24  ;;  %v6051_v45 = vadd.f32 %v22607_v3, %v6032_v47  ;;  %v5980_v3 = vadd.f32 %v22595_v5, %v5961_v31 }
 0x48f   :  { %v6207_v37 = vpop.f32.mrf.mxu2  ;;  %v6226_v40 = vpop.f32.mrf.mxu3 }
 0x490   :  { %v6070_v0 = vadd.f32 %v22609_v9, %v6051_v45  ;;  %v5999_v10 = vadd.f32 %v22597_v41, %v5980_v3  ;;  %v6263_v9 = vadd.f32 %v6262_v62, %v6244_v57 }
 0x492   :  { %v6018_v61 = vadd.f32 %v22599_v18, %v5999_v10 }
 0x493   :  { %v6245_v36 = vpop.f32.mrf.mxu0  ;;  %v6264_v55 = vpop.f32.mrf.mxu1 }
 0x497   :  { %v6276_v4 = vpop.f32.mrf.mxu2  ;;  %v6295_v42 = vpop.f32.mrf.mxu3 }
 0x498   :  { %v6277_v28 = vadd.f32 %v6276_v4, %v6258_v35  ;;  %v6208_v4 = vadd.f32 %v6207_v37, %v6189_v26  ;;  %v17717_v26 = vld [vmem:[%s25442_s5 + $0x438] sm:$0xff] }
 0x499   :  { %7797 = vmatpush.bf16.msra.mxu2 %v17717_v26 }
 0x49a   :  { %v6296_v14 = vadd.f32 %v6295_v42, %v6277_v28  ;;  %v6089_v42 = vadd.f32 %v22611_v38, %v6070_v0  ;;  %v17700_v0 = vld [vmem:[%s25442_s5 + $0x3b0] sm:$0xff] }
 0x49b   :  { %v6314_v46 = vpop.f32.mrf.mxu0  ;;  %v6333_v56 = vpop.f32.mrf.mxu1 }
 0x49c   :  { %v6315_v44 = vadd.f32 %v6314_v46, %v6296_v14  ;;  %v6108_v58 = vadd.f32 %v22613_v53, %v6089_v42  ;;  %v22656_v53 = vadd.f32 %v6381_v34, %v20463_v32 }
 0x49e   :  { %v6334_v16 = vadd.f32 %v6333_v56, %v6315_v44  ;;  %v6383_v37 = vmax.f32 %v6108_v58, 0.0  ;;  %v17707_v58 = vld [vmem:[%s25442_s5 + $0x3e8] sm:$0xff] }
 0x49f   :  { %v6278_v33 = vpop.f32.mrf.mxu2  ;;  %v6297_v7 = vpop.f32.mrf.mxu3 }
 0x4a0   :  { %v6279_v52 = vadd.f32 %v6278_v33, %v6260_v51  ;;  %v6227_v33 = vadd.f32 %v6226_v40, %v6208_v4  ;;  %v22660_v21 = vadd.f32 %v6383_v37, %v20468_v43  ;;  %v25548_v43 = vld [vmem:[#allocation24_spill] sm:$0xff] }
 0x4a2   :  { %v6298_v2 = vadd.f32 %v6297_v7, %v6279_v52  ;;  %v6246_v27 = vadd.f32 %v6245_v36, %v6227_v33  ;;  %v17701_v52 = vld [vmem:[%s25442_s5 + $0x3b8] sm:$0xff] }
 0x4a3   :  { %v6316_v49 = vpop.f32.mrf.mxu0  ;;  %v6335_v7 = vpop.f32.mrf.mxu1  ;;  %7759 = vmatpush.bf16.msra.mxu0 %v17701_v52 }
 0x4a4   :  { %v6317_v48 = vadd.f32 %v6316_v49, %v6298_v2  ;;  %v6265_v28 = vadd.f32 %v6264_v55, %v6246_v27 }
 0x4a6   :  { %v6336_v15 = vadd.f32 %v6335_v7, %v6317_v48  ;;  %v17699_v7 = vld [vmem:[%s25442_s5 + $0x3a8] sm:$0xff] }
 0x4a7   :  { %v6281_v17 = vpop.f32.mrf.mxu2  ;;  %v6300_v13 = vpop.f32.mrf.mxu3  ;;  %7760 = vmatpush.bf16.msra.mxu0 %v17700_v0 }
 0x4a8   :  { %v6282_v63 = vadd.f32 %v6281_v17, %v6263_v9  ;;  %v6037_v17 = vadd.f32 %v22601_v59, %v6018_v61 }
 0x4aa   :  { %v6301_v62 = vadd.f32 %v6300_v13, %v6282_v63 }
 0x4ab   :  { %v6319_v35 = vpop.f32.mrf.mxu0  ;;  %v6338_v60 = vpop.f32.mrf.mxu1  ;;  %7761 = vmatpush.bf16.msra.mxu0 %v17699_v7 }
 0x4ac   :  { %v6320_v19 = vadd.f32 %v6319_v35, %v6301_v62 }
 0x4ae   :  { %v6339_v47 = vadd.f32 %v6338_v60, %v6320_v19 }
 0x4af   :  { %v6283_v39 = vpop.f32.mrf.mxu2  ;;  %v6302_v11 = vpop.f32.mrf.mxu3 }
 0x4b0   :  { %v6284_v13 = vadd.f32 %v6283_v39, %v6265_v28  ;;  %v17709_v39 = vld [vmem:[%s25442_s5 + $0x3f8] sm:$0xff] }
 0x4b1   :  { %7778 = vmatpush.bf16.msra.mxu1 %v17709_v39 }
 0x4b2   :  { %v6303_v51 = vadd.f32 %v6302_v11, %v6284_v13  ;;  %v17708_v11 = vld [vmem:[%s25442_s5 + $0x3f0] sm:$0xff] }
 0x4b3   :  { %v6321_v45 = vpop.f32.mrf.mxu0  ;;  %v6340_v10 = vpop.f32.mrf.mxu1 }
 0x4b4   :  { %v6322_v3 = vadd.f32 %v6321_v45, %v6303_v51 }
 0x4b5   :  { %7779 = vmatpush.bf16.msra.mxu1 %v17708_v11  ;;  %v18003_v11 = vld [vmem:[%s25440_s3 + $0x1344] sm:$0xf0] }
 0x4b6   :  { %v6341_v63 = vadd.f32 %v6340_v10, %v6322_v3 }
 0x4b7   :  { %v6352_v50 = vpop.f32.mrf.mxu2  ;;  %v6371_v23 = vpop.f32.mrf.mxu3 }
 0x4b8   :  { %v6353_v1 = vadd.f32 %v6352_v50, %v6334_v16  ;;  %v17725_v50 = vld [vmem:[%s25442_s5 + $0x478] sm:$0xff] }
 0x4b9   :  { %7816 = vmatpush.bf16.msra.mxu3 %v17725_v50  ;;  %7780 = vmatpush.bf16.msra.mxu1 %v17707_v58 }
 0x4ba   :  { %v6372_v30 = vadd.f32 %v6371_v23, %v6353_v1  ;;  %v25549_v23 = vld [vmem:[#allocation25_spill] sm:$0xff] }
 0x4bc   :  { %v6382_v29 = vmax.f32 %v6372_v30, 0.0 }
 0x4be   :  { %v22653_v41 = vadd.f32 %v6382_v29, %v20459_v12  ;;  %v25547_v12 = vld [vmem:[#allocation17_spill] sm:$0xff] }
 0x4bf   :  { %v6354_v24 = vpop.f32.mrf.mxu2  ;;  %v6373_v38 = vpop.f32.mrf.mxu3  ;;  %v6056_v20 = vadd.f32 %v25547_v12, %v6037_v17  ;;  %v25552_v12 = vld [vmem:[#allocation16_spill] sm:$0xff] }
 0x4c0   :  { %v6355_v5 = vadd.f32 %v6354_v24, %v6336_v15  ;;  %v6397_v18 = vpack.c.bf16 %v22653_v41, %v22656_v53  ;;  %v25550_v15 = vld [vmem:[#allocation26_spill] sm:$0xff] }
 0x4c1   :  { %v6075_v25 = vadd.f32 %v25548_v43, %v6056_v20  ;;  %v6385_v20 = vmax.f32 %v25552_v12, 0.0  ;;  %v25562_v12 = vld [vmem:[#allocation20_spill] sm:$0xff] }
 0x4c2   :  { %v6374_v40 = vadd.f32 %v6373_v38, %v6355_v5  ;;  %v6403_v46 = vunpack.c.l.b16 %v6397_v18  ;;  %v6404_v59 = vunpack.c.h.b16 %v6397_v18 }
 0x4c3   :  { %v6094_v1 = vadd.f32 %v25549_v23, %v6075_v25 }
 0x4c4   :  { %v6384_v6 = vmax.f32 %v6374_v40, 0.0 }
 0x4c5   :  { %v22697_v29 = vadd.f32 %v25550_v15, %v6094_v1  ;;  %v17698_v15 = vld [vmem:[%s25442_s5 + $0x3a0] sm:$0xff] }
 0x4c6   :  { %v22665_v36 = vadd.f32 %v6384_v6, %v20473_v54  ;;  %7762 = vmatpush.bf16.msra.mxu0 %v17698_v15 }
 0x4c7   :  { %v6357_v22 = vpop.f32.mrf.mxu2  ;;  %v6376_v56 = vpop.f32.mrf.mxu3 }
 0x4c8   :  { %v6398_v32 = vpack.c.bf16 %v22665_v36, %v22660_v21  ;;  %v6358_v8 = vadd.f32 %v6357_v22, %v6339_v47 }
 0x4ca   :  { %v6405_v55 = vunpack.c.l.b16 %v6398_v32  ;;  %v6406_v14 = vunpack.c.h.b16 %v6398_v32  ;;  %v6377_v57 = vadd.f32 %v6376_v56, %v6358_v8  ;;  %v6387_v32 = vmax.f32 %v22697_v29, 0.0 }
 0x4cc   :  { %v6407_v44 = vpack.c.b16 %v6405_v55, %v6403_v46  ;;  %v6408_v54 = vpack.c.b16 %v6406_v14, %v6404_v59  ;;  %v6386_v24 = vmax.f32 %v6377_v57, 0.0  ;;  %v25553_v59 = vld [vmem:[#allocation18_spill] sm:$0xff] }
 0x4ce   :  { %v6410_v16 = vshrl.u32 %v6407_v44, 16  ;;  %v6413_v2 = vshll.u32 %v6407_v44, 16  ;;  %v6418_v49 = vshrl.u32 %v6408_v54, 16  ;;  %v6421_v31 = vshll.u32 %v6408_v54, 16 }
 0x4cf   :  { %v6359_v37 = vpop.f32.mrf.mxu2  ;;  %v6378_v60 = vpop.f32.mrf.mxu3  ;;  %v22716_v55 = vadd.f32 %v6386_v24, %v25553_v59  ;;  %v17967_v24 = vld [vmem:[%s25440_s3 + $0x1224] sm:$0xf0] }
 0x4d0   :  { %v6412_v4 = vrot.slane %v6410_v16, 6  ;;  %v6415_v42 = vrot.slane %v6413_v2, 7  ;;  %v6420_v48 = vrot.slane %v6418_v49, 6  ;;  %v6423_v30 = vrot.slane %v6421_v31, 7 }
 0x4d1   :  { %v6360_v18 = vadd.f32 %v6359_v37, %v6341_v63  ;;  %25554 = vst [vmem:[#allocation17_spill] sm:$0xff] %v22716_v55  ;;  %v17706_v63 = vld [vmem:[%s25442_s5 + $0x3e0] sm:$0xff]  ;;  %v17716_v37 = vld [vmem:[%s25442_s5 + $0x430] sm:$0xff] }
 0x4d2   :  { %v6416_v9 = vor.u32 %v6415_v42, %v6412_v4  ;;  %v6424_v33 = vor.u32 %v6423_v30, %v6420_v48  ;;  %7781 = vmatpush.bf16.msra.mxu1 %v17706_v63  ;;  %7798 = vmatpush.bf16.msra.mxu2 %v17716_v37  ;;  %v17694_v37 = vld [vmem:[%s25442_s5 + $0x380] sm:$0xff] }
 0x4d3   :  { %v22718_v14 = vadd.f32 %v6378_v60, %v6360_v18 }
 0x4d4   :  { %v6427_v5 = vsel %vm18303_vm2, 0, %v6416_v9  ;;  %v6428_v61 = vsel %vm18303_vm2, 0, %v6424_v33  ;;  %v6429_v27 = vsel %vm18303_vm2, %v6416_v9, 0  ;;  %v6430_v38 = vsel %vm18303_vm2, %v6424_v33, 0 }
 0x4d5   :  { %v6433_v35 = vunpack.c.l.b16 %v6427_v5  ;;  %v6434_v40 = vunpack.c.l.b16 %v6428_v61  ;;  %v6435_v62 = vunpack.c.h.b16 %v6427_v5  ;;  %v6436_v6 = vunpack.c.h.b16 %v6428_v61 }
 0x4d6   :  { %v6445_v17 = vunpack.c.l.b16 %v6429_v27  ;;  %v6446_v28 = vunpack.c.l.b16 %v6430_v38 }
 0x4d7   :  { %v22708_v19 = vpack.c.b16 %v6434_v40, %v6433_v35  ;;  %v22710_v13 = vpack.c.b16 %v6436_v6, %v6435_v62  ;;  %v17724_v35 = vld [vmem:[%s25442_s5 + $0x470] sm:$0xff] }
 0x4d8   :  { %v22713_v46 = vpack.c.b16 %v6446_v28, %v6445_v17  ;;  %7817 = vmatpush.bf16.msra.mxu3 %v17724_v35 }
 0x4d9   :  { %6441 = vst [vmem:[#allocation3] sm:$0xff] %v22708_v19  ;;  %v22722_v43 = vshrl.u32 %v22708_v19, 16  ;;  %v22725_v25 = vshll.u32 %v22708_v19, 16  ;;  %v22728_v47 = vshll.u32 %v22710_v13, 16  ;;  %v22731_v51 = vshrl.u32 %v22710_v13, 16 }
 0x4da   :  { %6442 = vst [vmem:[#allocation3 + $0x38] sm:$0xff] %v22710_v13  ;;  %v22735_v45 = vshll.u32 %v22713_v46, 16  ;;  %v14359_v44 = vrot.slane %v22708_v19, 9  ;;  %v6478_v54 = vrot.slane %v22710_v13, 5  ;;  %v6481_v52 = vrot.slane %v22713_v46, 5 }
 0x4db   :  { %v6451_v39 = vrot.slane %v22722_v43, 4  ;;  %v6454_v22 = vrot.slane %v22725_v25, 5  ;;  %v6460_v8 = vrot.slane %v22728_v47, 5  ;;  %v6464_v56 = vrot.slane %v22731_v51, 4 }
 0x4dc   :  { %v6470_v0 = vrot.slane %v22735_v45, 5  ;;  %v6479_v16 = vsel %vm18320_vm7, %v14359_v44, %v6478_v54  ;;  %v6480_v2 = vrot.slane %v6478_v54, 4  ;;  %v6487_v49 = vrot.slane %v22722_v43, 5 }
 0x4dd   :  { %v6455_v31 = vor.u32 %v6454_v22, %v6451_v39  ;;  %v6465_v26 = vor.u32 %v6464_v56, %v6460_v8  ;;  %v6488_v50 = vrot.slane %v22725_v25, 6  ;;  %v6491_v23 = vrot.slane %v22731_v51, 5  ;;  %6485 = vst [vmem:[#allocation3 + $0x10] sm:$0xff] %v6479_v16  ;;  %v17723_v16 = vld [vmem:[%s25442_s5 + $0x468] sm:$0xff] }
 0x4de   :  { %v6482_v1 = vsel %vm18320_vm7, %v6480_v2, %v6481_v52  ;;  %v6492_v3 = vrot.slane %v22728_v47, 6  ;;  %v6496_v57 = vshrl.u32 %v22713_v46, 16  ;;  %v6499_v4 = vrot.slane %v22735_v45, 6  ;;  %v25559_v2 = vld [vmem:[#allocation19_spill] sm:$0xff]  ;;  %7818 = vmatpush.bf16.msra.mxu3 %v17723_v16 }
 0x4df   :  { %v6456_v42 = vrot.slane %v6455_v31, 4  ;;  %v6466_v48 = vrot.slane %v6465_v26, 4  ;;  %6486 = vst [vmem:[#allocation3 + $0x48] sm:$0xff] %v6482_v1  ;;  %v6489_v30 = vor.u32 %v6488_v50, %v6487_v49  ;;  %v14360_v10 = vrot.slane %v22708_v19, 10 }
 0x4e0   :  { %v6493_v9 = vor.u32 %v6492_v3, %v6491_v23  ;;  %v6498_v33 = vrot.slane %v6496_v57, 5  ;;  %v6508_v7 = vrot.slane %v22710_v13, 6  ;;  %v6511_v58 = vrot.slane %v22713_v46, 6  ;;  %v15857_v23 = vld [vmem:[%s25440_s3 + $0x11c0] sm:$0xf] }
 0x4e1   :  { %v6461_v5 = vsel %vm18354_vm12, %v6456_v42, %v6460_v8  ;;  %v6471_v61 = vsel %vm18354_vm12, %v6466_v48, %v6470_v0  ;;  %v6490_v27 = vrot.slane %v6489_v30, 4  ;;  %v6517_v38 = vrot.slane %v22722_v43, 6  ;;  %v17704_v42 = vld [vmem:[%s25442_s5 + $0x3d0] sm:$0xff]  ;;  %v17875_v48 = vld [vmem:[%s25440_s3 + $0xf44] sm:$0xf0] }
 0x4e2   :  { %v6495_v40 = vrot.slane %v6493_v9, 4  ;;  %v6500_v62 = vor.u32 %v6499_v4, %v6498_v33  ;;  %v6509_v17 = vsel %vm18316_vm6, %v14360_v10, %v6508_v7  ;;  %v6510_v28 = vrot.slane %v6508_v7, 4  ;;  %6474 = vst [vmem:[#allocation3 + $0x8] sm:$0xff] %v6461_v5  ;;  %v17696_v4 = vld [vmem:[%s25442_s5 + $0x390] sm:$0xff]  ;;  %v17714_v10 = vld [vmem:[%s25442_s5 + $0x420] sm:$0xff]  ;;  %v17695_v5 = vld [vmem:[%s25442_s5 + $0x388] sm:$0xff] }
 0x4e3   :  { %v6494_v60 = vsel %vm18388_vm0, %v6490_v27, %v6493_v9  ;;  %v6518_v59 = vrot.slane %v22725_v25, 7  ;;  %v6521_v43 = vrot.slane %v22731_v51, 6  ;;  %v6522_v44 = vrot.slane %v22728_v47, 7  ;;  %6475 = vst [vmem:[#allocation3 + $0x40] sm:$0xff] %v6471_v61  ;;  %v17697_v25 = vld [vmem:[%s25442_s5 + $0x398] sm:$0xff]  ;;  %v17722_v9 = vld [vmem:[%s25442_s5 + $0x460] sm:$0xff] }
 0x4e4   :  { %v6501_v54 = vsel %vm18388_vm0, %v6495_v40, %v6500_v62  ;;  %v6512_v52 = vsel %vm18316_vm6, %v6510_v28, %v6511_v58  ;;  %v6526_v39 = vrot.slane %v6496_v57, 6  ;;  %v6527_v22 = vrot.slane %v22735_v45, 7  ;;  %6504 = vst [vmem:[#allocation3 + $0x18] sm:$0xff] %v6494_v60  ;;  %v17705_v47 = vld [vmem:[%s25442_s5 + $0x3d8] sm:$0xff]  ;;  %v17715_v45 = vld [vmem:[%s25442_s5 + $0x428] sm:$0xff]  ;;  %7763 = vmatpush.bf16.msra.mxu0 %v17697_v25  ;;  %7819 = vmatpush.bf16.msra.mxu3 %v17722_v9  ;;  %v17702_v62 = vld [vmem:[%s25442_s5 + $0x3c0] sm:$0xff] }
 0x4e5   :  { %6516 = vst [vmem:[#allocation3 + $0x58] sm:$0xff] %v6512_v52  ;;  %v6519_v51 = vor.u32 %v6518_v59, %v6517_v38  ;;  %v6523_v8 = vor.u32 %v6522_v44, %v6521_v43  ;;  %v14361_v56 = vrot.slane %v22708_v19, 11  ;;  %v6536_v0 = vrot.slane %v22710_v13, 7  ;;  %7782 = vmatpush.bf16.msra.mxu1 %v17705_v47  ;;  %7799 = vmatpush.bf16.msra.mxu2 %v17715_v45  ;;  %v17703_v61 = vld [vmem:[%s25442_s5 + $0x3c8] sm:$0xff]  ;;  %v17713_v27 = vld [vmem:[%s25442_s5 + $0x418] sm:$0xff]  ;;  %v17720_v28 = vld [vmem:[%s25442_s5 + $0x450] sm:$0xff] }
 0x4e6   :  { %v22804_v49 = vadd.f32 %v6385_v20, %v25559_v2  ;;  %v6528_v31 = vor.u32 %v6527_v22, %v6526_v39  ;;  %v6539_v26 = vrot.slane %v22713_v46, 7  ;;  %6505 = vst [vmem:[#allocation3 + $0x50] sm:$0xff] %v6501_v54  ;;  %v6388_v19 = vmax.f32 %v22718_v14, 0.0  ;;  %v25564_v14 = vld [vmem:[#allocation22_spill] sm:$0xff]  ;;  %v17721_v38 = vld [vmem:[%s25442_s5 + $0x458] sm:$0xff] }
 0x4e7   :  { %v6520_v13 = vrot.slane %v6519_v51, 4  ;;  %v6525_v50 = vrot.slane %v6523_v8, 4  ;;  %v6537_v1 = vsel %vm18361_vm13, %v14361_v56, %v6536_v0  ;;  %v6538_v3 = vrot.slane %v6536_v0, 4  ;;  %6515 = vst [vmem:[#allocation3 + $0x20] sm:$0xff] %v6509_v17  ;;  %v17712_v17 = vld [vmem:[%s25442_s5 + $0x410] sm:$0xff]  ;;  %v17733_v51 = vld [vmem:[%s25442_s5 + $0x4b8] sm:$0xff] }
 0x4e8   :  { %25560 = vst [vmem:[#allocation24_spill] sm:$0xff] %v22804_v49  ;;  %v22813_v20 = vadd.f32 %v6387_v32, %v25562_v12  ;;  %v6399_v46 = vpack.c.bf16 %v22716_v55, %v22804_v49  ;;  %v22818_v57 = vadd.f32 %v6388_v19, %v25564_v14  ;;  %7764 = vmatpush.bf16.msra.mxu0 %v17696_v4  ;;  %v14592_v60 = vld [vmem:[#allocation3] sm:$0xf]  ;;  %v17813_v59 = vld [vmem:[#allocation3 + $0x34] sm:$0xf0] }
 0x4e9   :  { %6543 = vst [vmem:[#allocation3 + $0x30] sm:$0xff] %v6537_v1  ;;  %v6524_v29 = vsel %vm18426_vm4, %v6520_v13, %v6523_v8  ;;  %v6529_v32 = vsel %vm18426_vm4, %v6525_v50, %v6528_v31  ;;  %v6540_v30 = vsel %vm18361_vm13, %v6538_v3, %v6539_v26  ;;  %7783 = vmatpush.bf16.msra.mxu1 %v17704_v42  ;;  %v17806_v43 = vld [vmem:[#allocation3 + $0x4] sm:$0xf]  ;;  %v14594_v22 = vld [vmem:[#allocation3 + $0x38] sm:$0xf0]  ;;  %v17741_v8 = vld [vmem:[%s25442_s5 + $0x4f8] sm:$0xff] }
 0x4ea   :  { %25563 = vst [vmem:[#allocation25_spill] sm:$0xff] %v22813_v20  ;;  %v6400_v33 = vpack.c.bf16 %v22818_v57, %v22813_v20  ;;  %7800 = vmatpush.bf16.msra.mxu2 %v17714_v10  ;;  %v6547_v7 = vunpack.c.l.b16 %v6399_v46  ;;  %v6548_v58 = vunpack.c.h.b16 %v6399_v46  ;;  %7820 = vmatpush.bf16.msra.mxu3 %v17721_v38  ;;  %v22864_v25 = vor.u32 %v17813_v59, %v14592_v60  ;;  %v17711_v2 = vld [vmem:[%s25442_s5 + $0x408] sm:$0xff]  ;;  %v17732_v13 = vld [vmem:[%s25442_s5 + $0x4b0] sm:$0xff]  ;;  %v17710_v1 = vld [vmem:[%s25442_s5 + $0x400] sm:$0xff] }
 0x4eb   :  { %25565 = vst [vmem:[#allocation26_spill] sm:$0xff] %v22818_v57  ;;  %v22866_v47 = vor.u32 %v17806_v43, %v14594_v22  ;;  %v17719_v31 = vld [vmem:[%s25442_s5 + $0x448] sm:$0xff]  ;;  %v17740_v50 = vld [vmem:[%s25442_s5 + $0x4f0] sm:$0xff]  ;;  %v17718_v3 = vld [vmem:[%s25442_s5 + $0x440] sm:$0xff] }
 0x4ec   :  { %6544 = vst [vmem:[#allocation3 + $0x68] sm:$0xff] %v6540_v30  ;;  %v6549_v15 = vunpack.c.l.b16 %v6400_v33  ;;  %v6550_v63 = vunpack.c.h.b16 %v6400_v33  ;;  %7765 = vmatpush.bf16.msra.mxu0 %v17695_v5  ;;  %v14600_v42 = vld [vmem:[#allocation3 + $0x8] sm:$0xf]  ;;  %v17814_v9 = vld [vmem:[#allocation3 + $0x3c] sm:$0xf0]  ;;  %v17739_v5 = vld [vmem:[%s25442_s5 + $0x4e8] sm:$0xff] }
 0x4ed   :  { %6532 = vst [vmem:[#allocation3 + $0x28] sm:$0xff] %v6524_v29  ;;  %7784 = vmatpush.bf16.msra.mxu1 %v17703_v61  ;;  %v17807_v33 = vld [vmem:[#allocation3 + $0xc] sm:$0xf]  ;;  %v17730_v43 = vld [vmem:[%s25442_s5 + $0x4a0] sm:$0xff] }
 0x4ee   :  { %6533 = vst [vmem:[#allocation3 + $0x60] sm:$0xff] %v6529_v32  ;;  %v6551_v35 = vpack.c.b16 %v6549_v15, %v6547_v7  ;;  %v6552_v40 = vpack.c.b16 %v6550_v63, %v6548_v58  ;;  %7801 = vmatpush.bf16.msra.mxu2 %v17713_v27  ;;  %7821 = vmatpush.bf16.msra.mxu3 %v17720_v28  ;;  %v14602_v7 = vld [vmem:[#allocation3 + $0x40] sm:$0xf0]  ;;  %v17731_v63 = vld [vmem:[%s25442_s5 + $0x4a8] sm:$0xff]  ;;  %v17749_v38 = vld [vmem:[%s25442_s5 + $0x538] sm:$0xff] }
 0x4ef   :  { %v17738_v22 = vld [vmem:[%s25442_s5 + $0x4e0] sm:$0xff] }
 0x4f0   :  { %v6554_v44 = vshrl.u32 %v6551_v35, 16  ;;  %v6557_v54 = vshll.u32 %v6551_v35, 16  ;;  %v6562_v52 = vshrl.u32 %v6552_v40, 16  ;;  %v6565_v39 = vshll.u32 %v6552_v40, 16  ;;  %7766 = vmatpush.bf16.msra.mxu0 %v17694_v37  ;;  %v17757_v37 = vld [vmem:[%s25442_s5 + $0x578] sm:$0xff] }
 0x4f1   :  { %7785 = vmatpush.bf16.msra.mxu1 %v17702_v62  ;;  %v22920_v40 = vor.u32 %v17814_v9, %v14600_v42  ;;  %v22922_v62 = vor.u32 %v17807_v33, %v14602_v7  ;;  %v17729_v42 = vld [vmem:[%s25442_s5 + $0x498] sm:$0xff]  ;;  %v17747_v33 = vld [vmem:[%s25442_s5 + $0x528] sm:$0xff] }
 0x4f2   :  { %v6556_v56 = vrot.slane %v6554_v44, 6  ;;  %v6559_v0 = vrot.slane %v6557_v54, 7  ;;  %v6564_v45 = vrot.slane %v6562_v52, 6  ;;  %v6567_v16 = vrot.slane %v6565_v39, 7  ;;  %7802 = vmatpush.bf16.msra.mxu2 %v17712_v17  ;;  %7822 = vmatpush.bf16.msra.mxu3 %v17719_v31  ;;  %v17755_v7 = vld [vmem:[%s25442_s5 + $0x568] sm:$0xff] }
 0x4f3   :  { %7767 = vmatmul.bf16.vlgmr.msra.gmra.mxu0 %v22864_v25 }
 0x4f4   :  { %v6560_v26 = vor.u32 %v6559_v0, %v6556_v56  ;;  %v6568_v19 = vor.u32 %v6567_v16, %v6564_v45  ;;  %7835 = vmatpush.bf16.msrb.mxu0 %v17733_v51  ;;  %7786 = vmatmul.bf16.vlgmr.msra.gmra.mxu1 %v22866_v47  ;;  %v17748_v45 = vld [vmem:[%s25442_s5 + $0x530] sm:$0xff] }
 0x4f5   :  { %7854 = vmatpush.bf16.msrb.mxu1 %v17741_v8  ;;  %v17756_v16 = vld [vmem:[%s25442_s5 + $0x570] sm:$0xff] }
 0x4f6   :  { %v6571_v12 = vsel %vm18303_vm2, 0, %v6560_v26  ;;  %v6572_v46 = vsel %vm18303_vm2, 0, %v6568_v19  ;;  %v6573_v14 = vsel %vm18303_vm2, %v6560_v26, 0  ;;  %v6574_v4 = vsel %vm18303_vm2, %v6568_v19, 0  ;;  %7803 = vmatpush.bf16.msra.mxu2 %v17711_v2  ;;  %7823 = vmatpush.bf16.msra.mxu3 %v17718_v3 }
 0x4f7   :  { %v6577_v29 = vunpack.c.l.b16 %v6571_v12  ;;  %v6578_v32 = vunpack.c.l.b16 %v6572_v46  ;;  %v6579_v30 = vunpack.c.h.b16 %v6571_v12  ;;  %v6580_v10 = vunpack.c.h.b16 %v6572_v46 }
 0x4f8   :  { %v6589_v58 = vunpack.c.l.b16 %v6573_v14  ;;  %v6590_v15 = vunpack.c.l.b16 %v6574_v4  ;;  %7836 = vmatpush.bf16.msrb.mxu0 %v17732_v13 }
 0x4f9   :  { %7855 = vmatpush.bf16.msrb.mxu1 %v17740_v50  ;;  %v22908_v61 = vpack.c.b16 %v6578_v32, %v6577_v29  ;;  %v22910_v27 = vpack.c.b16 %v6580_v10, %v6579_v30  ;;  %7824 = vmatmul.bf16.vlgmr.msra.gmra.mxu3 %v22922_v62  ;;  %v17737_v29 = vld [vmem:[%s25442_s5 + $0x4d8] sm:$0xff] }
 0x4fa   :  { %v22918_v35 = vpack.c.b16 %v6590_v15, %v6589_v58  ;;  %7804 = vmatpush.bf16.msra.mxu2 %v17710_v1  ;;  %7892 = vmatpush.bf16.msrb.mxu3 %v17757_v37  ;;  %v17736_v37 = vld [vmem:[%s25442_s5 + $0x4d0] sm:$0xff] }
 0x4fb   :  { %v22925_v17 = vshrl.u32 %v22908_v61, 16  ;;  %v22928_v28 = vshll.u32 %v22908_v61, 16  ;;  %v22931_v60 = vshll.u32 %v22910_v27, 16  ;;  %v22934_v59 = vshrl.u32 %v22910_v27, 16  ;;  %6585 = vst [vmem:[#allocation3 + $0x70] sm:$0xff] %v22908_v61 }
 0x4fc   :  { %v22941_v44 = vshll.u32 %v22918_v35, 16  ;;  %v14362_v54 = vrot.slane %v22908_v61, 9  ;;  %v6622_v52 = vrot.slane %v22910_v27, 5  ;;  %v6625_v39 = vrot.slane %v22918_v35, 5  ;;  %6586 = vst [vmem:[#allocation3 + $0xa8] sm:$0xff] %v22910_v27  ;;  %7837 = vmatpush.bf16.msrb.mxu0 %v17731_v63 }
 0x4fd   :  { %7856 = vmatpush.bf16.msrb.mxu1 %v17739_v5  ;;  %v6595_v51 = vrot.slane %v22925_v17, 4  ;;  %v6598_v8 = vrot.slane %v22928_v28, 5  ;;  %v6604_v56 = vrot.slane %v22931_v60, 5  ;;  %v6608_v0 = vrot.slane %v22934_v59, 4  ;;  %7805 = vmatmul.bf16.vlgmr.msra.gmra.mxu2 %v22920_v40 }
 0x4fe   :  { %7873 = vmatpush.bf16.msrb.mxu2 %v17749_v38  ;;  %v6614_v2 = vrot.slane %v22941_v44, 5  ;;  %v6623_v31 = vsel %vm18320_vm7, %v14362_v54, %v6622_v52  ;;  %v6624_v26 = vrot.slane %v6622_v52, 4  ;;  %v6631_v19 = vrot.slane %v22925_v17, 5  ;;  %7893 = vmatpush.bf16.msrb.mxu3 %v17756_v16  ;;  %v17728_v38 = vld [vmem:[%s25442_s5 + $0x490] sm:$0xff] }
 0x4ff   :  { %v22966_v13 = vor.u32 %v6598_v8, %v6595_v51  ;;  %v6609_v50 = vor.u32 %v6608_v0, %v6604_v56  ;;  %v6632_v1 = vrot.slane %v22928_v28, 6  ;;  %v6635_v3 = vrot.slane %v22934_v59, 5  ;;  %6629 = vst [vmem:[#allocation3 + $0x80] sm:$0xff] %v6623_v31  ;;  %v17746_v8 = vld [vmem:[%s25442_s5 + $0x520] sm:$0xff] }
 0x500   :  { %v6626_v12 = vsel %vm18320_vm7, %v6624_v26, %v6625_v39  ;;  %v6636_v46 = vrot.slane %v22931_v60, 6  ;;  %v6640_v14 = vshrl.u32 %v22918_v35, 16  ;;  %v6643_v4 = vrot.slane %v22941_v44, 6  ;;  %7838 = vmatpush.bf16.msrb.mxu0 %v17730_v43 }
 0x501   :  { %7857 = vmatpush.bf16.msrb.mxu1 %v17738_v22  ;;  %v6600_v32 = vrot.slane %v22966_v13, 4  ;;  %v6610_v30 = vrot.slane %v6609_v50, 4  ;;  %v22984_v10 = vor.u32 %v6632_v1, %v6631_v19  ;;  %v14363_v9 = vrot.slane %v22908_v61, 10  ;;  %6630 = vst [vmem:[#allocation3 + $0xb8] sm:$0xff] %v6626_v12 }
 0x502   :  { %7874 = vmatpush.bf16.msrb.mxu2 %v17748_v45  ;;  %v6637_v58 = vor.u32 %v6636_v46, %v6635_v3  ;;  %v6642_v15 = vrot.slane %v6640_v14, 5  ;;  %v6652_v63 = vrot.slane %v22910_v27, 6  ;;  %v6655_v5 = vrot.slane %v22918_v35, 6  ;;  %v14648_v22 = vld [vmem:[#allocation3 + $0x70] sm:$0xf]  ;;  %7894 = vmatpush.bf16.msrb.mxu3 %v17755_v7  ;;  %v17745_v7 = vld [vmem:[%s25442_s5 + $0x518] sm:$0xff] }
 0x503   :  { %v6615_v43 = vsel %vm18354_vm12, %v6610_v30, %v6614_v2  ;;  %v6634_v54 = vrot.slane %v22984_v10, 4  ;;  %v6661_v52 = vrot.slane %v22925_v17, 6  ;;  %v6662_v39 = vrot.slane %v22928_v28, 7  ;;  %v17827_v51 = vld [vmem:[#allocation3 + $0xa4] sm:$0xf0]  ;;  %v17754_v17 = vld [vmem:[%s25442_s5 + $0x560] sm:$0xff] }
 0x504   :  { %v6639_v0 = vrot.slane %v6637_v58, 4  ;;  %v6644_v45 = vor.u32 %v6643_v4, %v6642_v15  ;;  %v6653_v16 = vsel %vm18316_vm6, %v14363_v9, %v6652_v63  ;;  %v6654_v31 = vrot.slane %v6652_v63, 4  ;;  %6619 = vst [vmem:[#allocation3 + $0xb0] sm:$0xff] %v6615_v43  ;;  %v17820_v2 = vld [vmem:[#allocation3 + $0x74] sm:$0xf]  ;;  %7839 = vmatpush.bf16.msrb.mxu0 %v17729_v42  ;;  %v17753_v15 = vld [vmem:[%s25442_s5 + $0x558] sm:$0xff] }
 0x505   :  { %7858 = vmatpush.bf16.msrb.mxu1 %v17737_v29  ;;  %v6663_v28 = vor.u32 %v6662_v39, %v6661_v52  ;;  %v6665_v26 = vrot.slane %v22934_v59, 6  ;;  %v6666_v19 = vrot.slane %v22931_v60, 7  ;;  %v6670_v13 = vrot.slane %v6640_v14, 6  ;;  %6659 = vst [vmem:[#allocation3 + $0x90] sm:$0xff] %v6653_v16  ;;  %v14650_v50 = vld [vmem:[#allocation3 + $0xa8] sm:$0xf0] }
 0x506   :  { %7875 = vmatpush.bf16.msrb.mxu2 %v17747_v33  ;;  %v6645_v1 = vsel %vm18388_vm0, %v6639_v0, %v6644_v45  ;;  %v6656_v3 = vsel %vm18316_vm6, %v6654_v31, %v6655_v5  ;;  %v6671_v12 = vrot.slane %v22941_v44, 7  ;;  %v14364_v46 = vrot.slane %v22908_v61, 11  ;;  %v17727_v44 = vld [vmem:[%s25442_s5 + $0x488] sm:$0xff]  ;;  %7895 = vmatpush.bf16.msrb.mxu3 %v17754_v17  ;;  %v17734_v5 = vld [vmem:[%s25442_s5 + $0x4c0] sm:$0xff]  ;;  %v17765_v43 = vld [vmem:[%s25442_s5 + $0x5b8] sm:$0xff] }
 0x507   :  { %v6664_v4 = vrot.slane %v6663_v28, 4  ;;  %v6667_v42 = vor.u32 %v6666_v19, %v6665_v26  ;;  %v6680_v59 = vrot.slane %v22910_v27, 7  ;;  %v6683_v14 = vrot.slane %v22918_v35, 7  ;;  %6649 = vst [vmem:[#allocation3 + $0xc0] sm:$0xff] %v6645_v1  ;;  %v17735_v61 = vld [vmem:[%s25442_s5 + $0x4c8] sm:$0xff]  ;;  %v17764_v31 = vld [vmem:[%s25442_s5 + $0x5b0] sm:$0xff] }
 0x508   :  { %v6672_v29 = vor.u32 %v6671_v12, %v6670_v13  ;;  %6660 = vst [vmem:[#allocation3 + $0xc8] sm:$0xff] %v6656_v3  ;;  %v23024_v30 = vor.u32 %v17827_v51, %v14648_v22  ;;  %v23026_v10 = vor.u32 %v17820_v2, %v14650_v50  ;;  %7840 = vmatpush.bf16.msrb.mxu0 %v17728_v38  ;;  %v17743_v22 = vld [vmem:[%s25442_s5 + $0x508] sm:$0xff]  ;;  %v17772_v2 = vld [vmem:[%s25442_s5 + $0x5f0] sm:$0xff]  ;;  %v17815_v17 = vld [vmem:[#allocation3 + $0x44] sm:$0xf0] }
 0x509   :  { %7859 = vmatpush.bf16.msrb.mxu1 %v17736_v37  ;;  %v6669_v27 = vrot.slane %v6667_v42, 4  ;;  %v6681_v35 = vsel %vm18361_vm13, %v14364_v46, %v6680_v59  ;;  %v6682_v9 = vrot.slane %v6680_v59, 4  ;;  %v6605_v33 = vsel %vm18354_vm12, %v6600_v32, %v6604_v56  ;;  %v17726_v32 = vld [vmem:[%s25442_s5 + $0x480] sm:$0xff]  ;;  %v17752_v37 = vld [vmem:[%s25442_s5 + $0x550] sm:$0xff]  ;;  %v17751_v0 = vld [vmem:[%s25442_s5 + $0x548] sm:$0xff] }
 0x50a   :  { %7876 = vmatpush.bf16.msrb.mxu2 %v17746_v8  ;;  %6687 = vst [vmem:[#allocation3 + $0xa0] sm:$0xff] %v6681_v35  ;;  %7772 = vmatmul.bf16.gmra.mxu0 %v23024_v30  ;;  %v6638_v56 = vsel %vm18388_vm0, %v6634_v54, %v6637_v58  ;;  %v6668_v38 = vsel %vm18426_vm4, %v6664_v4, %v6667_v42  ;;  %v17744_v58 = vld [vmem:[%s25442_s5 + $0x510] sm:$0xff]  ;;  %v17773_v54 = vld [vmem:[%s25442_s5 + $0x5f8] sm:$0xff]  ;;  %v14608_v26 = vld [vmem:[#allocation3 + $0x10] sm:$0xf] }
 0x50b   :  { %7791 = vmatmul.bf16.gmra.mxu1 %v23026_v10  ;;  %v6673_v63 = vsel %vm18426_vm4, %v6669_v27, %v6672_v29  ;;  %v6684_v60 = vsel %vm18361_vm13, %v6682_v9, %v6683_v14  ;;  %6618 = vst [vmem:[#allocation3 + $0x78] sm:$0xff] %v6605_v33  ;;  %7896 = vmatpush.bf16.msrb.mxu3 %v17753_v15  ;;  %v17828_v52 = vld [vmem:[#allocation3 + $0xac] sm:$0xf0]  ;;  %v14658_v39 = vld [vmem:[#allocation3 + $0xb0] sm:$0xf0]  ;;  %v17763_v12 = vld [vmem:[%s25442_s5 + $0x5a8] sm:$0xff] }
 0x50c   :  { %6677 = vst [vmem:[#allocation3 + $0xd0] sm:$0xff] %v6673_v63  ;;  %7841 = vmatpush.bf16.msrb.mxu0 %v17727_v44  ;;  %v14610_v28 = vld [vmem:[#allocation3 + $0x48] sm:$0xf0]  ;;  %v17808_v19 = vld [vmem:[#allocation3 + $0x14] sm:$0xf]  ;;  %v23098_v1 = vor.u32 %v17815_v17, %v14608_v26  ;;  %v17771_v46 = vld [vmem:[%s25442_s5 + $0x5e8] sm:$0xff] }
 0x50d   :  { %7860 = vmatpush.bf16.msrb.mxu1 %v17735_v61  ;;  %6688 = vst [vmem:[#allocation3 + $0xd8] sm:$0xff] %v6684_v60  ;;  %v17742_v13 = vld [vmem:[%s25442_s5 + $0x500] sm:$0xff]  ;;  %v23100_v3 = vor.u32 %v17808_v19, %v14610_v28  ;;  %v17781_v4 = vld [vmem:[%s25442_s5 + $0x638] sm:$0xff]  ;;  %v17780_v29 = vld [vmem:[%s25442_s5 + $0x630] sm:$0xff] }
 0x50e   :  { %7877 = vmatpush.bf16.msrb.mxu2 %v17745_v7  ;;  %6648 = vst [vmem:[#allocation3 + $0x88] sm:$0xff] %v6638_v56  ;;  %v17750_v50 = vld [vmem:[%s25442_s5 + $0x540] sm:$0xff]  ;;  %v17789_v42 = vld [vmem:[%s25442_s5 + $0x678] sm:$0xff]  ;;  %v17788_v44 = vld [vmem:[%s25442_s5 + $0x670] sm:$0xff] }
 0x50f   :  { %6676 = vst [vmem:[#allocation3 + $0x98] sm:$0xff] %v6668_v38  ;;  %7897 = vmatpush.bf16.msrb.mxu3 %v17752_v37  ;;  %v17762_v59 = vld [vmem:[%s25442_s5 + $0x5a0] sm:$0xff]  ;;  %v14616_v61 = vld [vmem:[#allocation3 + $0x18] sm:$0xf]  ;;  %v17809_v35 = vld [vmem:[#allocation3 + $0x1c] sm:$0xf] }
 0x510   :  { %7842 = vmatpush.bf16.msrb.mxu0 %v17726_v32  ;;  %v17770_v14 = vld [vmem:[%s25442_s5 + $0x5e0] sm:$0xff]  ;;  %v17761_v33 = vld [vmem:[%s25442_s5 + $0x598] sm:$0xff]  ;;  %v17779_v15 = vld [vmem:[%s25442_s5 + $0x628] sm:$0xff] }
 0x511   :  { %7861 = vmatpush.bf16.msrb.mxu1 %v17734_v5  ;;  %v17816_v27 = vld [vmem:[#allocation3 + $0x4c] sm:$0xf0]  ;;  %v14618_v9 = vld [vmem:[#allocation3 + $0x50] sm:$0xf0]  ;;  %v17769_v7 = vld [vmem:[%s25442_s5 + $0x5d8] sm:$0xff] }
 0x512   :  { %7878 = vmatpush.bf16.msrb.mxu2 %v17744_v58  ;;  %v14656_v51 = vld [vmem:[#allocation3 + $0x78] sm:$0xf]  ;;  %v17821_v8 = vld [vmem:[#allocation3 + $0x7c] sm:$0xf]  ;;  %v23140_v60 = vor.u32 %v17816_v27, %v14616_v61  ;;  %v23142_v56 = vor.u32 %v17809_v35, %v14618_v9  ;;  %v17760_v32 = vld [vmem:[%s25442_s5 + $0x590] sm:$0xff] }
 0x513   :  { %v23080_v45 = vor.u32 %v17828_v52, %v14656_v51  ;;  %v23082_v16 = vor.u32 %v17821_v8, %v14658_v39  ;;  %7898 = vmatpush.bf16.msrb.mxu3 %v17751_v0  ;;  %v17787_v63 = vld [vmem:[%s25442_s5 + $0x668] sm:$0xff]  ;;  %v17768_v5 = vld [vmem:[%s25442_s5 + $0x5d0] sm:$0xff]  ;;  %v17786_v52 = vld [vmem:[%s25442_s5 + $0x660] sm:$0xff] }
 0x514   :  { %7911 = vmatpush.bf16.msra.mxu0 %v17765_v43  ;;  %v17829_v38 = vld [vmem:[#allocation3 + $0xb4] sm:$0xf0]  ;;  %v14666_v58 = vld [vmem:[#allocation3 + $0xb8] sm:$0xf0]  ;;  %v14664_v37 = vld [vmem:[#allocation3 + $0x80] sm:$0xf] }
 0x515   :  { %7930 = vmatpush.bf16.msra.mxu1 %v17773_v54  ;;  %7810 = vmatmul.bf16.gmra.mxu2 %v23080_v45  ;;  %v17822_v43 = vld [vmem:[#allocation3 + $0x84] sm:$0xf]  ;;  %v17778_v54 = vld [vmem:[%s25442_s5 + $0x620] sm:$0xff]  ;;  %v23158_v39 = vor.u32 %v17829_v38, %v14664_v37  ;;  %v17759_v51 = vld [vmem:[%s25442_s5 + $0x588] sm:$0xff] }
 0x516   :  { %7829 = vmatmul.bf16.gmra.mxu3 %v23082_v16  ;;  %7879 = vmatpush.bf16.msrb.mxu2 %v17743_v22  ;;  %v23160_v22 = vor.u32 %v17822_v43, %v14666_v58  ;;  %v17767_v8 = vld [vmem:[%s25442_s5 + $0x5c8] sm:$0xff]  ;;  %v17777_v0 = vld [vmem:[%s25442_s5 + $0x618] sm:$0xff]  ;;  %v17766_v17 = vld [vmem:[%s25442_s5 + $0x5c0] sm:$0xff] }
 0x517   :  { %7899 = vmatpush.bf16.msrb.mxu3 %v17750_v50  ;;  %v17797_v28 = vld [vmem:[%s25442_s5 + $0x6b8] sm:$0xff]  ;;  %v17830_v19 = vld [vmem:[#allocation3 + $0xbc] sm:$0xf0]  ;;  %v17783_v61 = vld [vmem:[%s25442_s5 + $0x648] sm:$0xff] }
 0x518   :  { %7912 = vmatpush.bf16.msra.mxu0 %v17764_v31  ;;  %v17785_v31 = vld [vmem:[%s25442_s5 + $0x658] sm:$0xff]  ;;  %v17784_v50 = vld [vmem:[%s25442_s5 + $0x650] sm:$0xff]  ;;  %v17817_v35 = vld [vmem:[#allocation3 + $0x54] sm:$0xf0] }
 0x519   :  { %7931 = vmatpush.bf16.msra.mxu1 %v17772_v2  ;;  %v17758_v2 = vld [vmem:[%s25442_s5 + $0x580] sm:$0xff]  ;;  %v17805_v26 = vld [vmem:[%s25442_s5 + $0x6f8] sm:$0xff]  ;;  %v14624_v27 = vld [vmem:[#allocation3 + $0x20] sm:$0xf] }
 0x51a   :  { %7843 = vmatmul.bf16.vlgmr.msrb.gmra.mxu0 %v23098_v1  ;;  %7880 = vmatpush.bf16.msrb.mxu2 %v17742_v13  ;;  %v17776_v13 = vld [vmem:[%s25442_s5 + $0x610] sm:$0xff]  ;;  %v14626_v9 = vld [vmem:[#allocation3 + $0x58] sm:$0xf0]  ;;  %v17782_v38 = vld [vmem:[%s25442_s5 + $0x640] sm:$0xff]  ;;  %v23230_v58 = vor.u32 %v17817_v35, %v14624_v27 }
 0x51b   :  { %7862 = vmatmul.bf16.vlgmr.msrb.gmra.mxu1 %v23100_v3  ;;  %7968 = vmatpush.bf16.msra.mxu3 %v17789_v42  ;;  %v17796_v42 = vld [vmem:[%s25442_s5 + $0x6b0] sm:$0xff]  ;;  %v17795_v43 = vld [vmem:[%s25442_s5 + $0x6a8] sm:$0xff]  ;;  %v17801_v27 = vld [vmem:[%s25442_s5 + $0x6d8] sm:$0xff] }
 0x51c   :  { %7913 = vmatpush.bf16.msra.mxu0 %v17763_v12  ;;  %v14672_v12 = vld [vmem:[#allocation3 + $0x88] sm:$0xf] }
 0x51d   :  { %7932 = vmatpush.bf16.msra.mxu1 %v17771_v46  ;;  %v17823_v46 = vld [vmem:[#allocation3 + $0x8c] sm:$0xf] }
 0x51e   :  { %7949 = vmatpush.bf16.msra.mxu2 %v17781_v4  ;;  %v14674_v4 = vld [vmem:[#allocation3 + $0xc0] sm:$0xf0] }
 0x51f   :  { %7969 = vmatpush.bf16.msra.mxu3 %v17788_v44  ;;  %v17775_v44 = vld [vmem:[%s25442_s5 + $0x608] sm:$0xff] }
 0x520   :  { %7914 = vmatpush.bf16.msra.mxu0 %v17762_v59  ;;  %v17804_v59 = vld [vmem:[%s25442_s5 + $0x6f0] sm:$0xff] }
 0x521   :  { %7933 = vmatpush.bf16.msra.mxu1 %v17770_v14  ;;  %v23200_v14 = vor.u32 %v17830_v19, %v14672_v12  ;;  %v17811_v12 = vld [vmem:[#allocation3 + $0x2c] sm:$0xf] }
 0x522   :  { %7950 = vmatpush.bf16.msra.mxu2 %v17780_v29  ;;  %v23202_v29 = vor.u32 %v17823_v46, %v14674_v4  ;;  %v15417_v46 = vld [vmem:[%s25440_s3 + $0xe50] sm:$0xf]  ;;  %v17845_v4 = vld [vmem:[%s25440_s3 + $0xe54] sm:$0xf0] }
 0x523   :  { %7970 = vmatpush.bf16.msra.mxu3 %v17787_v63  ;;  %v17865_v63 = vld [vmem:[%s25440_s3 + $0xef4] sm:$0xf0]  ;;  %v15418_v35 = vor.u32 %v17845_v4, %v15417_v46  ;;  %v15561_v46 = vld [vmem:[%s25440_s3 + $0xf70] sm:$0xf] }
 0x524   :  { %7915 = vmatpush.bf16.msra.mxu0 %v17761_v33  ;;  %v15433_v33 = vld [vmem:[%s25440_s3 + $0xe70] sm:$0xf]  ;;  %v17881_v4 = vld [vmem:[%s25440_s3 + $0xf74] sm:$0xf0] }
 0x525   :  { %7934 = vmatpush.bf16.msra.mxu1 %v17769_v7  ;;  %7881 = vmatmul.bf16.vlgmr.msrb.gmra.mxu2 %v23140_v60  ;;  %v17849_v7 = vld [vmem:[%s25440_s3 + $0xe74] sm:$0xf0] }
 0x526   :  { %7900 = vmatmul.bf16.vlgmr.msrb.gmra.mxu3 %v23142_v56  ;;  %7951 = vmatpush.bf16.msra.mxu2 %v17779_v15  ;;  %v15497_v15 = vld [vmem:[%s25440_s3 + $0xef0] sm:$0xf] }
 0x527   :  { %7971 = vmatpush.bf16.msra.mxu3 %v17786_v52  ;;  %v15434_v52 = vor.u32 %v17849_v7, %v15433_v33 }
 0x528   :  { %7916 = vmatpush.bf16.msra.mxu0 %v17760_v32  ;;  %v17810_v32 = vld [vmem:[#allocation3 + $0x24] sm:$0xf] }
 0x529   :  { %7935 = vmatpush.bf16.msra.mxu1 %v17768_v5  ;;  %v17774_v5 = vld [vmem:[%s25442_s5 + $0x600] sm:$0xff]  ;;  %v23232_v37 = vor.u32 %v17810_v32, %v14626_v9 }
 0x52a   :  { %7848 = vmatmul.bf16.gmra.mxu0 %v23158_v39  ;;  %7952 = vmatpush.bf16.msra.mxu2 %v17778_v54  ;;  %v17803_v54 = vld [vmem:[%s25442_s5 + $0x6e8] sm:$0xff]  ;;  %v15409_v32 = vld [vmem:[%s25440_s3 + $0xe40] sm:$0xf] }
 0x52b   :  { %7867 = vmatmul.bf16.gmra.mxu1 %v23160_v22  ;;  %7972 = vmatpush.bf16.msra.mxu3 %v17785_v31  ;;  %v15489_v31 = vld [vmem:[%s25440_s3 + $0xee0] sm:$0xf] }
 0x52c   :  { %7917 = vmatpush.bf16.msra.mxu0 %v17759_v51  ;;  %v15498_v51 = vor.u32 %v17865_v63, %v15497_v15  ;;  %v17792_v15 = vld [vmem:[%s25442_s5 + $0x690] sm:$0xff] }
 0x52d   :  { %7936 = vmatpush.bf16.msra.mxu1 %v17767_v8  ;;  %v15425_v8 = vld [vmem:[%s25440_s3 + $0xe60] sm:$0xf]  ;;  %v17800_v63 = vld [vmem:[%s25442_s5 + $0x6d0] sm:$0xff] }
 0x52e   :  { %7953 = vmatpush.bf16.msra.mxu2 %v17777_v0  ;;  %v17847_v0 = vld [vmem:[%s25440_s3 + $0xe64] sm:$0xf0] }
 0x52f   :  { %7973 = vmatpush.bf16.msra.mxu3 %v17784_v50  ;;  %v17818_v50 = vld [vmem:[#allocation3 + $0x5c] sm:$0xf0] }
 0x530   :  { %7918 = vmatpush.bf16.msra.mxu0 %v17758_v2  ;;  %v17863_v2 = vld [vmem:[%s25440_s3 + $0xee4] sm:$0xf0] }
 0x531   :  { %7937 = vmatpush.bf16.msra.mxu1 %v17766_v17  ;;  %v17794_v17 = vld [vmem:[%s25442_s5 + $0x6a0] sm:$0xff]  ;;  %v15490_v19 = vor.u32 %v17863_v2, %v15489_v31  ;;  %v17791_v2 = vld [vmem:[%s25442_s5 + $0x688] sm:$0xff] }
 0x532   :  { %7954 = vmatpush.bf16.msra.mxu2 %v17776_v13  ;;  %v14632_v13 = vld [vmem:[#allocation3 + $0x28] sm:$0xf] }
 0x533   :  { %7974 = vmatpush.bf16.msra.mxu3 %v17783_v61  ;;  %v17793_v61 = vld [vmem:[%s25442_s5 + $0x698] sm:$0xff]  ;;  %v23278_v33 = vor.u32 %v17818_v50, %v14632_v13  ;;  %v15465_v50 = vld [vmem:[%s25440_s3 + $0xeb0] sm:$0xf] }
 0x534   :  { %7987 = vmatpush.bf16.msrb.mxu0 %v17797_v28  ;;  %v17802_v28 = vld [vmem:[%s25442_s5 + $0x6e0] sm:$0xff]  ;;  %v17841_v13 = vld [vmem:[%s25440_s3 + $0xe34] sm:$0xf0] }
 0x535   :  { %8006 = vmatpush.bf16.msrb.mxu1 %v17805_v26  ;;  %7886 = vmatmul.bf16.gmra.mxu2 %v23200_v14  ;;  %v15426_v26 = vor.u32 %v17847_v0, %v15425_v8  ;;  %v17824_v8 = vld [vmem:[#allocation3 + $0x94] sm:$0xf] }
 0x536   :  { %7905 = vmatmul.bf16.gmra.mxu3 %v23202_v29  ;;  %7955 = vmatpush.bf16.msra.mxu2 %v17775_v44  ;;  %v14634_v44 = vld [vmem:[#allocation3 + $0x60] sm:$0xf0] }
 0x537   :  { %7975 = vmatpush.bf16.msra.mxu3 %v17782_v38  ;;  %v23280_v7 = vor.u32 %v17811_v12, %v14634_v44  ;;  %v15473_v38 = vld [vmem:[%s25440_s3 + $0xec0] sm:$0xf]  ;;  %v17857_v12 = vld [vmem:[%s25440_s3 + $0xeb4] sm:$0xf0] }
 0x538   :  { %7988 = vmatpush.bf16.msrb.mxu0 %v17796_v42  ;;  %v15481_v42 = vld [vmem:[%s25440_s3 + $0xed0] sm:$0xf] }
 0x539   :  { %8007 = vmatpush.bf16.msrb.mxu1 %v17804_v59  ;;  %v17861_v59 = vld [vmem:[%s25440_s3 + $0xed4] sm:$0xf0] }
 0x53a   :  { %7919 = vmatmul.bf16.vlgmr.msra.gmra.mxu0 %v23230_v58  ;;  %7956 = vmatpush.bf16.msra.mxu2 %v17774_v5  ;;  %v15482_v9 = vor.u32 %v17861_v59, %v15481_v42  ;;  %v17843_v5 = vld [vmem:[%s25440_s3 + $0xe44] sm:$0xf0]  ;;  %v15625_v42 = vld [vmem:[%s25440_s3 + $0xff0] sm:$0xf]  ;;  %v17897_v59 = vld [vmem:[%s25440_s3 + $0xff4] sm:$0xf0] }
 0x53b   :  { %7938 = vmatmul.bf16.vlgmr.msra.gmra.mxu1 %v23232_v37  ;;  %9400 = vmatpush.bf16.msrb.mxu3 %v15498_v51  ;;  %v14680_v51 = vld [vmem:[#allocation3 + $0x90] sm:$0xf]  ;;  %v15410_v0 = vor.u32 %v17843_v5, %v15409_v32  ;;  %v17855_v32 = vld [vmem:[%s25440_s3 + $0xea4] sm:$0xf0] }
 0x53c   :  { %7989 = vmatpush.bf16.msrb.mxu0 %v17795_v43  ;;  %v17859_v43 = vld [vmem:[%s25440_s3 + $0xec4] sm:$0xf0] }
 0x53d   :  { %8008 = vmatpush.bf16.msrb.mxu1 %v17803_v54  ;;  %v17831_v54 = vld [vmem:[#allocation3 + $0xc4] sm:$0xf0]  ;;  %v15474_v31 = vor.u32 %v17859_v43, %v15473_v38  ;;  %v14688_v5 = vld [vmem:[#allocation3 + $0x98] sm:$0xf]  ;;  %v17832_v38 = vld [vmem:[#allocation3 + $0xcc] sm:$0xf0]  ;;  %v15562_v43 = vor.u32 %v17881_v4, %v15561_v46 }
 0x53e   :  { %9381 = vmatpush.bf16.msrb.mxu2 %v15434_v52  ;;  %v14682_v52 = vld [vmem:[#allocation3 + $0xc8] sm:$0xf0]  ;;  %v17853_v46 = vld [vmem:[%s25440_s3 + $0xe94] sm:$0xf0]  ;;  %v23380_v4 = vor.u32 %v17832_v38, %v14688_v5  ;;  %v17851_v5 = vld [vmem:[%s25440_s3 + $0xe84] sm:$0xf0] }
 0x53f   :  { %9401 = vmatpush.bf16.msrb.mxu3 %v15490_v19  ;;  %v23313_v19 = vor.u32 %v17824_v8, %v14682_v52  ;;  %v17825_v52 = vld [vmem:[#allocation3 + $0x9c] sm:$0xf]  ;;  %v15385_v8 = vld [vmem:[%s25440_s3 + $0xe10] sm:$0xf] }
 0x540   :  { %7990 = vmatpush.bf16.msrb.mxu0 %v17794_v17  ;;  %v17799_v17 = vld [vmem:[%s25442_s5 + $0x6c8] sm:$0xff]  ;;  %v15545_v38 = vld [vmem:[%s25440_s3 + $0xf50] sm:$0xf] }
 0x541   :  { %8009 = vmatpush.bf16.msrb.mxu1 %v17802_v28  ;;  %v15401_v28 = vld [vmem:[%s25440_s3 + $0xe30] sm:$0xf] }
 0x542   :  { %9382 = vmatpush.bf16.msrb.mxu2 %v15426_v26  ;;  %v23311_v26 = vor.u32 %v17831_v54, %v14680_v51  ;;  %v15402_v44 = vor.u32 %v17841_v13, %v15401_v28  ;;  %v15626_v54 = vor.u32 %v17897_v59, %v15625_v42  ;;  %v14690_v51 = vld [vmem:[#allocation3 + $0xd0] sm:$0xf0]  ;;  %v15617_v28 = vld [vmem:[%s25440_s3 + $0xfe0] sm:$0xf]  ;;  %v17895_v13 = vld [vmem:[%s25440_s3 + $0xfe4] sm:$0xf0] }
 0x543   :  { %9402 = vmatpush.bf16.msrb.mxu3 %v15482_v9  ;;  %v15393_v9 = vld [vmem:[%s25440_s3 + $0xe20] sm:$0xf]  ;;  %v15618_v59 = vor.u32 %v17895_v13, %v15617_v28 }
 0x544   :  { %7991 = vmatpush.bf16.msrb.mxu0 %v17793_v61  ;;  %v15466_v61 = vor.u32 %v17857_v12, %v15465_v50  ;;  %v17837_v50 = vld [vmem:[%s25440_s3 + $0xe14] sm:$0xf0]  ;;  %v15449_v12 = vld [vmem:[%s25440_s3 + $0xe90] sm:$0xf] }
 0x545   :  { %8010 = vmatpush.bf16.msrb.mxu1 %v17801_v27  ;;  %7957 = vmatmul.bf16.vlgmr.msra.gmra.mxu2 %v23278_v33  ;;  %v17790_v27 = vld [vmem:[%s25442_s5 + $0x680] sm:$0xff] }
 0x546   :  { %7976 = vmatmul.bf16.vlgmr.msra.gmra.mxu3 %v23280_v7  ;;  %9383 = vmatpush.bf16.msrb.mxu2 %v15418_v35  ;;  %v17798_v35 = vld [vmem:[%s25442_s5 + $0x6c0] sm:$0xff] }
 0x547   :  { %9403 = vmatpush.bf16.msrb.mxu3 %v15474_v31 }
 0x548   :  { %7992 = vmatpush.bf16.msrb.mxu0 %v17792_v15  ;;  %v17839_v15 = vld [vmem:[%s25440_s3 + $0xe24] sm:$0xf0] }
 0x549   :  { %8011 = vmatpush.bf16.msrb.mxu1 %v17800_v63  ;;  %v15457_v63 = vld [vmem:[%s25440_s3 + $0xea0] sm:$0xf]  ;;  %v15394_v31 = vor.u32 %v17839_v15, %v15393_v9  ;;  %v15450_v9 = vor.u32 %v17853_v46, %v15449_v12 }
 0x54a   :  { %7924 = vmatmul.bf16.gmra.mxu0 %v23311_v26  ;;  %9384 = vmatpush.bf16.msrb.mxu2 %v15410_v0  ;;  %v15553_v0 = vld [vmem:[%s25440_s3 + $0xf60] sm:$0xf] }
 0x54b   :  { %7943 = vmatmul.bf16.gmra.mxu1 %v23313_v19  ;;  %9404 = vmatpush.bf16.msrb.mxu3 %v15466_v61  ;;  %v17819_v61 = vld [vmem:[#allocation3 + $0x64] sm:$0xf0]  ;;  %v15377_v15 = vld [vmem:[%s25440_s3 + $0xe00] sm:$0xf] }
 0x54c   :  { %7993 = vmatpush.bf16.msrb.mxu0 %v17791_v2  ;;  %v15458_v2 = vor.u32 %v17855_v32, %v15457_v63  ;;  %v17835_v63 = vld [vmem:[%s25440_s3 + $0xe04] sm:$0xf0]  ;;  %v15441_v32 = vld [vmem:[%s25440_s3 + $0xe80] sm:$0xf] }
 0x54d   :  { %8012 = vmatpush.bf16.msrb.mxu1 %v17799_v17  ;;  %v17879_v17 = vld [vmem:[%s25440_s3 + $0xf64] sm:$0xf0]  ;;  %v15378_v28 = vor.u32 %v17835_v63, %v15377_v15  ;;  %v15442_v13 = vor.u32 %v17851_v5, %v15441_v32  ;;  %v15745_v15 = vld [vmem:[%s25440_s3 + $0x10e0] sm:$0xf] }
 0x54e   :  { %9385 = vmatpush.bf16.msrb.mxu2 %v15402_v44  ;;  %v15554_v42 = vor.u32 %v17879_v17, %v15553_v0  ;;  %v23382_v44 = vor.u32 %v17825_v52, %v14690_v51  ;;  %v17893_v52 = vld [vmem:[%s25440_s3 + $0xfd4] sm:$0xf0]  ;;  %v15689_v51 = vld [vmem:[%s25440_s3 + $0x1070] sm:$0xf]  ;;  %v17812_v17 = vld [vmem:[#allocation3 + $0x34] sm:$0xf] }
 0x54f   :  { %9405 = vmatpush.bf16.msrb.mxu3 %v15458_v2  ;;  %v15753_v0 = vld [vmem:[%s25440_s3 + $0x10f0] sm:$0xf]  ;;  %v14640_v2 = vld [vmem:[#allocation3 + $0x30] sm:$0xf]  ;;  %v17927_v63 = vld [vmem:[%s25440_s3 + $0x10e4] sm:$0xf0] }
 0x550   :  { %7994 = vmatpush.bf16.msrb.mxu0 %v17790_v27  ;;  %v14642_v27 = vld [vmem:[#allocation3 + $0x68] sm:$0xf0] }
 0x551   :  { %8013 = vmatpush.bf16.msrb.mxu1 %v17798_v35  ;;  %v15386_v35 = vor.u32 %v17837_v50, %v15385_v8  ;;  %v17913_v8 = vld [vmem:[%s25440_s3 + $0x1074] sm:$0xf0]  ;;  %v23422_v50 = vor.u32 %v17819_v61, %v14640_v2  ;;  %v23424_v12 = vor.u32 %v17812_v17, %v14642_v27  ;;  %v17891_v61 = vld [vmem:[%s25440_s3 + $0xfc4] sm:$0xf0]  ;;  %v15681_v27 = vld [vmem:[%s25440_s3 + $0x1060] sm:$0xf] }
 0x552   :  { %9386 = vmatpush.bf16.msrb.mxu2 %v15394_v31  ;;  %v17929_v31 = vld [vmem:[%s25440_s3 + $0x10f4] sm:$0xf0]  ;;  %v15690_v57 = vor.u32 %v17913_v8, %v15689_v51  ;;  %v15593_v51 = vld [vmem:[%s25440_s3 + $0xfb0] sm:$0xf]  ;;  %v15521_v17 = vld [vmem:[%s25440_s3 + $0xf20] sm:$0xf] }
 0x553   :  { %9406 = vmatpush.bf16.msrb.mxu3 %v15450_v9  ;;  %v15754_v20 = vor.u32 %v17929_v31, %v15753_v0  ;;  %v17911_v9 = vld [vmem:[%s25440_s3 + $0x1064] sm:$0xf0]  ;;  %v15673_v8 = vld [vmem:[%s25440_s3 + $0x1050] sm:$0xf]  ;;  %v17925_v0 = vld [vmem:[%s25440_s3 + $0x10d4] sm:$0xf0] }
 0x554   :  { %9419 = vmatpush.bf16.msra.mxu0 %v15562_v43  ;;  %v17877_v43 = vld [vmem:[%s25440_s3 + $0xf54] sm:$0xf0] }
 0x555   :  { %9438 = vmatpush.bf16.msra.mxu1 %v15626_v54  ;;  %7962 = vmatmul.bf16.gmra.mxu2 %v23380_v4  ;;  %v15609_v54 = vld [vmem:[%s25440_s3 + $0xfd0] sm:$0xf]  ;;  %v15546_v46 = vor.u32 %v17877_v43, %v15545_v38  ;;  %v15682_v43 = vor.u32 %v17911_v9, %v15681_v27  ;;  %v15665_v27 = vld [vmem:[%s25440_s3 + $0x1040] sm:$0xf]  ;;  %v17907_v9 = vld [vmem:[%s25440_s3 + $0x1044] sm:$0xf0] }
 0x556   :  { %7981 = vmatmul.bf16.gmra.mxu3 %v23382_v44  ;;  %9387 = vmatpush.bf16.msrb.mxu2 %v15386_v35  ;;  %v15601_v35 = vld [vmem:[%s25440_s3 + $0xfc0] sm:$0xf]  ;;  %v15529_v38 = vld [vmem:[%s25440_s3 + $0xf30] sm:$0xf] }
 0x557   :  { %9407 = vmatpush.bf16.msrb.mxu3 %v15442_v13  ;;  %v15602_v5 = vor.u32 %v17891_v61, %v15601_v35  ;;  %v15585_v13 = vld [vmem:[%s25440_s3 + $0xfa0] sm:$0xf]  ;;  %v14698_v61 = vld [vmem:[#allocation3 + $0xd8] sm:$0xf0] }
 0x558   :  { %9420 = vmatpush.bf16.msra.mxu0 %v15554_v42  ;;  %v15610_v42 = vor.u32 %v17893_v52, %v15609_v54  ;;  %v15746_v54 = vor.u32 %v17927_v63, %v15745_v15  ;;  %v17873_v52 = vld [vmem:[%s25440_s3 + $0xf34] sm:$0xf0] }
 0x559   :  { %9439 = vmatpush.bf16.msra.mxu1 %v15618_v59  ;;  %v15537_v59 = vld [vmem:[%s25440_s3 + $0xf40] sm:$0xf]  ;;  %v15530_v31 = vor.u32 %v17873_v52, %v15529_v38  ;;  %v15513_v38 = vld [vmem:[%s25440_s3 + $0xf10] sm:$0xf]  ;;  %v17885_v52 = vld [vmem:[%s25440_s3 + $0xf94] sm:$0xf0] }
 0x55a   :  { %7995 = vmatmul.bf16.vlgmr.msrb.gmra.mxu0 %v23422_v50  ;;  %9388 = vmatpush.bf16.msrb.mxu2 %v15378_v28  ;;  %v15538_v32 = vor.u32 %v17875_v48, %v15537_v59  ;;  %v17889_v48 = vld [vmem:[%s25440_s3 + $0xfb4] sm:$0xf0]  ;;  %v17871_v28 = vld [vmem:[%s25440_s3 + $0xf24] sm:$0xf0] }
 0x55b   :  { %8014 = vmatmul.bf16.vlgmr.msrb.gmra.mxu1 %v23424_v12  ;;  %9476 = vmatpush.bf16.msra.mxu3 %v15754_v20  ;;  %v17909_v20 = vld [vmem:[%s25440_s3 + $0x1054] sm:$0xf0]  ;;  %v15594_v2 = vor.u32 %v17889_v48, %v15593_v51  ;;  %v15522_v15 = vor.u32 %v17871_v28, %v15521_v17  ;;  %v14696_v51 = vld [vmem:[#allocation3 + $0xa0] sm:$0xf]  ;;  %v17826_v48 = vld [vmem:[#allocation3 + $0xa4] sm:$0xf] }
 0x55c   :  { %9421 = vmatpush.bf16.msra.mxu0 %v15546_v46  ;;  %v17887_v46 = vld [vmem:[%s25440_s3 + $0xfa4] sm:$0xf0]  ;;  %v15674_v59 = vor.u32 %v17909_v20, %v15673_v8  ;;  %v15666_v20 = vor.u32 %v17907_v9, %v15665_v27  ;;  %v23525_v17 = vor.u32 %v17826_v48, %v14698_v61  ;;  %v15817_v27 = vld [vmem:[%s25440_s3 + $0x1170] sm:$0xf]  ;;  %v17945_v9 = vld [vmem:[%s25440_s3 + $0x1174] sm:$0xf0] }
 0x55d   :  { %9440 = vmatpush.bf16.msra.mxu1 %v15610_v42  ;;  %v17833_v42 = vld [vmem:[#allocation3 + $0xd4] sm:$0xf0]  ;;  %v15586_v63 = vor.u32 %v17887_v46, %v15585_v13  ;;  %v17921_v46 = vld [vmem:[%s25440_s3 + $0x10b4] sm:$0xf0] }
 0x55e   :  { %9457 = vmatpush.bf16.msra.mxu2 %v15690_v57  ;;  %v15737_v57 = vld [vmem:[%s25440_s3 + $0x10d0] sm:$0xf]  ;;  %v23514_v8 = vor.u32 %v17833_v42, %v14696_v51  ;;  %v15505_v42 = vld [vmem:[%s25440_s3 + $0xf00] sm:$0xf]  ;;  %v17883_v61 = vld [vmem:[%s25440_s3 + $0xf84] sm:$0xf0] }
 0x55f   :  { %9477 = vmatpush.bf16.msra.mxu3 %v15746_v54  ;;  %v15738_v35 = vor.u32 %v17925_v0, %v15737_v57  ;;  %v15577_v54 = vld [vmem:[%s25440_s3 + $0xf90] sm:$0xf]  ;;  %v15713_v51 = vld [vmem:[%s25440_s3 + $0x10a0] sm:$0xf]  ;;  %v17919_v48 = vld [vmem:[%s25440_s3 + $0x10a4] sm:$0xf0] }
 0x560   :  { %9422 = vmatpush.bf16.msra.mxu0 %v15538_v32  ;;  %v15729_v32 = vld [vmem:[%s25440_s3 + $0x10c0] sm:$0xf]  ;;  %v15657_v0 = vld [vmem:[%s25440_s3 + $0x1030] sm:$0xf]  ;;  %v15578_v13 = vor.u32 %v17885_v52, %v15577_v54  ;;  %v17903_v52 = vld [vmem:[%s25440_s3 + $0x1024] sm:$0xf0] }
 0x561   :  { %9441 = vmatpush.bf16.msra.mxu1 %v15602_v5  ;;  %v17923_v5 = vld [vmem:[%s25440_s3 + $0x10c4] sm:$0xf0] }
 0x562   :  { %9458 = vmatpush.bf16.msra.mxu2 %v15682_v43  ;;  %v17869_v43 = vld [vmem:[%s25440_s3 + $0xf14] sm:$0xf0]  ;;  %v15730_v57 = vor.u32 %v17923_v5, %v15729_v32 }
 0x563   :  { %9478 = vmatpush.bf16.msra.mxu3 %v15738_v35  ;;  %v15514_v28 = vor.u32 %v17869_v43, %v15513_v38  ;;  %v15569_v35 = vld [vmem:[%s25440_s3 + $0xf80] sm:$0xf] }
 0x564   :  { %9423 = vmatpush.bf16.msra.mxu0 %v15530_v31  ;;  %v17905_v31 = vld [vmem:[%s25440_s3 + $0x1034] sm:$0xf0]  ;;  %v15649_v38 = vld [vmem:[%s25440_s3 + $0x1020] sm:$0xf]  ;;  %v15570_v54 = vor.u32 %v17883_v61, %v15569_v35  ;;  %v15705_v61 = vld [vmem:[%s25440_s3 + $0x1090] sm:$0xf] }
 0x565   :  { %9442 = vmatpush.bf16.msra.mxu1 %v15594_v2  ;;  %9389 = vmatmul.bf16.vlgmr.msrb.gmra.mxu2 %v22864_v25  ;;  %v15721_v2 = vld [vmem:[%s25440_s3 + $0x10b0] sm:$0xf]  ;;  %v15658_v32 = vor.u32 %v17905_v31, %v15657_v0  ;;  %v23571_v0 = vld [vmem:[%s25443_s6 + $0x1] ss:$0 sm:$0xff]  ;;  %v17901_v35 = vld [vmem:[%s25440_s3 + $0x1014] sm:$0xf0] }
 0x566   :  { %9408 = vmatmul.bf16.vlgmr.msrb.gmra.mxu3 %v22866_v47  ;;  %9459 = vmatpush.bf16.msra.mxu2 %v15674_v59  ;;  %v17867_v59 = vld [vmem:[%s25440_s3 + $0xf04] sm:$0xf0]  ;;  %v15722_v5 = vor.u32 %v17921_v46, %v15721_v2  ;;  %v15641_v31 = vld [vmem:[%s25440_s3 + $0x1010] sm:$0xf]  ;;  %v15809_v2 = vld [vmem:[%s25440_s3 + $0x1160] sm:$0xf] }
 0x567   :  { %9479 = vmatpush.bf16.msra.mxu3 %v15730_v57  ;;  %v15506_v43 = vor.u32 %v17867_v59, %v15505_v42  ;;  %v17943_v46 = vld [vmem:[%s25440_s3 + $0x1164] sm:$0xf0]  ;;  %v15873_v42 = vld [vmem:[%s25440_s3 + $0x11e0] sm:$0xf] }
 0x568   :  { %9424 = vmatpush.bf16.msra.mxu0 %v15522_v15  ;;  %v15881_v15 = vld [vmem:[%s25440_s3 + $0x11f0] sm:$0xf]  ;;  %v17959_v59 = vld [vmem:[%s25440_s3 + $0x11e4] sm:$0xf0] }
 0x569   :  { %9443 = vmatpush.bf16.msra.mxu1 %v15586_v63  ;;  %v17961_v63 = vld [vmem:[%s25440_s3 + $0x11f4] sm:$0xf0] }
 0x56a   :  { %8000 = vmatmul.bf16.gmra.mxu0 %v23514_v8  ;;  %9460 = vmatpush.bf16.msra.mxu2 %v15666_v20  ;;  %v15818_v20 = vor.u32 %v17945_v9, %v15817_v27  ;;  %v15882_v57 = vor.u32 %v17961_v63, %v15881_v15  ;;  %v17917_v27 = vld [vmem:[%s25440_s3 + $0x1094] sm:$0xf0]  ;;  %v15810_v63 = vor.u32 %v17943_v46, %v15809_v2  ;;  %v15865_v2 = vld [vmem:[%s25440_s3 + $0x11d0] sm:$0xf] }
 0x56b   :  { %8019 = vmatmul.bf16.gmra.mxu1 %v23525_v17  ;;  %9480 = vmatpush.bf16.msra.mxu3 %v15722_v5  ;;  %v17977_v46 = vld [vmem:[%s25440_s3 + $0x1274] sm:$0xf0] }
 0x56c   :  { %9425 = vmatpush.bf16.msra.mxu0 %v15514_v28  ;;  %v15650_v28 = vor.u32 %v17903_v52, %v15649_v38  ;;  %v15642_v38 = vor.u32 %v17901_v35, %v15641_v31  ;;  %v17899_v52 = vld [vmem:[%s25440_s3 + $0x1004] sm:$0xf0] }
 0x56d   :  { %9444 = vmatpush.bf16.msra.mxu1 %v15578_v13  ;;  %v15714_v13 = vor.u32 %v17919_v48, %v15713_v51  ;;  %v15697_v51 = vld [vmem:[%s25440_s3 + $0x1080] sm:$0xf]  ;;  %v17915_v48 = vld [vmem:[%s25440_s3 + $0x1084] sm:$0xf0] }
 0x56e   :  { %9461 = vmatpush.bf16.msra.mxu2 %v15658_v32  ;;  %v15874_v32 = vor.u32 %v17959_v59, %v15873_v42  ;;  %v16009_v42 = vld [vmem:[%s25440_s3 + $0x12f0] sm:$0xf]  ;;  %v17993_v59 = vld [vmem:[%s25440_s3 + $0x12f4] sm:$0xf0] }
 0x56f   :  { %9481 = vmatpush.bf16.msra.mxu3 %v15714_v13  ;;  %v15945_v13 = vld [vmem:[%s25440_s3 + $0x1270] sm:$0xf] }
 0x570   :  { %9426 = vmatpush.bf16.msra.mxu0 %v15506_v43  ;;  %v7768_v9 = vpop.f32.mrf.mxu0  ;;  %v15706_v43 = vor.u32 %v17917_v27, %v15705_v61  ;;  %v15698_v61 = vor.u32 %v17915_v48, %v15697_v51  ;;  %v16001_v51 = vld [vmem:[%s25440_s3 + $0x12e0] sm:$0xf]  ;;  %v17991_v48 = vld [vmem:[%s25440_s3 + $0x12e4] sm:$0xf0] }
 0x571   :  { %9445 = vmatpush.bf16.msra.mxu1 %v15570_v54  ;;  %v7787_v15 = vpop.f32.mrf.mxu1  ;;  %v7769_v5 = vadd.f32 %v23571_v0, %v7768_v9  ;;  %v15633_v54 = vld [vmem:[%s25440_s3 + $0x1000] sm:$0xf] }
 0x572   :  { %9462 = vmatpush.bf16.msra.mxu2 %v15650_v28  ;;  %v17957_v28 = vld [vmem:[%s25440_s3 + $0x11d4] sm:$0xf0]  ;;  %v15634_v35 = vor.u32 %v17899_v52, %v15633_v54  ;;  %v17975_v52 = vld [vmem:[%s25440_s3 + $0x1264] sm:$0xf0] }
 0x573   :  { %v7788_v31 = vadd.f32 %v7787_v15, %v7769_v5  ;;  %9482 = vmatpush.bf16.msra.mxu3 %v15706_v43  ;;  %v15866_v9 = vor.u32 %v17957_v28, %v15865_v2  ;;  %v15793_v15 = vld [vmem:[%s25440_s3 + $0x1140] sm:$0xf]  ;;  %v16010_v5 = vor.u32 %v17993_v59, %v16009_v42  ;;  %v16002_v59 = vor.u32 %v17991_v48, %v16001_v51  ;;  %v17951_v48 = vld [vmem:[%s25440_s3 + $0x11a4] sm:$0xf0] }
 0x574   :  { %9495 = vmatpush.bf16.msrb.mxu0 %v15818_v20  ;;  %v15801_v20 = vld [vmem:[%s25440_s3 + $0x1150] sm:$0xf]  ;;  %v15937_v43 = vld [vmem:[%s25440_s3 + $0x1260] sm:$0xf] }
 0x575   :  { %9514 = vmatpush.bf16.msrb.mxu1 %v15882_v57  ;;  %v17941_v57 = vld [vmem:[%s25440_s3 + $0x1154] sm:$0xf0]  ;;  %9394 = vmatmul.bf16.gmra.mxu2 %v23024_v30  ;;  %v15938_v42 = vor.u32 %v17975_v52, %v15937_v43  ;;  %v17935_v52 = vld [vmem:[%s25440_s3 + $0x1124] sm:$0xf0]  ;;  %v15841_v51 = vld [vmem:[%s25440_s3 + $0x11a0] sm:$0xf] }
 0x576   :  { %9413 = vmatmul.bf16.gmra.mxu3 %v23026_v10  ;;  %9463 = vmatpush.bf16.msra.mxu2 %v15642_v38  ;;  %v15802_v27 = vor.u32 %v17941_v57, %v15801_v20  ;;  %v17955_v38 = vld [vmem:[%s25440_s3 + $0x11c4] sm:$0xf0] }
 0x577   :  { %9483 = vmatpush.bf16.msra.mxu3 %v15698_v61  ;;  %v15858_v28 = vor.u32 %v17955_v38, %v15857_v23  ;;  %v15849_v61 = vld [vmem:[%s25440_s3 + $0x11b0] sm:$0xf]  ;;  %v17953_v23 = vld [vmem:[%s25440_s3 + $0x11b4] sm:$0xf0]  ;;  %v15777_v38 = vld [vmem:[%s25440_s3 + $0x1120] sm:$0xf] }
 0x578   :  { %9496 = vmatpush.bf16.msrb.mxu0 %v15810_v63  ;;  %v17939_v63 = vld [vmem:[%s25440_s3 + $0x1144] sm:$0xf0]  ;;  %v7770_v54 = vpop.f32.mrf.mxu0 }
 0x579   :  { %9515 = vmatpush.bf16.msrb.mxu1 %v15874_v32  ;;  %v15946_v32 = vor.u32 %v17977_v46, %v15945_v13  ;;  %v7771_v20 = vadd.f32 %v23571_v0, %v7770_v54  ;;  %v7789_v57 = vpop.f32.mrf.mxu1  ;;  %v15794_v2 = vor.u32 %v17939_v63, %v15793_v15  ;;  %v15785_v13 = vld [vmem:[%s25440_s3 + $0x1130] sm:$0xf]  ;;  %v17989_v63 = vld [vmem:[%s25440_s3 + $0x12d4] sm:$0xf0] }
 0x57a   :  { %9427 = vmatmul.bf16.vlgmr.msra.gmra.mxu0 %v22920_v40  ;;  %9464 = vmatpush.bf16.msra.mxu2 %v15634_v35  ;;  %v17937_v35 = vld [vmem:[%s25440_s3 + $0x1134] sm:$0xf0]  ;;  %v15993_v15 = vld [vmem:[%s25440_s3 + $0x12d0] sm:$0xf] }
 0x57b   :  { %9446 = vmatmul.bf16.vlgmr.msra.gmra.mxu1 %v22922_v62  ;;  %v23666_v46 = vadd.f32 %v7789_v57, %v7771_v20  ;;  %9552 = vmatpush.bf16.msrb.mxu3 %v16010_v5  ;;  %v15850_v5 = vor.u32 %v17953_v23, %v15849_v61  ;;  %v17987_v61 = vld [vmem:[%s25440_s3 + $0x12c4] sm:$0xf0]  ;;  %v15769_v23 = vld [vmem:[%s25440_s3 + $0x1110] sm:$0xf] }
 0x57c   :  { %9497 = vmatpush.bf16.msrb.mxu0 %v15802_v27  ;;  %v15929_v27 = vld [vmem:[%s25440_s3 + $0x1250] sm:$0xf]  ;;  %v7825_v54 = vpop.f32.mrf.mxu3 }
 0x57d   :  { %9516 = vmatpush.bf16.msrb.mxu1 %v15866_v9  ;;  %v17973_v9 = vld [vmem:[%s25440_s3 + $0x1254] sm:$0xf0] }
 0x57e   :  { %9533 = vmatpush.bf16.msrb.mxu2 %v15946_v32  ;;  %v15786_v32 = vor.u32 %v17937_v35, %v15785_v13  ;;  %v15930_v57 = vor.u32 %v17973_v9, %v15929_v27  ;;  %v17971_v13 = vld [vmem:[%s25440_s3 + $0x1244] sm:$0xf0]  ;;  %v15842_v35 = vor.u32 %v17951_v48, %v15841_v51  ;;  %v17933_v27 = vld [vmem:[%s25440_s3 + $0x1114] sm:$0xf0]  ;;  %v15833_v9 = vld [vmem:[%s25440_s3 + $0x1190] sm:$0xf] }
 0x57f   :  { %9553 = vmatpush.bf16.msrb.mxu3 %v16002_v59  ;;  %v15778_v59 = vor.u32 %v17935_v52, %v15777_v38  ;;  %v15977_v52 = vld [vmem:[%s25440_s3 + $0x12b0] sm:$0xf]  ;;  %v15770_v48 = vor.u32 %v17933_v27, %v15769_v23  ;;  %v18009_v27 = vld [vmem:[%s25440_s3 + $0x1374] sm:$0xf0] }
 0x580   :  { %9498 = vmatpush.bf16.msrb.mxu0 %v15794_v2  ;;  %v7806_v43 = vpop.f32.mrf.mxu2  ;;  %v15994_v2 = vor.u32 %v17989_v63, %v15993_v15  ;;  %v17949_v15 = vld [vmem:[%s25440_s3 + $0x1194] sm:$0xf0] }
 0x581   :  { %9517 = vmatpush.bf16.msrb.mxu1 %v15858_v28  ;;  %v7807_v20 = vadd.f32 %v7806_v43, %v7788_v31  ;;  %v15921_v28 = vld [vmem:[%s25440_s3 + $0x1240] sm:$0xf]  ;;  %v15913_v43 = vld [vmem:[%s25440_s3 + $0x1230] sm:$0xf] }
 0x582   :  { %9534 = vmatpush.bf16.msrb.mxu2 %v15938_v42  ;;  %v15985_v31 = vld [vmem:[%s25440_s3 + $0x12c0] sm:$0xf] }
 0x583   :  { %v23707_v42 = vadd.f32 %v7825_v54, %v7807_v20  ;;  %9554 = vmatpush.bf16.msrb.mxu3 %v15994_v2  ;;  %v15986_v38 = vor.u32 %v17987_v61, %v15985_v31  ;;  %v17969_v54 = vld [vmem:[%s25440_s3 + $0x1234] sm:$0xf0]  ;;  %v15834_v20 = vor.u32 %v17949_v15, %v15833_v9  ;;  %v15761_v2 = vld [vmem:[%s25440_s3 + $0x1100] sm:$0xf]  ;;  %v16073_v31 = vld [vmem:[%s25440_s3 + $0x1370] sm:$0xf] }
 0x584   :  { %9499 = vmatpush.bf16.msrb.mxu0 %v15786_v32  ;;  %v16137_v9 = vld [vmem:[%s25440_s3 + $0x13f0] sm:$0xf]  ;;  %v18025_v15 = vld [vmem:[%s25440_s3 + $0x13f4] sm:$0xf0] }
 0x585   :  { %9518 = vmatpush.bf16.msrb.mxu1 %v15850_v5  ;;  %9465 = vmatmul.bf16.vlgmr.msra.gmra.mxu2 %v23098_v1  ;;  %v15922_v5 = vor.u32 %v17971_v13, %v15921_v28  ;;  %v17931_v28 = vld [vmem:[%s25440_s3 + $0x1104] sm:$0xf0] }
 0x586   :  { %9484 = vmatmul.bf16.vlgmr.msra.gmra.mxu3 %v23100_v3  ;;  %9535 = vmatpush.bf16.msrb.mxu2 %v15930_v57  ;;  %v17985_v57 = vld [vmem:[%s25440_s3 + $0x12b4] sm:$0xf0]  ;;  %v15762_v18 = vor.u32 %v17931_v28, %v15761_v2 }
 0x587   :  { %v7773_v63 = vpop.f32.mrf.mxu0  ;;  %9555 = vmatpush.bf16.msrb.mxu3 %v15986_v38  ;;  %v17983_v38 = vld [vmem:[%s25440_s3 + $0x12a4] sm:$0xf0] }
 0x588   :  { %v7792_v32 = vpop.f32.mrf.mxu1  ;;  %v7774_v51 = vadd.f32 %v23571_v0, %v7773_v63  ;;  %9500 = vmatpush.bf16.msrb.mxu0 %v15778_v59  ;;  %v7808_v13 = vpop.f32.mrf.mxu2  ;;  %v15825_v59 = vld [vmem:[%s25440_s3 + $0x1180] sm:$0xf] }
 0x589   :  { %9519 = vmatpush.bf16.msrb.mxu1 %v15842_v35  ;;  %v17947_v35 = vld [vmem:[%s25440_s3 + $0x1184] sm:$0xf0]  ;;  %v7809_v23 = vadd.f32 %v7808_v13, %v23666_v46  ;;  %v7827_v63 = vpop.f32.mrf.mxu3  ;;  %v15905_v46 = vld [vmem:[%s25440_s3 + $0x1220] sm:$0xf] }
 0x58a   :  { %v23757_v61 = vadd.f32 %v7792_v32, %v7774_v51  ;;  %9432 = vmatmul.bf16.gmra.mxu0 %v23080_v45  ;;  %9536 = vmatpush.bf16.msrb.mxu2 %v15922_v5  ;;  %v15914_v32 = vor.u32 %v17969_v54, %v15913_v43  ;;  %v15978_v51 = vor.u32 %v17985_v57, %v15977_v52  ;;  %v15969_v5 = vld [vmem:[%s25440_s3 + $0x12a0] sm:$0xf]  ;;  %v15897_v52 = vld [vmem:[%s25440_s3 + $0x1210] sm:$0xf] }
 0x58b   :  { %9451 = vmatmul.bf16.gmra.mxu1 %v23082_v16  ;;  %v23774_v13 = vadd.f32 %v7827_v63, %v7809_v23  ;;  %v15826_v6 = vor.u32 %v17947_v35, %v15825_v59  ;;  %v16074_v43 = vor.u32 %v18009_v27, %v16073_v31  ;;  %v16138_v54 = vor.u32 %v18025_v15, %v16137_v9  ;;  %v18007_v59 = vld [vmem:[%s25440_s3 + $0x1364] sm:$0xf0]  ;;  %v16129_v35 = vld [vmem:[%s25440_s3 + $0x13e0] sm:$0xf]  ;;  %v15961_v27 = vld [vmem:[%s25440_s3 + $0x1290] sm:$0xf] }
 0x58c   :  { %9501 = vmatpush.bf16.msrb.mxu0 %v15770_v48  ;;  %v16065_v48 = vld [vmem:[%s25440_s3 + $0x1360] sm:$0xf]  ;;  %9556 = vmatpush.bf16.msrb.mxu3 %v15978_v51  ;;  %v15906_v2 = vor.u32 %v17967_v24, %v15905_v46  ;;  %v15970_v28 = vor.u32 %v17983_v38, %v15969_v5  ;;  %v18023_v31 = vld [vmem:[%s25440_s3 + $0x13e4] sm:$0xf0]  ;;  %v17965_v24 = vld [vmem:[%s25440_s3 + $0x1214] sm:$0xf0] }
 0x58d   :  { %9520 = vmatpush.bf16.msrb.mxu1 %v15834_v20  ;;  %v17981_v9 = vld [vmem:[%s25440_s3 + $0x1294] sm:$0xf0]  ;;  %v16066_v63 = vor.u32 %v18007_v59, %v16065_v48  ;;  %v17963_v51 = vld [vmem:[%s25440_s3 + $0x1204] sm:$0xf0]  ;;  %v15953_v46 = vld [vmem:[%s25440_s3 + $0x1280] sm:$0xf] }
 0x58e   :  { %9537 = vmatpush.bf16.msrb.mxu2 %v15914_v32  ;;  %v15889_v32 = vld [vmem:[%s25440_s3 + $0x1200] sm:$0xf]  ;;  %v17979_v5 = vld [vmem:[%s25440_s3 + $0x1284] sm:$0xf0]  ;;  %v16057_v38 = vld [vmem:[%s25440_s3 + $0x1350] sm:$0xf] }
 0x58f   :  { %v7775_v20 = vpop.f32.mrf.mxu0  ;;  %v16201_v48 = vld [vmem:[%s25440_s3 + $0x1470] sm:$0xf] }
 0x590   :  { %v7794_v57 = vpop.f32.mrf.mxu1  ;;  %v7776_v23 = vadd.f32 %v23571_v0, %v7775_v20  ;;  %9502 = vmatpush.bf16.msrb.mxu0 %v15762_v18  ;;  %v16130_v0 = vor.u32 %v18023_v31, %v16129_v35  ;;  %9557 = vmatpush.bf16.msrb.mxu3 %v15970_v28  ;;  %v15962_v18 = vor.u32 %v17981_v9, %v15961_v27  ;;  %v18041_v20 = vld [vmem:[%s25440_s3 + $0x1474] sm:$0xf0] }
 0x591   :  { %9521 = vmatpush.bf16.msrb.mxu1 %v15826_v6  ;;  %v15898_v6 = vor.u32 %v17965_v24, %v15897_v52  ;;  %v18021_v52 = vld [vmem:[%s25440_s3 + $0x13d4] sm:$0xf0]  ;;  %v15890_v35 = vor.u32 %v17963_v51, %v15889_v32  ;;  %v15954_v31 = vor.u32 %v17979_v5, %v15953_v46  ;;  %v16113_v32 = vld [vmem:[%s25440_s3 + $0x13c0] sm:$0xf] }
 0x592   :  { %v23810_v15 = vadd.f32 %v7794_v57, %v7776_v23  ;;  %9538 = vmatpush.bf16.msrb.mxu2 %v15906_v2  ;;  %v16265_v57 = vld [vmem:[%s25440_s3 + $0x14f0] sm:$0xf]  ;;  %v18057_v2 = vld [vmem:[%s25440_s3 + $0x14f4] sm:$0xf0]  ;;  %v16193_v51 = vld [vmem:[%s25440_s3 + $0x1460] sm:$0xf] }
 0x593   :  { %v16257_v5 = vld [vmem:[%s25440_s3 + $0x14e0] sm:$0xf] }
 0x594   :  { %9571 = vmatpush.bf16.msra.mxu0 %v16074_v43  ;;  %v18005_v43 = vld [vmem:[%s25440_s3 + $0x1354] sm:$0xf0]  ;;  %9558 = vmatpush.bf16.msrb.mxu3 %v15962_v18  ;;  %v16266_v18 = vor.u32 %v18057_v2, %v16265_v57 }
 0x595   :  { %9590 = vmatpush.bf16.msra.mxu1 %v16138_v54  ;;  %9470 = vmatmul.bf16.gmra.mxu2 %v23158_v39  ;;  %v16121_v54 = vld [vmem:[%s25440_s3 + $0x13d0] sm:$0xf]  ;;  %v16058_v9 = vor.u32 %v18005_v43, %v16057_v38  ;;  %v18055_v38 = vld [vmem:[%s25440_s3 + $0x14e4] sm:$0xf0]  ;;  %v18001_v2 = vld [vmem:[%s25440_s3 + $0x1334] sm:$0xf0] }
 0x596   :  { %9489 = vmatmul.bf16.gmra.mxu3 %v23160_v22  ;;  %9539 = vmatpush.bf16.msrb.mxu2 %v15898_v6  ;;  %v16202_v6 = vor.u32 %v18041_v20, %v16201_v48  ;;  %v16041_v48 = vld [vmem:[%s25440_s3 + $0x1330] sm:$0xf]  ;;  %v16258_v57 = vor.u32 %v18055_v38, %v16257_v5 }
 0x597   :  { %v7844_v28 = vpop.f32.mrf.mxu0 }
 0x598   :  { %9572 = vmatpush.bf16.msra.mxu0 %v16066_v63  ;;  %v7863_v59 = vpop.f32.mrf.mxu1  ;;  %v7811_v23 = vpop.f32.mrf.mxu2  ;;  %v7845_v27 = vadd.f32 %v7844_v28, %v23707_v42  ;;  %v16122_v63 = vor.u32 %v18021_v52, %v16121_v54  ;;  %v18019_v42 = vld [vmem:[%s25440_s3 + $0x13c4] sm:$0xf0]  ;;  %9559 = vmatpush.bf16.msrb.mxu3 %v15954_v31  ;;  %v16185_v28 = vld [vmem:[%s25440_s3 + $0x1450] sm:$0xf]  ;;  %v18037_v31 = vld [vmem:[%s25440_s3 + $0x1454] sm:$0xf0] }
 0x599   :  { %9591 = vmatpush.bf16.msra.mxu1 %v16130_v0  ;;  %v7830_v24 = vpop.f32.mrf.mxu3  ;;  %v16049_v0 = vld [vmem:[%s25440_s3 + $0x1340] sm:$0xf]  ;;  %v7812_v34 = vadd.f32 %v7811_v23, %v23757_v61  ;;  %v18039_v61 = vld [vmem:[%s25440_s3 + $0x1464] sm:$0xf0]  ;;  %v16114_v52 = vor.u32 %v18019_v42, %v16113_v32  ;;  %v16249_v23 = vld [vmem:[%s25440_s3 + $0x14d0] sm:$0xf]  ;;  %v16186_v5 = vor.u32 %v18037_v31, %v16185_v28 }
 0x59a   :  { %v23867_v46 = vadd.f32 %v7863_v59, %v7845_v27  ;;  %9503 = vmatmul.bf16.vlgmr.msrb.gmra.mxu0 %v23140_v60  ;;  %9540 = vmatpush.bf16.msrb.mxu2 %v15890_v35  ;;  %v16050_v54 = vor.u32 %v18003_v11, %v16049_v0  ;;  %v16194_v20 = vor.u32 %v18039_v61, %v16193_v51  ;;  %v18017_v11 = vld [vmem:[%s25440_s3 + $0x13b4] sm:$0xf0]  ;;  %v17999_v42 = vld [vmem:[%s25440_s3 + $0x1324] sm:$0xf0]  ;;  %v16089_v28 = vld [vmem:[%s25440_s3 + $0x1390] sm:$0xf] }
 0x59b   :  { %9522 = vmatmul.bf16.vlgmr.msrb.gmra.mxu1 %v23142_v56  ;;  %v23880_v43 = vadd.f32 %v7830_v24, %v7812_v34  ;;  %v16105_v34 = vld [vmem:[%s25440_s3 + $0x13b0] sm:$0xf]  ;;  %v18053_v24 = vld [vmem:[%s25440_s3 + $0x14d4] sm:$0xf0]  ;;  %v16042_v0 = vor.u32 %v18001_v2, %v16041_v48  ;;  %v18015_v51 = vld [vmem:[%s25440_s3 + $0x13a4] sm:$0xf0] }
 0x59c   :  { %9573 = vmatpush.bf16.msra.mxu0 %v16058_v9  ;;  %9628 = vmatpush.bf16.msra.mxu3 %v16266_v18  ;;  %v16033_v18 = vld [vmem:[%s25440_s3 + $0x1320] sm:$0xf]  ;;  %v16250_v38 = vor.u32 %v18053_v24, %v16249_v23  ;;  %v18051_v2 = vld [vmem:[%s25440_s3 + $0x14c4] sm:$0xf0] }
 0x59d   :  { %9592 = vmatpush.bf16.msra.mxu1 %v16122_v63  ;;  %v16034_v48 = vor.u32 %v17999_v42, %v16033_v18 }
 0x59e   :  { %9609 = vmatpush.bf16.msra.mxu2 %v16202_v6  ;;  %v16106_v6 = vor.u32 %v18017_v11, %v16105_v34  ;;  %v16025_v34 = vld [vmem:[%s25440_s3 + $0x1310] sm:$0xf]  ;;  %v17997_v11 = vld [vmem:[%s25440_s3 + $0x1314] sm:$0xf0] }
 0x59f   :  { %v7846_v59 = vpop.f32.mrf.mxu0 }
 0x5a0   :  { %v7865_v35 = vpop.f32.mrf.mxu1  ;;  %v7813_v27 = vpop.f32.mrf.mxu2  ;;  %v7847_v63 = vadd.f32 %v7846_v59, %v23774_v13  ;;  %9574 = vmatpush.bf16.msra.mxu0 %v16050_v54  ;;  %9629 = vmatpush.bf16.msra.mxu3 %v16258_v57  ;;  %v16097_v13 = vld [vmem:[%s25440_s3 + $0x13a0] sm:$0xf]  ;;  %v18013_v59 = vld [vmem:[%s25440_s3 + $0x1394] sm:$0xf0] }
 0x5a1   :  { %v7832_v9 = vpop.f32.mrf.mxu3  ;;  %9593 = vmatpush.bf16.msra.mxu1 %v16114_v52  ;;  %v7814_v32 = vadd.f32 %v7813_v27, %v23810_v15  ;;  %v16177_v15 = vld [vmem:[%s25440_s3 + $0x1440] sm:$0xf]  ;;  %v18035_v52 = vld [vmem:[%s25440_s3 + $0x1444] sm:$0xf0]  ;;  %v16169_v27 = vld [vmem:[%s25440_s3 + $0x1430] sm:$0xf]  ;;  %v16090_v42 = vor.u32 %v18013_v59, %v16089_v28 }
 0x5a2   :  { %9610 = vmatpush.bf16.msra.mxu2 %v16194_v20  ;;  %v23920_v61 = vadd.f32 %v7865_v35, %v7847_v63  ;;  %v16098_v20 = vor.u32 %v18015_v51, %v16097_v13  ;;  %v16241_v57 = vld [vmem:[%s25440_s3 + $0x14c0] sm:$0xf]  ;;  %v16178_v23 = vor.u32 %v18035_v52, %v16177_v15  ;;  %v16233_v63 = vld [vmem:[%s25440_s3 + $0x14b0] sm:$0xf]  ;;  %v18049_v13 = vld [vmem:[%s25440_s3 + $0x14b4] sm:$0xf0] }
 0x5a3   :  { %v23922_v54 = vadd.f32 %v7832_v9, %v7814_v32  ;;  %v16242_v24 = vor.u32 %v18051_v2, %v16241_v57  ;;  %v18033_v9 = vld [vmem:[%s25440_s3 + $0x1434] sm:$0xf0]  ;;  %v16026_v32 = vor.u32 %v17997_v11, %v16025_v34  ;;  %v16017_v51 = vld [vmem:[%s25440_s3 + $0x1300] sm:$0xf]  ;;  %v18011_v15 = vld [vmem:[%s25440_s3 + $0x1384] sm:$0xf0]  ;;  %v16234_v11 = vor.u32 %v18049_v13, %v16233_v63 }
 0x5a4   :  { %9575 = vmatpush.bf16.msra.mxu0 %v16042_v0  ;;  %9630 = vmatpush.bf16.msra.mxu3 %v16250_v38  ;;  %v17848_v52 = vld [vmem:[%s25440_s3 + $0xe74] sm:$0xf]  ;;  %v15499_v57 = vld [vmem:[%s25440_s3 + $0xef8] sm:$0xf0]  ;;  %v16170_v34 = vor.u32 %v18033_v9, %v16169_v27  ;;  %v16161_v28 = vld [vmem:[%s25440_s3 + $0x1420] sm:$0xf] }
 0x5a5   :  { %9594 = vmatpush.bf16.msra.mxu1 %v16106_v6  ;;  %9541 = vmatmul.bf16.vlgmr.msrb.gmra.mxu2 %v23230_v58  ;;  %v16153_v9 = vld [vmem:[%s25440_s3 + $0x1410] sm:$0xf]  ;;  %v17846_v63 = vld [vmem:[%s25440_s3 + $0xe64] sm:$0xf]  ;;  %v15427_v13 = vld [vmem:[%s25440_s3 + $0xe68] sm:$0xf0] }
 0x5a6   :  { %9560 = vmatmul.bf16.vlgmr.msrb.gmra.mxu3 %v23232_v37  ;;  %9611 = vmatpush.bf16.msra.mxu2 %v16186_v5  ;;  %v17995_v5 = vld [vmem:[%s25440_s3 + $0x1304] sm:$0xf0] }
 0x5a7   :  { %v7849_v35 = vpop.f32.mrf.mxu0  ;;  %v16018_v59 = vor.u32 %v17995_v5, %v16017_v51  ;;  %v17862_v51 = vld [vmem:[%s25440_s3 + $0xee4] sm:$0xf]  ;;  %v15491_v5 = vld [vmem:[%s25440_s3 + $0xee8] sm:$0xf0] }
 0x5a8   :  { %v7868_v31 = vpop.f32.mrf.mxu1  ;;  %v7882_v0 = vpop.f32.mrf.mxu2  ;;  %v7850_v18 = vadd.f32 %v7849_v35, %v23880_v43  ;;  %9576 = vmatpush.bf16.msra.mxu0 %v16034_v48  ;;  %v16081_v43 = vld [vmem:[%s25440_s3 + $0x1380] sm:$0xf]  ;;  %9631 = vmatpush.bf16.msra.mxu3 %v16242_v24 }
 0x5a9   :  { %v7901_v6 = vpop.f32.mrf.mxu3  ;;  %9595 = vmatpush.bf16.msra.mxu1 %v16098_v20  ;;  %v7883_v38 = vadd.f32 %v7882_v0, %v23867_v46  ;;  %v15435_v46 = vld [vmem:[%s25440_s3 + $0xe78] sm:$0xf0]  ;;  %v17864_v20 = vld [vmem:[%s25440_s3 + $0xef4] sm:$0xf]  ;;  %v16082_v35 = vor.u32 %v18011_v15, %v16081_v43  ;;  %v16225_v0 = vld [vmem:[%s25440_s3 + $0x14a0] sm:$0xf] }
 0x5aa   :  { %v23979_v48 = vadd.f32 %v7868_v31, %v7850_v18  ;;  %9508 = vmatmul.bf16.gmra.mxu0 %v23200_v14  ;;  %9612 = vmatpush.bf16.msra.mxu2 %v16178_v23  ;;  %v18031_v31 = vld [vmem:[%s25440_s3 + $0x1424] sm:$0xf0]  ;;  %v15438_v24 = vor.u32 %v17848_v52, %v15435_v46  ;;  %v15502_v27 = vor.u32 %v17864_v20, %v15499_v57  ;;  %v18029_v52 = vld [vmem:[%s25440_s3 + $0x1414] sm:$0xf0]  ;;  %v16217_v46 = vld [vmem:[%s25440_s3 + $0x1490] sm:$0xf] }
 0x5ab   :  { %9527 = vmatmul.bf16.gmra.mxu1 %v23202_v29  ;;  %v23992_v2 = vadd.f32 %v7901_v6, %v7883_v38  ;;  %v18047_v23 = vld [vmem:[%s25440_s3 + $0x14a4] sm:$0xf0]  ;;  %v18045_v20 = vld [vmem:[%s25440_s3 + $0x1494] sm:$0xf0] }
 0x5ac   :  { %9577 = vmatpush.bf16.msra.mxu0 %v16026_v32  ;;  %9632 = vmatpush.bf16.msra.mxu3 %v16234_v11  ;;  %v16162_v32 = vor.u32 %v18031_v31, %v16161_v28  ;;  %v15494_v11 = vor.u32 %v17862_v51, %v15491_v5  ;;  %v16145_v31 = vld [vmem:[%s25440_s3 + $0x1400] sm:$0xf] }
 0x5ad   :  { %9596 = vmatpush.bf16.msra.mxu1 %v16090_v42  ;;  %v16226_v42 = vor.u32 %v18047_v23, %v16225_v0  ;;  %v16209_v0 = vld [vmem:[%s25440_s3 + $0x1480] sm:$0xf]  ;;  %v18043_v23 = vld [vmem:[%s25440_s3 + $0x1484] sm:$0xf0] }
 0x5ae   :  { %9613 = vmatpush.bf16.msra.mxu2 %v16170_v34 }
 0x5af   :  { %v7851_v6 = vpop.f32.mrf.mxu0 }
 0x5b0   :  { %v7870_v18 = vpop.f32.mrf.mxu1  ;;  %v7884_v38 = vpop.f32.mrf.mxu2  ;;  %v7852_v15 = vadd.f32 %v7851_v6, %v23922_v54  ;;  %9578 = vmatpush.bf16.msra.mxu0 %v16018_v59  ;;  %v15430_v54 = vor.u32 %v17846_v63, %v15427_v13  ;;  %9633 = vmatpush.bf16.msra.mxu3 %v16226_v42  ;;  %v16154_v59 = vor.u32 %v18029_v52, %v16153_v9  ;;  %v17860_v9 = vld [vmem:[%s25440_s3 + $0xed4] sm:$0xf]  ;;  %v15483_v63 = vld [vmem:[%s25440_s3 + $0xed8] sm:$0xf0] }
 0x5b1   :  { %v7903_v43 = vpop.f32.mrf.mxu3  ;;  %9597 = vmatpush.bf16.msra.mxu1 %v16082_v35  ;;  %v7885_v57 = vadd.f32 %v7884_v38, %v23920_v61  ;;  %v16218_v35 = vor.u32 %v18045_v20, %v16217_v46  ;;  %v18027_v61 = vld [vmem:[%s25440_s3 + $0x1404] sm:$0xf0]  ;;  %v17880_v6 = vld [vmem:[%s25440_s3 + $0xf74] sm:$0xf]  ;;  %v15627_v42 = vld [vmem:[%s25440_s3 + $0xff8] sm:$0xf0]  ;;  %v16210_v38 = vor.u32 %v18043_v23, %v16209_v0  ;;  %v15486_v20 = vor.u32 %v17860_v9, %v15483_v63 }
 0x5b2   :  { %v24032_v34 = vadd.f32 %v7870_v18, %v7852_v15  ;;  %9614 = vmatpush.bf16.msra.mxu2 %v16162_v32  ;;  %v15563_v18 = vld [vmem:[%s25440_s3 + $0xf78] sm:$0xf0]  ;;  %v17896_v32 = vld [vmem:[%s25440_s3 + $0xff4] sm:$0xf]  ;;  %v16146_v5 = vor.u32 %v18027_v61, %v16145_v31  ;;  %v17858_v31 = vld [vmem:[%s25440_s3 + $0xec4] sm:$0xf] }
 0x5b3   :  { %v24034_v28 = vadd.f32 %v7903_v43, %v7885_v57  ;;  %v17842_v57 = vld [vmem:[%s25440_s3 + $0xe44] sm:$0xf] }
 0x5b4   :  { %9647 = vmatpush.bf16.msrb.mxu0 %v15438_v24  ;;  %v17844_v24 = vld [vmem:[%s25440_s3 + $0xe54] sm:$0xf]  ;;  %9634 = vmatpush.bf16.msra.mxu3 %v16218_v35  ;;  %v15630_v35 = vor.u32 %v17896_v32, %v15627_v42  ;;  %v17878_v61 = vld [vmem:[%s25440_s3 + $0xf64] sm:$0xf]  ;;  %v15403_v42 = vld [vmem:[%s25440_s3 + $0xe38] sm:$0xf0] }
 0x5b5   :  { %9666 = vmatpush.bf16.msrb.mxu1 %v15502_v27  ;;  %v15419_v27 = vld [vmem:[%s25440_s3 + $0xe58] sm:$0xf0]  ;;  %9546 = vmatmul.bf16.gmra.mxu2 %v23311_v26  ;;  %v17894_v23 = vld [vmem:[%s25440_s3 + $0xfe4] sm:$0xf] }
 0x5b6   :  { %9565 = vmatmul.bf16.gmra.mxu3 %v23313_v19  ;;  %9615 = vmatpush.bf16.msra.mxu2 %v16154_v59  ;;  %v15422_v46 = vor.u32 %v17844_v24, %v15419_v27  ;;  %v15566_v59 = vor.u32 %v17880_v6, %v15563_v18  ;;  %v15619_v24 = vld [vmem:[%s25440_s3 + $0xfe8] sm:$0xf0]  ;;  %v17840_v6 = vld [vmem:[%s25440_s3 + $0xe34] sm:$0xf] }
 0x5b7   :  { %v7920_v13 = vpop.f32.mrf.mxu0  ;;  %v15622_v32 = vor.u32 %v17894_v23, %v15619_v24 }
 0x5b8   :  { %9648 = vmatpush.bf16.msrb.mxu0 %v15430_v54  ;;  %v7939_v51 = vpop.f32.mrf.mxu1  ;;  %v7887_v43 = vpop.f32.mrf.mxu2  ;;  %v7921_v52 = vadd.f32 %v7920_v13, %v23992_v2  ;;  %v15411_v54 = vld [vmem:[%s25440_s3 + $0xe48] sm:$0xf0]  ;;  %9635 = vmatpush.bf16.msra.mxu3 %v16210_v38  ;;  %v17856_v13 = vld [vmem:[%s25440_s3 + $0xeb4] sm:$0xf] }
 0x5b9   :  { %9667 = vmatpush.bf16.msrb.mxu1 %v15494_v11  ;;  %v7906_v15 = vpop.f32.mrf.mxu3  ;;  %v7888_v11 = vadd.f32 %v7887_v43, %v23979_v48  ;;  %v15475_v2 = vld [vmem:[%s25440_s3 + $0xec8] sm:$0xf0]  ;;  %v15414_v9 = vor.u32 %v17842_v57, %v15411_v54 }
 0x5ba   :  { %v24091_v0 = vadd.f32 %v7939_v51, %v7921_v52  ;;  %9579 = vmatmul.bf16.vlgmr.msra.gmra.mxu0 %v23278_v33  ;;  %v15555_v48 = vld [vmem:[%s25440_s3 + $0xf68] sm:$0xf0]  ;;  %9616 = vmatpush.bf16.msra.mxu2 %v16146_v5  ;;  %v15478_v63 = vor.u32 %v17858_v31, %v15475_v2  ;;  %v15467_v51 = vld [vmem:[%s25440_s3 + $0xeb8] sm:$0xf0]  ;;  %v17876_v5 = vld [vmem:[%s25440_s3 + $0xf54] sm:$0xf] }
 0x5bb   :  { %9598 = vmatmul.bf16.vlgmr.msra.gmra.mxu1 %v23280_v7  ;;  %v24104_v27 = vadd.f32 %v7906_v15, %v7888_v11  ;;  %v15558_v18 = vor.u32 %v17878_v61, %v15555_v48  ;;  %v15547_v15 = vld [vmem:[%s25440_s3 + $0xf58] sm:$0xf0]  ;;  %v17892_v52 = vld [vmem:[%s25440_s3 + $0xfd4] sm:$0xf]  ;;  %v15406_v11 = vor.u32 %v17840_v6, %v15403_v42  ;;  %v15395_v2 = vld [vmem:[%s25440_s3 + $0xe28] sm:$0xf0] }
 0x5bc   :  { %9649 = vmatpush.bf16.msrb.mxu0 %v15422_v46  ;;  %9704 = vmatpush.bf16.msrb.mxu3 %v15630_v35  ;;  %v15611_v46 = vld [vmem:[%s25440_s3 + $0xfd8] sm:$0xf0]  ;;  %v17838_v35 = vld [vmem:[%s25440_s3 + $0xe24] sm:$0xf]  ;;  %v15459_v61 = vld [vmem:[%s25440_s3 + $0xea8] sm:$0xf0]  ;;  %v15550_v23 = vor.u32 %v17876_v5, %v15547_v15 }
 0x5bd   :  { %9668 = vmatpush.bf16.msrb.mxu1 %v15486_v20  ;;  %v15614_v24 = vor.u32 %v17892_v52, %v15611_v46  ;;  %v15398_v6 = vor.u32 %v17838_v35, %v15395_v2  ;;  %v15603_v42 = vld [vmem:[%s25440_s3 + $0xfc8] sm:$0xf0]  ;;  %v17852_v5 = vld [vmem:[%s25440_s3 + $0xe94] sm:$0xf] }
 0x5be   :  { %9685 = vmatpush.bf16.msrb.mxu2 %v15566_v59  ;;  %v15470_v59 = vor.u32 %v17856_v13, %v15467_v51  ;;  %v17836_v13 = vld [vmem:[%s25440_s3 + $0xe14] sm:$0xf]  ;;  %v15387_v51 = vld [vmem:[%s25440_s3 + $0xe18] sm:$0xf0] }
 0x5bf   :  { %v7922_v38 = vpop.f32.mrf.mxu0 }
 0x5c0   :  { %v7941_v43 = vpop.f32.mrf.mxu1  ;;  %v7889_v20 = vpop.f32.mrf.mxu2  ;;  %v7923_v54 = vadd.f32 %v7922_v38, %v24034_v28  ;;  %9650 = vmatpush.bf16.msrb.mxu0 %v15414_v9  ;;  %9705 = vmatpush.bf16.msrb.mxu3 %v15622_v32  ;;  %v17854_v28 = vld [vmem:[%s25440_s3 + $0xea4] sm:$0xf]  ;;  %v15451_v38 = vld [vmem:[%s25440_s3 + $0xe98] sm:$0xf0] }
 0x5c1   :  { %v7908_v57 = vpop.f32.mrf.mxu3  ;;  %9669 = vmatpush.bf16.msrb.mxu1 %v15478_v63  ;;  %v7890_v31 = vadd.f32 %v7889_v20, %v24032_v34  ;;  %v17874_v34 = vld [vmem:[%s25440_s3 + $0xf44] sm:$0xf]  ;;  %v15539_v63 = vld [vmem:[%s25440_s3 + $0xf48] sm:$0xf0]  ;;  %v17872_v20 = vld [vmem:[%s25440_s3 + $0xf34] sm:$0xf]  ;;  %v15454_v2 = vor.u32 %v17852_v5, %v15451_v38 }
 0x5c2   :  { %9686 = vmatpush.bf16.msrb.mxu2 %v15558_v18  ;;  %v24144_v48 = vadd.f32 %v7941_v43, %v7923_v54  ;;  %v15462_v18 = vor.u32 %v17854_v28, %v15459_v61  ;;  %v17890_v32 = vld [vmem:[%s25440_s3 + $0xfc4] sm:$0xf]  ;;  %v15542_v52 = vor.u32 %v17874_v34, %v15539_v63  ;;  %v17888_v54 = vld [vmem:[%s25440_s3 + $0xfb4] sm:$0xf]  ;;  %v15595_v28 = vld [vmem:[%s25440_s3 + $0xfb8] sm:$0xf0] }
 0x5c3   :  { %v24146_v9 = vadd.f32 %v7908_v57, %v7890_v31  ;;  %v15606_v46 = vor.u32 %v17890_v32, %v15603_v42  ;;  %v15531_v57 = vld [vmem:[%s25440_s3 + $0xf38] sm:$0xf0]  ;;  %v15390_v31 = vor.u32 %v17836_v13, %v15387_v51  ;;  %v17834_v61 = vld [vmem:[%s25440_s3 + $0xe04] sm:$0xf]  ;;  %v15443_v34 = vld [vmem:[%s25440_s3 + $0xe88] sm:$0xf0]  ;;  %v15598_v51 = vor.u32 %v17888_v54, %v15595_v28 }
 0x5c4   :  { %9651 = vmatpush.bf16.msrb.mxu0 %v15406_v11  ;;  %9706 = vmatpush.bf16.msrb.mxu3 %v15614_v24  ;;  %v17912_v63 = vld [vmem:[%s25440_s3 + $0x1074] sm:$0xf]  ;;  %v15755_v32 = vld [vmem:[%s25440_s3 + $0x10f8] sm:$0xf0]  ;;  %v15534_v13 = vor.u32 %v17872_v20, %v15531_v57  ;;  %v17870_v5 = vld [vmem:[%s25440_s3 + $0xf24] sm:$0xf] }
 0x5c5   :  { %9670 = vmatpush.bf16.msrb.mxu1 %v15470_v59  ;;  %9617 = vmatmul.bf16.vlgmr.msra.gmra.mxu2 %v23422_v50  ;;  %v17868_v57 = vld [vmem:[%s25440_s3 + $0xf14] sm:$0xf]  ;;  %v17910_v54 = vld [vmem:[%s25440_s3 + $0x1064] sm:$0xf]  ;;  %v15683_v28 = vld [vmem:[%s25440_s3 + $0x1068] sm:$0xf0] }
 0x5c6   :  { %9636 = vmatmul.bf16.vlgmr.msra.gmra.mxu3 %v23424_v12  ;;  %9687 = vmatpush.bf16.msrb.mxu2 %v15550_v23  ;;  %v15379_v23 = vld [vmem:[%s25440_s3 + $0xe08] sm:$0xf0] }
 0x5c7   :  { %v7925_v43 = vpop.f32.mrf.mxu0  ;;  %v15382_v38 = vor.u32 %v17834_v61, %v15379_v23  ;;  %v17926_v61 = vld [vmem:[%s25440_s3 + $0x10e4] sm:$0xf]  ;;  %v15747_v23 = vld [vmem:[%s25440_s3 + $0x10e8] sm:$0xf0] }
 0x5c8   :  { %v7944_v15 = vpop.f32.mrf.mxu1  ;;  %v7958_v11 = vpop.f32.mrf.mxu2  ;;  %v7926_v35 = vadd.f32 %v7925_v43, %v24104_v27  ;;  %9652 = vmatpush.bf16.msrb.mxu0 %v15398_v6  ;;  %v17850_v27 = vld [vmem:[%s25440_s3 + $0xe84] sm:$0xf]  ;;  %9707 = vmatpush.bf16.msrb.mxu3 %v15606_v46 }
 0x5c9   :  { %v7977_v59 = vpop.f32.mrf.mxu3  ;;  %9671 = vmatpush.bf16.msrb.mxu1 %v15462_v18  ;;  %v7959_v24 = vadd.f32 %v7958_v11, %v24091_v0  ;;  %v15691_v0 = vld [vmem:[%s25440_s3 + $0x1078] sm:$0xf0]  ;;  %v17928_v18 = vld [vmem:[%s25440_s3 + $0x10f4] sm:$0xf]  ;;  %v15446_v43 = vor.u32 %v17850_v27, %v15443_v34  ;;  %v17886_v11 = vld [vmem:[%s25440_s3 + $0xfa4] sm:$0xf] }
 0x5ca   :  { %v24203_v6 = vadd.f32 %v7944_v15, %v7926_v35  ;;  %9584 = vmatmul.bf16.gmra.mxu0 %v23380_v4  ;;  %9688 = vmatpush.bf16.msrb.mxu2 %v15542_v52  ;;  %v15523_v15 = vld [vmem:[%s25440_s3 + $0xf28] sm:$0xf0]  ;;  %v15694_v46 = vor.u32 %v17912_v63, %v15691_v0  ;;  %v15758_v20 = vor.u32 %v17928_v18, %v15755_v32  ;;  %v15515_v63 = vld [vmem:[%s25440_s3 + $0xf18] sm:$0xf0]  ;;  %v17884_v0 = vld [vmem:[%s25440_s3 + $0xf94] sm:$0xf] }
 0x5cb   :  { %9603 = vmatmul.bf16.gmra.mxu1 %v23382_v44  ;;  %v24216_v42 = vadd.f32 %v7977_v59, %v7959_v24  ;;  %v15587_v52 = vld [vmem:[%s25440_s3 + $0xfa8] sm:$0xf0]  ;;  %v15579_v18 = vld [vmem:[%s25440_s3 + $0xf98] sm:$0xf0] }
 0x5cc   :  { %9653 = vmatpush.bf16.msrb.mxu0 %v15390_v31  ;;  %9708 = vmatpush.bf16.msrb.mxu3 %v15598_v51  ;;  %v15526_v31 = vor.u32 %v17870_v5, %v15523_v15  ;;  %v15750_v51 = vor.u32 %v17926_v61, %v15747_v23  ;;  %v17866_v15 = vld [vmem:[%s25440_s3 + $0xf04] sm:$0xf] }
 0x5cd   :  { %9672 = vmatpush.bf16.msrb.mxu1 %v15454_v2  ;;  %v15590_v2 = vor.u32 %v17886_v11, %v15587_v52  ;;  %v17882_v11 = vld [vmem:[%s25440_s3 + $0xf84] sm:$0xf]  ;;  %v15571_v52 = vld [vmem:[%s25440_s3 + $0xf88] sm:$0xf0] }
 0x5ce   :  { %9689 = vmatpush.bf16.msrb.mxu2 %v15534_v13 }
 0x5cf   :  { %v7927_v59 = vpop.f32.mrf.mxu0 }
 0x5d0   :  { %v7946_v35 = vpop.f32.mrf.mxu1  ;;  %v7960_v24 = vpop.f32.mrf.mxu2  ;;  %v7928_v34 = vadd.f32 %v7927_v59, %v24146_v9  ;;  %9654 = vmatpush.bf16.msrb.mxu0 %v15382_v38  ;;  %v15686_v9 = vor.u32 %v17910_v54, %v15683_v28  ;;  %9709 = vmatpush.bf16.msrb.mxu3 %v15590_v2  ;;  %v15518_v38 = vor.u32 %v17868_v57, %v15515_v63  ;;  %v17924_v57 = vld [vmem:[%s25440_s3 + $0x10d4] sm:$0xf]  ;;  %v15739_v54 = vld [vmem:[%s25440_s3 + $0x10d8] sm:$0xf0] }
 0x5d1   :  { %v7979_v27 = vpop.f32.mrf.mxu3  ;;  %9673 = vmatpush.bf16.msrb.mxu1 %v15446_v43  ;;  %v7961_v32 = vadd.f32 %v7960_v24, %v24144_v48  ;;  %v15582_v43 = vor.u32 %v17884_v0, %v15579_v18  ;;  %v15507_v48 = vld [vmem:[%s25440_s3 + $0xf08] sm:$0xf0]  ;;  %v17944_v59 = vld [vmem:[%s25440_s3 + $0x1174] sm:$0xf]  ;;  %v15883_v2 = vld [vmem:[%s25440_s3 + $0x11f8] sm:$0xf0]  ;;  %v15574_v24 = vor.u32 %v17882_v11, %v15571_v52  ;;  %v15742_v18 = vor.u32 %v17924_v57, %v15739_v54 }
 0x5d2   :  { %v24256_v13 = vadd.f32 %v7946_v35, %v7928_v34  ;;  %9690 = vmatpush.bf16.msrb.mxu2 %v15526_v31  ;;  %v15819_v35 = vld [vmem:[%s25440_s3 + $0x1178] sm:$0xf0]  ;;  %v17960_v31 = vld [vmem:[%s25440_s3 + $0x11f4] sm:$0xf]  ;;  %v15510_v23 = vor.u32 %v17866_v15, %v15507_v48  ;;  %v17922_v15 = vld [vmem:[%s25440_s3 + $0x10c4] sm:$0xf] }
 0x5d3   :  { %v24258_v5 = vadd.f32 %v7979_v27, %v7961_v32  ;;  %v17906_v32 = vld [vmem:[%s25440_s3 + $0x1044] sm:$0xf]  ;;  %v25567_v52 = vld [vmem:[#allocation23_spill] sm:$0xff]  ;;  %v15875_v54 = vld [vmem:[%s25440_s3 + $0x11e8] sm:$0xf0] }
 0x5d4   :  { %9723 = vmatpush.bf16.msra.mxu0 %v15694_v46  ;;  %v17908_v46 = vld [vmem:[%s25440_s3 + $0x1054] sm:$0xf]  ;;  %9710 = vmatpush.bf16.msrb.mxu3 %v15582_v43  ;;  %v15886_v43 = vor.u32 %v17960_v31, %v15883_v2  ;;  %v17942_v48 = vld [vmem:[%s25440_s3 + $0x1164] sm:$0xf] }
 0x5d5   :  { %9742 = vmatpush.bf16.msra.mxu1 %v15758_v20  ;;  %v15675_v20 = vld [vmem:[%s25440_s3 + $0x1058] sm:$0xf0]  ;;  %9622 = vmatmul.bf16.gmra.mxu2 %v23514_v8  ;;  %v18210_v11 = vld [vmem:[%s25437_s0] sm:$0xff]  ;;  %v17904_v31 = vld [vmem:[%s25440_s3 + $0x1034] sm:$0xf] }
 0x5d6   :  { %9641 = vmatmul.bf16.gmra.mxu3 %v23525_v17  ;;  %9691 = vmatpush.bf16.msrb.mxu2 %v15518_v38  ;;  %v15678_v0 = vor.u32 %v17908_v46, %v15675_v20  ;;  %v15822_v38 = vor.u32 %v17944_v59, %v15819_v35  ;;  %v15811_v20 = vld [vmem:[%s25440_s3 + $0x1168] sm:$0xf0]  ;;  %v17958_v57 = vld [vmem:[%s25440_s3 + $0x11e4] sm:$0xf] }
 0x5d7   :  { %v7996_v28 = vpop.f32.mrf.mxu0  ;;  %v15814_v2 = vor.u32 %v17942_v48, %v15811_v20  ;;  %v17902_v48 = vld [vmem:[%s25440_s3 + $0x1024] sm:$0xf] }
 0x5d8   :  { %9724 = vmatpush.bf16.msra.mxu0 %v15686_v9  ;;  %v8015_v61 = vpop.f32.mrf.mxu1  ;;  %v7963_v27 = vpop.f32.mrf.mxu2  ;;  %v7997_v63 = vadd.f32 %v7996_v28, %v24216_v42  ;;  %v15667_v9 = vld [vmem:[%s25440_s3 + $0x1048] sm:$0xf0]  ;;  %9711 = vmatpush.bf16.msrb.mxu3 %v15574_v24  ;;  %v15878_v28 = vor.u32 %v17958_v57, %v15875_v54  ;;  %v15723_v24 = vld [vmem:[%s25440_s3 + $0x10b8] sm:$0xf0]  ;;  %v25569_v20 = vld [vmem:[#allocation21_spill] sm:$0xff] }
 0x5d9   :  { %9743 = vmatpush.bf16.msra.mxu1 %v15750_v51  ;;  %v7982_v34 = vpop.f32.mrf.mxu3  ;;  %v7964_v51 = vadd.f32 %v7963_v27, %v24203_v6  ;;  %v15731_v42 = vld [vmem:[%s25440_s3 + $0x10c8] sm:$0xf0]  ;;  %v4493_v6 = vadd.f32 %v18210_v11, %v25567_v52  ;;  %v17940_v27 = vld [vmem:[%s25440_s3 + $0x1154] sm:$0xf]  ;;  %v17918_v52 = vld [vmem:[%s25440_s3 + $0x10a4] sm:$0xf] }
 0x5da   :  { %v8016_v46 = vadd.f32 %v8015_v61, %v7997_v63  ;;  %9655 = vmatmul.bf16.vlgmr.msrb.gmra.mxu0 %v22864_v25  ;;  %9692 = vmatpush.bf16.msrb.mxu2 %v15510_v23  ;;  %v15670_v25 = vor.u32 %v17906_v32, %v15667_v9  ;;  %v15659_v61 = vld [vmem:[%s25440_s3 + $0x1038] sm:$0xf0]  ;;  %v17920_v23 = vld [vmem:[%s25440_s3 + $0x10b4] sm:$0xf] }
 0x5db   :  { %9674 = vmatmul.bf16.vlgmr.msrb.gmra.mxu1 %v22866_v47  ;;  %v24330_v59 = vadd.f32 %v7982_v34, %v7964_v51  ;;  %v15734_v47 = vor.u32 %v17922_v15, %v15731_v42  ;;  %v15867_v32 = vld [vmem:[%s25440_s3 + $0x11d8] sm:$0xf0]  ;;  %v15662_v15 = vor.u32 %v17904_v31, %v15659_v61  ;;  %v15726_v42 = vor.u32 %v17920_v23, %v15723_v24 }
 0x5dc   :  { %v24332_v35 = vadd.f32 %v8016_v46, %v4493_v6  ;;  %9725 = vmatpush.bf16.msra.mxu0 %v15678_v0  ;;  %9780 = vmatpush.bf16.msra.mxu3 %v15886_v43  ;;  %v15803_v0 = vld [vmem:[%s25440_s3 + $0x1158] sm:$0xf0]  ;;  %v24362_v43 = vld [vmem:[%s25441_s4 + $0x4] sm:$0x3]  ;;  %v15715_v6 = vld [vmem:[%s25440_s3 + $0x10a8] sm:$0xf0] }
 0x5dd   :  { %9744 = vmatpush.bf16.msra.mxu1 %v15742_v18  ;;  %v17956_v18 = vld [vmem:[%s25440_s3 + $0x11d4] sm:$0xf]  ;;  %v18211_v46 = vld [vmem:[%s25437_s0 + $0x8] sm:$0xff]  ;;  %v15806_v54 = vor.u32 %v17940_v27, %v15803_v0  ;;  %v24384_v31 = vperm.slane %v24362_v43, 0  ;;  %v15718_v24 = vor.u32 %v17918_v52, %v15715_v6  ;;  %v17954_v27 = vld [vmem:[%s25440_s3 + $0x11c4] sm:$0xf] }
 0x5de   :  { %25568 = vst [vmem:[#allocation16_spill] sm:$0xff] %v24332_v35  ;;  %9761 = vmatpush.bf16.msra.mxu2 %v15822_v38  ;;  %v15643_v0 = vld [vmem:[%s25440_s3 + $0x1018] sm:$0xf0] }
 0x5df   :  { %v7998_v34 = vpop.f32.mrf.mxu0 }
 0x5e0   :  { %v8017_v63 = vpop.f32.mrf.mxu1  ;;  %v7965_v9 = vpop.f32.mrf.mxu2  ;;  %v7999_v38 = vadd.f32 %v7998_v34, %v24258_v5  ;;  %9726 = vmatpush.bf16.msra.mxu0 %v15670_v25  ;;  %9781 = vmatpush.bf16.msra.mxu3 %v15878_v28  ;;  %v15651_v5 = vld [vmem:[%s25440_s3 + $0x1028] sm:$0xf0]  ;;  %v15870_v25 = vor.u32 %v17956_v18, %v15867_v32  ;;  %v17916_v18 = vld [vmem:[%s25440_s3 + $0x1094] sm:$0xf]  ;;  %v15707_v32 = vld [vmem:[%s25440_s3 + $0x1098] sm:$0xf0] }
 0x5e1   :  { %v7984_v51 = vpop.f32.mrf.mxu3  ;;  %9745 = vmatpush.bf16.msra.mxu1 %v15734_v47  ;;  %v7966_v11 = vadd.f32 %v7965_v9, %v24256_v13  ;;  %v4494_v13 = vadd.f32 %v18211_v46, %v25569_v20  ;;  %v15795_v28 = vld [vmem:[%s25440_s3 + $0x1148] sm:$0xf0]  ;;  %v15654_v23 = vor.u32 %v17902_v48, %v15651_v5  ;;  %v15710_v6 = vor.u32 %v17916_v18, %v15707_v32  ;;  %v15851_v46 = vld [vmem:[%s25440_s3 + $0x11b8] sm:$0xf0]  ;;  %v17898_v20 = vld [vmem:[%s25440_s3 + $0x1004] sm:$0xf] }
 0x5e2   :  { %9762 = vmatpush.bf16.msra.mxu2 %v15814_v2  ;;  %v8018_v57 = vadd.f32 %v8017_v63, %v7999_v38  ;;  %v17938_v2 = vld [vmem:[%s25440_s3 + $0x1144] sm:$0xf]  ;;  %v15859_v34 = vld [vmem:[%s25440_s3 + $0x11c8] sm:$0xf0]  ;;  %v17900_v63 = vld [vmem:[%s25440_s3 + $0x1014] sm:$0xf] }
 0x5e3   :  { %v24381_v47 = vadd.f32 %v7984_v51, %v7966_v11  ;;  %v15798_v38 = vor.u32 %v17938_v2, %v15795_v28  ;;  %v15646_v52 = vor.u32 %v17900_v63, %v15643_v0  ;;  %v18212_v2 = vld [vmem:[%s25437_s0 + $0x10] sm:$0xff]  ;;  %v16011_v63 = vld [vmem:[%s25440_s3 + $0x12f8] sm:$0xf0] }
 0x5e4   :  { %v24392_v61 = vadd.f32 %v8018_v57, %v4494_v13  ;;  %9727 = vmatpush.bf16.msra.mxu0 %v15662_v15  ;;  %9782 = vmatpush.bf16.msra.mxu3 %v15870_v25  ;;  %v15787_v15 = vld [vmem:[%s25440_s3 + $0x1138] sm:$0xf0]  ;;  %v15635_v13 = vld [vmem:[%s25440_s3 + $0x1008] sm:$0xf0]  ;;  %v17976_v25 = vld [vmem:[%s25440_s3 + $0x1274] sm:$0xf] }
 0x5e5   :  { %9746 = vmatpush.bf16.msra.mxu1 %v15726_v42  ;;  %9693 = vmatmul.bf16.vlgmr.msrb.gmra.mxu2 %v22920_v40  ;;  %v15862_v40 = vor.u32 %v17954_v27, %v15859_v34  ;;  %v17952_v42 = vld [vmem:[%s25440_s3 + $0x11b4] sm:$0xf]  ;;  %v15947_v27 = vld [vmem:[%s25440_s3 + $0x1278] sm:$0xf0] }
 0x5e6   :  { %25570 = vst [vmem:[#allocation18_spill] sm:$0xff] %v24392_v61  ;;  %9712 = vmatmul.bf16.vlgmr.msrb.gmra.mxu3 %v22922_v62  ;;  %9763 = vmatpush.bf16.msra.mxu2 %v15806_v54  ;;  %v17936_v62 = vld [vmem:[%s25440_s3 + $0x1134] sm:$0xf]  ;;  %v15699_v54 = vld [vmem:[%s25440_s3 + $0x1088] sm:$0xf0] }
 0x5e7   :  { %v8001_v9 = vpop.f32.mrf.mxu0  ;;  %v25571_v28 = vld [vmem:[#allocation15_spill] sm:$0xff]  ;;  %v15790_v18 = vor.u32 %v17936_v62, %v15787_v15  ;;  %v15950_v62 = vor.u32 %v17976_v25, %v15947_v27  ;;  %v25573_v27 = vld [vmem:[#allocation14_spill] sm:$0xff] }
 0x5e8   :  { %v8020_v51 = vpop.f32.mrf.mxu1  ;;  %v9390_v48 = vpop.f32.mrf.mxu2  ;;  %v8002_v5 = vadd.f32 %v8001_v9, %v24330_v59  ;;  %9728 = vmatpush.bf16.msra.mxu0 %v15654_v23  ;;  %v17914_v59 = vld [vmem:[%s25440_s3 + $0x1084] sm:$0xf]  ;;  %v4495_v23 = vadd.f32 %v18212_v2, %v25571_v28  ;;  %v17992_v34 = vld [vmem:[%s25440_s3 + $0x12f4] sm:$0xf]  ;;  %9783 = vmatpush.bf16.msra.mxu3 %v15862_v40  ;;  %v15638_v9 = vor.u32 %v17898_v20, %v15635_v13  ;;  %v15843_v40 = vld [vmem:[%s25440_s3 + $0x11a8] sm:$0xf0] }
 0x5e9   :  { %v9409_v11 = vpop.f32.mrf.mxu3  ;;  %9747 = vmatpush.bf16.msra.mxu1 %v15718_v24  ;;  %v9391_v57 = vadd.f32 %v9390_v48, %v24384_v31  ;;  %v15779_v48 = vld [vmem:[%s25440_s3 + $0x1128] sm:$0xf0]  ;;  %v16014_v15 = vor.u32 %v17992_v34, %v16011_v63  ;;  %v17990_v13 = vld [vmem:[%s25440_s3 + $0x12e4] sm:$0xf]  ;;  %v15771_v2 = vld [vmem:[%s25440_s3 + $0x1118] sm:$0xf0] }
 0x5ea   :  { %v8021_v24 = vadd.f32 %v8020_v51, %v8002_v5  ;;  %9660 = vmatmul.bf16.gmra.mxu0 %v23024_v30  ;;  %9764 = vmatpush.bf16.msra.mxu2 %v15798_v38  ;;  %v15854_v30 = vor.u32 %v17952_v42, %v15851_v46  ;;  %v15702_v51 = vor.u32 %v17914_v59, %v15699_v54  ;;  %v17950_v38 = vld [vmem:[%s25440_s3 + $0x11a4] sm:$0xf]  ;;  %v17932_v42 = vld [vmem:[%s25440_s3 + $0x1114] sm:$0xf]  ;;  %v15939_v20 = vld [vmem:[%s25440_s3 + $0x1268] sm:$0xf0] }
 0x5eb   :  { %9679 = vmatmul.bf16.gmra.mxu1 %v23026_v10  ;;  %v24458_v0 = vadd.f32 %v9409_v11, %v9391_v57  ;;  %v17934_v10 = vld [vmem:[%s25440_s3 + $0x1124] sm:$0xf]  ;;  %v15846_v46 = vor.u32 %v17950_v38, %v15843_v40  ;;  %v16003_v57 = vld [vmem:[%s25440_s3 + $0x12e8] sm:$0xf0]  ;;  %v17948_v28 = vld [vmem:[%s25440_s3 + $0x1194] sm:$0xf] }
 0x5ec   :  { %v24463_v32 = vadd.f32 %v8021_v24, %v4495_v23  ;;  %9729 = vmatpush.bf16.msra.mxu0 %v15646_v52  ;;  %v17974_v11 = vld [vmem:[%s25440_s3 + $0x1264] sm:$0xf]  ;;  %9784 = vmatpush.bf16.msra.mxu3 %v15854_v30  ;;  %v15835_v23 = vld [vmem:[%s25440_s3 + $0x1198] sm:$0xf0]  ;;  %v16006_v30 = vor.u32 %v17990_v13, %v16003_v57  ;;  %v15763_v38 = vld [vmem:[%s25440_s3 + $0x1108] sm:$0xf0] }
 0x5ed   :  { %9748 = vmatpush.bf16.msra.mxu1 %v15710_v6  ;;  %v15782_v6 = vor.u32 %v17934_v10, %v15779_v48  ;;  %v17930_v48 = vld [vmem:[%s25440_s3 + $0x1104] sm:$0xf] }
 0x5ee   :  { %25572 = vst [vmem:[#allocation19_spill] sm:$0xff] %v24463_v32  ;;  %9765 = vmatpush.bf16.msra.mxu2 %v15790_v18  ;;  %v15942_v18 = vor.u32 %v17974_v11, %v15939_v20  ;;  %v17946_v40 = vld [vmem:[%s25440_s3 + $0x1184] sm:$0xf]  ;;  %v15931_v11 = vld [vmem:[%s25440_s3 + $0x1258] sm:$0xf0]  ;;  %v15766_v57 = vor.u32 %v17930_v48, %v15763_v38 }
 0x5ef   :  { %v8003_v5 = vpop.f32.mrf.mxu0  ;;  %v18022_v48 = vld [vmem:[%s25440_s3 + $0x13e4] sm:$0xf]  ;;  %v16131_v38 = vld [vmem:[%s25440_s3 + $0x13e8] sm:$0xf0] }
 0x5f0   :  { %v8022_v52 = vpop.f32.mrf.mxu1  ;;  %v9392_v59 = vpop.f32.mrf.mxu2  ;;  %v8004_v25 = vadd.f32 %v8003_v5, %v24381_v47  ;;  %9730 = vmatpush.bf16.msra.mxu0 %v15638_v9  ;;  %v18213_v47 = vld [vmem:[%s25437_s0 + $0x18] sm:$0xff]  ;;  %9785 = vmatpush.bf16.msra.mxu3 %v15846_v46  ;;  %v15774_v9 = vor.u32 %v17932_v42, %v15771_v2  ;;  %v17972_v42 = vld [vmem:[%s25440_s3 + $0x1254] sm:$0xf] }
 0x5f1   :  { %v9411_v54 = vpop.f32.mrf.mxu3  ;;  %9749 = vmatpush.bf16.msra.mxu1 %v15702_v51  ;;  %v9393_v24 = vadd.f32 %v9392_v59, %v24384_v31  ;;  %v4496_v34 = vadd.f32 %v18213_v47, %v25573_v27  ;;  %v15838_v51 = vor.u32 %v17948_v28, %v15835_v23  ;;  %v17988_v5 = vld [vmem:[%s25440_s3 + $0x12d4] sm:$0xf]  ;;  %v16139_v46 = vld [vmem:[%s25440_s3 + $0x13f8] sm:$0xf0]  ;;  %v15934_v28 = vor.u32 %v17972_v42, %v15931_v11  ;;  %v15923_v47 = vld [vmem:[%s25440_s3 + $0x1248] sm:$0xf0] }
 0x5f2   :  { %v8023_v63 = vadd.f32 %v8022_v52, %v8004_v25  ;;  %9766 = vmatpush.bf16.msra.mxu2 %v15782_v6  ;;  %v15995_v52 = vld [vmem:[%s25440_s3 + $0x12d8] sm:$0xf0]  ;;  %v18008_v6 = vld [vmem:[%s25440_s3 + $0x1374] sm:$0xf]  ;;  %v16134_v11 = vor.u32 %v18022_v48, %v16131_v38  ;;  %v18018_v38 = vld [vmem:[%s25440_s3 + $0x13c4] sm:$0xf] }
 0x5f3   :  { %v24504_v10 = vadd.f32 %v9411_v54, %v9393_v24  ;;  %v15998_v23 = vor.u32 %v17988_v5, %v15995_v52  ;;  %v17970_v24 = vld [vmem:[%s25440_s3 + $0x1244] sm:$0xf]  ;;  %v15915_v5 = vld [vmem:[%s25440_s3 + $0x1238] sm:$0xf0]  ;;  %v17984_v52 = vld [vmem:[%s25440_s3 + $0x12b4] sm:$0xf] }
 0x5f4   :  { %9799 = vmatpush.bf16.msrb.mxu0 %v15950_v62  ;;  %v24515_v62 = vadd.f32 %v8023_v63, %v4496_v34  ;;  %9786 = vmatpush.bf16.msra.mxu3 %v15838_v51  ;;  %v16067_v51 = vld [vmem:[%s25440_s3 + $0x1368] sm:$0xf0] }
 0x5f5   :  { %9818 = vmatpush.bf16.msrb.mxu1 %v16014_v15  ;;  %v15827_v15 = vld [vmem:[%s25440_s3 + $0x1188] sm:$0xf0]  ;;  %9698 = vmatmul.bf16.gmra.mxu2 %v23080_v45  ;;  %v16075_v45 = vld [vmem:[%s25440_s3 + $0x1378] sm:$0xf0] }
 0x5f6   :  { %25574 = vst [vmem:[#allocation20_spill] sm:$0xff] %v24515_v62  ;;  %9717 = vmatmul.bf16.gmra.mxu3 %v23082_v16  ;;  %v18024_v16 = vld [vmem:[%s25440_s3 + $0x13f4] sm:$0xf]  ;;  %9767 = vmatpush.bf16.msra.mxu2 %v15774_v9  ;;  %v15830_v59 = vor.u32 %v17946_v40, %v15827_v15  ;;  %v16078_v34 = vor.u32 %v18008_v6, %v16075_v45  ;;  %v15979_v6 = vld [vmem:[%s25440_s3 + $0x12b8] sm:$0xf0] }
 0x5f7   :  { %v9428_v20 = vpop.f32.mrf.mxu0  ;;  %v16142_v63 = vor.u32 %v18024_v16, %v16139_v46  ;;  %v17968_v15 = vld [vmem:[%s25440_s3 + $0x1234] sm:$0xf] }
 0x5f8   :  { %9800 = vmatpush.bf16.msrb.mxu0 %v15942_v18  ;;  %v9447_v13 = vpop.f32.mrf.mxu1  ;;  %v9395_v54 = vpop.f32.mrf.mxu2  ;;  %v9429_v2 = vadd.f32 %v9428_v20, %v24458_v0  ;;  %v17986_v18 = vld [vmem:[%s25440_s3 + $0x12c4] sm:$0xf]  ;;  %v15987_v0 = vld [vmem:[%s25440_s3 + $0x12c8] sm:$0xf0]  ;;  %9787 = vmatpush.bf16.msra.mxu3 %v15830_v59  ;;  %v18004_v45 = vld [vmem:[%s25440_s3 + $0x1354] sm:$0xf] }
 0x5f9   :  { %9819 = vmatpush.bf16.msrb.mxu1 %v16006_v30  ;;  %v9414_v25 = vpop.f32.mrf.mxu3  ;;  %v9396_v27 = vadd.f32 %v9395_v54, %v24384_v31  ;;  %v18006_v30 = vld [vmem:[%s25440_s3 + $0x1364] sm:$0xf]  ;;  %v16059_v20 = vld [vmem:[%s25440_s3 + $0x1358] sm:$0xf0] }
 0x5fa   :  { %v24563_v9 = vadd.f32 %v9447_v13, %v9429_v2  ;;  %9731 = vmatmul.bf16.vlgmr.msra.gmra.mxu0 %v23098_v1  ;;  %9768 = vmatpush.bf16.msra.mxu2 %v15766_v57  ;;  %v15926_v1 = vor.u32 %v17970_v24, %v15923_v47  ;;  %v16070_v42 = vor.u32 %v18006_v30, %v16067_v51  ;;  %v18020_v13 = vld [vmem:[%s25440_s3 + $0x13d4] sm:$0xf]  ;;  %v16123_v57 = vld [vmem:[%s25440_s3 + $0x13d8] sm:$0xf0]  ;;  %v15907_v47 = vld [vmem:[%s25440_s3 + $0x1228] sm:$0xf0] }
 0x5fb   :  { %9750 = vmatmul.bf16.vlgmr.msra.gmra.mxu1 %v23100_v3  ;;  %v24576_v40 = vadd.f32 %v9414_v25, %v9396_v27  ;;  %v15990_v3 = vor.u32 %v17986_v18, %v15987_v0  ;;  %v15918_v2 = vor.u32 %v17968_v15, %v15915_v5  ;;  %v15971_v27 = vld [vmem:[%s25440_s3 + $0x12a8] sm:$0xf0]  ;;  %v16126_v18 = vor.u32 %v18020_v13, %v16123_v57  ;;  %v15899_v15 = vld [vmem:[%s25440_s3 + $0x1218] sm:$0xf0] }
 0x5fc   :  { %9801 = vmatpush.bf16.msrb.mxu0 %v15934_v28  ;;  %9856 = vmatpush.bf16.msrb.mxu3 %v16142_v63  ;;  %v15982_v28 = vor.u32 %v17984_v52, %v15979_v6  ;;  %v16062_v63 = vor.u32 %v18004_v45, %v16059_v20  ;;  %v16051_v30 = vld [vmem:[%s25440_s3 + $0x1348] sm:$0xf0]  ;;  %v16043_v45 = vld [vmem:[%s25440_s3 + $0x1338] sm:$0xf0] }
 0x5fd   :  { %9820 = vmatpush.bf16.msrb.mxu1 %v15998_v23  ;;  %v17966_v23 = vld [vmem:[%s25440_s3 + $0x1224] sm:$0xf] }
 0x5fe   :  { %9837 = vmatpush.bf16.msrb.mxu2 %v16078_v34  ;;  %v15910_v51 = vor.u32 %v17966_v23, %v15907_v47  ;;  %v15955_v23 = vld [vmem:[%s25440_s3 + $0x1288] sm:$0xf0] }
 0x5ff   :  { %v9430_v16 = vpop.f32.mrf.mxu0 }
 0x600   :  { %v9449_v46 = vpop.f32.mrf.mxu1  ;;  %v9397_v59 = vpop.f32.mrf.mxu2  ;;  %v9431_v25 = vadd.f32 %v9430_v16, %v24504_v10  ;;  %9802 = vmatpush.bf16.msrb.mxu0 %v15926_v1  ;;  %9857 = vmatpush.bf16.msrb.mxu3 %v16134_v11  ;;  %v17982_v10 = vld [vmem:[%s25440_s3 + $0x12a4] sm:$0xf]  ;;  %v16115_v1 = vld [vmem:[%s25440_s3 + $0x13c8] sm:$0xf0]  ;;  %v15963_v11 = vld [vmem:[%s25440_s3 + $0x1298] sm:$0xf0] }
 0x601   :  { %v9416_v54 = vpop.f32.mrf.mxu3  ;;  %9821 = vmatpush.bf16.msrb.mxu1 %v15990_v3  ;;  %v9398_v24 = vadd.f32 %v9397_v59, %v24384_v31  ;;  %v18002_v31 = vld [vmem:[%s25440_s3 + $0x1344] sm:$0xf]  ;;  %v15974_v48 = vor.u32 %v17982_v10, %v15971_v27  ;;  %v17964_v3 = vld [vmem:[%s25440_s3 + $0x1214] sm:$0xf]  ;;  %v16267_v27 = vld [vmem:[%s25440_s3 + $0x14f8] sm:$0xf0] }
 0x602   :  { %9838 = vmatpush.bf16.msrb.mxu2 %v16070_v42  ;;  %v24616_v34 = vadd.f32 %v9449_v46, %v9431_v25  ;;  %v17980_v42 = vld [vmem:[%s25440_s3 + $0x1294] sm:$0xf]  ;;  %v16054_v6 = vor.u32 %v18002_v31, %v16051_v30  ;;  %v15902_v57 = vor.u32 %v17964_v3, %v15899_v15  ;;  %v17962_v25 = vld [vmem:[%s25440_s3 + $0x1204] sm:$0xf] }
 0x603   :  { %v24618_v0 = vadd.f32 %v9416_v54, %v9398_v24  ;;  %v18016_v16 = vld [vmem:[%s25440_s3 + $0x13b4] sm:$0xf]  ;;  %v15966_v59 = vor.u32 %v17980_v42, %v15963_v11  ;;  %v16107_v54 = vld [vmem:[%s25440_s3 + $0x13b8] sm:$0xf0]  ;;  %v18038_v42 = vld [vmem:[%s25440_s3 + $0x1464] sm:$0xf] }
 0x604   :  { %9803 = vmatpush.bf16.msrb.mxu0 %v15918_v2  ;;  %9858 = vmatpush.bf16.msrb.mxu3 %v16126_v18  ;;  %v15891_v2 = vld [vmem:[%s25440_s3 + $0x1208] sm:$0xf0]  ;;  %v18040_v24 = vld [vmem:[%s25440_s3 + $0x1474] sm:$0xf] }
 0x605   :  { %9822 = vmatpush.bf16.msrb.mxu1 %v15982_v28  ;;  %9769 = vmatmul.bf16.vlgmr.msra.gmra.mxu2 %v23140_v60  ;;  %v16118_v60 = vor.u32 %v18018_v38, %v16115_v1  ;;  %v18056_v10 = vld [vmem:[%s25440_s3 + $0x14f4] sm:$0xf]  ;;  %v15894_v31 = vor.u32 %v17962_v25, %v15891_v2  ;;  %v16099_v38 = vld [vmem:[%s25440_s3 + $0x13a8] sm:$0xf0] }
 0x606   :  { %9788 = vmatmul.bf16.vlgmr.msra.gmra.mxu3 %v23142_v56  ;;  %9839 = vmatpush.bf16.msrb.mxu2 %v16062_v63  ;;  %v18000_v56 = vld [vmem:[%s25440_s3 + $0x1334] sm:$0xf]  ;;  %v16270_v3 = vor.u32 %v18056_v10, %v16267_v27  ;;  %v16187_v27 = vld [vmem:[%s25440_s3 + $0x1458] sm:$0xf0] }
 0x607   :  { %v9433_v5 = vpop.f32.mrf.mxu0  ;;  %v16046_v18 = vor.u32 %v18000_v56, %v16043_v45  ;;  %v17996_v15 = vld [vmem:[%s25440_s3 + $0x1314] sm:$0xf]  ;;  %v18054_v56 = vld [vmem:[%s25440_s3 + $0x14e4] sm:$0xf]  ;;  %v16259_v45 = vld [vmem:[%s25440_s3 + $0x14e8] sm:$0xf0] }
 0x608   :  { %v9452_v52 = vpop.f32.mrf.mxu1  ;;  %v9466_v46 = vpop.f32.mrf.mxu2  ;;  %v9434_v13 = vadd.f32 %v9433_v5, %v24576_v40  ;;  %9804 = vmatpush.bf16.msrb.mxu0 %v15910_v51  ;;  %v17978_v40 = vld [vmem:[%s25440_s3 + $0x1284] sm:$0xf]  ;;  %9859 = vmatpush.bf16.msrb.mxu3 %v16118_v60  ;;  %v16035_v51 = vld [vmem:[%s25440_s3 + $0x1328] sm:$0xf0]  ;;  %v18036_v10 = vld [vmem:[%s25440_s3 + $0x1454] sm:$0xf] }
 0x609   :  { %v9485_v20 = vpop.f32.mrf.mxu3  ;;  %9823 = vmatpush.bf16.msrb.mxu1 %v15974_v48  ;;  %v9467_v28 = vadd.f32 %v9466_v46, %v24563_v9  ;;  %v16203_v9 = vld [vmem:[%s25440_s3 + $0x1478] sm:$0xf0]  ;;  %v15958_v30 = vor.u32 %v17978_v40, %v15955_v23  ;;  %v18014_v48 = vld [vmem:[%s25440_s3 + $0x13a4] sm:$0xf]  ;;  %v16195_v60 = vld [vmem:[%s25440_s3 + $0x1468] sm:$0xf0] }
 0x60a   :  { %v24675_v47 = vadd.f32 %v9452_v52, %v9434_v13  ;;  %9736 = vmatmul.bf16.gmra.mxu0 %v23158_v39  ;;  %9840 = vmatpush.bf16.msrb.mxu2 %v16054_v6  ;;  %v16110_v39 = vor.u32 %v18016_v16, %v16107_v54  ;;  %v16206_v1 = vor.u32 %v18040_v24, %v16203_v9  ;;  %v16027_v13 = vld [vmem:[%s25440_s3 + $0x1318] sm:$0xf0]  ;;  %v17994_v40 = vld [vmem:[%s25440_s3 + $0x1304] sm:$0xf]  ;;  %v16019_v23 = vld [vmem:[%s25440_s3 + $0x1308] sm:$0xf0] }
 0x60b   :  { %9755 = vmatmul.bf16.gmra.mxu1 %v23160_v22  ;;  %v24688_v63 = vadd.f32 %v9485_v20, %v9467_v28  ;;  %v17998_v22 = vld [vmem:[%s25440_s3 + $0x1324] sm:$0xf]  ;;  %v16102_v6 = vor.u32 %v18014_v48, %v16099_v38  ;;  %v16198_v25 = vor.u32 %v18038_v42, %v16195_v60  ;;  %v16030_v2 = vor.u32 %v17996_v15, %v16027_v13  ;;  %v16083_v9 = vld [vmem:[%s25440_s3 + $0x1388] sm:$0xf0]  ;;  %v18032_v60 = vld [vmem:[%s25440_s3 + $0x1434] sm:$0xf] }
 0x60c   :  { %9805 = vmatpush.bf16.msrb.mxu0 %v15902_v57  ;;  %9860 = vmatpush.bf16.msrb.mxu3 %v16110_v39  ;;  %v16038_v52 = vor.u32 %v17998_v22, %v16035_v51  ;;  %v18012_v57 = vld [vmem:[%s25440_s3 + $0x1394] sm:$0xf]  ;;  %v18010_v24 = vld [vmem:[%s25440_s3 + $0x1384] sm:$0xf]  ;;  %v16251_v39 = vld [vmem:[%s25440_s3 + $0x14d8] sm:$0xf0]  ;;  %v16190_v38 = vor.u32 %v18036_v10, %v16187_v27 }
 0x60d   :  { %9824 = vmatpush.bf16.msrb.mxu1 %v15966_v59  ;;  %v16091_v59 = vld [vmem:[%s25440_s3 + $0x1398] sm:$0xf0]  ;;  %v16179_v42 = vld [vmem:[%s25440_s3 + $0x1448] sm:$0xf0]  ;;  %v18044_v27 = vld [vmem:[%s25440_s3 + $0x1494] sm:$0xf] }
 0x60e   :  { %9841 = vmatpush.bf16.msrb.mxu2 %v16046_v18  ;;  %v16094_v28 = vor.u32 %v18012_v57, %v16091_v59  ;;  %v18052_v18 = vld [vmem:[%s25440_s3 + $0x14d4] sm:$0xf]  ;;  %v16155_v10 = vld [vmem:[%s25440_s3 + $0x1418] sm:$0xf0] }
 0x60f   :  { %v9435_v11 = vpop.f32.mrf.mxu0 }
 0x610   :  { %v9454_v5 = vpop.f32.mrf.mxu1  ;;  %v24717_v16 = vpop.f32.mrf.mxu2  ;;  %v9436_v20 = vadd.f32 %v9435_v11, %v24618_v0  ;;  %9806 = vmatpush.bf16.msrb.mxu0 %v15894_v31  ;;  %v16262_v0 = vor.u32 %v18054_v56, %v16259_v45  ;;  %9861 = vmatpush.bf16.msrb.mxu3 %v16102_v6  ;;  %v18050_v11 = vld [vmem:[%s25440_s3 + $0x14c4] sm:$0xf]  ;;  %v16171_v56 = vld [vmem:[%s25440_s3 + $0x1438] sm:$0xf0] }
 0x611   :  { %v24719_v46 = vpop.f32.mrf.mxu3  ;;  %9825 = vmatpush.bf16.msrb.mxu1 %v15958_v30  ;;  %v16174_v59 = vor.u32 %v18032_v60, %v16171_v56 }
 0x612   :  { %v24731_v54 = vadd.f32 %v9454_v5, %v9436_v20  ;;  %9842 = vmatpush.bf16.msrb.mxu2 %v16038_v52 }
 0x614   :  { %9875 = vmatpush.bf16.msra.mxu0 %v16206_v1  ;;  %9862 = vmatpush.bf16.msrb.mxu3 %v16094_v28  ;;  %v16254_v1 = vor.u32 %v18052_v18, %v16251_v39  ;;  %v18046_v28 = vld [vmem:[%s25440_s3 + $0x14a4] sm:$0xf]  ;;  %v16219_v18 = vld [vmem:[%s25440_s3 + $0x1498] sm:$0xf0] }
 0x615   :  { %9894 = vmatpush.bf16.msra.mxu1 %v16270_v3  ;;  %9774 = vmatmul.bf16.gmra.mxu2 %v23200_v14  ;;  %v16022_v14 = vor.u32 %v17994_v40, %v16019_v23  ;;  %v18034_v3 = vld [vmem:[%s25440_s3 + $0x1444] sm:$0xf]  ;;  %v16227_v40 = vld [vmem:[%s25440_s3 + $0x14a8] sm:$0xf0] }
 0x616   :  { %9793 = vmatmul.bf16.gmra.mxu3 %v23202_v29  ;;  %9843 = vmatpush.bf16.msrb.mxu2 %v16030_v2  ;;  %v16086_v29 = vor.u32 %v18010_v24, %v16083_v9  ;;  %v16163_v2 = vld [vmem:[%s25440_s3 + $0x1428] sm:$0xf0]  ;;  %v16230_v24 = vor.u32 %v18046_v28, %v16227_v40  ;;  %v18028_v9 = vld [vmem:[%s25440_s3 + $0x1414] sm:$0xf] }
 0x617   :  { %v9504_v22 = vpop.f32.mrf.mxu0 }
 0x618   :  { %9876 = vmatpush.bf16.msra.mxu0 %v16198_v25  ;;  %v9523_v31 = vpop.f32.mrf.mxu1  ;;  %v9471_v30 = vpop.f32.mrf.mxu2  ;;  %v9505_v48 = vadd.f32 %v9504_v22, %v24688_v63  ;;  %v16243_v63 = vld [vmem:[%s25440_s3 + $0x14c8] sm:$0xf0]  ;;  %9863 = vmatpush.bf16.msrb.mxu3 %v16086_v29 }
 0x619   :  { %9895 = vmatpush.bf16.msra.mxu1 %v16262_v0  ;;  %v9490_v51 = vpop.f32.mrf.mxu3  ;;  %v9472_v15 = vadd.f32 %v9471_v30, %v24675_v47  ;;  %v16182_v47 = vor.u32 %v18034_v3, %v16179_v42  ;;  %v16246_v6 = vor.u32 %v18050_v11, %v16243_v63  ;;  %v18030_v0 = vld [vmem:[%s25440_s3 + $0x1424] sm:$0xf] }
 0x61a   :  { %v9524_v5 = vadd.f32 %v9523_v31, %v9505_v48  ;;  %9807 = vmatmul.bf16.vlgmr.msrb.gmra.mxu0 %v23230_v58  ;;  %9844 = vmatpush.bf16.msrb.mxu2 %v16022_v14  ;;  %v18048_v58 = vld [vmem:[%s25440_s3 + $0x14b4] sm:$0xf]  ;;  %v16166_v23 = vor.u32 %v18030_v0, %v16163_v2  ;;  %v18026_v30 = vld [vmem:[%s25440_s3 + $0x1404] sm:$0xf]  ;;  %v16147_v48 = vld [vmem:[%s25440_s3 + $0x1408] sm:$0xf0] }
 0x61b   :  { %9826 = vmatmul.bf16.vlgmr.msrb.gmra.mxu1 %v23232_v37  ;;  %v9491_v52 = vadd.f32 %v9490_v51, %v9472_v15  ;;  %v16235_v37 = vld [vmem:[%s25440_s3 + $0x14b8] sm:$0xf0]  ;;  %v16150_v42 = vor.u32 %v18026_v30, %v16147_v48 }
 0x61c   :  { %9877 = vmatpush.bf16.msra.mxu0 %v16190_v38  ;;  %v16238_v25 = vor.u32 %v18048_v58, %v16235_v37  ;;  %v18042_v38 = vld [vmem:[%s25440_s3 + $0x1484] sm:$0xf] }
 0x61d   :  { %9896 = vmatpush.bf16.msra.mxu1 %v16254_v1  ;;  %v16211_v1 = vld [vmem:[%s25440_s3 + $0x1488] sm:$0xf0] }
 0x61e   :  { %v16214_v11 = vor.u32 %v18042_v38, %v16211_v1 }
 0x61f   :  { %v24787_v45 = vpop.f32.mrf.mxu0 }
 0x620   :  { %v24789_v20 = vpop.f32.mrf.mxu1  ;;  %v24791_v13 = vpop.f32.mrf.mxu2  ;;  %9878 = vmatpush.bf16.msra.mxu0 %v16182_v47 }
 0x621   :  { %v24793_v57 = vpop.f32.mrf.mxu3  ;;  %9897 = vmatpush.bf16.msra.mxu1 %v16246_v6 }
 0x624   :  { %9879 = vmatpush.bf16.msra.mxu0 %v16174_v59 }
 0x625   :  { %9898 = vmatpush.bf16.msra.mxu1 %v16238_v25  ;;  %9845 = vmatmul.bf16.vlgmr.msrb.gmra.mxu2 %v23278_v33  ;;  %v16158_v33 = vor.u32 %v18028_v9, %v16155_v10 }
 0x626   :  { %9864 = vmatmul.bf16.vlgmr.msrb.gmra.mxu3 %v23280_v7  ;;  %v16222_v7 = vor.u32 %v18044_v27, %v16219_v18 }
 0x627   :  { %v9509_v39 = vpop.f32.mrf.mxu0 }
 0x628   :  { %v9528_v22 = vpop.f32.mrf.mxu1  ;;  %v9542_v31 = vpop.f32.mrf.mxu2  ;;  %v9510_v29 = vadd.f32 %v9509_v39, %v9491_v52  ;;  %9880 = vmatpush.bf16.msra.mxu0 %v16166_v23 }
 0x629   :  { %v9561_v14 = vpop.f32.mrf.mxu3  ;;  %9899 = vmatpush.bf16.msra.mxu1 %v16230_v24  ;;  %v9543_v51 = vadd.f32 %v9542_v31, %v9524_v5 }
 0x62a   :  { %v9529_v3 = vadd.f32 %v9528_v22, %v9510_v29  ;;  %9812 = vmatmul.bf16.gmra.mxu0 %v23311_v26  ;;  %v8258_v22 = vperm.slane %v24362_v43, 1 }
 0x62b   :  { %9831 = vmatmul.bf16.gmra.mxu1 %v23313_v19  ;;  %v9562_v15 = vadd.f32 %v9561_v14, %v9543_v51 }
 0x62c   :  { %9881 = vmatpush.bf16.msra.mxu0 %v16158_v33 }
 0x62d   :  { %9900 = vmatpush.bf16.msra.mxu1 %v16222_v7 }
 0x62f   :  { %v24835_v63 = vpop.f32.mrf.mxu0 }
 0x630   :  { %v24837_v5 = vpop.f32.mrf.mxu1  ;;  %v24839_v52 = vpop.f32.mrf.mxu2  ;;  %9882 = vmatpush.bf16.msra.mxu0 %v16150_v42 }
 0x631   :  { %v24841_v47 = vpop.f32.mrf.mxu3  ;;  %9901 = vmatpush.bf16.msra.mxu1 %v16214_v11 }
 0x635   :  { %9850 = vmatmul.bf16.gmra.mxu2 %v23380_v4 }
 0x636   :  { %9869 = vmatmul.bf16.gmra.mxu3 %v23382_v44 }
 0x637   :  { %v9580_v26 = vpop.f32.mrf.mxu0 }
 0x638   :  { %v9599_v19 = vpop.f32.mrf.mxu1  ;;  %v9547_v6 = vpop.f32.mrf.mxu2  ;;  %v9581_v56 = vadd.f32 %v9580_v26, %v9562_v15 }
 0x639   :  { %v9566_v60 = vpop.f32.mrf.mxu3  ;;  %v9548_v58 = vadd.f32 %v9547_v6, %v9529_v3 }
 0x63a   :  { %v9600_v37 = vadd.f32 %v9599_v19, %v9581_v56  ;;  %9883 = vmatmul.bf16.vlgmr.msra.gmra.mxu0 %v23422_v50 }
 0x63b   :  { %9902 = vmatmul.bf16.vlgmr.msra.gmra.mxu1 %v23424_v12  ;;  %v9567_v59 = vadd.f32 %v9566_v60, %v9548_v58 }
 0x63f   :  { %v24847_v25 = vpop.f32.mrf.mxu0 }
 0x640   :  { %v24849_v0 = vpop.f32.mrf.mxu1  ;;  %v24851_v2 = vpop.f32.mrf.mxu2 }
 0x641   :  { %v24853_v4 = vpop.f32.mrf.mxu3 }
 0x647   :  { %v9585_v44 = vpop.f32.mrf.mxu0 }
 0x648   :  { %v9604_v28 = vpop.f32.mrf.mxu1  ;;  %v9618_v40 = vpop.f32.mrf.mxu2  ;;  %v9586_v24 = vadd.f32 %v9585_v44, %v9567_v59 }
 0x649   :  { %v9637_v23 = vpop.f32.mrf.mxu3  ;;  %v9619_v9 = vadd.f32 %v9618_v40, %v9600_v37 }
 0x64a   :  { %v9605_v10 = vadd.f32 %v9604_v28, %v9586_v24  ;;  %9888 = vmatmul.bf16.gmra.mxu0 %v23514_v8 }
 0x64b   :  { %9907 = vmatmul.bf16.gmra.mxu1 %v23525_v17  ;;  %v24857_v50 = vadd.f32 %v9637_v23, %v9619_v9 }
 0x64f   :  { %v24859_v12 = vpop.f32.mrf.mxu0 }
 0x650   :  { %v24861_v27 = vpop.f32.mrf.mxu1  ;;  %v24863_v18 = vpop.f32.mrf.mxu2 }
 0x651   :  { %v24865_v39 = vpop.f32.mrf.mxu3 }
 0x657   :  { %v9656_v31 = vpop.f32.mrf.mxu0 }
 0x658   :  { %v9675_v14 = vpop.f32.mrf.mxu1  ;;  %v9623_v29 = vpop.f32.mrf.mxu2  ;;  %v9657_v7 = vadd.f32 %v9656_v31, %v8258_v22 }
 0x659   :  { %v9642_v33 = vpop.f32.mrf.mxu3  ;;  %v9624_v8 = vadd.f32 %v9623_v29, %v9605_v10 }
 0x65a   :  { %v9676_v30 = vadd.f32 %v9675_v14, %v9657_v7 }
 0x65b   :  { %v24868_v17 = vadd.f32 %v9642_v33, %v9624_v8 }
 0x65f   :  { %v9658_v51 = vpop.f32.mrf.mxu0 }
 0x660   :  { %v9677_v48 = vpop.f32.mrf.mxu1  ;;  %v24870_v38 = vpop.f32.mrf.mxu2  ;;  %v9659_v49 = vadd.f32 %v9658_v51, %v8258_v22 }
 0x661   :  { %25575 = vst [vmem:[#allocation22_spill] sm:$0xff] %v24870_v38  ;;  %v24872_v1 = vpop.f32.mrf.mxu3 }
 0x662   :  { %25576 = vst [vmem:[#allocation23_spill] sm:$0xff] %v24872_v1 }
 0x667   :  { %v9661_v3 = vpop.f32.mrf.mxu0 }
 0x668   :  { %v9680_v15 = vpop.f32.mrf.mxu1  ;;  %v9694_v42 = vpop.f32.mrf.mxu2  ;;  %v9662_v43 = vadd.f32 %v9661_v3, %v8258_v22 }
 0x669   :  { %v9713_v11 = vpop.f32.mrf.mxu3 }
 0x66a   :  { %v9681_v26 = vadd.f32 %v9680_v15, %v9662_v43 }
 0x66f   :  { %v9663_v19 = vpop.f32.mrf.mxu0 }
 0x670   :  { %v9682_v6 = vpop.f32.mrf.mxu1  ;;  %v9696_v60 = vpop.f32.mrf.mxu2  ;;  %v9664_v31 = vadd.f32 %v9663_v19, %v8258_v22  ;;  %v9695_v19 = vadd.f32 %v9694_v42, %v9676_v30 }
 0x671   :  { %v9715_v56 = vpop.f32.mrf.mxu3 }
 0x672   :  { %v9683_v33 = vadd.f32 %v9682_v6, %v9664_v31  ;;  %v9714_v38 = vadd.f32 %v9713_v11, %v9695_v19 }
 0x677   :  { %v9732_v58 = vpop.f32.mrf.mxu0 }
 0x678   :  { %v9751_v37 = vpop.f32.mrf.mxu1  ;;  %v9699_v59 = vpop.f32.mrf.mxu2 }
 0x679   :  { %v9718_v44 = vpop.f32.mrf.mxu3  ;;  %v9700_v28 = vadd.f32 %v9699_v59, %v9681_v26 }
 0x67b   :  { %v9719_v40 = vadd.f32 %v9718_v44, %v9700_v28 }
 0x67f   :  { %v9734_v23 = vpop.f32.mrf.mxu0 }
 0x680   :  { %v9753_v24 = vpop.f32.mrf.mxu1  ;;  %v9701_v9 = vpop.f32.mrf.mxu2 }
 0x681   :  { %v9720_v10 = vpop.f32.mrf.mxu3  ;;  %v9702_v3 = vadd.f32 %v9701_v9, %v9683_v33  ;;  %v9678_v9 = vadd.f32 %v9677_v48, %v9659_v49 }
 0x683   :  { %v9721_v62 = vadd.f32 %v9720_v10, %v9702_v3  ;;  %v9469_v10 = vadd.f32 %v24717_v16, %v24616_v34 }
 0x687   :  { %v9737_v14 = vpop.f32.mrf.mxu0 }
 0x688   :  { %v9756_v29 = vpop.f32.mrf.mxu1  ;;  %v9770_v7 = vpop.f32.mrf.mxu2  ;;  %v9738_v8 = vadd.f32 %v9737_v14, %v9719_v40  ;;  %v9733_v14 = vadd.f32 %v9732_v58, %v9714_v38 }
 0x689   :  { %v9789_v15 = vpop.f32.mrf.mxu3 }
 0x68a   :  { %v9757_v43 = vadd.f32 %v9756_v29, %v9738_v8  ;;  %v9697_v29 = vadd.f32 %v9696_v60, %v9678_v9 }
 0x68f   :  { %v9739_v32 = vpop.f32.mrf.mxu0 }
 0x690   :  { %v9758_v61 = vpop.f32.mrf.mxu1  ;;  %v9772_v35 = vpop.f32.mrf.mxu2  ;;  %v9740_v55 = vadd.f32 %v9739_v32, %v9721_v62  ;;  %v9752_v32 = vadd.f32 %v9751_v37, %v9733_v14 }
 0x691   :  { %v9791_v59 = vpop.f32.mrf.mxu3 }
 0x692   :  { %v24874_v26 = vadd.f32 %v9758_v61, %v9740_v55  ;;  %v9488_v55 = vadd.f32 %v24719_v46, %v9469_v10  ;;  %v9716_v61 = vadd.f32 %v9715_v56, %v9697_v29  ;;  %v9771_v62 = vadd.f32 %v9770_v7, %v9752_v32 }
 0x694   :  { %v9507_v22 = vadd.f32 %v24787_v45, %v9488_v55  ;;  %v9735_v30 = vadd.f32 %v9734_v23, %v9716_v61  ;;  %v9790_v42 = vadd.f32 %v9789_v15, %v9771_v62 }
 0x696   :  { %v9526_v49 = vadd.f32 %v24789_v20, %v9507_v22  ;;  %v9754_v48 = vadd.f32 %v9753_v24, %v9735_v30  ;;  %v9474_v24 = vadd.f32 %v24791_v13, %v24731_v54 }
 0x697   :  { %v9808_v44 = vpop.f32.mrf.mxu0 }
 0x698   :  { %v9827_v28 = vpop.f32.mrf.mxu1  ;;  %v9775_v1 = vpop.f32.mrf.mxu2  ;;  %v9809_v38 = vadd.f32 %v9808_v44, %v9790_v42  ;;  %v9545_v34 = vadd.f32 %v24839_v52, %v9526_v49  ;;  %v9773_v16 = vadd.f32 %v9772_v35, %v9754_v48 }
 0x699   :  { %v9794_v6 = vpop.f32.mrf.mxu3 }
 0x69a   :  { %v9828_v46 = vadd.f32 %v9827_v28, %v9809_v38  ;;  %v9564_v56 = vadd.f32 %v24841_v47, %v9545_v34  ;;  %v9792_v37 = vadd.f32 %v9791_v59, %v9773_v16  ;;  %v9776_v28 = vadd.f32 %v9775_v1, %v9757_v43 }
 0x69b   :  { %v9913_v47 = vmax.f32 %v24857_v50, 0.0 }
 0x69c   :  { %v9583_v23 = vadd.f32 %v24847_v25, %v9564_v56  ;;  %v9493_v25 = vadd.f32 %v24793_v57, %v9474_v24  ;;  %v9795_v55 = vadd.f32 %v9794_v6, %v9776_v28  ;;  %v18064_v56 = vld [vmem:[%s25442_s5 + $0x730] sm:$0xff]  ;;  %v9917_v28 = vmax.f32 %v24868_v17, 0.0  ;;  %v18070_v17 = vld [vmem:[%s25442_s5 + $0x760] sm:$0xff] }
 0x69d   :  { %v9921_v13 = vadd.f32 %v9913_v47, %v22656_v53  ;;  %v25577_v47 = vld [vmem:[#allocation22_spill] sm:$0xff] }
 0x69e   :  { %v9602_v35 = vadd.f32 %v24849_v0, %v9583_v23  ;;  %v9512_v32 = vadd.f32 %v24835_v63, %v9493_v25 }
 0x69f   :  { %v9810_v31 = vpop.f32.mrf.mxu0 }
 0x6a0   :  { %v9829_v40 = vpop.f32.mrf.mxu1  ;;  %v9777_v33 = vpop.f32.mrf.mxu2  ;;  %v9811_v15 = vadd.f32 %v9810_v31, %v9792_v37  ;;  %v9621_v59 = vadd.f32 %v24863_v18, %v9602_v35  ;;  %v9531_v62 = vadd.f32 %v24837_v5, %v9512_v32  ;;  %v18073_v5 = vld [vmem:[%s25442_s5 + $0x778] sm:$0xff] }
 0x6a1   :  { %v9796_v51 = vpop.f32.mrf.mxu3  ;;  %v9778_v6 = vadd.f32 %v9777_v33, %v24874_v26  ;;  %11310 = vmatpush.bf16.msra.mxu3 %v18073_v5 }
 0x6a2   :  { %v9830_v9 = vadd.f32 %v9829_v40, %v9811_v15  ;;  %v9640_v0 = vadd.f32 %v24865_v39, %v9621_v59  ;;  %v9550_v63 = vadd.f32 %v24851_v2, %v9531_v62  ;;  %v18081_v15 = vld [vmem:[%s25442_s5 + $0x7b8] sm:$0xff] }
 0x6a3   :  { %v9797_v2 = vadd.f32 %v9796_v51, %v9778_v6  ;;  %11329 = vmatpush.bf16.msrb.mxu0 %v18081_v15 }
 0x6a4   :  { %v9915_v57 = vmax.f32 %v9640_v0, 0.0  ;;  %v9569_v38 = vadd.f32 %v24853_v4, %v9550_v63  ;;  %v18072_v4 = vld [vmem:[%s25442_s5 + $0x770] sm:$0xff]  ;;  %v18062_v0 = vld [vmem:[%s25442_s5 + $0x720] sm:$0xff] }
 0x6a5   :  { %11311 = vmatpush.bf16.msra.mxu3 %v18072_v4 }
 0x6a6   :  { %v9923_v48 = vadd.f32 %v9915_v57, %v22660_v21  ;;  %v9588_v33 = vadd.f32 %v24859_v12, %v9569_v38  ;;  %v18063_v12 = vld [vmem:[%s25442_s5 + $0x728] sm:$0xff]  ;;  %v18080_v57 = vld [vmem:[%s25442_s5 + $0x7b0] sm:$0xff] }
 0x6a7   :  { %v9813_v8 = vpop.f32.mrf.mxu0  ;;  %11330 = vmatpush.bf16.msrb.mxu0 %v18080_v57 }
 0x6a8   :  { %v9832_v3 = vpop.f32.mrf.mxu1  ;;  %v9846_v11 = vpop.f32.mrf.mxu2  ;;  %v9814_v43 = vadd.f32 %v9813_v8, %v9795_v55  ;;  %v18065_v8 = vld [vmem:[%s25442_s5 + $0x738] sm:$0xff] }
 0x6a9   :  { %v9847_v7 = vadd.f32 %v9846_v11, %v9828_v46  ;;  %v9865_v45 = vpop.f32.mrf.mxu3  ;;  %11291 = vmatpush.bf16.msra.mxu2 %v18065_v8 }
 0x6aa   :  { %v9833_v53 = vadd.f32 %v9832_v3, %v9814_v43  ;;  %v25579_v43 = vld [vmem:[#allocation23_spill] sm:$0xff] }
 0x6ab   :  { %v9866_v19 = vadd.f32 %v9865_v45, %v9847_v7 }
 0x6ad   :  { %11292 = vmatpush.bf16.msra.mxu2 %v18064_v56 }
 0x6af   :  { %v9815_v60 = vpop.f32.mrf.mxu0 }
 0x6b0   :  { %v24882_v58 = vpop.f32.mrf.mxu1  ;;  %v9848_v20 = vpop.f32.mrf.mxu2  ;;  %v9816_v21 = vadd.f32 %v9815_v60, %v9797_v2  ;;  %v18071_v60 = vld [vmem:[%s25442_s5 + $0x768] sm:$0xff] }
 0x6b1   :  { %v9849_v10 = vadd.f32 %v9848_v20, %v9830_v9  ;;  %v9867_v54 = vpop.f32.mrf.mxu3  ;;  %11293 = vmatpush.bf16.msra.mxu2 %v18063_v12  ;;  %11312 = vmatpush.bf16.msra.mxu3 %v18071_v60 }
 0x6b2   :  { %v9835_v20 = vadd.f32 %v24882_v58, %v9816_v21 }
 0x6b3   :  { %v9868_v40 = vadd.f32 %v9867_v54, %v9849_v10 }
 0x6b5   :  { %11294 = vmatpush.bf16.msra.mxu2 %v18062_v0  ;;  %11313 = vmatpush.bf16.msra.mxu3 %v18070_v17  ;;  %v18059_v0 = vld [vmem:[%s25442_s5 + $0x708] sm:$0xff] }
 0x6b6   :  { %v18067_v17 = vld [vmem:[%s25442_s5 + $0x748] sm:$0xff] }
 0x6b7   :  { %v9884_v44 = vpop.f32.mrf.mxu0 }
 0x6b8   :  { %v9903_v52 = vpop.f32.mrf.mxu1  ;;  %v9885_v14 = vadd.f32 %v9884_v44, %v9866_v19  ;;  %v9851_v30 = vpop.f32.mrf.mxu2  ;;  %v9607_v19 = vadd.f32 %v24861_v27, %v9588_v33  ;;  %v18089_v44 = vld [vmem:[%s25442_s5 + $0x7f8] sm:$0xff] }
 0x6b9   :  { %v9852_v39 = vadd.f32 %v9851_v30, %v9833_v53  ;;  %v9870_v11 = vpop.f32.mrf.mxu3  ;;  %11348 = vmatpush.bf16.msrb.mxu1 %v18089_v44  ;;  %v18088_v30 = vld [vmem:[%s25442_s5 + $0x7f0] sm:$0xff]  ;;  %v18069_v33 = vld [vmem:[%s25442_s5 + $0x758] sm:$0xff] }
 0x6ba   :  { %v9904_v29 = vadd.f32 %v9903_v52, %v9885_v14  ;;  %v9626_v59 = vadd.f32 %v25577_v47, %v9607_v19  ;;  %11314 = vmatpush.bf16.msra.mxu3 %v18069_v33  ;;  %v18060_v19 = vld [vmem:[%s25442_s5 + $0x710] sm:$0xff]  ;;  %v18066_v33 = vld [vmem:[%s25442_s5 + $0x740] sm:$0xff] }
 0x6bb   :  { %v9871_v3 = vadd.f32 %v9870_v11, %v9852_v39 }
 0x6bc   :  { %v9914_v31 = vmax.f32 %v9904_v29, 0.0 }
 0x6bd   :  { %11349 = vmatpush.bf16.msrb.mxu1 %v18088_v30 }
 0x6be   :  { %v9922_v1 = vadd.f32 %v9914_v31, %v22653_v41 }
 0x6bf   :  { %v9886_v50 = vpop.f32.mrf.mxu0 }
 0x6c0   :  { %v9929_v61 = vpack.c.bf16 %v9922_v1, %v9921_v13  ;;  %v9887_v18 = vadd.f32 %v9886_v50, %v9868_v40  ;;  %v9905_v22 = vpop.f32.mrf.mxu1  ;;  %v9853_v37 = vpop.f32.mrf.mxu2  ;;  %v25578_v40 = vld [vmem:[#allocation24_spill] sm:$0xff]  ;;  %v24939_v50 = vadd.f32 %v25579_v43, %v9626_v59 }
 0x6c1   :  { %v9854_v10 = vadd.f32 %v9853_v37, %v9835_v20  ;;  %v9872_v55 = vpop.f32.mrf.mxu3  ;;  %v9925_v1 = vadd.f32 %v9917_v28, %v25578_v40  ;;  %v18098_v28 = vld [vmem:[%s25442_s5 + $0x840] sm:$0xff] }
 0x6c2   :  { %v9906_v42 = vadd.f32 %v9905_v22, %v9887_v18  ;;  %v9936_v34 = vunpack.c.h.b16 %v9929_v61  ;;  %v25580_v18 = vld [vmem:[#allocation17_spill] sm:$0xff] }
 0x6c4   :  { %v9916_v49 = vmax.f32 %v9906_v42, 0.0  ;;  %v18119_v42 = vld [vmem:[%s25442_s5 + $0x8e8] sm:$0xff] }
 0x6c6   :  { %v9924_v41 = vadd.f32 %v9916_v49, %v22665_v36  ;;  %v9935_v36 = vunpack.c.l.b16 %v9929_v61  ;;  %v9873_v61 = vadd.f32 %v9872_v55, %v9854_v10 }
 0x6c7   :  { %v9889_v51 = vpop.f32.mrf.mxu0 }
 0x6c8   :  { %v9930_v26 = vpack.c.bf16 %v9924_v41, %v9923_v48  ;;  %v9890_v23 = vadd.f32 %v9889_v51, %v9871_v3  ;;  %v9908_v24 = vpop.f32.mrf.mxu1 }
 0x6ca   :  { %v9937_v16 = vunpack.c.l.b16 %v9930_v26  ;;  %v9938_v46 = vunpack.c.h.b16 %v9930_v26  ;;  %v9909_v29 = vadd.f32 %v9908_v24, %v9890_v23  ;;  %v18061_v26 = vld [vmem:[%s25442_s5 + $0x718] sm:$0xff] }
 0x6cb   :  { %11295 = vmatpush.bf16.msra.mxu2 %v18061_v26  ;;  %v18058_v26 = vld [vmem:[%s25442_s5 + $0x700] sm:$0xff] }
 0x6cc   :  { %v9939_v7 = vpack.c.b16 %v9937_v16, %v9935_v36  ;;  %v9940_v45 = vpack.c.b16 %v9938_v46, %v9936_v34  ;;  %v9918_v32 = vmax.f32 %v9909_v29, 0.0  ;;  %v18079_v34 = vld [vmem:[%s25442_s5 + $0x7a8] sm:$0xff]  ;;  %v9919_v46 = vmax.f32 %v24939_v50, 0.0  ;;  %v18086_v29 = vld [vmem:[%s25442_s5 + $0x7e0] sm:$0xff] }
 0x6cd   :  { %v18087_v16 = vld [vmem:[%s25442_s5 + $0x7e8] sm:$0xff]  ;;  %11331 = vmatpush.bf16.msrb.mxu0 %v18079_v34 }
 0x6ce   :  { %v9942_v52 = vshrl.u32 %v9939_v7, 16  ;;  %v9945_v35 = vshll.u32 %v9939_v7, 16  ;;  %v9950_v9 = vshrl.u32 %v9940_v45, 16  ;;  %v9953_v14 = vshll.u32 %v9940_v45, 16  ;;  %11350 = vmatpush.bf16.msrb.mxu1 %v18087_v16 }
 0x6cf   :  { %v9926_v62 = vadd.f32 %v9918_v32, %v25580_v18  ;;  %v9891_v22 = vpop.f32.mrf.mxu0  ;;  %11296 = vmatpush.bf16.msra.mxu2 %v18060_v19  ;;  %v18077_v18 = vld [vmem:[%s25442_s5 + $0x798] sm:$0xff] }
 0x6d0   :  { %v9944_v27 = vrot.slane %v9942_v52, 6  ;;  %v9947_v25 = vrot.slane %v9945_v35, 7  ;;  %v9952_v58 = vrot.slane %v9950_v9, 6  ;;  %v9955_v31 = vrot.slane %v9953_v14, 7  ;;  %v9910_v36 = vpop.f32.mrf.mxu1  ;;  %v18068_v35 = vld [vmem:[%s25442_s5 + $0x750] sm:$0xff]  ;;  %v18078_v9 = vld [vmem:[%s25442_s5 + $0x7a0] sm:$0xff] }
 0x6d1   :  { %v24956_v2 = vpack.c.bf16 %v9926_v62, %v9925_v1  ;;  %v9892_v11 = vadd.f32 %v9891_v22, %v9873_v61  ;;  %11315 = vmatpush.bf16.msra.mxu3 %v18068_v35  ;;  %11332 = vmatpush.bf16.msrb.mxu0 %v18078_v9  ;;  %v18085_v62 = vld [vmem:[%s25442_s5 + $0x7d8] sm:$0xff] }
 0x6d2   :  { %v9948_v54 = vor.u32 %v9947_v25, %v9944_v27  ;;  %v9956_v13 = vor.u32 %v9955_v31, %v9952_v58  ;;  %11351 = vmatpush.bf16.msrb.mxu1 %v18086_v29  ;;  %v18097_v29 = vld [vmem:[%s25442_s5 + $0x838] sm:$0xff] }
 0x6d3   :  { %v24977_v4 = vadd.f32 %v9910_v36, %v9892_v11  ;;  %11297 = vmatpush.bf16.msra.mxu2 %v18059_v0  ;;  %v18075_v0 = vld [vmem:[%s25442_s5 + $0x788] sm:$0xff] }
 0x6d4   :  { %v9959_v63 = vsel %vm18303_vm2, 0, %v9948_v54  ;;  %v9960_v6 = vsel %vm18303_vm2, 0, %v9956_v13  ;;  %v9961_v53 = vsel %vm18303_vm2, %v9948_v54, 0  ;;  %v9962_v49 = vsel %vm18303_vm2, %v9956_v13, 0 }
 0x6d5   :  { %v9965_v39 = vunpack.c.l.b16 %v9959_v63  ;;  %v9966_v48 = vunpack.c.l.b16 %v9960_v6  ;;  %v9967_v41 = vunpack.c.h.b16 %v9959_v63  ;;  %v9968_v8 = vunpack.c.h.b16 %v9960_v6  ;;  %11316 = vmatpush.bf16.msra.mxu3 %v18067_v17  ;;  %11333 = vmatpush.bf16.msrb.mxu0 %v18077_v18  ;;  %v18083_v17 = vld [vmem:[%s25442_s5 + $0x7c8] sm:$0xff]  ;;  %v18104_v18 = vld [vmem:[%s25442_s5 + $0x870] sm:$0xff]  ;;  %v18137_v6 = vld [vmem:[%s25442_s5 + $0x978] sm:$0xff] }
 0x6d6   :  { %v9977_v5 = vunpack.c.l.b16 %v9961_v53  ;;  %v9978_v38 = vunpack.c.l.b16 %v9962_v49  ;;  %11352 = vmatpush.bf16.msrb.mxu1 %v18085_v62  ;;  %v18074_v62 = vld [vmem:[%s25442_s5 + $0x780] sm:$0xff] }
 0x6d7   :  { %v24964_v21 = vpack.c.b16 %v9966_v48, %v9965_v39  ;;  %v24966_v3 = vpack.c.b16 %v9968_v8, %v9967_v41  ;;  %11298 = vmatpush.bf16.msra.mxu2 %v18058_v26 }
 0x6d8   :  { %v24975_v56 = vpack.c.b16 %v9978_v38, %v9977_v5  ;;  %v18115_v5 = vld [vmem:[%s25442_s5 + $0x8c8] sm:$0xff] }
 0x6d9   :  { %9973 = vst [vmem:[#allocation3] sm:$0xff] %v24964_v21  ;;  %v24981_v51 = vshrl.u32 %v24964_v21, 16  ;;  %v24984_v37 = vshll.u32 %v24964_v21, 16  ;;  %v24987_v7 = vshll.u32 %v24966_v3, 16  ;;  %v24990_v45 = vshrl.u32 %v24966_v3, 16  ;;  %11317 = vmatpush.bf16.msra.mxu3 %v18066_v33 }
 0x6da   :  { %9974 = vst [vmem:[#allocation3 + $0x38] sm:$0xff] %v24966_v3  ;;  %v24994_v23 = vshll.u32 %v24975_v56, 16  ;;  %v16271_v12 = vrot.slane %v24964_v21, 9  ;;  %v10010_v60 = vrot.slane %v24966_v3, 5  ;;  %v10013_v15 = vrot.slane %v24975_v56, 5 }
 0x6db   :  { %v9983_v20 = vrot.slane %v24981_v51, 4  ;;  %v9986_v24 = vrot.slane %v24984_v37, 5  ;;  %v9992_v44 = vrot.slane %v24987_v7, 5  ;;  %v9996_v52 = vrot.slane %v24990_v45, 4  ;;  %11367 = vmatpush.bf16.msrb.mxu2 %v18097_v29  ;;  %v18111_v29 = vld [vmem:[%s25442_s5 + $0x8a8] sm:$0xff] }
 0x6dc   :  { %v10002_v14 = vrot.slane %v24994_v23, 5  ;;  %v10011_v47 = vsel %vm18320_vm7, %v16271_v12, %v10010_v60  ;;  %v10012_v59 = vrot.slane %v10010_v60, 4  ;;  %v10019_v10 = vrot.slane %v24981_v51, 5  ;;  %v18076_v60 = vld [vmem:[%s25442_s5 + $0x790] sm:$0xff] }
 0x6dd   :  { %v9987_v27 = vor.u32 %v9986_v24, %v9983_v20  ;;  %v9997_v25 = vor.u32 %v9996_v52, %v9992_v44  ;;  %v10020_v58 = vrot.slane %v24984_v37, 6  ;;  %v10023_v31 = vrot.slane %v24990_v45, 5  ;;  %10017 = vst [vmem:[#allocation3 + $0x10] sm:$0xff] %v10011_v47  ;;  %11334 = vmatpush.bf16.msrb.mxu0 %v18076_v60 }
 0x6de   :  { %v10014_v32 = vsel %vm18320_vm7, %v10012_v59, %v10013_v15  ;;  %v10024_v55 = vrot.slane %v24987_v7, 6  ;;  %v10028_v54 = vshrl.u32 %v24975_v56, 16  ;;  %v10031_v13 = vrot.slane %v24994_v23, 6  ;;  %v18084_v15 = vld [vmem:[%s25442_s5 + $0x7d0] sm:$0xff] }
 0x6df   :  { %v9988_v40 = vrot.slane %v9987_v27, 4  ;;  %v9998_v1 = vrot.slane %v9997_v25, 4  ;;  %10018 = vst [vmem:[#allocation3 + $0x48] sm:$0xff] %v10014_v32  ;;  %v10021_v43 = vor.u32 %v10020_v58, %v10019_v10  ;;  %v16272_v61 = vrot.slane %v24964_v21, 10  ;;  %11353 = vmatpush.bf16.msrb.mxu1 %v18084_v15  ;;  %v25587_v32 = vld [vmem:[#allocation25_spill] sm:$0xff] }
 0x6e0   :  { %v10025_v22 = vor.u32 %v10024_v55, %v10023_v31  ;;  %v10030_v57 = vrot.slane %v10028_v54, 5  ;;  %v10040_v30 = vrot.slane %v24966_v3, 6  ;;  %v10043_v63 = vrot.slane %v24975_v56, 6  ;;  %v18170_v10 = vld [vmem:[#allocation3 + $0x4] sm:$0xf]  ;;  %v18114_v25 = vld [vmem:[%s25442_s5 + $0x8c0] sm:$0xff] }
 0x6e1   :  { %v9993_v53 = vsel %vm18354_vm12, %v9988_v40, %v9992_v44  ;;  %v10003_v49 = vsel %vm18354_vm12, %v9998_v1, %v10002_v14  ;;  %v10022_v39 = vrot.slane %v10021_v43, 4  ;;  %v10049_v48 = vrot.slane %v24981_v51, 6  ;;  %v18177_v9 = vld [vmem:[#allocation3 + $0x34] sm:$0xf0]  ;;  %v16506_v31 = vld [vmem:[#allocation3 + $0x38] sm:$0xf0]  ;;  %11335 = vmatpush.bf16.msrb.mxu0 %v18075_v0 }
 0x6e2   :  { %v10027_v41 = vrot.slane %v10025_v22, 4  ;;  %v10032_v8 = vor.u32 %v10031_v13, %v10030_v57  ;;  %v10041_v38 = vsel %vm18316_vm6, %v16272_v61, %v10040_v30  ;;  %v10042_v11 = vrot.slane %v10040_v30, 4  ;;  %10006 = vst [vmem:[#allocation3 + $0x8] sm:$0xff] %v9993_v53  ;;  %v18105_v13 = vld [vmem:[%s25442_s5 + $0x878] sm:$0xff]  ;;  %v18096_v61 = vld [vmem:[%s25442_s5 + $0x830] sm:$0xff]  ;;  %v18135_v40 = vld [vmem:[%s25442_s5 + $0x968] sm:$0xff] }
 0x6e3   :  { %v10026_v34 = vsel %vm18388_vm0, %v10022_v39, %v10025_v22  ;;  %v10050_v16 = vrot.slane %v24984_v37, 7  ;;  %v10053_v51 = vrot.slane %v24990_v45, 6  ;;  %v10054_v12 = vrot.slane %v24987_v7, 7  ;;  %10007 = vst [vmem:[#allocation3 + $0x40] sm:$0xff] %v10003_v49  ;;  %v16504_v7 = vld [vmem:[#allocation3] sm:$0xf]  ;;  %11386 = vmatpush.bf16.msrb.mxu3 %v18105_v13  ;;  %11354 = vmatpush.bf16.msrb.mxu1 %v18083_v17 }
 0x6e4   :  { %v10033_v19 = vsel %vm18388_vm0, %v10027_v41, %v10032_v8  ;;  %v10044_v20 = vsel %vm18316_vm6, %v10042_v11, %v10043_v63  ;;  %v10058_v37 = vrot.slane %v10028_v54, 6  ;;  %v10059_v45 = vrot.slane %v24994_v23, 7  ;;  %10036 = vst [vmem:[#allocation3 + $0x18] sm:$0xff] %v10026_v34  ;;  %v18082_v22 = vld [vmem:[%s25442_s5 + $0x7c0] sm:$0xff]  ;;  %11368 = vmatpush.bf16.msrb.mxu2 %v18096_v61  ;;  %v18095_v49 = vld [vmem:[%s25442_s5 + $0x828] sm:$0xff]  ;;  %v18113_v34 = vld [vmem:[%s25442_s5 + $0x8b8] sm:$0xff] }
 0x6e5   :  { %10048 = vst [vmem:[#allocation3 + $0x58] sm:$0xff] %v10044_v20  ;;  %v10051_v24 = vor.u32 %v10050_v16, %v10049_v48  ;;  %v10055_v44 = vor.u32 %v10054_v12, %v10053_v51  ;;  %v16273_v52 = vrot.slane %v24964_v21, 11  ;;  %v10068_v35 = vrot.slane %v24966_v3, 7  ;;  %11336 = vmatpush.bf16.msrb.mxu0 %v18074_v62  ;;  %v18121_v16 = vld [vmem:[%s25442_s5 + $0x8f8] sm:$0xff]  ;;  %v18100_v0 = vld [vmem:[%s25442_s5 + $0x850] sm:$0xff]  ;;  %v18110_v17 = vld [vmem:[%s25442_s5 + $0x8a0] sm:$0xff] }
 0x6e6   :  { %v10060_v14 = vor.u32 %v10059_v45, %v10058_v37  ;;  %v10071_v47 = vrot.slane %v24975_v56, 7  ;;  %10037 = vst [vmem:[#allocation3 + $0x50] sm:$0xff] %v10033_v19  ;;  %v9920_v59 = vmax.f32 %v24977_v4, 0.0  ;;  %v16505_v23 = vor.u32 %v18177_v9, %v16504_v7  ;;  %v25588_v4 = vld [vmem:[#allocation26_spill] sm:$0xff]  ;;  %v18094_v19 = vld [vmem:[%s25442_s5 + $0x820] sm:$0xff] }
 0x6e7   :  { %v10052_v27 = vrot.slane %v10051_v24, 4  ;;  %v10057_v21 = vrot.slane %v10055_v44, 4  ;;  %v10069_v3 = vsel %vm18361_vm13, %v16273_v52, %v10068_v35  ;;  %v10070_v58 = vrot.slane %v10068_v35, 4  ;;  %10047 = vst [vmem:[#allocation3 + $0x20] sm:$0xff] %v10041_v38  ;;  %11387 = vmatpush.bf16.msrb.mxu3 %v18104_v18  ;;  %11355 = vmatpush.bf16.msrb.mxu1 %v18082_v22  ;;  %v18112_v24 = vld [vmem:[%s25442_s5 + $0x8b0] sm:$0xff]  ;;  %v18118_v61 = vld [vmem:[%s25442_s5 + $0x8e0] sm:$0xff] }
 0x6e8   :  { %v9927_v56 = vadd.f32 %v9919_v46, %v25587_v32  ;;  %10075 = vst [vmem:[#allocation3 + $0x30] sm:$0xff] %v10069_v3  ;;  %v9928_v55 = vadd.f32 %v9920_v59, %v25588_v4  ;;  %11299 = vmatmul.bf16.vlgmr.msra.gmra.mxu2 %v16505_v23  ;;  %v16509_v54 = vor.u32 %v18170_v10, %v16506_v31  ;;  %v10079_v57 = vunpack.c.l.b16 %v24956_v2  ;;  %v18120_v52 = vld [vmem:[%s25442_s5 + $0x8f0] sm:$0xff]  ;;  %v18101_v31 = vld [vmem:[%s25442_s5 + $0x858] sm:$0xff] }
 0x6e9   :  { %v10056_v50 = vsel %vm18426_vm4, %v10052_v27, %v10055_v44  ;;  %v10061_v46 = vsel %vm18426_vm4, %v10057_v21, %v10060_v14  ;;  %v10072_v1 = vsel %vm18361_vm13, %v10070_v58, %v10071_v47  ;;  %v10080_v30 = vunpack.c.h.b16 %v24956_v2  ;;  %v16512_v39 = vld [vmem:[#allocation3 + $0x8] sm:$0xf]  ;;  %v18171_v11 = vld [vmem:[#allocation3 + $0xc] sm:$0xf]  ;;  %v18103_v2 = vld [vmem:[%s25442_s5 + $0x868] sm:$0xff]  ;;  %11369 = vmatpush.bf16.msrb.mxu2 %v18095_v49  ;;  %11405 = vmatpush.bf16.msra.mxu0 %v18113_v34 }
 0x6ea   :  { %10076 = vst [vmem:[#allocation3 + $0x68] sm:$0xff] %v10072_v1  ;;  %v9932_v43 = vpack.c.bf16 %v9928_v55, %v9927_v56  ;;  %11318 = vmatmul.bf16.vlgmr.msra.gmra.mxu3 %v16509_v54  ;;  %v18178_v48 = vld [vmem:[#allocation3 + $0x3c] sm:$0xf0]  ;;  %v16514_v26 = vld [vmem:[#allocation3 + $0x40] sm:$0xf0]  ;;  %v18102_v44 = vld [vmem:[%s25442_s5 + $0x860] sm:$0xff] }
 0x6eb   :  { %10064 = vst [vmem:[#allocation3 + $0x28] sm:$0xff] %v10056_v50  ;;  %v16513_v38 = vor.u32 %v18178_v48, %v16512_v39  ;;  %v16517_v33 = vor.u32 %v18171_v11, %v16514_v26  ;;  %11388 = vmatpush.bf16.msrb.mxu3 %v18103_v2  ;;  %11424 = vmatpush.bf16.msra.mxu1 %v18121_v16  ;;  %v18093_v14 = vld [vmem:[%s25442_s5 + $0x818] sm:$0xff]  ;;  %v18092_v54 = vld [vmem:[%s25442_s5 + $0x810] sm:$0xff]  ;;  %v18091_v39 = vld [vmem:[%s25442_s5 + $0x808] sm:$0xff] }
 0x6ec   :  { %10065 = vst [vmem:[#allocation3 + $0x60] sm:$0xff] %v10061_v46  ;;  %v10081_v63 = vunpack.c.l.b16 %v9932_v43  ;;  %v10082_v53 = vunpack.c.h.b16 %v9932_v43  ;;  %v18109_v11 = vld [vmem:[%s25442_s5 + $0x898] sm:$0xff]  ;;  %v18099_v16 = vld [vmem:[%s25442_s5 + $0x848] sm:$0xff] }
 0x6ed   :  { %11337 = vmatmul.bf16.vlgmr.msrb.gmra.mxu0 %v16513_v38  ;;  %11356 = vmatmul.bf16.vlgmr.msrb.gmra.mxu1 %v16517_v33 }
 0x6ee   :  { %v10083_v41 = vpack.c.b16 %v10081_v63, %v10079_v57  ;;  %v10084_v8 = vpack.c.b16 %v10082_v53, %v10080_v30  ;;  %11370 = vmatpush.bf16.msrb.mxu2 %v18094_v19  ;;  %11406 = vmatpush.bf16.msra.mxu0 %v18112_v24  ;;  %v18090_v24 = vld [vmem:[%s25442_s5 + $0x800] sm:$0xff] }
 0x6ef   :  { %11389 = vmatpush.bf16.msrb.mxu3 %v18102_v44  ;;  %11425 = vmatpush.bf16.msra.mxu1 %v18120_v52 }
 0x6f0   :  { %v10086_v51 = vshrl.u32 %v10083_v41, 16  ;;  %v10089_v12 = vshll.u32 %v10083_v41, 16  ;;  %v10094_v60 = vshrl.u32 %v10084_v8, 16  ;;  %v10097_v15 = vshll.u32 %v10084_v8, 16 }
 0x6f2   :  { %v10088_v20 = vrot.slane %v10086_v51, 6  ;;  %v10091_v37 = vrot.slane %v10089_v12, 7  ;;  %v10096_v45 = vrot.slane %v10094_v60, 6  ;;  %v10099_v7 = vrot.slane %v10097_v15, 7  ;;  %11371 = vmatpush.bf16.msrb.mxu2 %v18093_v14  ;;  %11407 = vmatpush.bf16.msra.mxu0 %v18111_v29  ;;  %v18117_v51 = vld [vmem:[%s25442_s5 + $0x8d8] sm:$0xff]  ;;  %v18108_v14 = vld [vmem:[%s25442_s5 + $0x890] sm:$0xff] }
 0x6f3   :  { %11390 = vmatpush.bf16.msrb.mxu3 %v18101_v31  ;;  %11426 = vmatpush.bf16.msra.mxu1 %v18119_v42 }
 0x6f4   :  { %v10092_v35 = vor.u32 %v10091_v37, %v10088_v20  ;;  %v10100_v9 = vor.u32 %v10099_v7, %v10096_v45 }
 0x6f6   :  { %v10103_v47 = vsel %vm18303_vm2, 0, %v10092_v35  ;;  %v10104_v59 = vsel %vm18303_vm2, 0, %v10100_v9  ;;  %v10105_v23 = vsel %vm18303_vm2, %v10092_v35, 0  ;;  %v10106_v10 = vsel %vm18303_vm2, %v10100_v9, 0  ;;  %11372 = vmatpush.bf16.msrb.mxu2 %v18092_v54  ;;  %11408 = vmatpush.bf16.msra.mxu0 %v18110_v17 }
 0x6f7   :  { %v10109_v27 = vunpack.c.l.b16 %v10103_v47  ;;  %v10110_v21 = vunpack.c.l.b16 %v10104_v59  ;;  %v10111_v3 = vunpack.c.h.b16 %v10103_v47  ;;  %v10112_v58 = vunpack.c.h.b16 %v10104_v59  ;;  %11391 = vmatpush.bf16.msrb.mxu3 %v18100_v0  ;;  %11427 = vmatpush.bf16.msra.mxu1 %v18118_v61  ;;  %v18116_v47 = vld [vmem:[%s25442_s5 + $0x8d0] sm:$0xff]  ;;  %v18129_v59 = vld [vmem:[%s25442_s5 + $0x938] sm:$0xff] }
 0x6f8   :  { %v10121_v32 = vunpack.c.l.b16 %v10105_v23  ;;  %v10122_v56 = vunpack.c.l.b16 %v10106_v10  ;;  %vm11561_vm2 = vcmask 130048  }
 0x6f9   :  { %v25156_v4 = vpack.c.b16 %v10110_v21, %v10109_v27  ;;  %v25158_v55 = vpack.c.b16 %v10112_v58, %v10111_v3 }
 0x6fa   :  { %v25163_v13 = vpack.c.b16 %v10122_v56, %v10121_v32  ;;  %11373 = vmatpush.bf16.msrb.mxu2 %v18091_v39  ;;  %11409 = vmatpush.bf16.msra.mxu0 %v18109_v11  ;;  %v18136_v39 = vld [vmem:[%s25442_s5 + $0x970] sm:$0xff] }
 0x6fb   :  { %10117 = vst [vmem:[#allocation3 + $0x70] sm:$0xff] %v25156_v4  ;;  %v25173_v50 = vshrl.u32 %v25156_v4, 16  ;;  %v25176_v46 = vshll.u32 %v25156_v4, 16  ;;  %v25179_v1 = vshll.u32 %v25158_v55, 16  ;;  %v25182_v43 = vshrl.u32 %v25158_v55, 16  ;;  %11392 = vmatpush.bf16.msrb.mxu3 %v18099_v16  ;;  %11428 = vmatpush.bf16.msra.mxu1 %v18117_v51 }
 0x6fc   :  { %10118 = vst [vmem:[#allocation3 + $0xa8] sm:$0xff] %v25158_v55  ;;  %v25189_v18 = vshll.u32 %v25163_v13, 16  ;;  %v16274_v62 = vrot.slane %v25156_v4, 9  ;;  %v10154_v22 = vrot.slane %v25158_v55, 5  ;;  %v10157_v57 = vrot.slane %v25163_v13, 5 }
 0x6fd   :  { %v10127_v30 = vrot.slane %v25173_v50, 4  ;;  %v10130_v63 = vrot.slane %v25176_v46, 5  ;;  %v10136_v53 = vrot.slane %v25179_v1, 5  ;;  %v10140_v49 = vrot.slane %v25182_v43, 4 }
 0x6fe   :  { %v10146_v48 = vrot.slane %v25189_v18, 5  ;;  %v10155_v41 = vsel %vm18320_vm7, %v16274_v62, %v10154_v22  ;;  %v10156_v8 = vrot.slane %v10154_v22, 4  ;;  %v10163_v38 = vrot.slane %v25173_v50, 5  ;;  %11374 = vmatpush.bf16.msrb.mxu2 %v18090_v24  ;;  %11410 = vmatpush.bf16.msra.mxu0 %v18108_v14  ;;  %v18152_v24 = vld [vmem:[%s25442_s5 + $0x9f0] sm:$0xff]  ;;  %v18172_v14 = vld [vmem:[#allocation3 + $0x14] sm:$0xf] }
 0x6ff   :  { %v10131_v26 = vor.u32 %v10130_v63, %v10127_v30  ;;  %v10141_v33 = vor.u32 %v10140_v49, %v10136_v53  ;;  %v10164_v2 = vrot.slane %v25176_v46, 6  ;;  %v10167_v34 = vrot.slane %v25182_v43, 5  ;;  %10161 = vst [vmem:[#allocation3 + $0x80] sm:$0xff] %v10155_v41  ;;  %11393 = vmatpush.bf16.msrb.mxu3 %v18098_v28  ;;  %11429 = vmatpush.bf16.msra.mxu1 %v18116_v47  ;;  %v18107_v63 = vld [vmem:[%s25442_s5 + $0x888] sm:$0xff]  ;;  %v18179_v28 = vld [vmem:[#allocation3 + $0x44] sm:$0xf0] }
 0x700   :  { %v10158_v12 = vsel %vm18320_vm7, %v10156_v8, %v10157_v57  ;;  %v10168_v60 = vrot.slane %v25179_v1, 6  ;;  %v10172_v15 = vshrl.u32 %v25163_v13, 16  ;;  %v10175_v19 = vrot.slane %v25189_v18, 6  ;;  %v18143_v47 = vld [vmem:[%s25442_s5 + $0x9a8] sm:$0xff] }
 0x701   :  { %v10132_v20 = vrot.slane %v10131_v26, 4  ;;  %v10142_v37 = vrot.slane %v10141_v33, 4  ;;  %v25221_v45 = vor.u32 %v10164_v2, %v10163_v38  ;;  %v16275_v7 = vrot.slane %v25156_v4, 10  ;;  %10162 = vst [vmem:[#allocation3 + $0xb8] sm:$0xff] %v10158_v12 }
 0x702   :  { %v10169_v44 = vor.u32 %v10168_v60, %v10167_v34  ;;  %v10174_v52 = vrot.slane %v10172_v15, 5  ;;  %v10184_v35 = vrot.slane %v25158_v55, 6  ;;  %v10187_v9 = vrot.slane %v25163_v13, 6  ;;  %v16560_v21 = vld [vmem:[#allocation3 + $0x70] sm:$0xf]  ;;  %11443 = vmatpush.bf16.msra.mxu2 %v18129_v59  ;;  %11411 = vmatpush.bf16.msra.mxu0 %v18107_v63  ;;  %v18151_v59 = vld [vmem:[%s25442_s5 + $0x9e8] sm:$0xff] }
 0x703   :  { %v10137_v23 = vsel %vm18354_vm12, %v10132_v20, %v10136_v53  ;;  %v10147_v10 = vsel %vm18354_vm12, %v10142_v37, %v10146_v48  ;;  %v10166_v29 = vrot.slane %v25221_v45, 4  ;;  %v10193_v27 = vrot.slane %v25173_v50, 6  ;;  %v18191_v3 = vld [vmem:[#allocation3 + $0xa4] sm:$0xf0]  ;;  %v18184_v58 = vld [vmem:[#allocation3 + $0x74] sm:$0xf]  ;;  %11462 = vmatpush.bf16.msra.mxu3 %v18137_v6  ;;  %11430 = vmatpush.bf16.msra.mxu1 %v18115_v5 }
 0x704   :  { %v10171_v31 = vrot.slane %v10169_v44, 4  ;;  %v10176_v42 = vor.u32 %v10175_v19, %v10174_v52  ;;  %v10185_v32 = vsel %vm18316_vm6, %v16275_v7, %v10184_v35  ;;  %v10186_v56 = vrot.slane %v10184_v35, 4  ;;  %10150 = vst [vmem:[#allocation3 + $0x78] sm:$0xff] %v10137_v23  ;;  %v16562_v54 = vld [vmem:[#allocation3 + $0xa8] sm:$0xf0]  ;;  %v18106_v34 = vld [vmem:[%s25442_s5 + $0x880] sm:$0xff] }
 0x705   :  { %v10194_v0 = vrot.slane %v25176_v46, 7  ;;  %v10197_v17 = vrot.slane %v25182_v43, 6  ;;  %v10198_v50 = vrot.slane %v25179_v1, 7  ;;  %v10202_v61 = vrot.slane %v10172_v15, 6  ;;  %10151 = vst [vmem:[#allocation3 + $0xb0] sm:$0xff] %v10147_v10  ;;  %v18127_v15 = vld [vmem:[%s25442_s5 + $0x928] sm:$0xff] }
 0x706   :  { %v10177_v62 = vsel %vm18388_vm0, %v10171_v31, %v10176_v42  ;;  %v10188_v22 = vsel %vm18316_vm6, %v10186_v56, %v10187_v9  ;;  %v10203_v57 = vrot.slane %v25189_v18, 7  ;;  %v16276_v30 = vrot.slane %v25156_v4, 11  ;;  %10191 = vst [vmem:[#allocation3 + $0x90] sm:$0xff] %v10185_v32  ;;  %v18145_v19 = vld [vmem:[%s25442_s5 + $0x9b8] sm:$0xff]  ;;  %11412 = vmatpush.bf16.msra.mxu0 %v18106_v34  ;;  %v18126_v37 = vld [vmem:[%s25442_s5 + $0x920] sm:$0xff]  ;;  %v18144_v7 = vld [vmem:[%s25442_s5 + $0x9b0] sm:$0xff] }
 0x707   :  { %v10195_v46 = vor.u32 %v10194_v0, %v10193_v27  ;;  %v10199_v43 = vor.u32 %v10198_v50, %v10197_v17  ;;  %v10212_v1 = vrot.slane %v25158_v55, 7  ;;  %10181 = vst [vmem:[#allocation3 + $0xc0] sm:$0xff] %v10177_v62  ;;  %v10215_v4 = vrot.slane %v25163_v13, 7  ;;  %v18128_v55 = vld [vmem:[%s25442_s5 + $0x930] sm:$0xff]  ;;  %11463 = vmatpush.bf16.msra.mxu3 %v18136_v39  ;;  %v18153_v20 = vld [vmem:[%s25442_s5 + $0x9f8] sm:$0xff]  ;;  %11431 = vmatpush.bf16.msra.mxu1 %v18114_v25  ;;  %v18134_v45 = vld [vmem:[%s25442_s5 + $0x960] sm:$0xff] }
 0x708   :  { %v10204_v18 = vor.u32 %v10203_v57, %v10202_v61  ;;  %10192 = vst [vmem:[#allocation3 + $0xc8] sm:$0xff] %v10188_v22  ;;  %v16561_v53 = vor.u32 %v18191_v3, %v16560_v21  ;;  %v16565_v49 = vor.u32 %v18184_v58, %v16562_v54  ;;  %v10170_v13 = vsel %vm18388_vm0, %v10166_v29, %v10169_v44  ;;  %v16522_v44 = vld [vmem:[#allocation3 + $0x48] sm:$0xf0]  ;;  %v16520_v9 = vld [vmem:[#allocation3 + $0x10] sm:$0xf]  ;;  %v18124_v27 = vld [vmem:[%s25442_s5 + $0x910] sm:$0xff] }
 0x709   :  { %v10196_v48 = vrot.slane %v10195_v46, 4  ;;  %v10201_v41 = vrot.slane %v10199_v43, 4  ;;  %v10213_v8 = vsel %vm18361_vm13, %v16276_v30, %v10212_v1  ;;  %v10214_v38 = vrot.slane %v10212_v1, 4  ;;  %10180 = vst [vmem:[#allocation3 + $0x88] sm:$0xff] %v10170_v13  ;;  %11444 = vmatpush.bf16.msra.mxu2 %v18128_v55  ;;  %v18125_v52 = vld [vmem:[%s25442_s5 + $0x918] sm:$0xff]  ;;  %v18132_v21 = vld [vmem:[%s25442_s5 + $0x950] sm:$0xff] }
 0x70a   :  { %10219 = vst [vmem:[#allocation3 + $0xa0] sm:$0xff] %v10213_v8  ;;  %11304 = vmatmul.bf16.gmra.mxu2 %v16561_v53  ;;  %11323 = vmatmul.bf16.gmra.mxu3 %v16565_v49  ;;  %v18133_v35 = vld [vmem:[%s25442_s5 + $0x958] sm:$0xff]  ;;  %v16521_v23 = vor.u32 %v18179_v28, %v16520_v9  ;;  %v16525_v10 = vor.u32 %v18172_v14, %v16522_v44  ;;  %v16528_v29 = vld [vmem:[#allocation3 + $0x18] sm:$0xf]  ;;  %v18180_v3 = vld [vmem:[#allocation3 + $0x4c] sm:$0xf0] }
 0x70b   :  { %v10205_v11 = vsel %vm18426_vm4, %v10201_v41, %v10204_v18  ;;  %v10216_v26 = vsel %vm18361_vm13, %v10214_v38, %v10215_v4  ;;  %v16568_v33 = vld [vmem:[#allocation3 + $0x78] sm:$0xf]  ;;  %v18185_v2 = vld [vmem:[#allocation3 + $0x7c] sm:$0xf]  ;;  %v10200_v16 = vsel %vm18426_vm4, %v10196_v48, %v10199_v43  ;;  %11464 = vmatpush.bf16.msra.mxu3 %v18135_v40  ;;  %11481 = vmatpush.bf16.msrb.mxu0 %v18145_v19  ;;  %v16530_v31 = vld [vmem:[#allocation3 + $0x50] sm:$0xf0] }
 0x70c   :  { %10209 = vst [vmem:[#allocation3 + $0xd0] sm:$0xff] %v10205_v11  ;;  %v18192_v36 = vld [vmem:[#allocation3 + $0xac] sm:$0xf0]  ;;  %v16570_v51 = vld [vmem:[#allocation3 + $0xb0] sm:$0xf0]  ;;  %11500 = vmatpush.bf16.msrb.mxu1 %v18153_v20  ;;  %v16529_v56 = vor.u32 %v18180_v3, %v16528_v29  ;;  %v18123_v6 = vld [vmem:[%s25442_s5 + $0x908] sm:$0xff] }
 0x70d   :  { %10220 = vst [vmem:[#allocation3 + $0xd8] sm:$0xff] %v10216_v26  ;;  %v16569_v12 = vor.u32 %v18192_v36, %v16568_v33  ;;  %v16573_v60 = vor.u32 %v18185_v2, %v16570_v51  ;;  %11445 = vmatpush.bf16.msra.mxu2 %v18127_v15  ;;  %v18173_v58 = vld [vmem:[#allocation3 + $0x1c] sm:$0xf]  ;;  %v18142_v42 = vld [vmem:[%s25442_s5 + $0x9a0] sm:$0xff]  ;;  %v18141_v17 = vld [vmem:[%s25442_s5 + $0x998] sm:$0xff] }
 0x70e   :  { %10208 = vst [vmem:[#allocation3 + $0x98] sm:$0xff] %v10200_v16  ;;  %v18150_v32 = vld [vmem:[%s25442_s5 + $0x9e0] sm:$0xff]  ;;  %v16533_v54 = vor.u32 %v18173_v58, %v16530_v31  ;;  %v18131_v0 = vld [vmem:[%s25442_s5 + $0x948] sm:$0xff]  ;;  %v18149_v50 = vld [vmem:[%s25442_s5 + $0x9d8] sm:$0xff] }
 0x70f   :  { %11342 = vmatmul.bf16.gmra.mxu0 %v16569_v12  ;;  %11361 = vmatmul.bf16.gmra.mxu1 %v16573_v60  ;;  %v18122_v61 = vld [vmem:[%s25442_s5 + $0x900] sm:$0xff]  ;;  %v18161_v22 = vld [vmem:[%s25442_s5 + $0xa38] sm:$0xff]  ;;  %v18140_v30 = vld [vmem:[%s25442_s5 + $0x990] sm:$0xff] }
 0x710   :  { %11465 = vmatpush.bf16.msra.mxu3 %v18134_v45  ;;  %11482 = vmatpush.bf16.msrb.mxu0 %v18144_v7  ;;  %v18130_v62 = vld [vmem:[%s25442_s5 + $0x940] sm:$0xff]  ;;  %v18169_v57 = vld [vmem:[%s25442_s5 + $0xa78] sm:$0xff]  ;;  %v18148_v46 = vld [vmem:[%s25442_s5 + $0x9d0] sm:$0xff] }
 0x711   :  { %11446 = vmatpush.bf16.msra.mxu2 %v18126_v37  ;;  %11501 = vmatpush.bf16.msrb.mxu1 %v18152_v24  ;;  %v18193_v43 = vld [vmem:[#allocation3 + $0xb4] sm:$0xf0]  ;;  %v16578_v1 = vld [vmem:[#allocation3 + $0xb8] sm:$0xf0]  ;;  %v16576_v63 = vld [vmem:[#allocation3 + $0x80] sm:$0xf] }
 0x712   :  { %v18186_v5 = vld [vmem:[#allocation3 + $0x84] sm:$0xf]  ;;  %v16577_v53 = vor.u32 %v18193_v43, %v16576_v63  ;;  %v18139_v55 = vld [vmem:[%s25442_s5 + $0x988] sm:$0xff]  ;;  %v18194_v48 = vld [vmem:[#allocation3 + $0xbc] sm:$0xf0] }
 0x713   :  { %v18160_v18 = vld [vmem:[%s25442_s5 + $0xa30] sm:$0xff]  ;;  %v16581_v49 = vor.u32 %v18186_v5, %v16578_v1  ;;  %v18147_v39 = vld [vmem:[%s25442_s5 + $0x9c8] sm:$0xff]  ;;  %v16584_v41 = vld [vmem:[#allocation3 + $0x88] sm:$0xf] }
 0x714   :  { %11466 = vmatpush.bf16.msra.mxu3 %v18133_v35  ;;  %11483 = vmatpush.bf16.msrb.mxu0 %v18143_v47  ;;  %v18168_v4 = vld [vmem:[%s25442_s5 + $0xa70] sm:$0xff]  ;;  %v18187_v8 = vld [vmem:[#allocation3 + $0x8c] sm:$0xf]  ;;  %v18138_v13 = vld [vmem:[%s25442_s5 + $0x980] sm:$0xff]  ;;  %v16585_v26 = vor.u32 %v18194_v48, %v16584_v41 }
 0x715   :  { %11447 = vmatpush.bf16.msra.mxu2 %v18125_v52  ;;  %11502 = vmatpush.bf16.msrb.mxu1 %v18151_v59  ;;  %v16586_v38 = vld [vmem:[#allocation3 + $0xc0] sm:$0xf0]  ;;  %v18146_v11 = vld [vmem:[%s25442_s5 + $0x9c0] sm:$0xff]  ;;  %v18159_v2 = vld [vmem:[%s25442_s5 + $0xa28] sm:$0xff] }
 0x716   :  { %v16589_v33 = vor.u32 %v18187_v8, %v16586_v38  ;;  %v18167_v34 = vld [vmem:[%s25442_s5 + $0xa68] sm:$0xff]  ;;  %v18158_v16 = vld [vmem:[%s25442_s5 + $0xa20] sm:$0xff]  ;;  %v18157_v12 = vld [vmem:[%s25442_s5 + $0xa18] sm:$0xff] }
 0x717   :  { %v18166_v36 = vld [vmem:[%s25442_s5 + $0xa60] sm:$0xff]  ;;  %v18181_v51 = vld [vmem:[#allocation3 + $0x54] sm:$0xf0]  ;;  %v16538_v25 = vld [vmem:[#allocation3 + $0x58] sm:$0xf0] }
 0x718   :  { %11467 = vmatpush.bf16.msra.mxu3 %v18132_v21  ;;  %11484 = vmatpush.bf16.msrb.mxu0 %v18142_v42  ;;  %v18165_v60 = vld [vmem:[%s25442_s5 + $0xa58] sm:$0xff]  ;;  %v16536_v15 = vld [vmem:[#allocation3 + $0x20] sm:$0xf]  ;;  %v18174_v40 = vld [vmem:[#allocation3 + $0x24] sm:$0xf] }
 0x719   :  { %11448 = vmatpush.bf16.msra.mxu2 %v18124_v27  ;;  %11503 = vmatpush.bf16.msrb.mxu1 %v18150_v32  ;;  %v16537_v19 = vor.u32 %v18181_v51, %v16536_v15  ;;  %v16541_v20 = vor.u32 %v18174_v40, %v16538_v25  ;;  %v16544_v37 = vld [vmem:[#allocation3 + $0x28] sm:$0xf]  ;;  %v18156_v45 = vld [vmem:[%s25442_s5 + $0xa10] sm:$0xff]  ;;  %v18175_v28 = vld [vmem:[#allocation3 + $0x2c] sm:$0xf] }
 0x71a   :  { %11375 = vmatmul.bf16.vlgmr.msrb.gmra.mxu2 %v16521_v23  ;;  %11394 = vmatmul.bf16.vlgmr.msrb.gmra.mxu3 %v16525_v10  ;;  %v18164_v7 = vld [vmem:[%s25442_s5 + $0xa50] sm:$0xff]  ;;  %v18155_v9 = vld [vmem:[%s25442_s5 + $0xa08] sm:$0xff]  ;;  %v18154_v47 = vld [vmem:[%s25442_s5 + $0xa00] sm:$0xff] }
 0x71b   :  { %v18182_v24 = vld [vmem:[#allocation3 + $0x5c] sm:$0xf0]  ;;  %v16546_v44 = vld [vmem:[#allocation3 + $0x60] sm:$0xf0]  ;;  %v18163_v14 = vld [vmem:[%s25442_s5 + $0xa48] sm:$0xff] }
 0x71c   :  { %11468 = vmatpush.bf16.msra.mxu3 %v18131_v0  ;;  %11485 = vmatpush.bf16.msrb.mxu0 %v18141_v17  ;;  %v16545_v52 = vor.u32 %v18182_v24, %v16544_v37  ;;  %v16549_v35 = vor.u32 %v18175_v28, %v16546_v44  ;;  %v18162_v59 = vld [vmem:[%s25442_s5 + $0xa40] sm:$0xff]  ;;  %v18195_v23 = vld [vmem:[#allocation3 + $0xc4] sm:$0xf0]  ;;  %v16594_v10 = vld [vmem:[#allocation3 + $0xc8] sm:$0xf0] }
 0x71d   :  { %11449 = vmatpush.bf16.msra.mxu2 %v18123_v6  ;;  %11504 = vmatpush.bf16.msrb.mxu1 %v18149_v50  ;;  %v16592_v29 = vld [vmem:[#allocation3 + $0x90] sm:$0xf]  ;;  %v18188_v27 = vld [vmem:[#allocation3 + $0x94] sm:$0xf]  ;;  %v16600_v31 = vld [vmem:[#allocation3 + $0x98] sm:$0xf] }
 0x71e   :  { %v16593_v21 = vor.u32 %v18195_v23, %v16592_v29  ;;  %v16597_v3 = vor.u32 %v18188_v27, %v16594_v10  ;;  %v18196_v58 = vld [vmem:[#allocation3 + $0xcc] sm:$0xf0]  ;;  %v18189_v42 = vld [vmem:[#allocation3 + $0x9c] sm:$0xf]  ;;  %v16602_v32 = vld [vmem:[#allocation3 + $0xd0] sm:$0xf0] }
 0x71f   :  { %11413 = vmatmul.bf16.vlgmr.msra.gmra.mxu0 %v16529_v56  ;;  %11432 = vmatmul.bf16.vlgmr.msra.gmra.mxu1 %v16533_v54  ;;  %v16601_v56 = vor.u32 %v18196_v58, %v16600_v31  ;;  %v16605_v54 = vor.u32 %v18189_v42, %v16602_v32  ;;  %v18183_v6 = vld [vmem:[#allocation3 + $0x64] sm:$0xf0]  ;;  %v16554_v0 = vld [vmem:[#allocation3 + $0x68] sm:$0xf0]  ;;  %v16552_v17 = vld [vmem:[#allocation3 + $0x30] sm:$0xf] }
 0x720   :  { %11469 = vmatpush.bf16.msra.mxu3 %v18130_v62  ;;  %11486 = vmatpush.bf16.msrb.mxu0 %v18140_v30  ;;  %v18176_v50 = vld [vmem:[#allocation3 + $0x34] sm:$0xf]  ;;  %v16608_v30 = vld [vmem:[#allocation3 + $0xa0] sm:$0xf]  ;;  %v18209_v63 = vld [vmem:[%s25443_s6 + $0x2] ss:$0 sm:$0xff] }
 0x721   :  { %11450 = vmatpush.bf16.msra.mxu2 %v18122_v61  ;;  %11505 = vmatpush.bf16.msrb.mxu1 %v18148_v46  ;;  %v16553_v61 = vor.u32 %v18183_v6, %v16552_v17  ;;  %v16557_v62 = vor.u32 %v18176_v50, %v16554_v0  ;;  %v18190_v46 = vld [vmem:[#allocation3 + $0xa4] sm:$0xf]  ;;  %s18246_s6 = smov [#allocation4]  }
 0x722   :  { %s11570_s16 = sshll.u32 %s18246_s6, 4  ;;  %s11571_s16 = int_to_ptr.vmem [resolvable:$true] %s11570_s16 }
 0x724   :  { %11538 = vmatpush.bf16.msrb.mxu3 %v18169_v57  ;;  %11487 = vmatpush.bf16.msrb.mxu0 %v18139_v55  ;;  %v16610_v57 = vld [vmem:[#allocation3 + $0xd8] sm:$0xf0] }
 0x725   :  { %11519 = vmatpush.bf16.msrb.mxu2 %v18161_v22  ;;  %11506 = vmatpush.bf16.msrb.mxu1 %v18147_v39  ;;  %v18197_v22 = vld [vmem:[#allocation3 + $0xd4] sm:$0xf0]  ;;  %v16613_v1 = vor.u32 %v18190_v46, %v16610_v57 }
 0x726   :  { %v16609_v43 = vor.u32 %v18197_v22, %v16608_v30 }
 0x728   :  { %11539 = vmatpush.bf16.msrb.mxu3 %v18168_v4  ;;  %11488 = vmatpush.bf16.msrb.mxu0 %v18138_v13 }
 0x729   :  { %11520 = vmatpush.bf16.msrb.mxu2 %v18160_v18  ;;  %11507 = vmatpush.bf16.msrb.mxu1 %v18146_v11 }
 0x72a   :  { %11380 = vmatmul.bf16.gmra.mxu2 %v16577_v53  ;;  %11399 = vmatmul.bf16.gmra.mxu3 %v16581_v49 }
 0x72c   :  { %11540 = vmatpush.bf16.msrb.mxu3 %v18167_v34 }
 0x72d   :  { %11521 = vmatpush.bf16.msrb.mxu2 %v18159_v2 }
 0x72f   :  { %11418 = vmatmul.bf16.gmra.mxu0 %v16585_v26  ;;  %11437 = vmatmul.bf16.gmra.mxu1 %v16589_v33 }
 0x730   :  { %11541 = vmatpush.bf16.msrb.mxu3 %v18166_v36 }
 0x731   :  { %11522 = vmatpush.bf16.msrb.mxu2 %v18158_v16 }
 0x734   :  { %11542 = vmatpush.bf16.msrb.mxu3 %v18165_v60 }
 0x735   :  { %11523 = vmatpush.bf16.msrb.mxu2 %v18157_v12 }
 0x738   :  { %11543 = vmatpush.bf16.msrb.mxu3 %v18164_v7 }
 0x739   :  { %11524 = vmatpush.bf16.msrb.mxu2 %v18156_v45 }
 0x73a   :  { %11451 = vmatmul.bf16.vlgmr.msra.gmra.mxu2 %v16537_v19  ;;  %11470 = vmatmul.bf16.vlgmr.msra.gmra.mxu3 %v16541_v20 }
 0x73c   :  { %11544 = vmatpush.bf16.msrb.mxu3 %v18163_v14 }
 0x73d   :  { %11525 = vmatpush.bf16.msrb.mxu2 %v18155_v9 }
 0x73f   :  { %11489 = vmatmul.bf16.vlgmr.msrb.gmra.mxu0 %v16545_v52  ;;  %11508 = vmatmul.bf16.vlgmr.msrb.gmra.mxu1 %v16549_v35 }
 0x740   :  { %11545 = vmatpush.bf16.msrb.mxu3 %v18162_v59 }
 0x741   :  { %11526 = vmatpush.bf16.msrb.mxu2 %v18154_v47 }
 0x74a   :  { %11456 = vmatmul.bf16.gmra.mxu2 %v16593_v21  ;;  %11475 = vmatmul.bf16.gmra.mxu3 %v16597_v3 }
 0x74f   :  { %11494 = vmatmul.bf16.gmra.mxu0 %v16601_v56  ;;  %11513 = vmatmul.bf16.gmra.mxu1 %v16605_v54 }
 0x75a   :  { %11527 = vmatmul.bf16.vlgmr.msrb.gmra.mxu2 %v16553_v61  ;;  %11546 = vmatmul.bf16.vlgmr.msrb.gmra.mxu3 %v16557_v62 }
 0x76a   :  { %11532 = vmatmul.bf16.gmra.mxu2 %v16609_v43  ;;  %11551 = vmatmul.bf16.gmra.mxu3 %v16613_v1  ;;  %v11338_v41 = vpop.f32.mrf.mxu0  ;;  %v11357_v8 = vpop.f32.mrf.mxu1 }
 0x76b   :  { %v11300_v5 = vpop.f32.mrf.mxu2 }
 0x76c   :  { %v11301_v18 = vadd.f32 %v18209_v63, %v11300_v5 }
 0x76d   :  { %v11319_v4 = vpop.f32.mrf.mxu3 }
 0x76e   :  { %v11320_v53 = vadd.f32 %v11319_v4, %v11301_v18 }
 0x770   :  { %v11339_v47 = vadd.f32 %v11338_v41, %v11320_v53 }
 0x772   :  { %v11340_v38 = vpop.f32.mrf.mxu0  ;;  %v11359_v26 = vpop.f32.mrf.mxu1  ;;  %v11358_v10 = vadd.f32 %v11357_v8, %v11339_v47 }
 0x773   :  { %v11302_v49 = vpop.f32.mrf.mxu2 }
 0x774   :  { %v11303_v55 = vadd.f32 %v18209_v63, %v11302_v49 }
 0x775   :  { %v11321_v39 = vpop.f32.mrf.mxu3 }
 0x776   :  { %v11322_v48 = vadd.f32 %v11321_v39, %v11303_v55 }
 0x778   :  { %v11341_v21 = vadd.f32 %v11340_v38, %v11322_v48 }
 0x77a   :  { %v11360_v32 = vadd.f32 %v11359_v26, %v11341_v21 }
 0x78c   :  { %v11343_v34 = vpop.f32.mrf.mxu0  ;;  %v11362_v25 = vpop.f32.mrf.mxu1 }
 0x78d   :  { %v11305_v13 = vpop.f32.mrf.mxu2  ;;  %v11324_v11 = vpop.f32.mrf.mxu3 }
 0x78e   :  { %v11306_v33 = vadd.f32 %v18209_v63, %v11305_v13 }
 0x790   :  { %v11325_v2 = vadd.f32 %v11324_v11, %v11306_v33 }
 0x792   :  { %v11344_v0 = vadd.f32 %v11343_v34, %v11325_v2 }
 0x794   :  { %v11345_v60 = vpop.f32.mrf.mxu0  ;;  %v11364_v19 = vpop.f32.mrf.mxu1  ;;  %v11363_v57 = vadd.f32 %v11362_v25, %v11344_v0 }
 0x795   :  { %v11307_v16 = vpop.f32.mrf.mxu2  ;;  %v11326_v36 = vpop.f32.mrf.mxu3 }
 0x796   :  { %v11308_v51 = vadd.f32 %v18209_v63, %v11307_v16 }
 0x798   :  { %v11327_v12 = vadd.f32 %v11326_v36, %v11308_v51 }
 0x79a   :  { %v11346_v1 = vadd.f32 %v11345_v60, %v11327_v12 }
 0x79c   :  { %v11414_v45 = vpop.f32.mrf.mxu0  ;;  %v11433_v7 = vpop.f32.mrf.mxu1  ;;  %v11365_v55 = vadd.f32 %v11364_v19, %v11346_v1 }
 0x79d   :  { %v11376_v15 = vpop.f32.mrf.mxu2  ;;  %v11395_v40 = vpop.f32.mrf.mxu3 }
 0x79e   :  { %v11377_v27 = vadd.f32 %v11376_v15, %v11358_v10 }
 0x7a0   :  { %v11396_v42 = vadd.f32 %v11395_v40, %v11377_v27  ;;  %v25590_v40 = vld [vmem:[#allocation16_spill] sm:$0xff] }
 0x7a2   :  { %v11415_v56 = vadd.f32 %v11414_v45, %v11396_v42 }
 0x7a4   :  { %v11416_v44 = vpop.f32.mrf.mxu0  ;;  %v11435_v9 = vpop.f32.mrf.mxu1  ;;  %v11434_v61 = vadd.f32 %v11433_v7, %v11415_v56 }
 0x7a5   :  { %v11378_v20 = vpop.f32.mrf.mxu2  ;;  %v11397_v37 = vpop.f32.mrf.mxu3 }
 0x7a6   :  { %v11379_v54 = vadd.f32 %v11378_v20, %v11360_v32 }
 0x7a8   :  { %v11398_v62 = vadd.f32 %v11397_v37, %v11379_v54 }
 0x7aa   :  { %v11417_v46 = vadd.f32 %v11416_v44, %v11398_v62 }
 0x7ac   :  { %v11419_v14 = vpop.f32.mrf.mxu0  ;;  %v11438_v29 = vpop.f32.mrf.mxu1  ;;  %v11436_v53 = vadd.f32 %v11435_v9, %v11417_v46 }
 0x7ad   :  { %v11381_v24 = vpop.f32.mrf.mxu2  ;;  %v11400_v28 = vpop.f32.mrf.mxu3 }
 0x7ae   :  { %v11382_v43 = vadd.f32 %v11381_v24, %v11363_v57 }
 0x7b0   :  { %v11401_v49 = vadd.f32 %v11400_v28, %v11382_v43 }
 0x7b2   :  { %v11420_v8 = vadd.f32 %v11419_v14, %v11401_v49  ;;  %v25591_v14 = vld [vmem:[#allocation18_spill] sm:$0xff] }
 0x7b4   :  { %v11421_v3 = vpop.f32.mrf.mxu0  ;;  %v11440_v6 = vpop.f32.mrf.mxu1  ;;  %v11439_v2 = vadd.f32 %v11438_v29, %v11420_v8 }
 0x7b5   :  { %v11383_v52 = vpop.f32.mrf.mxu2  ;;  %v11402_v35 = vpop.f32.mrf.mxu3 }
 0x7b6   :  { %v11384_v38 = vadd.f32 %v11383_v52, %v11365_v55 }
 0x7b8   :  { %v11403_v34 = vadd.f32 %v11402_v35, %v11384_v38 }
 0x7ba   :  { %v11422_v60 = vadd.f32 %v11421_v3, %v11403_v34 }
 0x7bc   :  { %v11490_v22 = vpop.f32.mrf.mxu0  ;;  %v11509_v5 = vpop.f32.mrf.mxu1  ;;  %v11441_v24 = vadd.f32 %v11440_v6, %v11422_v60 }
 0x7bd   :  { %v11452_v59 = vpop.f32.mrf.mxu2  ;;  %v11471_v23 = vpop.f32.mrf.mxu3 }
 0x7be   :  { %v11453_v30 = vadd.f32 %v11452_v59, %v11434_v61 }
 0x7c0   :  { %v11472_v63 = vadd.f32 %v11471_v23, %v11453_v30 }
 0x7c2   :  { %v11491_v39 = vadd.f32 %v11490_v22, %v11472_v63 }
 0x7c4   :  { %v11492_v41 = vpop.f32.mrf.mxu0  ;;  %v11510_v13 = vadd.f32 %v11509_v5, %v11491_v39  ;;  %v11511_v36 = vpop.f32.mrf.mxu1 }
 0x7c5   :  { %v11454_v58 = vpop.f32.mrf.mxu2  ;;  %v11473_v31 = vpop.f32.mrf.mxu3 }
 0x7c6   :  { %v11455_v48 = vadd.f32 %v11454_v58, %v11436_v53 }
 0x7c8   :  { %v11474_v11 = vadd.f32 %v11473_v31, %v11455_v48  ;;  %v25592_v31 = vld [vmem:[#allocation19_spill] sm:$0xff] }
 0x7ca   :  { %v11493_v51 = vadd.f32 %v11492_v41, %v11474_v11 }
 0x7cc   :  { %v11495_v15 = vpop.f32.mrf.mxu0  ;;  %v11512_v20 = vadd.f32 %v11511_v36, %v11493_v51  ;;  %v11514_v9 = vpop.f32.mrf.mxu1 }
 0x7cd   :  { %v11457_v17 = vpop.f32.mrf.mxu2  ;;  %v11476_v50 = vpop.f32.mrf.mxu3 }
 0x7ce   :  { %v11458_v25 = vadd.f32 %v11457_v17, %v11439_v2 }
 0x7d0   :  { %v11477_v37 = vadd.f32 %v11476_v50, %v11458_v25  ;;  %v25593_v50 = vld [vmem:[#allocation20_spill] sm:$0xff] }
 0x7d2   :  { %v11496_v44 = vadd.f32 %v11495_v15, %v11477_v37 }
 0x7d4   :  { %v11515_v59 = vadd.f32 %v11514_v9, %v11496_v44  ;;  %v11497_v10 = vpop.f32.mrf.mxu0  ;;  %v11516_v32 = vpop.f32.mrf.mxu1 }
 0x7d5   :  { %v11459_v18 = vpop.f32.mrf.mxu2  ;;  %v11478_v4 = vpop.f32.mrf.mxu3 }
 0x7d6   :  { %v11460_v52 = vadd.f32 %v11459_v18, %v11441_v24 }
 0x7d8   :  { %v11479_v23 = vadd.f32 %v11478_v4, %v11460_v52 }
 0x7da   :  { %v11498_v3 = vadd.f32 %v11497_v10, %v11479_v23 }
 0x7dc   :  { %v11517_v56 = vadd.f32 %v11516_v32, %v11498_v3 }
 0x7dd   :  { %v11528_v26 = vpop.f32.mrf.mxu2  ;;  %v11547_v33 = vpop.f32.mrf.mxu3 }
 0x7de   :  { %v11529_v16 = vadd.f32 %v11528_v26, %v11510_v13 }
 0x7e0   :  { %v11548_v12 = vadd.f32 %v11547_v33, %v11529_v16 }
 0x7e2   :  { %v11557_v19 = vadd.f32 %v11548_v12, %v25590_v40 }
 0x7e4   :  { %11562 = vst.msk [vmem:[#allocation4] sm:$0xff] %vm11561_vm2, %v11557_v19 }
 0x7e5   :  { %v11530_v45 = vpop.f32.mrf.mxu2  ;;  %v11549_v7 = vpop.f32.mrf.mxu3 }
 0x7e6   :  { %v11531_v28 = vadd.f32 %v11530_v45, %v11512_v20 }
 0x7e8   :  { %v11550_v35 = vadd.f32 %v11549_v7, %v11531_v28 }
 0x7ea   :  { %v11558_v47 = vadd.f32 %v11550_v35, %v25591_v14 }
 0x7ec   :  { %11563 = vst.msk [vmem:[#allocation4 + $0x8] sm:$0xff] %vm11561_vm2, %v11558_v47 }
 0x7ed   :  { %v11533_v29 = vpop.f32.mrf.mxu2  ;;  %v11552_v27 = vpop.f32.mrf.mxu3 }
 0x7ee   :  { %v11534_v21 = vadd.f32 %v11533_v29, %v11515_v59 }
 0x7f0   :  { %v11553_v58 = vadd.f32 %v11552_v27, %v11534_v21 }
 0x7f2   :  { %v11559_v42 = vadd.f32 %v11553_v58, %v25592_v31 }
 0x7f4   :  { %11564 = vst.msk [vmem:[#allocation4 + $0x10] sm:$0xff] %vm11561_vm2, %v11559_v42 }
 0x7f5   :  { %v11535_v54 = vpop.f32.mrf.mxu2  ;;  %v11554_v0 = vpop.f32.mrf.mxu3 }
 0x7f6   :  { %v11536_v6 = vadd.f32 %v11535_v54, %v11517_v56 }
 0x7f8   :  { %v11555_v17 = vadd.f32 %v11554_v0, %v11536_v6 }
 0x7fa   :  { %v11560_v61 = vadd.f32 %v11555_v17, %v25593_v50 }
 0x7fc   :  { %11565 = vst.msk [vmem:[#allocation4 + $0x18] sm:$0xff] %vm11561_vm2, %v11560_v61 }
 0x7fd   :  { %11578 = dma.vmem_to_hbm [thread:$0]  %s11571_s16, 512, %s11573_s18, [#allocation5], %s18247_s19, %s18247_s19, %s18248_s20  }
 0x7fe   :  { %18238 = dma.done.wait [#allocation5], 512  }
 0x7ff   :  { %18239 = vsyncadd [#allocation5], 4294966784 }
 0x800   :  { %11583 = vsyncpa [#allocation5], 1 }

</bundles_post_ra>
